<compile_context>
chip_gen: v5e
topology: v5e:2x2
jax: 0.10.0
libtpu: 0.0.40
codegen_flags: <defaults>
</compile_context>

<pallas_src>
import math

import jax
import jax.numpy as jnp
from jax import lax
from jax.experimental import pallas as pl
from jax.experimental.pallas import tpu as pltpu


def _levels(highest):
    lv, s = [], 1
    while s <= highest:
        lv.append(s)
        s *= 2
    return lv


def _round_up(x, m):
    return ((x + m - 1) // m) * m


def _vmem():
    return pl.BlockSpec(memory_space=pltpu.MemorySpace.VMEM)


# ----------------------------------------------------------------------------
# In-kernel GRU cell.  gi = x @ W_ih + b_ih is supplied (f32).  The h @ W_hh
# matmul runs in bf16 on the MXU with f32 accumulation; gate math stays f32.
# Gate slices are at lane offsets 0 / Hp / 2Hp (Hp multiple of 128 -> aligned).
# ----------------------------------------------------------------------------
def _gru_cell(gi, h, whh_ref, bhh_ref, Hp, cdt):
    gh = jnp.dot(h.astype(cdt), whh_ref[...],
                 preferred_element_type=jnp.float32) + bhh_ref[...]
    r = jax.nn.sigmoid(gi[:, 0:Hp] + gh[:, 0:Hp])
    z = jax.nn.sigmoid(gi[:, Hp:2 * Hp] + gh[:, Hp:2 * Hp])
    n = jnp.tanh(gi[:, 2 * Hp:3 * Hp] + r * gh[:, 2 * Hp:3 * Hp])
    return (1.0 - z) * n + z * h


# ----------------------------------------------------------------------------
# Kernel A: chunked, interleaved forward / backward GRU sweeps.
# ----------------------------------------------------------------------------
def _run_sweeps(data_p, gt_p, back_flat, fwd_flat, *, T, Bp, Hp, n_layers,
                time_chunk, cdt):
    S = T - 1                            # recurrence steps
    C = max(1, min(time_chunk, S))       # chunk size (C <= T-1 keeps slices in-bounds)
    NC = pl.cdiv(S, C)                   # grid size
    SP = NC * C                          # padded step count (tail steps discarded)
    in_b = data_p.shape[-1]
    in_f = gt_p.shape[-1]
    nw = 4 * n_layers

    def kernel(*refs):
        data_r, gt_r = refs[0], refs[1]
        wrefs = refs[2:2 + 2 * nw]
        back_w = [wrefs[4 * l:4 * l + 4] for l in range(n_layers)]
        fwd_w = [wrefs[nw + 4 * l:nw + 4 * l + 4] for l in range(n_layers)]
        hf_out, hb_out = refs[2 + 2 * nw], refs[3 + 2 * nw]
        gif_s, gib_s, hst = refs[4 + 2 * nw:]

        c = pl.program_id(0)

        @pl.when(c == 0)
        def _init():
            hst[...] = jnp.zeros_like(hst)

        # Per-chunk layer-0 input projections: one batched MXU matmul per GRU,
        # so the serial loop only keeps h @ W_hh on its critical path.
        start_f = jnp.minimum(c * C, T - C)          # fwd consumes gt[c*C + j]
        start_b = jnp.maximum(T - (c + 1) * C, 0)    # back consumes data[T-1-c*C-j]
        gt_chunk = gt_r[pl.ds(start_f, C)]           # (C, Bp, in_f) bf16
        gif_s[...] = (
            jnp.dot(gt_chunk.reshape(C * Bp, in_f), fwd_w[0][0][...],
                    preferred_element_type=jnp.float32)
            + fwd_w[0][2][...]).reshape(C, Bp, 3 * Hp)
        data_chunk = data_r[pl.ds(start_b, C)]       # (C, Bp, in_b) bf16
        gib_s[...] = (
            jnp.dot(data_chunk.reshape(C * Bp, in_b), back_w[0][0][...],
                    preferred_element_type=jnp.float32)
            + back_w[0][2][...]).reshape(C, Bp, 3 * Hp)

        def stack_step(gi0, states, layers):
            new_states, x = [], None
            for l in range(n_layers):
                wih, whh, bih, bhh = layers[l]
                if l == 0:
                    gi = gi0
                else:
                    gi = jnp.dot(x.astype(cdt), wih[...],
                                 preferred_element_type=jnp.float32) + bih[...]
                h_new = _gru_cell(gi, states[l], whh, bhh, Hp, cdt)
                new_states.append(h_new)
                x = h_new
            return tuple(new_states), x

        def body(j, carry):
            hfs, hbs = carry[:n_layers], carry[n_layers:]
            i = c * C + j                                    # global step index
            # ---- forward GRU, time t = i (state AFTER consuming gt[t]) ----
            row_f = jnp.minimum(i - start_f, C - 1)
            hfs, xf = stack_step(gif_s[row_f], hfs, fwd_w)
            hf_out[j] = xf
            # ---- backward GRU, time t_b = T-1-i; emit state BEFORE step ----
            # hb_pad[SP-1-i] = h_back_dict[T-i]  (last chunk's tail rows unused).
            hb_out[C - 1 - j] = hbs[n_layers - 1]
            row_b = jnp.maximum((T - 1 - i) - start_b, 0)
            hbs, _ = stack_step(gib_s[row_b], hbs, back_w)
            return hfs + hbs

        carry0 = tuple(hst[l] for l in range(2 * n_layers))
        carry = lax.fori_loop(0, C, body, carry0, unroll=True)
        for l in range(2 * n_layers):
            hst[l] = carry[l]

    flat_in = [data_p, gt_p] + list(back_flat) + list(fwd_flat)
    hf, hb = pl.pallas_call(
        kernel,
        grid=(NC,),
        in_specs=[_vmem() for _ in flat_in],
        out_specs=(pl.BlockSpec((C, Bp, Hp), lambda c: (c, 0, 0)),
                   pl.BlockSpec((C, Bp, Hp), lambda c: (NC - 1 - c, 0, 0))),
        out_shape=(jax.ShapeDtypeStruct((SP, Bp, Hp), jnp.float32),
                   jax.ShapeDtypeStruct((SP, Bp, Hp), jnp.float32)),
        scratch_shapes=[pltpu.VMEM((C, Bp, 3 * Hp), jnp.float32),   # fwd layer-0 gi
                        pltpu.VMEM((C, Bp, 3 * Hp), jnp.float32),   # back layer-0 gi
                        pltpu.VMEM((2 * n_layers, Bp, Hp), jnp.float32)],  # hidden states
        compiler_params=pltpu.CompilerParams(
            dimension_semantics=("arbitrary",),
            vmem_limit_bytes=64 * 1024 * 1024),
    )(*flat_in)
    return hf, hb, SP


# ----------------------------------------------------------------------------
# Kernel B: batched multiresolution decoders + squared-error loss.
# ----------------------------------------------------------------------------
def _run_decoders(hf, hb, gt_f32, dec_flat, levels, *, T, SP, B, Bp, Hp,
                  y_dim, cdt):
    n_lev = len(levels)
    inv_scale = 1.0 / float(T * B)   # count == T, then / data.shape[1]

    def kernel(*refs):
        hf_r, hb_r, gt_r = refs[0], refs[1], refs[2]
        dw = refs[3:3 + 5 * n_lev]
        out_ref = refs[3 + 5 * n_lev]
        acc = jnp.zeros((Bp, y_dim), jnp.float32)
        for k, s in enumerate(levels):
            n_t = T - 2 * s + 1                       # valid t: 0 .. T-2s
            if n_t < 1:
                continue
            wt, wb, bd, wm, bm = dw[5 * k:5 * k + 5]
            hf_blk = hf_r[pl.ds(0, n_t)].reshape(n_t * Bp, Hp)        # h[-1] at t
            off_b = 2 * s + SP - T - 1
            hb_blk = hb_r[pl.ds(off_b, n_t)].reshape(n_t * Bp, Hp)    # h_back_dict[t+2s]
            dec = jnp.maximum(
                jnp.dot(hf_blk.astype(cdt), wt[...],
                        preferred_element_type=jnp.float32)
                + jnp.dot(hb_blk.astype(cdt), wb[...],
                          preferred_element_type=jnp.float32)
                + bd[...], 0.0)
            mean = jnp.dot(dec.astype(cdt), wm[...],
                           preferred_element_type=jnp.float32) + bm[...]
            diff = mean - gt_r[pl.ds(s, n_t)].reshape(n_t * Bp, y_dim)  # gt[t+s]
            acc = acc + jnp.sum((diff * diff).reshape(n_t, Bp, y_dim), axis=0)
        # Mask padded batch rows, reduce once, scale once.
        bmask = (lax.broadcasted_iota(jnp.int32, (Bp, 1), 0) < B
                 ).astype(jnp.float32)
        per_dim = jnp.sum(acc * bmask, axis=0, keepdims=True)   # (1, y_dim)
        out_ref[...] = jnp.sum(per_dim, axis=1, keepdims=True) * inv_scale

    flat = [hf, hb, gt_f32] + list(dec_flat)
    return pl.pallas_call(
        kernel,
        out_shape=jax.ShapeDtypeStruct((1, 1), jnp.float32),
        in_specs=[_vmem() for _ in flat],
        out_specs=_vmem(),
        compiler_params=pltpu.CompilerParams(
            vmem_limit_bytes=64 * 1024 * 1024),
    )(*flat)


# ----------------------------------------------------------------------------
# Wrapper: NAOMI.forward (deterministic branch).
# ----------------------------------------------------------------------------
def naomi_forward_pallas(data, gt, back_layers, fwd_layers, dec_levels, *,
                         rnn_dim, highest, time_chunk=16,
                         compute_dtype=jnp.bfloat16):
    T, B, _ = data.shape
    y_dim = gt.shape[2]
    H = rnn_dim
    n_layers = len(back_layers)
    levels = _levels(highest)
    assert T >= 2

    # Bp multiple of 16 so bf16 (16,128)-packed tiles stay aligned under the
    # (C, Bp, in) -> (C*Bp, in) merges; Hp multiple of 128 lanes so gate slices
    # and GRU state blocks are lane-dense.
    Bp = _round_up(B, 16)
    Hp = _round_up(H, 128)
    cdt = compute_dtype

    def pad_batch(x):
        return jnp.pad(x, ((0, 0), (0, Bp - B), (0, 0)))

    data_p = pad_batch(data).astype(cdt)
    gt_p = pad_batch(gt).astype(cdt)
    gt_f32 = pad_batch(gt).astype(jnp.float32)      # exact targets for the loss

    def pad_gates(w):
        # (..., 3H) -> (..., 3Hp): zero-pad each [r|z|n] gate block so padded
        # hidden columns stay exactly 0 through the recurrence.
        pads = [(0, 0)] * (w.ndim - 1) + [(0, Hp - H)]
        return jnp.concatenate(
            [jnp.pad(w[..., g * H:(g + 1) * H], pads) for g in range(3)], axis=-1)

    def prep_gru(layers):
        flat = []
        for l, (wi_t, wh_t, bi, bh) in enumerate(layers):
            wi_p = pad_gates(wi_t)
            if l > 0:
                wi_p = jnp.pad(wi_p, ((0, Hp - H), (0, 0)))     # input dim H -> Hp
            wh_p = jnp.pad(pad_gates(wh_t), ((0, Hp - H), (0, 0)))
            flat += [wi_p.astype(cdt), wh_p.astype(cdt),
                     pad_gates(bi), pad_gates(bh)]              # biases stay f32
        return flat

    back_flat = prep_gru(back_layers)
    fwd_flat = prep_gru(fwd_layers)

    hf, hb, SP = _run_sweeps(data_p, gt_p, back_flat, fwd_flat,
                             T=T, Bp=Bp, Hp=Hp, n_layers=n_layers,
                             time_chunk=time_chunk, cdt=cdt)

    # Split each decoder's (2H, dim) weight into forward/backward halves so the
    # kernel never concatenates hidden states; zero-pad H -> Hp.
    dec_flat = []
    for (wd_t, bd, wm_t, bm) in dec_levels:
        wt = jnp.pad(wd_t[:H, :], ((0, Hp - H), (0, 0))).astype(cdt)
        wb = jnp.pad(wd_t[H:, :], ((0, Hp - H), (0, 0))).astype(cdt)
        dec_flat += [wt, wb, bd, wm_t.astype(cdt), bm]

    loss = _run_decoders(hf, hb, gt_f32, dec_flat, levels,
                         T=T, SP=SP, B=B, Bp=Bp, Hp=Hp, y_dim=y_dim, cdt=cdt)
    return loss[0, 0]


# ----------------------------------------------------------------------------
# Pure-JAX f32 reference (straight transcription of the PyTorch forward).
# ----------------------------------------------------------------------------
def _gru_cell_ref(x, h, wi_t, wh_t, bi, bh, H):
    gi = jnp.dot(x, wi_t) + bi
    gh = jnp.dot(h, wh_t) + bh
    r = jax.nn.sigmoid(gi[:, 0:H] + gh[:, 0:H])
    z = jax.nn.sigmoid(gi[:, H:2 * H] + gh[:, H:2 * H])
    n = jnp.tanh(gi[:, 2 * H:3 * H] + r * gh[:, 2 * H:3 * H])
    return (1.0 - z) * n + z * h


def _gru_stack_ref(x, hs, layers, H):
    new_hs, inp = [], x
    for (wi_t, wh_t, bi, bh), h_l in zip(layers, hs):
        h_new = _gru_cell_ref(inp, h_l, wi_t, wh_t, bi, bh, H)
        new_hs.append(h_new)
        inp = h_new
    return new_hs


def _naomi_loss_ref(data, gt, back_layers, fwd_layers, dec_levels, levels, H):
    T, B = data.shape[0], data.shape[1]
    n_layers = len(back_layers)

    hb = [jnp.zeros((B, H), jnp.float32) for _ in range(n_layers)]
    hback_dict = {}
    for t in range(T - 1, 0, -1):
        hback_dict[t + 1] = hb[-1]
        hb = _gru_stack_ref(data[t], hb, back_layers, H)

    hf = [jnp.zeros((B, H), jnp.float32) for _ in range(n_layers)]
    loss = jnp.zeros((1, 1), jnp.float32)
    for t in range(T):
        hf = _gru_stack_ref(gt[t], hf, fwd_layers, H)
        for step, (wd_t, bd, wm_t, bm) in zip(levels, dec_levels):
            if t + 2 * step <= T:
                nxt = gt[t + step]
                cat = jnp.concatenate([hf[-1], hback_dict[t + 2 * step]], axis=1)
                dec = jnp.maximum(jnp.dot(cat, wd_t) + bd, 0.0)
                mean = jnp.dot(dec, wm_t) + bm
                diff = mean - nxt
                loss = loss + jnp.sum(diff * diff, keepdims=True)
    return loss / jnp.float32(T) / jnp.float32(B)


# ----------------------------------------------------------------------------
# Deterministic synthetic parameters matching NAOMI.__init__ shapes.
# ----------------------------------------------------------------------------
def init_naomi_params(key, *, y_dim, rnn_dim, n_layers, highest, dec_dims):
    H = rnn_dim
    levels = _levels(highest)
    keys = iter(jax.random.split(key, 128))

    def uni(shape, bound):
        return jax.random.uniform(next(keys), shape, jnp.float32, -bound, bound)

    def gru_params(input_dim):
        layers = []
        b = 1.0 / math.sqrt(H)
        for l in range(n_layers):
            in_dim = input_dim if l == 0 else H
            wi = uni((3 * H, in_dim), b)          # PyTorch shape (3H, in)
            wh = uni((3 * H, H), b)
            bi = uni((3 * H,), b)
            bh = uni((3 * H,), b)
            layers.append((wi.T, wh.T, bi.reshape(1, -1), bh.reshape(1, -1)))
        return layers

    back_layers = gru_params(y_dim + 1)           # back_gru: input y_dim + 1
    fwd_layers = gru_params(y_dim)                # gru: input y_dim

    dec_levels = []
    for step in levels:
        dim = dec_dims[step]
        kd = 1.0 / math.sqrt(2 * H)
        wd = uni((dim, 2 * H), kd)                # Linear(2*rnn_dim, dim)
        bd = uni((dim,), kd)
        km = 1.0 / math.sqrt(dim)
        wm = uni((y_dim, dim), km)                # Linear(dim, y_dim)
        bm = uni((y_dim,), km)
        dec_levels.append((wd.T, bd.reshape(1, -1), wm.T, bm.reshape(1, -1)))
    return back_layers, fwd_layers, dec_levels


if __name__ == "__main__":
    # Small NAOMI config (deterministic task => non-stochastic decoder path).
    T, B = 8, 2
    y_dim, rnn_dim, n_layers, highest = 4, 32, 2, 4
    dec_dims = {1: 16, 2: 16, 4: 16}

    key = jax.random.PRNGKey(0)
    k_data, k_gt, k_par = jax.random.split(key, 3)
    data = jax.random.normal(k_data, (T, B, y_dim + 1), jnp.float32)
    ground_truth = jax.random.normal(k_gt, (T, B, y_dim), jnp.float32)

    back_layers, fwd_layers, dec_levels = init_naomi_params(
        k_par, y_dim=y_dim, rnn_dim=rnn_dim, n_layers=n_layers,
        highest=highest, dec_dims=dec_dims)

    # time_chunk=4 at T=8 gives a 2-step grid, so chunked recurrence,
    # cross-chunk state handoff and tail-padding paths are all exercised.
    fwd_fn = jax.jit(lambda d, g, bl, fl, dl: naomi_forward_pallas(
        d, g, bl, fl, dl, rnn_dim=rnn_dim, highest=highest, time_chunk=4))
    loss = jax.block_until_ready(
        fwd_fn(data, ground_truth, back_layers, fwd_layers, dec_levels))

    ref = _naomi_loss_ref(data, ground_truth, back_layers, fwd_layers,
                          dec_levels, _levels(highest), rnn_dim)[0, 0]
    ref = jax.block_until_ready(ref)

    # Kernel uses bf16 weights/activations on the MXU (f32 gates/accumulation),
    # so compare against the pure-f32 reference with a bf16-appropriate tolerance.
    rel = abs(float(loss) - float(ref)) / max(1.0, abs(float(ref)))
    assert rel <= 2e-2, (float(loss), float(ref), rel)
    print("KERNEL_OK")
</pallas_src>

<mosaic_0001>
module attributes {stable_mosaic.version = 11 : i64} {
  func.func @kernel(%arg0: i32, %arg1: memref<8x16x5xbf16, #tpu.memory_space<vmem>>, %arg2: memref<8x16x4xbf16, #tpu.memory_space<vmem>>, %arg3: memref<5x384xbf16, #tpu.memory_space<vmem>>, %arg4: memref<128x384xbf16, #tpu.memory_space<vmem>>, %arg5: memref<1x384xf32, #tpu.memory_space<vmem>>, %arg6: memref<1x384xf32, #tpu.memory_space<vmem>>, %arg7: memref<128x384xbf16, #tpu.memory_space<vmem>>, %arg8: memref<128x384xbf16, #tpu.memory_space<vmem>>, %arg9: memref<1x384xf32, #tpu.memory_space<vmem>>, %arg10: memref<1x384xf32, #tpu.memory_space<vmem>>, %arg11: memref<4x384xbf16, #tpu.memory_space<vmem>>, %arg12: memref<128x384xbf16, #tpu.memory_space<vmem>>, %arg13: memref<1x384xf32, #tpu.memory_space<vmem>>, %arg14: memref<1x384xf32, #tpu.memory_space<vmem>>, %arg15: memref<128x384xbf16, #tpu.memory_space<vmem>>, %arg16: memref<128x384xbf16, #tpu.memory_space<vmem>>, %arg17: memref<1x384xf32, #tpu.memory_space<vmem>>, %arg18: memref<1x384xf32, #tpu.memory_space<vmem>>, %arg19: memref<4x16x128xf32, #tpu.memory_space<vmem>>, %arg20: memref<4x16x128xf32, #tpu.memory_space<vmem>>, %arg21: memref<4x16x384xf32, #tpu.memory_space<vmem>>, %arg22: memref<4x16x384xf32, #tpu.memory_space<vmem>>, %arg23: memref<4x16x128xf32, #tpu.memory_space<vmem>>) attributes {dimension_semantics = [#tpu.dimension_semantics<arbitrary>], iteration_bounds = array<i64: 2>, scalar_prefetch = 0 : i64, scratch_operands = 3 : i64, tpu.core_type = #tpu.core_type<tc>, window_params = [{pipeline_mode = #tpu.pipeline_mode<synchronous>, transform_indices = @transform_0, window_bounds = array<i64: 8, 16, 5>}, {pipeline_mode = #tpu.pipeline_mode<synchronous>, transform_indices = @transform_1, window_bounds = array<i64: 8, 16, 4>}, {pipeline_mode = #tpu.pipeline_mode<synchronous>, transform_indices = @transform_2, window_bounds = array<i64: 5, 384>}, {pipeline_mode = #tpu.pipeline_mode<synchronous>, transform_indices = @transform_3, window_bounds = array<i64: 128, 384>}, {pipeline_mode = #tpu.pipeline_mode<synchronous>, transform_indices = @transform_4, window_bounds = array<i64: 1, 384>}, {pipeline_mode = #tpu.pipeline_mode<synchronous>, transform_indices = @transform_5, window_bounds = array<i64: 1, 384>}, {pipeline_mode = #tpu.pipeline_mode<synchronous>, transform_indices = @transform_6, window_bounds = array<i64: 128, 384>}, {pipeline_mode = #tpu.pipeline_mode<synchronous>, transform_indices = @transform_7, window_bounds = array<i64: 128, 384>}, {pipeline_mode = #tpu.pipeline_mode<synchronous>, transform_indices = @transform_8, window_bounds = array<i64: 1, 384>}, {pipeline_mode = #tpu.pipeline_mode<synchronous>, transform_indices = @transform_9, window_bounds = array<i64: 1, 384>}, {pipeline_mode = #tpu.pipeline_mode<synchronous>, transform_indices = @transform_10, window_bounds = array<i64: 4, 384>}, {pipeline_mode = #tpu.pipeline_mode<synchronous>, transform_indices = @transform_11, window_bounds = array<i64: 128, 384>}, {pipeline_mode = #tpu.pipeline_mode<synchronous>, transform_indices = @transform_12, window_bounds = array<i64: 1, 384>}, {pipeline_mode = #tpu.pipeline_mode<synchronous>, transform_indices = @transform_13, window_bounds = array<i64: 1, 384>}, {pipeline_mode = #tpu.pipeline_mode<synchronous>, transform_indices = @transform_14, window_bounds = array<i64: 128, 384>}, {pipeline_mode = #tpu.pipeline_mode<synchronous>, transform_indices = @transform_15, window_bounds = array<i64: 128, 384>}, {pipeline_mode = #tpu.pipeline_mode<synchronous>, transform_indices = @transform_16, window_bounds = array<i64: 1, 384>}, {pipeline_mode = #tpu.pipeline_mode<synchronous>, transform_indices = @transform_17, window_bounds = array<i64: 1, 384>}, {transform_indices = @transform_18, window_bounds = array<i64: 4, 16, 128>}, {transform_indices = @transform_19, window_bounds = array<i64: 4, 16, 128>}]} {
    %c0_i32 = arith.constant 0 : i32
    %0 = arith.cmpi eq, %arg0, %c0_i32 : i32
    %1 = arith.extui %0 : i1 to i32
    %c0_i32_0 = arith.constant 0 : i32
    %2 = arith.cmpi ne, %1, %c0_i32_0 : i32
    scf.if %2 {
      %cst_265 = arith.constant 0.000000e+00 : f32
      %697 = vector.broadcast %cst_265 : f32 to vector<4x16x128xf32>
      %c0_266 = arith.constant 0 : index
      %c0_267 = arith.constant 0 : index
      %c0_268 = arith.constant 0 : index
      %698 = vector.load %arg23[%c0_266, %c0_267, %c0_268] : memref<4x16x128xf32, #tpu.memory_space<vmem>>, vector<4x16x128xf32>
      tpu.vector_store %arg23[%c0_266, %c0_267, %c0_268], %697 {strides = array<i32>} : memref<4x16x128xf32, #tpu.memory_space<vmem>>, vector<4x16x128xf32>,
    } else {
    }
    %c4_i32 = arith.constant 4 : i32
    %3 = arith.muli %arg0, %c4_i32 : i32
    %c4_i32_1 = arith.constant 4 : i32
    %4 = arith.minsi %3, %c4_i32_1 : i32
    %c1_i32 = arith.constant 1 : i32
    %5 = arith.addi %arg0, %c1_i32 : i32
    %c4_i32_2 = arith.constant 4 : i32
    %6 = arith.muli %5, %c4_i32_2 : i32
    %c8_i32 = arith.constant 8 : i32
    %7 = arith.subi %c8_i32, %6 : i32
    %c0_i32_3 = arith.constant 0 : i32
    %8 = arith.maxsi %7, %c0_i32_3 : i32
    %9 = arith.index_cast %4 : i32 to index
    %c0 = arith.constant 0 : index
    %c0_4 = arith.constant 0 : index
    %10 = vector.load %arg2[%9, %c0, %c0_4] : memref<8x16x4xbf16, #tpu.memory_space<vmem>>, vector<4x16x4xbf16>
    %11 = vector.shape_cast %10 : vector<4x16x4xbf16> to vector<64x4xbf16>
    %c0_5 = arith.constant 0 : index
    %c0_6 = arith.constant 0 : index
    %12 = vector.load %arg11[%c0_5, %c0_6] : memref<4x384xbf16, #tpu.memory_space<vmem>>, vector<4x384xbf16>
    %cst = arith.constant dense<0.000000e+00> : vector<64x384xf32>
    %13 = tpu.matmul %11, %12, %cst {dimension_numbers = #tpu.dot_dimension_numbers<[1], [0], [0], [1], [0, 0, 1, 1], [], []>} : vector<64x4xbf16>, vector<4x384xbf16>, vector<64x384xf32> -> vector<64x384xf32>
    %c0_7 = arith.constant 0 : index
    %c0_8 = arith.constant 0 : index
    %14 = vector.load %arg13[%c0_7, %c0_8] : memref<1x384xf32, #tpu.memory_space<vmem>>, vector<1x384xf32>
    %15 = vector.broadcast %14 : vector<1x384xf32> to vector<64x384xf32>
    %16 = arith.addf %13, %15 : vector<64x384xf32>
    %17 = vector.shape_cast %16 : vector<64x384xf32> to vector<4x16x384xf32>
    %c0_9 = arith.constant 0 : index
    %c0_10 = arith.constant 0 : index
    %c0_11 = arith.constant 0 : index
    %18 = vector.load %arg21[%c0_9, %c0_10, %c0_11] : memref<4x16x384xf32, #tpu.memory_space<vmem>>, vector<4x16x384xf32>
    tpu.vector_store %arg21[%c0_9, %c0_10, %c0_11], %17 {strides = array<i32>} : memref<4x16x384xf32, #tpu.memory_space<vmem>>, vector<4x16x384xf32>,
    %19 = arith.index_cast %8 : i32 to index
    %c0_12 = arith.constant 0 : index
    %c0_13 = arith.constant 0 : index
    %20 = vector.load %arg1[%19, %c0_12, %c0_13] : memref<8x16x5xbf16, #tpu.memory_space<vmem>>, vector<4x16x5xbf16>
    %21 = vector.shape_cast %20 : vector<4x16x5xbf16> to vector<64x5xbf16>
    %c0_14 = arith.constant 0 : index
    %c0_15 = arith.constant 0 : index
    %22 = vector.load %arg3[%c0_14, %c0_15] : memref<5x384xbf16, #tpu.memory_space<vmem>>, vector<5x384xbf16>
    %cst_16 = arith.constant dense<0.000000e+00> : vector<64x384xf32>
    %23 = tpu.matmul %21, %22, %cst_16 {dimension_numbers = #tpu.dot_dimension_numbers<[1], [0], [0], [1], [0, 0, 1, 1], [], []>} : vector<64x5xbf16>, vector<5x384xbf16>, vector<64x384xf32> -> vector<64x384xf32>
    %c0_17 = arith.constant 0 : index
    %c0_18 = arith.constant 0 : index
    %24 = vector.load %arg5[%c0_17, %c0_18] : memref<1x384xf32, #tpu.memory_space<vmem>>, vector<1x384xf32>
    %25 = vector.broadcast %24 : vector<1x384xf32> to vector<64x384xf32>
    %26 = arith.addf %23, %25 : vector<64x384xf32>
    %27 = vector.shape_cast %26 : vector<64x384xf32> to vector<4x16x384xf32>
    %c0_19 = arith.constant 0 : index
    %c0_20 = arith.constant 0 : index
    %c0_21 = arith.constant 0 : index
    %28 = vector.load %arg22[%c0_19, %c0_20, %c0_21] : memref<4x16x384xf32, #tpu.memory_space<vmem>>, vector<4x16x384xf32>
    tpu.vector_store %arg22[%c0_19, %c0_20, %c0_21], %27 {strides = array<i32>} : memref<4x16x384xf32, #tpu.memory_space<vmem>>, vector<4x16x384xf32>,
    %c0_22 = arith.constant 0 : index
    %c0_23 = arith.constant 0 : index
    %c0_24 = arith.constant 0 : index
    %29 = vector.load %arg23[%c0_22, %c0_23, %c0_24] : memref<4x16x128xf32, #tpu.memory_space<vmem>>, vector<1x16x128xf32>
    %30 = vector.shape_cast %29 : vector<1x16x128xf32> to vector<16x128xf32>
    %c1 = arith.constant 1 : index
    %c0_25 = arith.constant 0 : index
    %c0_26 = arith.constant 0 : index
    %31 = vector.load %arg23[%c1, %c0_25, %c0_26] : memref<4x16x128xf32, #tpu.memory_space<vmem>>, vector<1x16x128xf32>
    %32 = vector.shape_cast %31 : vector<1x16x128xf32> to vector<16x128xf32>
    %c2 = arith.constant 2 : index
    %c0_27 = arith.constant 0 : index
    %c0_28 = arith.constant 0 : index
    %33 = vector.load %arg23[%c2, %c0_27, %c0_28] : memref<4x16x128xf32, #tpu.memory_space<vmem>>, vector<1x16x128xf32>
    %34 = vector.shape_cast %33 : vector<1x16x128xf32> to vector<16x128xf32>
    %c3 = arith.constant 3 : index
    %c0_29 = arith.constant 0 : index
    %c0_30 = arith.constant 0 : index
    %35 = vector.load %arg23[%c3, %c0_29, %c0_30] : memref<4x16x128xf32, #tpu.memory_space<vmem>>, vector<1x16x128xf32>
    %36 = vector.shape_cast %35 : vector<1x16x128xf32> to vector<16x128xf32>
    %c0_i32_31 = arith.constant 0 : i32
    %c4_i32_32 = arith.constant 4 : i32
    %37 = arith.muli %arg0, %c4_i32_32 : i32
    %38 = arith.addi %37, %c0_i32_31 : i32
    %39 = arith.subi %38, %4 : i32
    %c3_i32 = arith.constant 3 : i32
    %40 = arith.minsi %39, %c3_i32 : i32
    %41 = arith.index_cast %40 : i32 to index
    %c0_33 = arith.constant 0 : index
    %c0_34 = arith.constant 0 : index
    %42 = vector.load %arg21[%41, %c0_33, %c0_34] : memref<4x16x384xf32, #tpu.memory_space<vmem>>, vector<1x16x384xf32>
    %43 = vector.shape_cast %42 : vector<1x16x384xf32> to vector<16x384xf32>
    %44 = arith.truncf %30 : vector<16x128xf32> to vector<16x128xbf16>
    %c0_35 = arith.constant 0 : index
    %c0_36 = arith.constant 0 : index
    %45 = vector.load %arg12[%c0_35, %c0_36] : memref<128x384xbf16, #tpu.memory_space<vmem>>, vector<128x384xbf16>
    %cst_37 = arith.constant dense<0.000000e+00> : vector<16x384xf32>
    %46 = tpu.matmul %44, %45, %cst_37 {dimension_numbers = #tpu.dot_dimension_numbers<[1], [0], [0], [1], [0, 0, 1, 1], [], []>} : vector<16x128xbf16>, vector<128x384xbf16>, vector<16x384xf32> -> vector<16x384xf32>
    %c0_38 = arith.constant 0 : index
    %c0_39 = arith.constant 0 : index
    %47 = vector.load %arg14[%c0_38, %c0_39] : memref<1x384xf32, #tpu.memory_space<vmem>>, vector<1x384xf32>
    %48 = vector.broadcast %47 : vector<1x384xf32> to vector<16x384xf32>
    %49 = arith.addf %46, %48 : vector<16x384xf32>
    %50 = vector.extract_strided_slice %43 {offsets = [0, 0], sizes = [16, 128], strides = [1, 1]} : vector<16x384xf32> to vector<16x128xf32>
    %51 = vector.extract_strided_slice %49 {offsets = [0, 0], sizes = [16, 128], strides = [1, 1]} : vector<16x384xf32> to vector<16x128xf32>
    %52 = arith.addf %50, %51 : vector<16x128xf32>
    %53 = arith.negf %52 : vector<16x128xf32>
    %54 = math.exp %53 : vector<16x128xf32>
    %cst_40 = arith.constant 1.000000e+00 : f32
    %55 = vector.broadcast %cst_40 : f32 to vector<16x128xf32>
    %56 = arith.addf %55, %54 : vector<16x128xf32>
    %57 = arith.divf %55, %56 : vector<16x128xf32>
    %58 = vector.extract_strided_slice %43 {offsets = [0, 128], sizes = [16, 128], strides = [1, 1]} : vector<16x384xf32> to vector<16x128xf32>
    %59 = vector.extract_strided_slice %49 {offsets = [0, 128], sizes = [16, 128], strides = [1, 1]} : vector<16x384xf32> to vector<16x128xf32>
    %60 = arith.addf %58, %59 : vector<16x128xf32>
    %61 = arith.negf %60 : vector<16x128xf32>
    %62 = math.exp %61 : vector<16x128xf32>
    %cst_41 = arith.constant 1.000000e+00 : f32
    %63 = vector.broadcast %cst_41 : f32 to vector<16x128xf32>
    %64 = arith.addf %63, %62 : vector<16x128xf32>
    %65 = arith.divf %63, %64 : vector<16x128xf32>
    %66 = vector.extract_strided_slice %43 {offsets = [0, 256], sizes = [16, 128], strides = [1, 1]} : vector<16x384xf32> to vector<16x128xf32>
    %67 = vector.extract_strided_slice %49 {offsets = [0, 256], sizes = [16, 128], strides = [1, 1]} : vector<16x384xf32> to vector<16x128xf32>
    %68 = arith.mulf %57, %67 : vector<16x128xf32>
    %69 = arith.addf %66, %68 : vector<16x128xf32>
    %70 = math.tanh %69 : vector<16x128xf32>
    %cst_42 = arith.constant 1.000000e+00 : f32
    %71 = vector.broadcast %cst_42 : f32 to vector<16x128xf32>
    %72 = arith.subf %71, %65 : vector<16x128xf32>
    %73 = arith.mulf %72, %70 : vector<16x128xf32>
    %74 = arith.mulf %65, %30 : vector<16x128xf32>
    %75 = arith.addf %73, %74 : vector<16x128xf32>
    %76 = arith.truncf %75 : vector<16x128xf32> to vector<16x128xbf16>
    %c0_43 = arith.constant 0 : index
    %c0_44 = arith.constant 0 : index
    %77 = vector.load %arg15[%c0_43, %c0_44] : memref<128x384xbf16, #tpu.memory_space<vmem>>, vector<128x384xbf16>
    %cst_45 = arith.constant dense<0.000000e+00> : vector<16x384xf32>
    %78 = tpu.matmul %76, %77, %cst_45 {dimension_numbers = #tpu.dot_dimension_numbers<[1], [0], [0], [1], [0, 0, 1, 1], [], []>} : vector<16x128xbf16>, vector<128x384xbf16>, vector<16x384xf32> -> vector<16x384xf32>
    %c0_46 = arith.constant 0 : index
    %c0_47 = arith.constant 0 : index
    %79 = vector.load %arg17[%c0_46, %c0_47] : memref<1x384xf32, #tpu.memory_space<vmem>>, vector<1x384xf32>
    %80 = vector.broadcast %79 : vector<1x384xf32> to vector<16x384xf32>
    %81 = arith.addf %78, %80 : vector<16x384xf32>
    %82 = arith.truncf %32 : vector<16x128xf32> to vector<16x128xbf16>
    %c0_48 = arith.constant 0 : index
    %c0_49 = arith.constant 0 : index
    %83 = vector.load %arg16[%c0_48, %c0_49] : memref<128x384xbf16, #tpu.memory_space<vmem>>, vector<128x384xbf16>
    %cst_50 = arith.constant dense<0.000000e+00> : vector<16x384xf32>
    %84 = tpu.matmul %82, %83, %cst_50 {dimension_numbers = #tpu.dot_dimension_numbers<[1], [0], [0], [1], [0, 0, 1, 1], [], []>} : vector<16x128xbf16>, vector<128x384xbf16>, vector<16x384xf32> -> vector<16x384xf32>
    %c0_51 = arith.constant 0 : index
    %c0_52 = arith.constant 0 : index
    %85 = vector.load %arg18[%c0_51, %c0_52] : memref<1x384xf32, #tpu.memory_space<vmem>>, vector<1x384xf32>
    %86 = vector.broadcast %85 : vector<1x384xf32> to vector<16x384xf32>
    %87 = arith.addf %84, %86 : vector<16x384xf32>
    %88 = vector.extract_strided_slice %81 {offsets = [0, 0], sizes = [16, 128], strides = [1, 1]} : vector<16x384xf32> to vector<16x128xf32>
    %89 = vector.extract_strided_slice %87 {offsets = [0, 0], sizes = [16, 128], strides = [1, 1]} : vector<16x384xf32> to vector<16x128xf32>
    %90 = arith.addf %88, %89 : vector<16x128xf32>
    %91 = arith.negf %90 : vector<16x128xf32>
    %92 = math.exp %91 : vector<16x128xf32>
    %cst_53 = arith.constant 1.000000e+00 : f32
    %93 = vector.broadcast %cst_53 : f32 to vector<16x128xf32>
    %94 = arith.addf %93, %92 : vector<16x128xf32>
    %95 = arith.divf %93, %94 : vector<16x128xf32>
    %96 = vector.extract_strided_slice %81 {offsets = [0, 128], sizes = [16, 128], strides = [1, 1]} : vector<16x384xf32> to vector<16x128xf32>
    %97 = vector.extract_strided_slice %87 {offsets = [0, 128], sizes = [16, 128], strides = [1, 1]} : vector<16x384xf32> to vector<16x128xf32>
    %98 = arith.addf %96, %97 : vector<16x128xf32>
    %99 = arith.negf %98 : vector<16x128xf32>
    %100 = math.exp %99 : vector<16x128xf32>
    %cst_54 = arith.constant 1.000000e+00 : f32
    %101 = vector.broadcast %cst_54 : f32 to vector<16x128xf32>
    %102 = arith.addf %101, %100 : vector<16x128xf32>
    %103 = arith.divf %101, %102 : vector<16x128xf32>
    %104 = vector.extract_strided_slice %81 {offsets = [0, 256], sizes = [16, 128], strides = [1, 1]} : vector<16x384xf32> to vector<16x128xf32>
    %105 = vector.extract_strided_slice %87 {offsets = [0, 256], sizes = [16, 128], strides = [1, 1]} : vector<16x384xf32> to vector<16x128xf32>
    %106 = arith.mulf %95, %105 : vector<16x128xf32>
    %107 = arith.addf %104, %106 : vector<16x128xf32>
    %108 = math.tanh %107 : vector<16x128xf32>
    %cst_55 = arith.constant 1.000000e+00 : f32
    %109 = vector.broadcast %cst_55 : f32 to vector<16x128xf32>
    %110 = arith.subf %109, %103 : vector<16x128xf32>
    %111 = arith.mulf %110, %108 : vector<16x128xf32>
    %112 = arith.mulf %103, %32 : vector<16x128xf32>
    %113 = arith.addf %111, %112 : vector<16x128xf32>
    %114 = arith.index_cast %c0_i32_31 : i32 to index
    %c0_56 = arith.constant 0 : index
    %c0_57 = arith.constant 0 : index
    %115 = vector.load %arg19[%114, %c0_56, %c0_57] : memref<4x16x128xf32, #tpu.memory_space<vmem>>, vector<1x16x128xf32>
    %116 = vector.shape_cast %115 : vector<1x16x128xf32> to vector<16x128xf32>
    %117 = vector.shape_cast %113 : vector<16x128xf32> to vector<1x16x128xf32>
    tpu.vector_store %arg19[%114, %c0_56, %c0_57], %117 {strides = array<i32>} : memref<4x16x128xf32, #tpu.memory_space<vmem>>, vector<1x16x128xf32>,
    %c3_i32_58 = arith.constant 3 : i32
    %118 = arith.subi %c3_i32_58, %c0_i32_31 : i32
    %119 = arith.index_cast %118 : i32 to index
    %c0_59 = arith.constant 0 : index
    %c0_60 = arith.constant 0 : index
    %120 = vector.load %arg20[%119, %c0_59, %c0_60] : memref<4x16x128xf32, #tpu.memory_space<vmem>>, vector<1x16x128xf32>
    %121 = vector.shape_cast %120 : vector<1x16x128xf32> to vector<16x128xf32>
    %122 = vector.shape_cast %36 : vector<16x128xf32> to vector<1x16x128xf32>
    tpu.vector_store %arg20[%119, %c0_59, %c0_60], %122 {strides = array<i32>} : memref<4x16x128xf32, #tpu.memory_space<vmem>>, vector<1x16x128xf32>,
    %c7_i32 = arith.constant 7 : i32
    %123 = arith.subi %c7_i32, %38 : i32
    %124 = arith.subi %123, %8 : i32
    %c0_i32_61 = arith.constant 0 : i32
    %125 = arith.maxsi %124, %c0_i32_61 : i32
    %126 = arith.index_cast %125 : i32 to index
    %c0_62 = arith.constant 0 : index
    %c0_63 = arith.constant 0 : index
    %127 = vector.load %arg22[%126, %c0_62, %c0_63] : memref<4x16x384xf32, #tpu.memory_space<vmem>>, vector<1x16x384xf32>
    %128 = vector.shape_cast %127 : vector<1x16x384xf32> to vector<16x384xf32>
    %129 = arith.truncf %34 : vector<16x128xf32> to vector<16x128xbf16>
    %c0_64 = arith.constant 0 : index
    %c0_65 = arith.constant 0 : index
    %130 = vector.load %arg4[%c0_64, %c0_65] : memref<128x384xbf16, #tpu.memory_space<vmem>>, vector<128x384xbf16>
    %cst_66 = arith.constant dense<0.000000e+00> : vector<16x384xf32>
    %131 = tpu.matmul %129, %130, %cst_66 {dimension_numbers = #tpu.dot_dimension_numbers<[1], [0], [0], [1], [0, 0, 1, 1], [], []>} : vector<16x128xbf16>, vector<128x384xbf16>, vector<16x384xf32> -> vector<16x384xf32>
    %c0_67 = arith.constant 0 : index
    %c0_68 = arith.constant 0 : index
    %132 = vector.load %arg6[%c0_67, %c0_68] : memref<1x384xf32, #tpu.memory_space<vmem>>, vector<1x384xf32>
    %133 = vector.broadcast %132 : vector<1x384xf32> to vector<16x384xf32>
    %134 = arith.addf %131, %133 : vector<16x384xf32>
    %135 = vector.extract_strided_slice %128 {offsets = [0, 0], sizes = [16, 128], strides = [1, 1]} : vector<16x384xf32> to vector<16x128xf32>
    %136 = vector.extract_strided_slice %134 {offsets = [0, 0], sizes = [16, 128], strides = [1, 1]} : vector<16x384xf32> to vector<16x128xf32>
    %137 = arith.addf %135, %136 : vector<16x128xf32>
    %138 = arith.negf %137 : vector<16x128xf32>
    %139 = math.exp %138 : vector<16x128xf32>
    %cst_69 = arith.constant 1.000000e+00 : f32
    %140 = vector.broadcast %cst_69 : f32 to vector<16x128xf32>
    %141 = arith.addf %140, %139 : vector<16x128xf32>
    %142 = arith.divf %140, %141 : vector<16x128xf32>
    %143 = vector.extract_strided_slice %128 {offsets = [0, 128], sizes = [16, 128], strides = [1, 1]} : vector<16x384xf32> to vector<16x128xf32>
    %144 = vector.extract_strided_slice %134 {offsets = [0, 128], sizes = [16, 128], strides = [1, 1]} : vector<16x384xf32> to vector<16x128xf32>
    %145 = arith.addf %143, %144 : vector<16x128xf32>
    %146 = arith.negf %145 : vector<16x128xf32>
    %147 = math.exp %146 : vector<16x128xf32>
    %cst_70 = arith.constant 1.000000e+00 : f32
    %148 = vector.broadcast %cst_70 : f32 to vector<16x128xf32>
    %149 = arith.addf %148, %147 : vector<16x128xf32>
    %150 = arith.divf %148, %149 : vector<16x128xf32>
    %151 = vector.extract_strided_slice %128 {offsets = [0, 256], sizes = [16, 128], strides = [1, 1]} : vector<16x384xf32> to vector<16x128xf32>
    %152 = vector.extract_strided_slice %134 {offsets = [0, 256], sizes = [16, 128], strides = [1, 1]} : vector<16x384xf32> to vector<16x128xf32>
    %153 = arith.mulf %142, %152 : vector<16x128xf32>
    %154 = arith.addf %151, %153 : vector<16x128xf32>
    %155 = math.tanh %154 : vector<16x128xf32>
    %cst_71 = arith.constant 1.000000e+00 : f32
    %156 = vector.broadcast %cst_71 : f32 to vector<16x128xf32>
    %157 = arith.subf %156, %150 : vector<16x128xf32>
    %158 = arith.mulf %157, %155 : vector<16x128xf32>
    %159 = arith.mulf %150, %34 : vector<16x128xf32>
    %160 = arith.addf %158, %159 : vector<16x128xf32>
    %161 = arith.truncf %160 : vector<16x128xf32> to vector<16x128xbf16>
    %c0_72 = arith.constant 0 : index
    %c0_73 = arith.constant 0 : index
    %162 = vector.load %arg7[%c0_72, %c0_73] : memref<128x384xbf16, #tpu.memory_space<vmem>>, vector<128x384xbf16>
    %cst_74 = arith.constant dense<0.000000e+00> : vector<16x384xf32>
    %163 = tpu.matmul %161, %162, %cst_74 {dimension_numbers = #tpu.dot_dimension_numbers<[1], [0], [0], [1], [0, 0, 1, 1], [], []>} : vector<16x128xbf16>, vector<128x384xbf16>, vector<16x384xf32> -> vector<16x384xf32>
    %c0_75 = arith.constant 0 : index
    %c0_76 = arith.constant 0 : index
    %164 = vector.load %arg9[%c0_75, %c0_76] : memref<1x384xf32, #tpu.memory_space<vmem>>, vector<1x384xf32>
    %165 = vector.broadcast %164 : vector<1x384xf32> to vector<16x384xf32>
    %166 = arith.addf %163, %165 : vector<16x384xf32>
    %167 = arith.truncf %36 : vector<16x128xf32> to vector<16x128xbf16>
    %c0_77 = arith.constant 0 : index
    %c0_78 = arith.constant 0 : index
    %168 = vector.load %arg8[%c0_77, %c0_78] : memref<128x384xbf16, #tpu.memory_space<vmem>>, vector<128x384xbf16>
    %cst_79 = arith.constant dense<0.000000e+00> : vector<16x384xf32>
    %169 = tpu.matmul %167, %168, %cst_79 {dimension_numbers = #tpu.dot_dimension_numbers<[1], [0], [0], [1], [0, 0, 1, 1], [], []>} : vector<16x128xbf16>, vector<128x384xbf16>, vector<16x384xf32> -> vector<16x384xf32>
    %c0_80 = arith.constant 0 : index
    %c0_81 = arith.constant 0 : index
    %170 = vector.load %arg10[%c0_80, %c0_81] : memref<1x384xf32, #tpu.memory_space<vmem>>, vector<1x384xf32>
    %171 = vector.broadcast %170 : vector<1x384xf32> to vector<16x384xf32>
    %172 = arith.addf %169, %171 : vector<16x384xf32>
    %173 = vector.extract_strided_slice %166 {offsets = [0, 0], sizes = [16, 128], strides = [1, 1]} : vector<16x384xf32> to vector<16x128xf32>
    %174 = vector.extract_strided_slice %172 {offsets = [0, 0], sizes = [16, 128], strides = [1, 1]} : vector<16x384xf32> to vector<16x128xf32>
    %175 = arith.addf %173, %174 : vector<16x128xf32>
    %176 = arith.negf %175 : vector<16x128xf32>
    %177 = math.exp %176 : vector<16x128xf32>
    %cst_82 = arith.constant 1.000000e+00 : f32
    %178 = vector.broadcast %cst_82 : f32 to vector<16x128xf32>
    %179 = arith.addf %178, %177 : vector<16x128xf32>
    %180 = arith.divf %178, %179 : vector<16x128xf32>
    %181 = vector.extract_strided_slice %166 {offsets = [0, 128], sizes = [16, 128], strides = [1, 1]} : vector<16x384xf32> to vector<16x128xf32>
    %182 = vector.extract_strided_slice %172 {offsets = [0, 128], sizes = [16, 128], strides = [1, 1]} : vector<16x384xf32> to vector<16x128xf32>
    %183 = arith.addf %181, %182 : vector<16x128xf32>
    %184 = arith.negf %183 : vector<16x128xf32>
    %185 = math.exp %184 : vector<16x128xf32>
    %cst_83 = arith.constant 1.000000e+00 : f32
    %186 = vector.broadcast %cst_83 : f32 to vector<16x128xf32>
    %187 = arith.addf %186, %185 : vector<16x128xf32>
    %188 = arith.divf %186, %187 : vector<16x128xf32>
    %189 = vector.extract_strided_slice %166 {offsets = [0, 256], sizes = [16, 128], strides = [1, 1]} : vector<16x384xf32> to vector<16x128xf32>
    %190 = vector.extract_strided_slice %172 {offsets = [0, 256], sizes = [16, 128], strides = [1, 1]} : vector<16x384xf32> to vector<16x128xf32>
    %191 = arith.mulf %180, %190 : vector<16x128xf32>
    %192 = arith.addf %189, %191 : vector<16x128xf32>
    %193 = math.tanh %192 : vector<16x128xf32>
    %cst_84 = arith.constant 1.000000e+00 : f32
    %194 = vector.broadcast %cst_84 : f32 to vector<16x128xf32>
    %195 = arith.subf %194, %188 : vector<16x128xf32>
    %196 = arith.mulf %195, %193 : vector<16x128xf32>
    %197 = arith.mulf %188, %36 : vector<16x128xf32>
    %198 = arith.addf %196, %197 : vector<16x128xf32>
    %c1_i32_85 = arith.constant 1 : i32
    %c4_i32_86 = arith.constant 4 : i32
    %199 = arith.muli %arg0, %c4_i32_86 : i32
    %200 = arith.addi %199, %c1_i32_85 : i32
    %201 = arith.subi %200, %4 : i32
    %c3_i32_87 = arith.constant 3 : i32
    %202 = arith.minsi %201, %c3_i32_87 : i32
    %203 = arith.index_cast %202 : i32 to index
    %c0_88 = arith.constant 0 : index
    %c0_89 = arith.constant 0 : index
    %204 = vector.load %arg21[%203, %c0_88, %c0_89] : memref<4x16x384xf32, #tpu.memory_space<vmem>>, vector<1x16x384xf32>
    %205 = vector.shape_cast %204 : vector<1x16x384xf32> to vector<16x384xf32>
    %206 = arith.truncf %75 : vector<16x128xf32> to vector<16x128xbf16>
    %c0_90 = arith.constant 0 : index
    %c0_91 = arith.constant 0 : index
    %207 = vector.load %arg12[%c0_90, %c0_91] : memref<128x384xbf16, #tpu.memory_space<vmem>>, vector<128x384xbf16>
    %cst_92 = arith.constant dense<0.000000e+00> : vector<16x384xf32>
    %208 = tpu.matmul %206, %207, %cst_92 {dimension_numbers = #tpu.dot_dimension_numbers<[1], [0], [0], [1], [0, 0, 1, 1], [], []>} : vector<16x128xbf16>, vector<128x384xbf16>, vector<16x384xf32> -> vector<16x384xf32>
    %c0_93 = arith.constant 0 : index
    %c0_94 = arith.constant 0 : index
    %209 = vector.load %arg14[%c0_93, %c0_94] : memref<1x384xf32, #tpu.memory_space<vmem>>, vector<1x384xf32>
    %210 = vector.broadcast %209 : vector<1x384xf32> to vector<16x384xf32>
    %211 = arith.addf %208, %210 : vector<16x384xf32>
    %212 = vector.extract_strided_slice %205 {offsets = [0, 0], sizes = [16, 128], strides = [1, 1]} : vector<16x384xf32> to vector<16x128xf32>
    %213 = vector.extract_strided_slice %211 {offsets = [0, 0], sizes = [16, 128], strides = [1, 1]} : vector<16x384xf32> to vector<16x128xf32>
    %214 = arith.addf %212, %213 : vector<16x128xf32>
    %215 = arith.negf %214 : vector<16x128xf32>
    %216 = math.exp %215 : vector<16x128xf32>
    %cst_95 = arith.constant 1.000000e+00 : f32
    %217 = vector.broadcast %cst_95 : f32 to vector<16x128xf32>
    %218 = arith.addf %217, %216 : vector<16x128xf32>
    %219 = arith.divf %217, %218 : vector<16x128xf32>
    %220 = vector.extract_strided_slice %205 {offsets = [0, 128], sizes = [16, 128], strides = [1, 1]} : vector<16x384xf32> to vector<16x128xf32>
    %221 = vector.extract_strided_slice %211 {offsets = [0, 128], sizes = [16, 128], strides = [1, 1]} : vector<16x384xf32> to vector<16x128xf32>
    %222 = arith.addf %220, %221 : vector<16x128xf32>
    %223 = arith.negf %222 : vector<16x128xf32>
    %224 = math.exp %223 : vector<16x128xf32>
    %cst_96 = arith.constant 1.000000e+00 : f32
    %225 = vector.broadcast %cst_96 : f32 to vector<16x128xf32>
    %226 = arith.addf %225, %224 : vector<16x128xf32>
    %227 = arith.divf %225, %226 : vector<16x128xf32>
    %228 = vector.extract_strided_slice %205 {offsets = [0, 256], sizes = [16, 128], strides = [1, 1]} : vector<16x384xf32> to vector<16x128xf32>
    %229 = vector.extract_strided_slice %211 {offsets = [0, 256], sizes = [16, 128], strides = [1, 1]} : vector<16x384xf32> to vector<16x128xf32>
    %230 = arith.mulf %219, %229 : vector<16x128xf32>
    %231 = arith.addf %228, %230 : vector<16x128xf32>
    %232 = math.tanh %231 : vector<16x128xf32>
    %cst_97 = arith.constant 1.000000e+00 : f32
    %233 = vector.broadcast %cst_97 : f32 to vector<16x128xf32>
    %234 = arith.subf %233, %227 : vector<16x128xf32>
    %235 = arith.mulf %234, %232 : vector<16x128xf32>
    %236 = arith.mulf %227, %75 : vector<16x128xf32>
    %237 = arith.addf %235, %236 : vector<16x128xf32>
    %238 = arith.truncf %237 : vector<16x128xf32> to vector<16x128xbf16>
    %c0_98 = arith.constant 0 : index
    %c0_99 = arith.constant 0 : index
    %239 = vector.load %arg15[%c0_98, %c0_99] : memref<128x384xbf16, #tpu.memory_space<vmem>>, vector<128x384xbf16>
    %cst_100 = arith.constant dense<0.000000e+00> : vector<16x384xf32>
    %240 = tpu.matmul %238, %239, %cst_100 {dimension_numbers = #tpu.dot_dimension_numbers<[1], [0], [0], [1], [0, 0, 1, 1], [], []>} : vector<16x128xbf16>, vector<128x384xbf16>, vector<16x384xf32> -> vector<16x384xf32>
    %c0_101 = arith.constant 0 : index
    %c0_102 = arith.constant 0 : index
    %241 = vector.load %arg17[%c0_101, %c0_102] : memref<1x384xf32, #tpu.memory_space<vmem>>, vector<1x384xf32>
    %242 = vector.broadcast %241 : vector<1x384xf32> to vector<16x384xf32>
    %243 = arith.addf %240, %242 : vector<16x384xf32>
    %244 = arith.truncf %113 : vector<16x128xf32> to vector<16x128xbf16>
    %c0_103 = arith.constant 0 : index
    %c0_104 = arith.constant 0 : index
    %245 = vector.load %arg16[%c0_103, %c0_104] : memref<128x384xbf16, #tpu.memory_space<vmem>>, vector<128x384xbf16>
    %cst_105 = arith.constant dense<0.000000e+00> : vector<16x384xf32>
    %246 = tpu.matmul %244, %245, %cst_105 {dimension_numbers = #tpu.dot_dimension_numbers<[1], [0], [0], [1], [0, 0, 1, 1], [], []>} : vector<16x128xbf16>, vector<128x384xbf16>, vector<16x384xf32> -> vector<16x384xf32>
    %c0_106 = arith.constant 0 : index
    %c0_107 = arith.constant 0 : index
    %247 = vector.load %arg18[%c0_106, %c0_107] : memref<1x384xf32, #tpu.memory_space<vmem>>, vector<1x384xf32>
    %248 = vector.broadcast %247 : vector<1x384xf32> to vector<16x384xf32>
    %249 = arith.addf %246, %248 : vector<16x384xf32>
    %250 = vector.extract_strided_slice %243 {offsets = [0, 0], sizes = [16, 128], strides = [1, 1]} : vector<16x384xf32> to vector<16x128xf32>
    %251 = vector.extract_strided_slice %249 {offsets = [0, 0], sizes = [16, 128], strides = [1, 1]} : vector<16x384xf32> to vector<16x128xf32>
    %252 = arith.addf %250, %251 : vector<16x128xf32>
    %253 = arith.negf %252 : vector<16x128xf32>
    %254 = math.exp %253 : vector<16x128xf32>
    %cst_108 = arith.constant 1.000000e+00 : f32
    %255 = vector.broadcast %cst_108 : f32 to vector<16x128xf32>
    %256 = arith.addf %255, %254 : vector<16x128xf32>
    %257 = arith.divf %255, %256 : vector<16x128xf32>
    %258 = vector.extract_strided_slice %243 {offsets = [0, 128], sizes = [16, 128], strides = [1, 1]} : vector<16x384xf32> to vector<16x128xf32>
    %259 = vector.extract_strided_slice %249 {offsets = [0, 128], sizes = [16, 128], strides = [1, 1]} : vector<16x384xf32> to vector<16x128xf32>
    %260 = arith.addf %258, %259 : vector<16x128xf32>
    %261 = arith.negf %260 : vector<16x128xf32>
    %262 = math.exp %261 : vector<16x128xf32>
    %cst_109 = arith.constant 1.000000e+00 : f32
    %263 = vector.broadcast %cst_109 : f32 to vector<16x128xf32>
    %264 = arith.addf %263, %262 : vector<16x128xf32>
    %265 = arith.divf %263, %264 : vector<16x128xf32>
    %266 = vector.extract_strided_slice %243 {offsets = [0, 256], sizes = [16, 128], strides = [1, 1]} : vector<16x384xf32> to vector<16x128xf32>
    %267 = vector.extract_strided_slice %249 {offsets = [0, 256], sizes = [16, 128], strides = [1, 1]} : vector<16x384xf32> to vector<16x128xf32>
    %268 = arith.mulf %257, %267 : vector<16x128xf32>
    %269 = arith.addf %266, %268 : vector<16x128xf32>
    %270 = math.tanh %269 : vector<16x128xf32>
    %cst_110 = arith.constant 1.000000e+00 : f32
    %271 = vector.broadcast %cst_110 : f32 to vector<16x128xf32>
    %272 = arith.subf %271, %265 : vector<16x128xf32>
    %273 = arith.mulf %272, %270 : vector<16x128xf32>
    %274 = arith.mulf %265, %113 : vector<16x128xf32>
    %275 = arith.addf %273, %274 : vector<16x128xf32>
    %276 = arith.index_cast %c1_i32_85 : i32 to index
    %c0_111 = arith.constant 0 : index
    %c0_112 = arith.constant 0 : index
    %277 = vector.load %arg19[%276, %c0_111, %c0_112] : memref<4x16x128xf32, #tpu.memory_space<vmem>>, vector<1x16x128xf32>
    %278 = vector.shape_cast %277 : vector<1x16x128xf32> to vector<16x128xf32>
    %279 = vector.shape_cast %275 : vector<16x128xf32> to vector<1x16x128xf32>
    tpu.vector_store %arg19[%276, %c0_111, %c0_112], %279 {strides = array<i32>} : memref<4x16x128xf32, #tpu.memory_space<vmem>>, vector<1x16x128xf32>,
    %c3_i32_113 = arith.constant 3 : i32
    %280 = arith.subi %c3_i32_113, %c1_i32_85 : i32
    %281 = arith.index_cast %280 : i32 to index
    %c0_114 = arith.constant 0 : index
    %c0_115 = arith.constant 0 : index
    %282 = vector.load %arg20[%281, %c0_114, %c0_115] : memref<4x16x128xf32, #tpu.memory_space<vmem>>, vector<1x16x128xf32>
    %283 = vector.shape_cast %282 : vector<1x16x128xf32> to vector<16x128xf32>
    %284 = vector.shape_cast %198 : vector<16x128xf32> to vector<1x16x128xf32>
    tpu.vector_store %arg20[%281, %c0_114, %c0_115], %284 {strides = array<i32>} : memref<4x16x128xf32, #tpu.memory_space<vmem>>, vector<1x16x128xf32>,
    %c7_i32_116 = arith.constant 7 : i32
    %285 = arith.subi %c7_i32_116, %200 : i32
    %286 = arith.subi %285, %8 : i32
    %c0_i32_117 = arith.constant 0 : i32
    %287 = arith.maxsi %286, %c0_i32_117 : i32
    %288 = arith.index_cast %287 : i32 to index
    %c0_118 = arith.constant 0 : index
    %c0_119 = arith.constant 0 : index
    %289 = vector.load %arg22[%288, %c0_118, %c0_119] : memref<4x16x384xf32, #tpu.memory_space<vmem>>, vector<1x16x384xf32>
    %290 = vector.shape_cast %289 : vector<1x16x384xf32> to vector<16x384xf32>
    %291 = arith.truncf %160 : vector<16x128xf32> to vector<16x128xbf16>
    %c0_120 = arith.constant 0 : index
    %c0_121 = arith.constant 0 : index
    %292 = vector.load %arg4[%c0_120, %c0_121] : memref<128x384xbf16, #tpu.memory_space<vmem>>, vector<128x384xbf16>
    %cst_122 = arith.constant dense<0.000000e+00> : vector<16x384xf32>
    %293 = tpu.matmul %291, %292, %cst_122 {dimension_numbers = #tpu.dot_dimension_numbers<[1], [0], [0], [1], [0, 0, 1, 1], [], []>} : vector<16x128xbf16>, vector<128x384xbf16>, vector<16x384xf32> -> vector<16x384xf32>
    %c0_123 = arith.constant 0 : index
    %c0_124 = arith.constant 0 : index
    %294 = vector.load %arg6[%c0_123, %c0_124] : memref<1x384xf32, #tpu.memory_space<vmem>>, vector<1x384xf32>
    %295 = vector.broadcast %294 : vector<1x384xf32> to vector<16x384xf32>
    %296 = arith.addf %293, %295 : vector<16x384xf32>
    %297 = vector.extract_strided_slice %290 {offsets = [0, 0], sizes = [16, 128], strides = [1, 1]} : vector<16x384xf32> to vector<16x128xf32>
    %298 = vector.extract_strided_slice %296 {offsets = [0, 0], sizes = [16, 128], strides = [1, 1]} : vector<16x384xf32> to vector<16x128xf32>
    %299 = arith.addf %297, %298 : vector<16x128xf32>
    %300 = arith.negf %299 : vector<16x128xf32>
    %301 = math.exp %300 : vector<16x128xf32>
    %cst_125 = arith.constant 1.000000e+00 : f32
    %302 = vector.broadcast %cst_125 : f32 to vector<16x128xf32>
    %303 = arith.addf %302, %301 : vector<16x128xf32>
    %304 = arith.divf %302, %303 : vector<16x128xf32>
    %305 = vector.extract_strided_slice %290 {offsets = [0, 128], sizes = [16, 128], strides = [1, 1]} : vector<16x384xf32> to vector<16x128xf32>
    %306 = vector.extract_strided_slice %296 {offsets = [0, 128], sizes = [16, 128], strides = [1, 1]} : vector<16x384xf32> to vector<16x128xf32>
    %307 = arith.addf %305, %306 : vector<16x128xf32>
    %308 = arith.negf %307 : vector<16x128xf32>
    %309 = math.exp %308 : vector<16x128xf32>
    %cst_126 = arith.constant 1.000000e+00 : f32
    %310 = vector.broadcast %cst_126 : f32 to vector<16x128xf32>
    %311 = arith.addf %310, %309 : vector<16x128xf32>
    %312 = arith.divf %310, %311 : vector<16x128xf32>
    %313 = vector.extract_strided_slice %290 {offsets = [0, 256], sizes = [16, 128], strides = [1, 1]} : vector<16x384xf32> to vector<16x128xf32>
    %314 = vector.extract_strided_slice %296 {offsets = [0, 256], sizes = [16, 128], strides = [1, 1]} : vector<16x384xf32> to vector<16x128xf32>
    %315 = arith.mulf %304, %314 : vector<16x128xf32>
    %316 = arith.addf %313, %315 : vector<16x128xf32>
    %317 = math.tanh %316 : vector<16x128xf32>
    %cst_127 = arith.constant 1.000000e+00 : f32
    %318 = vector.broadcast %cst_127 : f32 to vector<16x128xf32>
    %319 = arith.subf %318, %312 : vector<16x128xf32>
    %320 = arith.mulf %319, %317 : vector<16x128xf32>
    %321 = arith.mulf %312, %160 : vector<16x128xf32>
    %322 = arith.addf %320, %321 : vector<16x128xf32>
    %323 = arith.truncf %322 : vector<16x128xf32> to vector<16x128xbf16>
    %c0_128 = arith.constant 0 : index
    %c0_129 = arith.constant 0 : index
    %324 = vector.load %arg7[%c0_128, %c0_129] : memref<128x384xbf16, #tpu.memory_space<vmem>>, vector<128x384xbf16>
    %cst_130 = arith.constant dense<0.000000e+00> : vector<16x384xf32>
    %325 = tpu.matmul %323, %324, %cst_130 {dimension_numbers = #tpu.dot_dimension_numbers<[1], [0], [0], [1], [0, 0, 1, 1], [], []>} : vector<16x128xbf16>, vector<128x384xbf16>, vector<16x384xf32> -> vector<16x384xf32>
    %c0_131 = arith.constant 0 : index
    %c0_132 = arith.constant 0 : index
    %326 = vector.load %arg9[%c0_131, %c0_132] : memref<1x384xf32, #tpu.memory_space<vmem>>, vector<1x384xf32>
    %327 = vector.broadcast %326 : vector<1x384xf32> to vector<16x384xf32>
    %328 = arith.addf %325, %327 : vector<16x384xf32>
    %329 = arith.truncf %198 : vector<16x128xf32> to vector<16x128xbf16>
    %c0_133 = arith.constant 0 : index
    %c0_134 = arith.constant 0 : index
    %330 = vector.load %arg8[%c0_133, %c0_134] : memref<128x384xbf16, #tpu.memory_space<vmem>>, vector<128x384xbf16>
    %cst_135 = arith.constant dense<0.000000e+00> : vector<16x384xf32>
    %331 = tpu.matmul %329, %330, %cst_135 {dimension_numbers = #tpu.dot_dimension_numbers<[1], [0], [0], [1], [0, 0, 1, 1], [], []>} : vector<16x128xbf16>, vector<128x384xbf16>, vector<16x384xf32> -> vector<16x384xf32>
    %c0_136 = arith.constant 0 : index
    %c0_137 = arith.constant 0 : index
    %332 = vector.load %arg10[%c0_136, %c0_137] : memref<1x384xf32, #tpu.memory_space<vmem>>, vector<1x384xf32>
    %333 = vector.broadcast %332 : vector<1x384xf32> to vector<16x384xf32>
    %334 = arith.addf %331, %333 : vector<16x384xf32>
    %335 = vector.extract_strided_slice %328 {offsets = [0, 0], sizes = [16, 128], strides = [1, 1]} : vector<16x384xf32> to vector<16x128xf32>
    %336 = vector.extract_strided_slice %334 {offsets = [0, 0], sizes = [16, 128], strides = [1, 1]} : vector<16x384xf32> to vector<16x128xf32>
    %337 = arith.addf %335, %336 : vector<16x128xf32>
    %338 = arith.negf %337 : vector<16x128xf32>
    %339 = math.exp %338 : vector<16x128xf32>
    %cst_138 = arith.constant 1.000000e+00 : f32
    %340 = vector.broadcast %cst_138 : f32 to vector<16x128xf32>
    %341 = arith.addf %340, %339 : vector<16x128xf32>
    %342 = arith.divf %340, %341 : vector<16x128xf32>
    %343 = vector.extract_strided_slice %328 {offsets = [0, 128], sizes = [16, 128], strides = [1, 1]} : vector<16x384xf32> to vector<16x128xf32>
    %344 = vector.extract_strided_slice %334 {offsets = [0, 128], sizes = [16, 128], strides = [1, 1]} : vector<16x384xf32> to vector<16x128xf32>
    %345 = arith.addf %343, %344 : vector<16x128xf32>
    %346 = arith.negf %345 : vector<16x128xf32>
    %347 = math.exp %346 : vector<16x128xf32>
    %cst_139 = arith.constant 1.000000e+00 : f32
    %348 = vector.broadcast %cst_139 : f32 to vector<16x128xf32>
    %349 = arith.addf %348, %347 : vector<16x128xf32>
    %350 = arith.divf %348, %349 : vector<16x128xf32>
    %351 = vector.extract_strided_slice %328 {offsets = [0, 256], sizes = [16, 128], strides = [1, 1]} : vector<16x384xf32> to vector<16x128xf32>
    %352 = vector.extract_strided_slice %334 {offsets = [0, 256], sizes = [16, 128], strides = [1, 1]} : vector<16x384xf32> to vector<16x128xf32>
    %353 = arith.mulf %342, %352 : vector<16x128xf32>
    %354 = arith.addf %351, %353 : vector<16x128xf32>
    %355 = math.tanh %354 : vector<16x128xf32>
    %cst_140 = arith.constant 1.000000e+00 : f32
    %356 = vector.broadcast %cst_140 : f32 to vector<16x128xf32>
    %357 = arith.subf %356, %350 : vector<16x128xf32>
    %358 = arith.mulf %357, %355 : vector<16x128xf32>
    %359 = arith.mulf %350, %198 : vector<16x128xf32>
    %360 = arith.addf %358, %359 : vector<16x128xf32>
    %c2_i32 = arith.constant 2 : i32
    %c4_i32_141 = arith.constant 4 : i32
    %361 = arith.muli %arg0, %c4_i32_141 : i32
    %362 = arith.addi %361, %c2_i32 : i32
    %363 = arith.subi %362, %4 : i32
    %c3_i32_142 = arith.constant 3 : i32
    %364 = arith.minsi %363, %c3_i32_142 : i32
    %365 = arith.index_cast %364 : i32 to index
    %c0_143 = arith.constant 0 : index
    %c0_144 = arith.constant 0 : index
    %366 = vector.load %arg21[%365, %c0_143, %c0_144] : memref<4x16x384xf32, #tpu.memory_space<vmem>>, vector<1x16x384xf32>
    %367 = vector.shape_cast %366 : vector<1x16x384xf32> to vector<16x384xf32>
    %368 = arith.truncf %237 : vector<16x128xf32> to vector<16x128xbf16>
    %c0_145 = arith.constant 0 : index
    %c0_146 = arith.constant 0 : index
    %369 = vector.load %arg12[%c0_145, %c0_146] : memref<128x384xbf16, #tpu.memory_space<vmem>>, vector<128x384xbf16>
    %cst_147 = arith.constant dense<0.000000e+00> : vector<16x384xf32>
    %370 = tpu.matmul %368, %369, %cst_147 {dimension_numbers = #tpu.dot_dimension_numbers<[1], [0], [0], [1], [0, 0, 1, 1], [], []>} : vector<16x128xbf16>, vector<128x384xbf16>, vector<16x384xf32> -> vector<16x384xf32>
    %c0_148 = arith.constant 0 : index
    %c0_149 = arith.constant 0 : index
    %371 = vector.load %arg14[%c0_148, %c0_149] : memref<1x384xf32, #tpu.memory_space<vmem>>, vector<1x384xf32>
    %372 = vector.broadcast %371 : vector<1x384xf32> to vector<16x384xf32>
    %373 = arith.addf %370, %372 : vector<16x384xf32>
    %374 = vector.extract_strided_slice %367 {offsets = [0, 0], sizes = [16, 128], strides = [1, 1]} : vector<16x384xf32> to vector<16x128xf32>
    %375 = vector.extract_strided_slice %373 {offsets = [0, 0], sizes = [16, 128], strides = [1, 1]} : vector<16x384xf32> to vector<16x128xf32>
    %376 = arith.addf %374, %375 : vector<16x128xf32>
    %377 = arith.negf %376 : vector<16x128xf32>
    %378 = math.exp %377 : vector<16x128xf32>
    %cst_150 = arith.constant 1.000000e+00 : f32
    %379 = vector.broadcast %cst_150 : f32 to vector<16x128xf32>
    %380 = arith.addf %379, %378 : vector<16x128xf32>
    %381 = arith.divf %379, %380 : vector<16x128xf32>
    %382 = vector.extract_strided_slice %367 {offsets = [0, 128], sizes = [16, 128], strides = [1, 1]} : vector<16x384xf32> to vector<16x128xf32>
    %383 = vector.extract_strided_slice %373 {offsets = [0, 128], sizes = [16, 128], strides = [1, 1]} : vector<16x384xf32> to vector<16x128xf32>
    %384 = arith.addf %382, %383 : vector<16x128xf32>
    %385 = arith.negf %384 : vector<16x128xf32>
    %386 = math.exp %385 : vector<16x128xf32>
    %cst_151 = arith.constant 1.000000e+00 : f32
    %387 = vector.broadcast %cst_151 : f32 to vector<16x128xf32>
    %388 = arith.addf %387, %386 : vector<16x128xf32>
    %389 = arith.divf %387, %388 : vector<16x128xf32>
    %390 = vector.extract_strided_slice %367 {offsets = [0, 256], sizes = [16, 128], strides = [1, 1]} : vector<16x384xf32> to vector<16x128xf32>
    %391 = vector.extract_strided_slice %373 {offsets = [0, 256], sizes = [16, 128], strides = [1, 1]} : vector<16x384xf32> to vector<16x128xf32>
    %392 = arith.mulf %381, %391 : vector<16x128xf32>
    %393 = arith.addf %390, %392 : vector<16x128xf32>
    %394 = math.tanh %393 : vector<16x128xf32>
    %cst_152 = arith.constant 1.000000e+00 : f32
    %395 = vector.broadcast %cst_152 : f32 to vector<16x128xf32>
    %396 = arith.subf %395, %389 : vector<16x128xf32>
    %397 = arith.mulf %396, %394 : vector<16x128xf32>
    %398 = arith.mulf %389, %237 : vector<16x128xf32>
    %399 = arith.addf %397, %398 : vector<16x128xf32>
    %400 = arith.truncf %399 : vector<16x128xf32> to vector<16x128xbf16>
    %c0_153 = arith.constant 0 : index
    %c0_154 = arith.constant 0 : index
    %401 = vector.load %arg15[%c0_153, %c0_154] : memref<128x384xbf16, #tpu.memory_space<vmem>>, vector<128x384xbf16>
    %cst_155 = arith.constant dense<0.000000e+00> : vector<16x384xf32>
    %402 = tpu.matmul %400, %401, %cst_155 {dimension_numbers = #tpu.dot_dimension_numbers<[1], [0], [0], [1], [0, 0, 1, 1], [], []>} : vector<16x128xbf16>, vector<128x384xbf16>, vector<16x384xf32> -> vector<16x384xf32>
    %c0_156 = arith.constant 0 : index
    %c0_157 = arith.constant 0 : index
    %403 = vector.load %arg17[%c0_156, %c0_157] : memref<1x384xf32, #tpu.memory_space<vmem>>, vector<1x384xf32>
    %404 = vector.broadcast %403 : vector<1x384xf32> to vector<16x384xf32>
    %405 = arith.addf %402, %404 : vector<16x384xf32>
    %406 = arith.truncf %275 : vector<16x128xf32> to vector<16x128xbf16>
    %c0_158 = arith.constant 0 : index
    %c0_159 = arith.constant 0 : index
    %407 = vector.load %arg16[%c0_158, %c0_159] : memref<128x384xbf16, #tpu.memory_space<vmem>>, vector<128x384xbf16>
    %cst_160 = arith.constant dense<0.000000e+00> : vector<16x384xf32>
    %408 = tpu.matmul %406, %407, %cst_160 {dimension_numbers = #tpu.dot_dimension_numbers<[1], [0], [0], [1], [0, 0, 1, 1], [], []>} : vector<16x128xbf16>, vector<128x384xbf16>, vector<16x384xf32> -> vector<16x384xf32>
    %c0_161 = arith.constant 0 : index
    %c0_162 = arith.constant 0 : index
    %409 = vector.load %arg18[%c0_161, %c0_162] : memref<1x384xf32, #tpu.memory_space<vmem>>, vector<1x384xf32>
    %410 = vector.broadcast %409 : vector<1x384xf32> to vector<16x384xf32>
    %411 = arith.addf %408, %410 : vector<16x384xf32>
    %412 = vector.extract_strided_slice %405 {offsets = [0, 0], sizes = [16, 128], strides = [1, 1]} : vector<16x384xf32> to vector<16x128xf32>
    %413 = vector.extract_strided_slice %411 {offsets = [0, 0], sizes = [16, 128], strides = [1, 1]} : vector<16x384xf32> to vector<16x128xf32>
    %414 = arith.addf %412, %413 : vector<16x128xf32>
    %415 = arith.negf %414 : vector<16x128xf32>
    %416 = math.exp %415 : vector<16x128xf32>
    %cst_163 = arith.constant 1.000000e+00 : f32
    %417 = vector.broadcast %cst_163 : f32 to vector<16x128xf32>
    %418 = arith.addf %417, %416 : vector<16x128xf32>
    %419 = arith.divf %417, %418 : vector<16x128xf32>
    %420 = vector.extract_strided_slice %405 {offsets = [0, 128], sizes = [16, 128], strides = [1, 1]} : vector<16x384xf32> to vector<16x128xf32>
    %421 = vector.extract_strided_slice %411 {offsets = [0, 128], sizes = [16, 128], strides = [1, 1]} : vector<16x384xf32> to vector<16x128xf32>
    %422 = arith.addf %420, %421 : vector<16x128xf32>
    %423 = arith.negf %422 : vector<16x128xf32>
    %424 = math.exp %423 : vector<16x128xf32>
    %cst_164 = arith.constant 1.000000e+00 : f32
    %425 = vector.broadcast %cst_164 : f32 to vector<16x128xf32>
    %426 = arith.addf %425, %424 : vector<16x128xf32>
    %427 = arith.divf %425, %426 : vector<16x128xf32>
    %428 = vector.extract_strided_slice %405 {offsets = [0, 256], sizes = [16, 128], strides = [1, 1]} : vector<16x384xf32> to vector<16x128xf32>
    %429 = vector.extract_strided_slice %411 {offsets = [0, 256], sizes = [16, 128], strides = [1, 1]} : vector<16x384xf32> to vector<16x128xf32>
    %430 = arith.mulf %419, %429 : vector<16x128xf32>
    %431 = arith.addf %428, %430 : vector<16x128xf32>
    %432 = math.tanh %431 : vector<16x128xf32>
    %cst_165 = arith.constant 1.000000e+00 : f32
    %433 = vector.broadcast %cst_165 : f32 to vector<16x128xf32>
    %434 = arith.subf %433, %427 : vector<16x128xf32>
    %435 = arith.mulf %434, %432 : vector<16x128xf32>
    %436 = arith.mulf %427, %275 : vector<16x128xf32>
    %437 = arith.addf %435, %436 : vector<16x128xf32>
    %438 = arith.index_cast %c2_i32 : i32 to index
    %c0_166 = arith.constant 0 : index
    %c0_167 = arith.constant 0 : index
    %439 = vector.load %arg19[%438, %c0_166, %c0_167] : memref<4x16x128xf32, #tpu.memory_space<vmem>>, vector<1x16x128xf32>
    %440 = vector.shape_cast %439 : vector<1x16x128xf32> to vector<16x128xf32>
    %441 = vector.shape_cast %437 : vector<16x128xf32> to vector<1x16x128xf32>
    tpu.vector_store %arg19[%438, %c0_166, %c0_167], %441 {strides = array<i32>} : memref<4x16x128xf32, #tpu.memory_space<vmem>>, vector<1x16x128xf32>,
    %c3_i32_168 = arith.constant 3 : i32
    %442 = arith.subi %c3_i32_168, %c2_i32 : i32
    %443 = arith.index_cast %442 : i32 to index
    %c0_169 = arith.constant 0 : index
    %c0_170 = arith.constant 0 : index
    %444 = vector.load %arg20[%443, %c0_169, %c0_170] : memref<4x16x128xf32, #tpu.memory_space<vmem>>, vector<1x16x128xf32>
    %445 = vector.shape_cast %444 : vector<1x16x128xf32> to vector<16x128xf32>
    %446 = vector.shape_cast %360 : vector<16x128xf32> to vector<1x16x128xf32>
    tpu.vector_store %arg20[%443, %c0_169, %c0_170], %446 {strides = array<i32>} : memref<4x16x128xf32, #tpu.memory_space<vmem>>, vector<1x16x128xf32>,
    %c7_i32_171 = arith.constant 7 : i32
    %447 = arith.subi %c7_i32_171, %362 : i32
    %448 = arith.subi %447, %8 : i32
    %c0_i32_172 = arith.constant 0 : i32
    %449 = arith.maxsi %448, %c0_i32_172 : i32
    %450 = arith.index_cast %449 : i32 to index
    %c0_173 = arith.constant 0 : index
    %c0_174 = arith.constant 0 : index
    %451 = vector.load %arg22[%450, %c0_173, %c0_174] : memref<4x16x384xf32, #tpu.memory_space<vmem>>, vector<1x16x384xf32>
    %452 = vector.shape_cast %451 : vector<1x16x384xf32> to vector<16x384xf32>
    %453 = arith.truncf %322 : vector<16x128xf32> to vector<16x128xbf16>
    %c0_175 = arith.constant 0 : index
    %c0_176 = arith.constant 0 : index
    %454 = vector.load %arg4[%c0_175, %c0_176] : memref<128x384xbf16, #tpu.memory_space<vmem>>, vector<128x384xbf16>
    %cst_177 = arith.constant dense<0.000000e+00> : vector<16x384xf32>
    %455 = tpu.matmul %453, %454, %cst_177 {dimension_numbers = #tpu.dot_dimension_numbers<[1], [0], [0], [1], [0, 0, 1, 1], [], []>} : vector<16x128xbf16>, vector<128x384xbf16>, vector<16x384xf32> -> vector<16x384xf32>
    %c0_178 = arith.constant 0 : index
    %c0_179 = arith.constant 0 : index
    %456 = vector.load %arg6[%c0_178, %c0_179] : memref<1x384xf32, #tpu.memory_space<vmem>>, vector<1x384xf32>
    %457 = vector.broadcast %456 : vector<1x384xf32> to vector<16x384xf32>
    %458 = arith.addf %455, %457 : vector<16x384xf32>
    %459 = vector.extract_strided_slice %452 {offsets = [0, 0], sizes = [16, 128], strides = [1, 1]} : vector<16x384xf32> to vector<16x128xf32>
    %460 = vector.extract_strided_slice %458 {offsets = [0, 0], sizes = [16, 128], strides = [1, 1]} : vector<16x384xf32> to vector<16x128xf32>
    %461 = arith.addf %459, %460 : vector<16x128xf32>
    %462 = arith.negf %461 : vector<16x128xf32>
    %463 = math.exp %462 : vector<16x128xf32>
    %cst_180 = arith.constant 1.000000e+00 : f32
    %464 = vector.broadcast %cst_180 : f32 to vector<16x128xf32>
    %465 = arith.addf %464, %463 : vector<16x128xf32>
    %466 = arith.divf %464, %465 : vector<16x128xf32>
    %467 = vector.extract_strided_slice %452 {offsets = [0, 128], sizes = [16, 128], strides = [1, 1]} : vector<16x384xf32> to vector<16x128xf32>
    %468 = vector.extract_strided_slice %458 {offsets = [0, 128], sizes = [16, 128], strides = [1, 1]} : vector<16x384xf32> to vector<16x128xf32>
    %469 = arith.addf %467, %468 : vector<16x128xf32>
    %470 = arith.negf %469 : vector<16x128xf32>
    %471 = math.exp %470 : vector<16x128xf32>
    %cst_181 = arith.constant 1.000000e+00 : f32
    %472 = vector.broadcast %cst_181 : f32 to vector<16x128xf32>
    %473 = arith.addf %472, %471 : vector<16x128xf32>
    %474 = arith.divf %472, %473 : vector<16x128xf32>
    %475 = vector.extract_strided_slice %452 {offsets = [0, 256], sizes = [16, 128], strides = [1, 1]} : vector<16x384xf32> to vector<16x128xf32>
    %476 = vector.extract_strided_slice %458 {offsets = [0, 256], sizes = [16, 128], strides = [1, 1]} : vector<16x384xf32> to vector<16x128xf32>
    %477 = arith.mulf %466, %476 : vector<16x128xf32>
    %478 = arith.addf %475, %477 : vector<16x128xf32>
    %479 = math.tanh %478 : vector<16x128xf32>
    %cst_182 = arith.constant 1.000000e+00 : f32
    %480 = vector.broadcast %cst_182 : f32 to vector<16x128xf32>
    %481 = arith.subf %480, %474 : vector<16x128xf32>
    %482 = arith.mulf %481, %479 : vector<16x128xf32>
    %483 = arith.mulf %474, %322 : vector<16x128xf32>
    %484 = arith.addf %482, %483 : vector<16x128xf32>
    %485 = arith.truncf %484 : vector<16x128xf32> to vector<16x128xbf16>
    %c0_183 = arith.constant 0 : index
    %c0_184 = arith.constant 0 : index
    %486 = vector.load %arg7[%c0_183, %c0_184] : memref<128x384xbf16, #tpu.memory_space<vmem>>, vector<128x384xbf16>
    %cst_185 = arith.constant dense<0.000000e+00> : vector<16x384xf32>
    %487 = tpu.matmul %485, %486, %cst_185 {dimension_numbers = #tpu.dot_dimension_numbers<[1], [0], [0], [1], [0, 0, 1, 1], [], []>} : vector<16x128xbf16>, vector<128x384xbf16>, vector<16x384xf32> -> vector<16x384xf32>
    %c0_186 = arith.constant 0 : index
    %c0_187 = arith.constant 0 : index
    %488 = vector.load %arg9[%c0_186, %c0_187] : memref<1x384xf32, #tpu.memory_space<vmem>>, vector<1x384xf32>
    %489 = vector.broadcast %488 : vector<1x384xf32> to vector<16x384xf32>
    %490 = arith.addf %487, %489 : vector<16x384xf32>
    %491 = arith.truncf %360 : vector<16x128xf32> to vector<16x128xbf16>
    %c0_188 = arith.constant 0 : index
    %c0_189 = arith.constant 0 : index
    %492 = vector.load %arg8[%c0_188, %c0_189] : memref<128x384xbf16, #tpu.memory_space<vmem>>, vector<128x384xbf16>
    %cst_190 = arith.constant dense<0.000000e+00> : vector<16x384xf32>
    %493 = tpu.matmul %491, %492, %cst_190 {dimension_numbers = #tpu.dot_dimension_numbers<[1], [0], [0], [1], [0, 0, 1, 1], [], []>} : vector<16x128xbf16>, vector<128x384xbf16>, vector<16x384xf32> -> vector<16x384xf32>
    %c0_191 = arith.constant 0 : index
    %c0_192 = arith.constant 0 : index
    %494 = vector.load %arg10[%c0_191, %c0_192] : memref<1x384xf32, #tpu.memory_space<vmem>>, vector<1x384xf32>
    %495 = vector.broadcast %494 : vector<1x384xf32> to vector<16x384xf32>
    %496 = arith.addf %493, %495 : vector<16x384xf32>
    %497 = vector.extract_strided_slice %490 {offsets = [0, 0], sizes = [16, 128], strides = [1, 1]} : vector<16x384xf32> to vector<16x128xf32>
    %498 = vector.extract_strided_slice %496 {offsets = [0, 0], sizes = [16, 128], strides = [1, 1]} : vector<16x384xf32> to vector<16x128xf32>
    %499 = arith.addf %497, %498 : vector<16x128xf32>
    %500 = arith.negf %499 : vector<16x128xf32>
    %501 = math.exp %500 : vector<16x128xf32>
    %cst_193 = arith.constant 1.000000e+00 : f32
    %502 = vector.broadcast %cst_193 : f32 to vector<16x128xf32>
    %503 = arith.addf %502, %501 : vector<16x128xf32>
    %504 = arith.divf %502, %503 : vector<16x128xf32>
    %505 = vector.extract_strided_slice %490 {offsets = [0, 128], sizes = [16, 128], strides = [1, 1]} : vector<16x384xf32> to vector<16x128xf32>
    %506 = vector.extract_strided_slice %496 {offsets = [0, 128], sizes = [16, 128], strides = [1, 1]} : vector<16x384xf32> to vector<16x128xf32>
    %507 = arith.addf %505, %506 : vector<16x128xf32>
    %508 = arith.negf %507 : vector<16x128xf32>
    %509 = math.exp %508 : vector<16x128xf32>
    %cst_194 = arith.constant 1.000000e+00 : f32
    %510 = vector.broadcast %cst_194 : f32 to vector<16x128xf32>
    %511 = arith.addf %510, %509 : vector<16x128xf32>
    %512 = arith.divf %510, %511 : vector<16x128xf32>
    %513 = vector.extract_strided_slice %490 {offsets = [0, 256], sizes = [16, 128], strides = [1, 1]} : vector<16x384xf32> to vector<16x128xf32>
    %514 = vector.extract_strided_slice %496 {offsets = [0, 256], sizes = [16, 128], strides = [1, 1]} : vector<16x384xf32> to vector<16x128xf32>
    %515 = arith.mulf %504, %514 : vector<16x128xf32>
    %516 = arith.addf %513, %515 : vector<16x128xf32>
    %517 = math.tanh %516 : vector<16x128xf32>
    %cst_195 = arith.constant 1.000000e+00 : f32
    %518 = vector.broadcast %cst_195 : f32 to vector<16x128xf32>
    %519 = arith.subf %518, %512 : vector<16x128xf32>
    %520 = arith.mulf %519, %517 : vector<16x128xf32>
    %521 = arith.mulf %512, %360 : vector<16x128xf32>
    %522 = arith.addf %520, %521 : vector<16x128xf32>
    %c3_i32_196 = arith.constant 3 : i32
    %c4_i32_197 = arith.constant 4 : i32
    %523 = arith.muli %arg0, %c4_i32_197 : i32
    %524 = arith.addi %523, %c3_i32_196 : i32
    %525 = arith.subi %524, %4 : i32
    %c3_i32_198 = arith.constant 3 : i32
    %526 = arith.minsi %525, %c3_i32_198 : i32
    %527 = arith.index_cast %526 : i32 to index
    %c0_199 = arith.constant 0 : index
    %c0_200 = arith.constant 0 : index
    %528 = vector.load %arg21[%527, %c0_199, %c0_200] : memref<4x16x384xf32, #tpu.memory_space<vmem>>, vector<1x16x384xf32>
    %529 = vector.shape_cast %528 : vector<1x16x384xf32> to vector<16x384xf32>
    %530 = arith.truncf %399 : vector<16x128xf32> to vector<16x128xbf16>
    %c0_201 = arith.constant 0 : index
    %c0_202 = arith.constant 0 : index
    %531 = vector.load %arg12[%c0_201, %c0_202] : memref<128x384xbf16, #tpu.memory_space<vmem>>, vector<128x384xbf16>
    %cst_203 = arith.constant dense<0.000000e+00> : vector<16x384xf32>
    %532 = tpu.matmul %530, %531, %cst_203 {dimension_numbers = #tpu.dot_dimension_numbers<[1], [0], [0], [1], [0, 0, 1, 1], [], []>} : vector<16x128xbf16>, vector<128x384xbf16>, vector<16x384xf32> -> vector<16x384xf32>
    %c0_204 = arith.constant 0 : index
    %c0_205 = arith.constant 0 : index
    %533 = vector.load %arg14[%c0_204, %c0_205] : memref<1x384xf32, #tpu.memory_space<vmem>>, vector<1x384xf32>
    %534 = vector.broadcast %533 : vector<1x384xf32> to vector<16x384xf32>
    %535 = arith.addf %532, %534 : vector<16x384xf32>
    %536 = vector.extract_strided_slice %529 {offsets = [0, 0], sizes = [16, 128], strides = [1, 1]} : vector<16x384xf32> to vector<16x128xf32>
    %537 = vector.extract_strided_slice %535 {offsets = [0, 0], sizes = [16, 128], strides = [1, 1]} : vector<16x384xf32> to vector<16x128xf32>
    %538 = arith.addf %536, %537 : vector<16x128xf32>
    %539 = arith.negf %538 : vector<16x128xf32>
    %540 = math.exp %539 : vector<16x128xf32>
    %cst_206 = arith.constant 1.000000e+00 : f32
    %541 = vector.broadcast %cst_206 : f32 to vector<16x128xf32>
    %542 = arith.addf %541, %540 : vector<16x128xf32>
    %543 = arith.divf %541, %542 : vector<16x128xf32>
    %544 = vector.extract_strided_slice %529 {offsets = [0, 128], sizes = [16, 128], strides = [1, 1]} : vector<16x384xf32> to vector<16x128xf32>
    %545 = vector.extract_strided_slice %535 {offsets = [0, 128], sizes = [16, 128], strides = [1, 1]} : vector<16x384xf32> to vector<16x128xf32>
    %546 = arith.addf %544, %545 : vector<16x128xf32>
    %547 = arith.negf %546 : vector<16x128xf32>
    %548 = math.exp %547 : vector<16x128xf32>
    %cst_207 = arith.constant 1.000000e+00 : f32
    %549 = vector.broadcast %cst_207 : f32 to vector<16x128xf32>
    %550 = arith.addf %549, %548 : vector<16x128xf32>
    %551 = arith.divf %549, %550 : vector<16x128xf32>
    %552 = vector.extract_strided_slice %529 {offsets = [0, 256], sizes = [16, 128], strides = [1, 1]} : vector<16x384xf32> to vector<16x128xf32>
    %553 = vector.extract_strided_slice %535 {offsets = [0, 256], sizes = [16, 128], strides = [1, 1]} : vector<16x384xf32> to vector<16x128xf32>
    %554 = arith.mulf %543, %553 : vector<16x128xf32>
    %555 = arith.addf %552, %554 : vector<16x128xf32>
    %556 = math.tanh %555 : vector<16x128xf32>
    %cst_208 = arith.constant 1.000000e+00 : f32
    %557 = vector.broadcast %cst_208 : f32 to vector<16x128xf32>
    %558 = arith.subf %557, %551 : vector<16x128xf32>
    %559 = arith.mulf %558, %556 : vector<16x128xf32>
    %560 = arith.mulf %551, %399 : vector<16x128xf32>
    %561 = arith.addf %559, %560 : vector<16x128xf32>
    %562 = arith.truncf %561 : vector<16x128xf32> to vector<16x128xbf16>
    %c0_209 = arith.constant 0 : index
    %c0_210 = arith.constant 0 : index
    %563 = vector.load %arg15[%c0_209, %c0_210] : memref<128x384xbf16, #tpu.memory_space<vmem>>, vector<128x384xbf16>
    %cst_211 = arith.constant dense<0.000000e+00> : vector<16x384xf32>
    %564 = tpu.matmul %562, %563, %cst_211 {dimension_numbers = #tpu.dot_dimension_numbers<[1], [0], [0], [1], [0, 0, 1, 1], [], []>} : vector<16x128xbf16>, vector<128x384xbf16>, vector<16x384xf32> -> vector<16x384xf32>
    %c0_212 = arith.constant 0 : index
    %c0_213 = arith.constant 0 : index
    %565 = vector.load %arg17[%c0_212, %c0_213] : memref<1x384xf32, #tpu.memory_space<vmem>>, vector<1x384xf32>
    %566 = vector.broadcast %565 : vector<1x384xf32> to vector<16x384xf32>
    %567 = arith.addf %564, %566 : vector<16x384xf32>
    %568 = arith.truncf %437 : vector<16x128xf32> to vector<16x128xbf16>
    %c0_214 = arith.constant 0 : index
    %c0_215 = arith.constant 0 : index
    %569 = vector.load %arg16[%c0_214, %c0_215] : memref<128x384xbf16, #tpu.memory_space<vmem>>, vector<128x384xbf16>
    %cst_216 = arith.constant dense<0.000000e+00> : vector<16x384xf32>
    %570 = tpu.matmul %568, %569, %cst_216 {dimension_numbers = #tpu.dot_dimension_numbers<[1], [0], [0], [1], [0, 0, 1, 1], [], []>} : vector<16x128xbf16>, vector<128x384xbf16>, vector<16x384xf32> -> vector<16x384xf32>
    %c0_217 = arith.constant 0 : index
    %c0_218 = arith.constant 0 : index
    %571 = vector.load %arg18[%c0_217, %c0_218] : memref<1x384xf32, #tpu.memory_space<vmem>>, vector<1x384xf32>
    %572 = vector.broadcast %571 : vector<1x384xf32> to vector<16x384xf32>
    %573 = arith.addf %570, %572 : vector<16x384xf32>
    %574 = vector.extract_strided_slice %567 {offsets = [0, 0], sizes = [16, 128], strides = [1, 1]} : vector<16x384xf32> to vector<16x128xf32>
    %575 = vector.extract_strided_slice %573 {offsets = [0, 0], sizes = [16, 128], strides = [1, 1]} : vector<16x384xf32> to vector<16x128xf32>
    %576 = arith.addf %574, %575 : vector<16x128xf32>
    %577 = arith.negf %576 : vector<16x128xf32>
    %578 = math.exp %577 : vector<16x128xf32>
    %cst_219 = arith.constant 1.000000e+00 : f32
    %579 = vector.broadcast %cst_219 : f32 to vector<16x128xf32>
    %580 = arith.addf %579, %578 : vector<16x128xf32>
    %581 = arith.divf %579, %580 : vector<16x128xf32>
    %582 = vector.extract_strided_slice %567 {offsets = [0, 128], sizes = [16, 128], strides = [1, 1]} : vector<16x384xf32> to vector<16x128xf32>
    %583 = vector.extract_strided_slice %573 {offsets = [0, 128], sizes = [16, 128], strides = [1, 1]} : vector<16x384xf32> to vector<16x128xf32>
    %584 = arith.addf %582, %583 : vector<16x128xf32>
    %585 = arith.negf %584 : vector<16x128xf32>
    %586 = math.exp %585 : vector<16x128xf32>
    %cst_220 = arith.constant 1.000000e+00 : f32
    %587 = vector.broadcast %cst_220 : f32 to vector<16x128xf32>
    %588 = arith.addf %587, %586 : vector<16x128xf32>
    %589 = arith.divf %587, %588 : vector<16x128xf32>
    %590 = vector.extract_strided_slice %567 {offsets = [0, 256], sizes = [16, 128], strides = [1, 1]} : vector<16x384xf32> to vector<16x128xf32>
    %591 = vector.extract_strided_slice %573 {offsets = [0, 256], sizes = [16, 128], strides = [1, 1]} : vector<16x384xf32> to vector<16x128xf32>
    %592 = arith.mulf %581, %591 : vector<16x128xf32>
    %593 = arith.addf %590, %592 : vector<16x128xf32>
    %594 = math.tanh %593 : vector<16x128xf32>
    %cst_221 = arith.constant 1.000000e+00 : f32
    %595 = vector.broadcast %cst_221 : f32 to vector<16x128xf32>
    %596 = arith.subf %595, %589 : vector<16x128xf32>
    %597 = arith.mulf %596, %594 : vector<16x128xf32>
    %598 = arith.mulf %589, %437 : vector<16x128xf32>
    %599 = arith.addf %597, %598 : vector<16x128xf32>
    %600 = arith.index_cast %c3_i32_196 : i32 to index
    %c0_222 = arith.constant 0 : index
    %c0_223 = arith.constant 0 : index
    %601 = vector.load %arg19[%600, %c0_222, %c0_223] : memref<4x16x128xf32, #tpu.memory_space<vmem>>, vector<1x16x128xf32>
    %602 = vector.shape_cast %601 : vector<1x16x128xf32> to vector<16x128xf32>
    %603 = vector.shape_cast %599 : vector<16x128xf32> to vector<1x16x128xf32>
    tpu.vector_store %arg19[%600, %c0_222, %c0_223], %603 {strides = array<i32>} : memref<4x16x128xf32, #tpu.memory_space<vmem>>, vector<1x16x128xf32>,
    %c3_i32_224 = arith.constant 3 : i32
    %604 = arith.subi %c3_i32_224, %c3_i32_196 : i32
    %605 = arith.index_cast %604 : i32 to index
    %c0_225 = arith.constant 0 : index
    %c0_226 = arith.constant 0 : index
    %606 = vector.load %arg20[%605, %c0_225, %c0_226] : memref<4x16x128xf32, #tpu.memory_space<vmem>>, vector<1x16x128xf32>
    %607 = vector.shape_cast %606 : vector<1x16x128xf32> to vector<16x128xf32>
    %608 = vector.shape_cast %522 : vector<16x128xf32> to vector<1x16x128xf32>
    tpu.vector_store %arg20[%605, %c0_225, %c0_226], %608 {strides = array<i32>} : memref<4x16x128xf32, #tpu.memory_space<vmem>>, vector<1x16x128xf32>,
    %c7_i32_227 = arith.constant 7 : i32
    %609 = arith.subi %c7_i32_227, %524 : i32
    %610 = arith.subi %609, %8 : i32
    %c0_i32_228 = arith.constant 0 : i32
    %611 = arith.maxsi %610, %c0_i32_228 : i32
    %612 = arith.index_cast %611 : i32 to index
    %c0_229 = arith.constant 0 : index
    %c0_230 = arith.constant 0 : index
    %613 = vector.load %arg22[%612, %c0_229, %c0_230] : memref<4x16x384xf32, #tpu.memory_space<vmem>>, vector<1x16x384xf32>
    %614 = vector.shape_cast %613 : vector<1x16x384xf32> to vector<16x384xf32>
    %615 = arith.truncf %484 : vector<16x128xf32> to vector<16x128xbf16>
    %c0_231 = arith.constant 0 : index
    %c0_232 = arith.constant 0 : index
    %616 = vector.load %arg4[%c0_231, %c0_232] : memref<128x384xbf16, #tpu.memory_space<vmem>>, vector<128x384xbf16>
    %cst_233 = arith.constant dense<0.000000e+00> : vector<16x384xf32>
    %617 = tpu.matmul %615, %616, %cst_233 {dimension_numbers = #tpu.dot_dimension_numbers<[1], [0], [0], [1], [0, 0, 1, 1], [], []>} : vector<16x128xbf16>, vector<128x384xbf16>, vector<16x384xf32> -> vector<16x384xf32>
    %c0_234 = arith.constant 0 : index
    %c0_235 = arith.constant 0 : index
    %618 = vector.load %arg6[%c0_234, %c0_235] : memref<1x384xf32, #tpu.memory_space<vmem>>, vector<1x384xf32>
    %619 = vector.broadcast %618 : vector<1x384xf32> to vector<16x384xf32>
    %620 = arith.addf %617, %619 : vector<16x384xf32>
    %621 = vector.extract_strided_slice %614 {offsets = [0, 0], sizes = [16, 128], strides = [1, 1]} : vector<16x384xf32> to vector<16x128xf32>
    %622 = vector.extract_strided_slice %620 {offsets = [0, 0], sizes = [16, 128], strides = [1, 1]} : vector<16x384xf32> to vector<16x128xf32>
    %623 = arith.addf %621, %622 : vector<16x128xf32>
    %624 = arith.negf %623 : vector<16x128xf32>
    %625 = math.exp %624 : vector<16x128xf32>
    %cst_236 = arith.constant 1.000000e+00 : f32
    %626 = vector.broadcast %cst_236 : f32 to vector<16x128xf32>
    %627 = arith.addf %626, %625 : vector<16x128xf32>
    %628 = arith.divf %626, %627 : vector<16x128xf32>
    %629 = vector.extract_strided_slice %614 {offsets = [0, 128], sizes = [16, 128], strides = [1, 1]} : vector<16x384xf32> to vector<16x128xf32>
    %630 = vector.extract_strided_slice %620 {offsets = [0, 128], sizes = [16, 128], strides = [1, 1]} : vector<16x384xf32> to vector<16x128xf32>
    %631 = arith.addf %629, %630 : vector<16x128xf32>
    %632 = arith.negf %631 : vector<16x128xf32>
    %633 = math.exp %632 : vector<16x128xf32>
    %cst_237 = arith.constant 1.000000e+00 : f32
    %634 = vector.broadcast %cst_237 : f32 to vector<16x128xf32>
    %635 = arith.addf %634, %633 : vector<16x128xf32>
    %636 = arith.divf %634, %635 : vector<16x128xf32>
    %637 = vector.extract_strided_slice %614 {offsets = [0, 256], sizes = [16, 128], strides = [1, 1]} : vector<16x384xf32> to vector<16x128xf32>
    %638 = vector.extract_strided_slice %620 {offsets = [0, 256], sizes = [16, 128], strides = [1, 1]} : vector<16x384xf32> to vector<16x128xf32>
    %639 = arith.mulf %628, %638 : vector<16x128xf32>
    %640 = arith.addf %637, %639 : vector<16x128xf32>
    %641 = math.tanh %640 : vector<16x128xf32>
    %cst_238 = arith.constant 1.000000e+00 : f32
    %642 = vector.broadcast %cst_238 : f32 to vector<16x128xf32>
    %643 = arith.subf %642, %636 : vector<16x128xf32>
    %644 = arith.mulf %643, %641 : vector<16x128xf32>
    %645 = arith.mulf %636, %484 : vector<16x128xf32>
    %646 = arith.addf %644, %645 : vector<16x128xf32>
    %647 = arith.truncf %646 : vector<16x128xf32> to vector<16x128xbf16>
    %c0_239 = arith.constant 0 : index
    %c0_240 = arith.constant 0 : index
    %648 = vector.load %arg7[%c0_239, %c0_240] : memref<128x384xbf16, #tpu.memory_space<vmem>>, vector<128x384xbf16>
    %cst_241 = arith.constant dense<0.000000e+00> : vector<16x384xf32>
    %649 = tpu.matmul %647, %648, %cst_241 {dimension_numbers = #tpu.dot_dimension_numbers<[1], [0], [0], [1], [0, 0, 1, 1], [], []>} : vector<16x128xbf16>, vector<128x384xbf16>, vector<16x384xf32> -> vector<16x384xf32>
    %c0_242 = arith.constant 0 : index
    %c0_243 = arith.constant 0 : index
    %650 = vector.load %arg9[%c0_242, %c0_243] : memref<1x384xf32, #tpu.memory_space<vmem>>, vector<1x384xf32>
    %651 = vector.broadcast %650 : vector<1x384xf32> to vector<16x384xf32>
    %652 = arith.addf %649, %651 : vector<16x384xf32>
    %653 = arith.truncf %522 : vector<16x128xf32> to vector<16x128xbf16>
    %c0_244 = arith.constant 0 : index
    %c0_245 = arith.constant 0 : index
    %654 = vector.load %arg8[%c0_244, %c0_245] : memref<128x384xbf16, #tpu.memory_space<vmem>>, vector<128x384xbf16>
    %cst_246 = arith.constant dense<0.000000e+00> : vector<16x384xf32>
    %655 = tpu.matmul %653, %654, %cst_246 {dimension_numbers = #tpu.dot_dimension_numbers<[1], [0], [0], [1], [0, 0, 1, 1], [], []>} : vector<16x128xbf16>, vector<128x384xbf16>, vector<16x384xf32> -> vector<16x384xf32>
    %c0_247 = arith.constant 0 : index
    %c0_248 = arith.constant 0 : index
    %656 = vector.load %arg10[%c0_247, %c0_248] : memref<1x384xf32, #tpu.memory_space<vmem>>, vector<1x384xf32>
    %657 = vector.broadcast %656 : vector<1x384xf32> to vector<16x384xf32>
    %658 = arith.addf %655, %657 : vector<16x384xf32>
    %659 = vector.extract_strided_slice %652 {offsets = [0, 0], sizes = [16, 128], strides = [1, 1]} : vector<16x384xf32> to vector<16x128xf32>
    %660 = vector.extract_strided_slice %658 {offsets = [0, 0], sizes = [16, 128], strides = [1, 1]} : vector<16x384xf32> to vector<16x128xf32>
    %661 = arith.addf %659, %660 : vector<16x128xf32>
    %662 = arith.negf %661 : vector<16x128xf32>
    %663 = math.exp %662 : vector<16x128xf32>
    %cst_249 = arith.constant 1.000000e+00 : f32
    %664 = vector.broadcast %cst_249 : f32 to vector<16x128xf32>
    %665 = arith.addf %664, %663 : vector<16x128xf32>
    %666 = arith.divf %664, %665 : vector<16x128xf32>
    %667 = vector.extract_strided_slice %652 {offsets = [0, 128], sizes = [16, 128], strides = [1, 1]} : vector<16x384xf32> to vector<16x128xf32>
    %668 = vector.extract_strided_slice %658 {offsets = [0, 128], sizes = [16, 128], strides = [1, 1]} : vector<16x384xf32> to vector<16x128xf32>
    %669 = arith.addf %667, %668 : vector<16x128xf32>
    %670 = arith.negf %669 : vector<16x128xf32>
    %671 = math.exp %670 : vector<16x128xf32>
    %cst_250 = arith.constant 1.000000e+00 : f32
    %672 = vector.broadcast %cst_250 : f32 to vector<16x128xf32>
    %673 = arith.addf %672, %671 : vector<16x128xf32>
    %674 = arith.divf %672, %673 : vector<16x128xf32>
    %675 = vector.extract_strided_slice %652 {offsets = [0, 256], sizes = [16, 128], strides = [1, 1]} : vector<16x384xf32> to vector<16x128xf32>
    %676 = vector.extract_strided_slice %658 {offsets = [0, 256], sizes = [16, 128], strides = [1, 1]} : vector<16x384xf32> to vector<16x128xf32>
    %677 = arith.mulf %666, %676 : vector<16x128xf32>
    %678 = arith.addf %675, %677 : vector<16x128xf32>
    %679 = math.tanh %678 : vector<16x128xf32>
    %cst_251 = arith.constant 1.000000e+00 : f32
    %680 = vector.broadcast %cst_251 : f32 to vector<16x128xf32>
    %681 = arith.subf %680, %674 : vector<16x128xf32>
    %682 = arith.mulf %681, %679 : vector<16x128xf32>
    %683 = arith.mulf %674, %522 : vector<16x128xf32>
    %684 = arith.addf %682, %683 : vector<16x128xf32>
    %c4_i32_252 = arith.constant 4 : i32
    %c0_253 = arith.constant 0 : index
    %c0_254 = arith.constant 0 : index
    %c0_255 = arith.constant 0 : index
    %685 = vector.load %arg23[%c0_253, %c0_254, %c0_255] : memref<4x16x128xf32, #tpu.memory_space<vmem>>, vector<1x16x128xf32>
    %686 = vector.shape_cast %685 : vector<1x16x128xf32> to vector<16x128xf32>
    %687 = vector.shape_cast %561 : vector<16x128xf32> to vector<1x16x128xf32>
    tpu.vector_store %arg23[%c0_253, %c0_254, %c0_255], %687 {strides = array<i32>} : memref<4x16x128xf32, #tpu.memory_space<vmem>>, vector<1x16x128xf32>,
    %c1_256 = arith.constant 1 : index
    %c0_257 = arith.constant 0 : index
    %c0_258 = arith.constant 0 : index
    %688 = vector.load %arg23[%c1_256, %c0_257, %c0_258] : memref<4x16x128xf32, #tpu.memory_space<vmem>>, vector<1x16x128xf32>
    %689 = vector.shape_cast %688 : vector<1x16x128xf32> to vector<16x128xf32>
    %690 = vector.shape_cast %599 : vector<16x128xf32> to vector<1x16x128xf32>
    tpu.vector_store %arg23[%c1_256, %c0_257, %c0_258], %690 {strides = array<i32>} : memref<4x16x128xf32, #tpu.memory_space<vmem>>, vector<1x16x128xf32>,
    %c2_259 = arith.constant 2 : index
    %c0_260 = arith.constant 0 : index
    %c0_261 = arith.constant 0 : index
    %691 = vector.load %arg23[%c2_259, %c0_260, %c0_261] : memref<4x16x128xf32, #tpu.memory_space<vmem>>, vector<1x16x128xf32>
    %692 = vector.shape_cast %691 : vector<1x16x128xf32> to vector<16x128xf32>
    %693 = vector.shape_cast %646 : vector<16x128xf32> to vector<1x16x128xf32>
    tpu.vector_store %arg23[%c2_259, %c0_260, %c0_261], %693 {strides = array<i32>} : memref<4x16x128xf32, #tpu.memory_space<vmem>>, vector<1x16x128xf32>,
    %c3_262 = arith.constant 3 : index
    %c0_263 = arith.constant 0 : index
    %c0_264 = arith.constant 0 : index
    %694 = vector.load %arg23[%c3_262, %c0_263, %c0_264] : memref<4x16x128xf32, #tpu.memory_space<vmem>>, vector<1x16x128xf32>
    %695 = vector.shape_cast %694 : vector<1x16x128xf32> to vector<16x128xf32>
    %696 = vector.shape_cast %684 : vector<16x128xf32> to vector<1x16x128xf32>
    tpu.vector_store %arg23[%c3_262, %c0_263, %c0_264], %696 {strides = array<i32>} : memref<4x16x128xf32, #tpu.memory_space<vmem>>, vector<1x16x128xf32>,
    return
  }
  func.func @transform_0(%arg0: i32) -> (i32, i32, i32) {
    %c0_i32 = arith.constant 0 : i32
    %c0_i32_0 = arith.constant 0 : i32
    %c0_i32_1 = arith.constant 0 : i32
    %c0_i32_2 = arith.constant 0 : i32
    return %c0_i32, %c0_i32_0, %c0_i32_1 : i32, i32, i32
  }
  func.func @transform_1(%arg0: i32) -> (i32, i32, i32) {
    %c0_i32 = arith.constant 0 : i32
    %c0_i32_0 = arith.constant 0 : i32
    %c0_i32_1 = arith.constant 0 : i32
    %c0_i32_2 = arith.constant 0 : i32
    return %c0_i32, %c0_i32_0, %c0_i32_1 : i32, i32, i32
  }
  func.func @transform_2(%arg0: i32) -> (i32, i32) {
    %c0_i32 = arith.constant 0 : i32
    %c0_i32_0 = arith.constant 0 : i32
    %c0_i32_1 = arith.constant 0 : i32
    return %c0_i32, %c0_i32_0 : i32, i32
  }
  func.func @transform_3(%arg0: i32) -> (i32, i32) {
    %c0_i32 = arith.constant 0 : i32
    %c0_i32_0 = arith.constant 0 : i32
    %c0_i32_1 = arith.constant 0 : i32
    return %c0_i32, %c0_i32_0 : i32, i32
  }
  func.func @transform_4(%arg0: i32) -> (i32, i32) {
    %c0_i32 = arith.constant 0 : i32
    %c0_i32_0 = arith.constant 0 : i32
    %c0_i32_1 = arith.constant 0 : i32
    return %c0_i32, %c0_i32_0 : i32, i32
  }
  func.func @transform_5(%arg0: i32) -> (i32, i32) {
    %c0_i32 = arith.constant 0 : i32
    %c0_i32_0 = arith.constant 0 : i32
    %c0_i32_1 = arith.constant 0 : i32
    return %c0_i32, %c0_i32_0 : i32, i32
  }
  func.func @transform_6(%arg0: i32) -> (i32, i32) {
    %c0_i32 = arith.constant 0 : i32
    %c0_i32_0 = arith.constant 0 : i32
    %c0_i32_1 = arith.constant 0 : i32
    return %c0_i32, %c0_i32_0 : i32, i32
  }
  func.func @transform_7(%arg0: i32) -> (i32, i32) {
    %c0_i32 = arith.constant 0 : i32
    %c0_i32_0 = arith.constant 0 : i32
    %c0_i32_1 = arith.constant 0 : i32
    return %c0_i32, %c0_i32_0 : i32, i32
  }
  func.func @transform_8(%arg0: i32) -> (i32, i32) {
    %c0_i32 = arith.constant 0 : i32
    %c0_i32_0 = arith.constant 0 : i32
    %c0_i32_1 = arith.constant 0 : i32
    return %c0_i32, %c0_i32_0 : i32, i32
  }
  func.func @transform_9(%arg0: i32) -> (i32, i32) {
    %c0_i32 = arith.constant 0 : i32
    %c0_i32_0 = arith.constant 0 : i32
    %c0_i32_1 = arith.constant 0 : i32
    return %c0_i32, %c0_i32_0 : i32, i32
  }
  func.func @transform_10(%arg0: i32) -> (i32, i32) {
    %c0_i32 = arith.constant 0 : i32
    %c0_i32_0 = arith.constant 0 : i32
    %c0_i32_1 = arith.constant 0 : i32
    return %c0_i32, %c0_i32_0 : i32, i32
  }
  func.func @transform_11(%arg0: i32) -> (i32, i32) {
    %c0_i32 = arith.constant 0 : i32
    %c0_i32_0 = arith.constant 0 : i32
    %c0_i32_1 = arith.constant 0 : i32
    return %c0_i32, %c0_i32_0 : i32, i32
  }
  func.func @transform_12(%arg0: i32) -> (i32, i32) {
    %c0_i32 = arith.constant 0 : i32
    %c0_i32_0 = arith.constant 0 : i32
    %c0_i32_1 = arith.constant 0 : i32
    return %c0_i32, %c0_i32_0 : i32, i32
  }
  func.func @transform_13(%arg0: i32) -> (i32, i32) {
    %c0_i32 = arith.constant 0 : i32
    %c0_i32_0 = arith.constant 0 : i32
    %c0_i32_1 = arith.constant 0 : i32
    return %c0_i32, %c0_i32_0 : i32, i32
  }
  func.func @transform_14(%arg0: i32) -> (i32, i32) {
    %c0_i32 = arith.constant 0 : i32
    %c0_i32_0 = arith.constant 0 : i32
    %c0_i32_1 = arith.constant 0 : i32
    return %c0_i32, %c0_i32_0 : i32, i32
  }
  func.func @transform_15(%arg0: i32) -> (i32, i32) {
    %c0_i32 = arith.constant 0 : i32
    %c0_i32_0 = arith.constant 0 : i32
    %c0_i32_1 = arith.constant 0 : i32
    return %c0_i32, %c0_i32_0 : i32, i32
  }
  func.func @transform_16(%arg0: i32) -> (i32, i32) {
    %c0_i32 = arith.constant 0 : i32
    %c0_i32_0 = arith.constant 0 : i32
    %c0_i32_1 = arith.constant 0 : i32
    return %c0_i32, %c0_i32_0 : i32, i32
  }
  func.func @transform_17(%arg0: i32) -> (i32, i32) {
    %c0_i32 = arith.constant 0 : i32
    %c0_i32_0 = arith.constant 0 : i32
    %c0_i32_1 = arith.constant 0 : i32
    return %c0_i32, %c0_i32_0 : i32, i32
  }
  func.func @transform_18(%arg0: i32) -> (i32, i32, i32) {
    %c0_i32 = arith.constant 0 : i32
    %c0_i32_0 = arith.constant 0 : i32
    %c0_i32_1 = arith.constant 0 : i32
    return %arg0, %c0_i32, %c0_i32_0 : i32, i32, i32
  }
  func.func @transform_19(%arg0: i32) -> (i32, i32, i32) {
    %c1_i32 = arith.constant 1 : i32
    %0 = arith.subi %c1_i32, %arg0 : i32
    %c0_i32 = arith.constant 0 : i32
    %c0_i32_0 = arith.constant 0 : i32
    %c0_i32_1 = arith.constant 0 : i32
    return %0, %c0_i32, %c0_i32_0 : i32, i32, i32
  }
}

module attributes {stable_mosaic.version = 11 : i64} {
  func.func @kernel(%arg0: memref<8x16x128xf32, #tpu.memory_space<vmem>>, %arg1: memref<8x16x128xf32, #tpu.memory_space<vmem>>, %arg2: memref<8x16x4xf32, #tpu.memory_space<vmem>>, %arg3: memref<128x16xbf16, #tpu.memory_space<vmem>>, %arg4: memref<128x16xbf16, #tpu.memory_space<vmem>>, %arg5: memref<1x16xf32, #tpu.memory_space<vmem>>, %arg6: memref<16x4xbf16, #tpu.memory_space<vmem>>, %arg7: memref<1x4xf32, #tpu.memory_space<vmem>>, %arg8: memref<128x16xbf16, #tpu.memory_space<vmem>>, %arg9: memref<128x16xbf16, #tpu.memory_space<vmem>>, %arg10: memref<1x16xf32, #tpu.memory_space<vmem>>, %arg11: memref<16x4xbf16, #tpu.memory_space<vmem>>, %arg12: memref<1x4xf32, #tpu.memory_space<vmem>>, %arg13: memref<128x16xbf16, #tpu.memory_space<vmem>>, %arg14: memref<128x16xbf16, #tpu.memory_space<vmem>>, %arg15: memref<1x16xf32, #tpu.memory_space<vmem>>, %arg16: memref<16x4xbf16, #tpu.memory_space<vmem>>, %arg17: memref<1x4xf32, #tpu.memory_space<vmem>>, %arg18: memref<1x1xf32, #tpu.memory_space<vmem>>) attributes {dimension_semantics = [], scalar_prefetch = 0 : i64, scratch_operands = 0 : i64, tpu.core_type = #tpu.core_type<tc>} {
    %cst = arith.constant 0.000000e+00 : f32
    %0 = vector.broadcast %cst : f32 to vector<16x4xf32>
    %c0 = arith.constant 0 : index
    %c0_0 = arith.constant 0 : index
    %c0_1 = arith.constant 0 : index
    %1 = vector.load %arg0[%c0, %c0_0, %c0_1] : memref<8x16x128xf32, #tpu.memory_space<vmem>>, vector<7x16x128xf32>
    %2 = vector.shape_cast %1 : vector<7x16x128xf32> to vector<112x128xf32>
    %c1 = arith.constant 1 : index
    %c0_2 = arith.constant 0 : index
    %c0_3 = arith.constant 0 : index
    %3 = vector.load %arg1[%c1, %c0_2, %c0_3] : memref<8x16x128xf32, #tpu.memory_space<vmem>>, vector<7x16x128xf32>
    %4 = vector.shape_cast %3 : vector<7x16x128xf32> to vector<112x128xf32>
    %5 = arith.truncf %2 : vector<112x128xf32> to vector<112x128xbf16>
    %c0_4 = arith.constant 0 : index
    %c0_5 = arith.constant 0 : index
    %6 = vector.load %arg3[%c0_4, %c0_5] : memref<128x16xbf16, #tpu.memory_space<vmem>>, vector<128x16xbf16>
    %cst_6 = arith.constant dense<0.000000e+00> : vector<112x16xf32>
    %7 = tpu.matmul %5, %6, %cst_6 {dimension_numbers = #tpu.dot_dimension_numbers<[1], [0], [0], [1], [0, 0, 1, 1], [], []>} : vector<112x128xbf16>, vector<128x16xbf16>, vector<112x16xf32> -> vector<112x16xf32>
    %8 = arith.truncf %4 : vector<112x128xf32> to vector<112x128xbf16>
    %c0_7 = arith.constant 0 : index
    %c0_8 = arith.constant 0 : index
    %9 = vector.load %arg4[%c0_7, %c0_8] : memref<128x16xbf16, #tpu.memory_space<vmem>>, vector<128x16xbf16>
    %cst_9 = arith.constant dense<0.000000e+00> : vector<112x16xf32>
    %10 = tpu.matmul %8, %9, %cst_9 {dimension_numbers = #tpu.dot_dimension_numbers<[1], [0], [0], [1], [0, 0, 1, 1], [], []>} : vector<112x128xbf16>, vector<128x16xbf16>, vector<112x16xf32> -> vector<112x16xf32>
    %11 = arith.addf %7, %10 : vector<112x16xf32>
    %c0_10 = arith.constant 0 : index
    %c0_11 = arith.constant 0 : index
    %12 = vector.load %arg5[%c0_10, %c0_11] : memref<1x16xf32, #tpu.memory_space<vmem>>, vector<1x16xf32>
    %13 = vector.broadcast %12 : vector<1x16xf32> to vector<112x16xf32>
    %14 = arith.addf %11, %13 : vector<112x16xf32>
    %cst_12 = arith.constant 0.000000e+00 : f32
    %15 = vector.broadcast %cst_12 : f32 to vector<112x16xf32>
    %16 = arith.maximumf %14, %15 : vector<112x16xf32>
    %17 = arith.truncf %16 : vector<112x16xf32> to vector<112x16xbf16>
    %c0_13 = arith.constant 0 : index
    %c0_14 = arith.constant 0 : index
    %18 = vector.load %arg6[%c0_13, %c0_14] : memref<16x4xbf16, #tpu.memory_space<vmem>>, vector<16x4xbf16>
    %cst_15 = arith.constant dense<0.000000e+00> : vector<112x4xf32>
    %19 = tpu.matmul %17, %18, %cst_15 {dimension_numbers = #tpu.dot_dimension_numbers<[1], [0], [0], [1], [0, 0, 1, 1], [], []>} : vector<112x16xbf16>, vector<16x4xbf16>, vector<112x4xf32> -> vector<112x4xf32>
    %c0_16 = arith.constant 0 : index
    %c0_17 = arith.constant 0 : index
    %20 = vector.load %arg7[%c0_16, %c0_17] : memref<1x4xf32, #tpu.memory_space<vmem>>, vector<1x4xf32>
    %21 = vector.broadcast %20 : vector<1x4xf32> to vector<112x4xf32>
    %22 = arith.addf %19, %21 : vector<112x4xf32>
    %c1_18 = arith.constant 1 : index
    %c0_19 = arith.constant 0 : index
    %c0_20 = arith.constant 0 : index
    %23 = vector.load %arg2[%c1_18, %c0_19, %c0_20] : memref<8x16x4xf32, #tpu.memory_space<vmem>>, vector<7x16x4xf32>
    %24 = vector.shape_cast %23 : vector<7x16x4xf32> to vector<112x4xf32>
    %25 = arith.subf %22, %24 : vector<112x4xf32>
    %26 = arith.mulf %25, %25 : vector<112x4xf32>
    %27 = vector.shape_cast %26 : vector<112x4xf32> to vector<7x16x4xf32>
    %cst_21 = arith.constant dense<0.000000e+00> : vector<16x4xf32>
    %28 = vector.multi_reduction <add>, %27, %cst_21 [0] : vector<7x16x4xf32> to vector<16x4xf32>
    %29 = arith.addf %0, %28 : vector<16x4xf32>
    %c0_22 = arith.constant 0 : index
    %c0_23 = arith.constant 0 : index
    %c0_24 = arith.constant 0 : index
    %30 = vector.load %arg0[%c0_22, %c0_23, %c0_24] : memref<8x16x128xf32, #tpu.memory_space<vmem>>, vector<5x16x128xf32>
    %31 = vector.shape_cast %30 : vector<5x16x128xf32> to vector<80x128xf32>
    %c3 = arith.constant 3 : index
    %c0_25 = arith.constant 0 : index
    %c0_26 = arith.constant 0 : index
    %32 = vector.load %arg1[%c3, %c0_25, %c0_26] : memref<8x16x128xf32, #tpu.memory_space<vmem>>, vector<5x16x128xf32>
    %33 = vector.shape_cast %32 : vector<5x16x128xf32> to vector<80x128xf32>
    %34 = arith.truncf %31 : vector<80x128xf32> to vector<80x128xbf16>
    %c0_27 = arith.constant 0 : index
    %c0_28 = arith.constant 0 : index
    %35 = vector.load %arg8[%c0_27, %c0_28] : memref<128x16xbf16, #tpu.memory_space<vmem>>, vector<128x16xbf16>
    %cst_29 = arith.constant dense<0.000000e+00> : vector<80x16xf32>
    %36 = tpu.matmul %34, %35, %cst_29 {dimension_numbers = #tpu.dot_dimension_numbers<[1], [0], [0], [1], [0, 0, 1, 1], [], []>} : vector<80x128xbf16>, vector<128x16xbf16>, vector<80x16xf32> -> vector<80x16xf32>
    %37 = arith.truncf %33 : vector<80x128xf32> to vector<80x128xbf16>
    %c0_30 = arith.constant 0 : index
    %c0_31 = arith.constant 0 : index
    %38 = vector.load %arg9[%c0_30, %c0_31] : memref<128x16xbf16, #tpu.memory_space<vmem>>, vector<128x16xbf16>
    %cst_32 = arith.constant dense<0.000000e+00> : vector<80x16xf32>
    %39 = tpu.matmul %37, %38, %cst_32 {dimension_numbers = #tpu.dot_dimension_numbers<[1], [0], [0], [1], [0, 0, 1, 1], [], []>} : vector<80x128xbf16>, vector<128x16xbf16>, vector<80x16xf32> -> vector<80x16xf32>
    %40 = arith.addf %36, %39 : vector<80x16xf32>
    %c0_33 = arith.constant 0 : index
    %c0_34 = arith.constant 0 : index
    %41 = vector.load %arg10[%c0_33, %c0_34] : memref<1x16xf32, #tpu.memory_space<vmem>>, vector<1x16xf32>
    %42 = vector.broadcast %41 : vector<1x16xf32> to vector<80x16xf32>
    %43 = arith.addf %40, %42 : vector<80x16xf32>
    %cst_35 = arith.constant 0.000000e+00 : f32
    %44 = vector.broadcast %cst_35 : f32 to vector<80x16xf32>
    %45 = arith.maximumf %43, %44 : vector<80x16xf32>
    %46 = arith.truncf %45 : vector<80x16xf32> to vector<80x16xbf16>
    %c0_36 = arith.constant 0 : index
    %c0_37 = arith.constant 0 : index
    %47 = vector.load %arg11[%c0_36, %c0_37] : memref<16x4xbf16, #tpu.memory_space<vmem>>, vector<16x4xbf16>
    %cst_38 = arith.constant dense<0.000000e+00> : vector<80x4xf32>
    %48 = tpu.matmul %46, %47, %cst_38 {dimension_numbers = #tpu.dot_dimension_numbers<[1], [0], [0], [1], [0, 0, 1, 1], [], []>} : vector<80x16xbf16>, vector<16x4xbf16>, vector<80x4xf32> -> vector<80x4xf32>
    %c0_39 = arith.constant 0 : index
    %c0_40 = arith.constant 0 : index
    %49 = vector.load %arg12[%c0_39, %c0_40] : memref<1x4xf32, #tpu.memory_space<vmem>>, vector<1x4xf32>
    %50 = vector.broadcast %49 : vector<1x4xf32> to vector<80x4xf32>
    %51 = arith.addf %48, %50 : vector<80x4xf32>
    %c2 = arith.constant 2 : index
    %c0_41 = arith.constant 0 : index
    %c0_42 = arith.constant 0 : index
    %52 = vector.load %arg2[%c2, %c0_41, %c0_42] : memref<8x16x4xf32, #tpu.memory_space<vmem>>, vector<5x16x4xf32>
    %53 = vector.shape_cast %52 : vector<5x16x4xf32> to vector<80x4xf32>
    %54 = arith.subf %51, %53 : vector<80x4xf32>
    %55 = arith.mulf %54, %54 : vector<80x4xf32>
    %56 = vector.shape_cast %55 : vector<80x4xf32> to vector<5x16x4xf32>
    %cst_43 = arith.constant dense<0.000000e+00> : vector<16x4xf32>
    %57 = vector.multi_reduction <add>, %56, %cst_43 [0] : vector<5x16x4xf32> to vector<16x4xf32>
    %58 = arith.addf %29, %57 : vector<16x4xf32>
    %c0_44 = arith.constant 0 : index
    %c0_45 = arith.constant 0 : index
    %c0_46 = arith.constant 0 : index
    %59 = vector.load %arg0[%c0_44, %c0_45, %c0_46] : memref<8x16x128xf32, #tpu.memory_space<vmem>>, vector<1x16x128xf32>
    %60 = vector.shape_cast %59 : vector<1x16x128xf32> to vector<16x128xf32>
    %c7 = arith.constant 7 : index
    %c0_47 = arith.constant 0 : index
    %c0_48 = arith.constant 0 : index
    %61 = vector.load %arg1[%c7, %c0_47, %c0_48] : memref<8x16x128xf32, #tpu.memory_space<vmem>>, vector<1x16x128xf32>
    %62 = vector.shape_cast %61 : vector<1x16x128xf32> to vector<16x128xf32>
    %63 = arith.truncf %60 : vector<16x128xf32> to vector<16x128xbf16>
    %c0_49 = arith.constant 0 : index
    %c0_50 = arith.constant 0 : index
    %64 = vector.load %arg13[%c0_49, %c0_50] : memref<128x16xbf16, #tpu.memory_space<vmem>>, vector<128x16xbf16>
    %cst_51 = arith.constant dense<0.000000e+00> : vector<16x16xf32>
    %65 = tpu.matmul %63, %64, %cst_51 {dimension_numbers = #tpu.dot_dimension_numbers<[1], [0], [0], [1], [0, 0, 1, 1], [], []>} : vector<16x128xbf16>, vector<128x16xbf16>, vector<16x16xf32> -> vector<16x16xf32>
    %66 = arith.truncf %62 : vector<16x128xf32> to vector<16x128xbf16>
    %c0_52 = arith.constant 0 : index
    %c0_53 = arith.constant 0 : index
    %67 = vector.load %arg14[%c0_52, %c0_53] : memref<128x16xbf16, #tpu.memory_space<vmem>>, vector<128x16xbf16>
    %cst_54 = arith.constant dense<0.000000e+00> : vector<16x16xf32>
    %68 = tpu.matmul %66, %67, %cst_54 {dimension_numbers = #tpu.dot_dimension_numbers<[1], [0], [0], [1], [0, 0, 1, 1], [], []>} : vector<16x128xbf16>, vector<128x16xbf16>, vector<16x16xf32> -> vector<16x16xf32>
    %69 = arith.addf %65, %68 : vector<16x16xf32>
    %c0_55 = arith.constant 0 : index
    %c0_56 = arith.constant 0 : index
    %70 = vector.load %arg15[%c0_55, %c0_56] : memref<1x16xf32, #tpu.memory_space<vmem>>, vector<1x16xf32>
    %71 = vector.broadcast %70 : vector<1x16xf32> to vector<16x16xf32>
    %72 = arith.addf %69, %71 : vector<16x16xf32>
    %cst_57 = arith.constant 0.000000e+00 : f32
    %73 = vector.broadcast %cst_57 : f32 to vector<16x16xf32>
    %74 = arith.maximumf %72, %73 : vector<16x16xf32>
    %75 = arith.truncf %74 : vector<16x16xf32> to vector<16x16xbf16>
    %c0_58 = arith.constant 0 : index
    %c0_59 = arith.constant 0 : index
    %76 = vector.load %arg16[%c0_58, %c0_59] : memref<16x4xbf16, #tpu.memory_space<vmem>>, vector<16x4xbf16>
    %cst_60 = arith.constant dense<0.000000e+00> : vector<16x4xf32>
    %77 = tpu.matmul %75, %76, %cst_60 {dimension_numbers = #tpu.dot_dimension_numbers<[1], [0], [0], [1], [0, 0, 1, 1], [], []>} : vector<16x16xbf16>, vector<16x4xbf16>, vector<16x4xf32> -> vector<16x4xf32>
    %c0_61 = arith.constant 0 : index
    %c0_62 = arith.constant 0 : index
    %78 = vector.load %arg17[%c0_61, %c0_62] : memref<1x4xf32, #tpu.memory_space<vmem>>, vector<1x4xf32>
    %79 = vector.broadcast %78 : vector<1x4xf32> to vector<16x4xf32>
    %80 = arith.addf %77, %79 : vector<16x4xf32>
    %c4 = arith.constant 4 : index
    %c0_63 = arith.constant 0 : index
    %c0_64 = arith.constant 0 : index
    %81 = vector.load %arg2[%c4, %c0_63, %c0_64] : memref<8x16x4xf32, #tpu.memory_space<vmem>>, vector<1x16x4xf32>
    %82 = vector.shape_cast %81 : vector<1x16x4xf32> to vector<16x4xf32>
    %83 = arith.subf %80, %82 : vector<16x4xf32>
    %84 = arith.mulf %83, %83 : vector<16x4xf32>
    %85 = vector.shape_cast %84 : vector<16x4xf32> to vector<1x16x4xf32>
    %cst_65 = arith.constant dense<0.000000e+00> : vector<16x4xf32>
    %86 = vector.multi_reduction <add>, %85, %cst_65 [0] : vector<1x16x4xf32> to vector<16x4xf32>
    %87 = arith.addf %58, %86 : vector<16x4xf32>
    %88 = tpu.iota {dimensions = array<i32: 0>} : vector<16x1xi32>
    %c2_i32 = arith.constant 2 : i32
    %89 = vector.broadcast %c2_i32 : i32 to vector<16x1xi32>
    %90 = arith.cmpi slt, %88, %89 : vector<16x1xi32>
    %91 = arith.extui %90 : vector<16x1xi1> to vector<16x1xi32>
    %92 = arith.sitofp %91 : vector<16x1xi32> to vector<16x1xf32>
    %93 = vector.broadcast %92 : vector<16x1xf32> to vector<16x4xf32>
    %94 = arith.mulf %87, %93 : vector<16x4xf32>
    %cst_66 = arith.constant dense<0.000000e+00> : vector<4xf32>
    %95 = vector.multi_reduction <add>, %94, %cst_66 [0] : vector<16x4xf32> to vector<4xf32>
    %96 = vector.shape_cast %95 : vector<4xf32> to vector<1x4xf32>
    %cst_67 = arith.constant dense<0.000000e+00> : vector<1xf32>
    %97 = vector.multi_reduction <add>, %96, %cst_67 [1] : vector<1x4xf32> to vector<1xf32>
    %98 = vector.shape_cast %97 : vector<1xf32> to vector<1x1xf32>
    %cst_68 = arith.constant 6.250000e-02 : f32
    %99 = vector.broadcast %cst_68 : f32 to vector<1x1xf32>
    %100 = arith.mulf %98, %99 : vector<1x1xf32>
    %c0_69 = arith.constant 0 : index
    %c0_70 = arith.constant 0 : index
    %101 = vector.load %arg18[%c0_69, %c0_70] : memref<1x1xf32, #tpu.memory_space<vmem>>, vector<1x1xf32>
    tpu.vector_store %arg18[%c0_69, %c0_70], %100 {strides = array<i32>} : memref<1x1xf32, #tpu.memory_space<vmem>>, vector<1x1xf32>,
    return
  }
}

</mosaic_0001>

<bundles_post_ra>
// kernel: _lambda_.3
= control target key start
LH: loop header
LB: loop body
LE: loop exit
PB: predicated region body
PF: predicated region fallthrough
CT: control target
= control target key end

     0   :  { %s2058_s0 = inlined_call_operand.vmem [shape: f32[8,16,128], index: 0, kind: input, shape index: {}]   ;;  %s2059_s1 = inlined_call_operand.vmem [shape: f32[8,16,128], index: 1, kind: input, shape index: {}]   ;;  %s2060_s2 = inlined_call_operand.vmem [shape: f32[8,16,4], index: 2, kind: input, shape index: {}]   ;;  %s2061_s3 = inlined_call_operand.vmem [shape: bf16[128,16], index: 3, kind: input, shape index: {}]   ;;  %s2062_s4 = inlined_call_operand.vmem [shape: bf16[128,16], index: 4, kind: input, shape index: {}]   ;;  %s2063_s5 = inlined_call_operand.vmem [shape: f32[1,16], index: 5, kind: input, shape index: {}]   ;;  %s2064_s6 = inlined_call_operand.vmem [shape: bf16[16,4], index: 6, kind: input, shape index: {}]   ;;  %s2065_s7 = inlined_call_operand.vmem [shape: f32[1,4], index: 7, kind: input, shape index: {}]   ;;  %s2066_s8 = inlined_call_operand.vmem [shape: bf16[128,16], index: 8, kind: input, shape index: {}]   ;;  %s2067_s9 = inlined_call_operand.vmem [shape: bf16[128,16], index: 9, kind: input, shape index: {}]   ;;  %s2068_s10 = inlined_call_operand.vmem [shape: f32[1,16], index: 10, kind: input, shape index: {}]   ;;  %s2069_s11 = inlined_call_operand.vmem [shape: bf16[16,4], index: 11, kind: input, shape index: {}]   ;;  %s2070_s12 = inlined_call_operand.vmem [shape: f32[1,4], index: 12, kind: input, shape index: {}]   ;;  %s2071_s13 = inlined_call_operand.vmem [shape: bf16[128,16], index: 13, kind: input, shape index: {}]   ;;  %s2072_s14 = inlined_call_operand.vmem [shape: bf16[128,16], index: 14, kind: input, shape index: {}]   ;;  %s2073_s15 = inlined_call_operand.vmem [shape: f32[1,16], index: 15, kind: input, shape index: {}]   ;;  %s2074_s16 = inlined_call_operand.vmem [shape: bf16[16,4], index: 16, kind: input, shape index: {}]   ;;  %s2075_s17 = inlined_call_operand.vmem [shape: f32[1,4], index: 17, kind: input, shape index: {}]   ;;  %s2076_s18 = inlined_call_operand.hbm [shape: f32[1,1], index: 18, kind: output, shape index: {}]  }
   0x1   :  { %2080 = sst [smem:[#allocation5_spill]] %s2058_s0 }
   0x2   :  { %2081 = sst [smem:[#allocation6_spill]] %s2059_s1 }
   0x3   :  { %2082 = sst [smem:[#allocation7_spill]] %s2060_s2 }
   0x4   :  { %v1416_v0 = vld [vmem:[%s2062_s4 + $0x38] sm:$0xff]  ;;  %v1415_v3 = vld [vmem:[%s2062_s4 + $0x30] sm:$0xff]  ;;  %v1414_v6 = vld [vmem:[%s2062_s4 + $0x28] sm:$0xff] }
   0x5   :  { %v1408_v1 = vld [vmem:[%s2061_s3 + $0x38] sm:$0xff]  ;;  %184 = vmatpush.bf16.msra.mxu0 %v1416_v0  ;;  %v1407_v4 = vld [vmem:[%s2061_s3 + $0x30] sm:$0xff]  ;;  %v1406_v7 = vld [vmem:[%s2061_s3 + $0x28] sm:$0xff] }
   0x6   :  { %v1433_v2 = vld [vmem:[%s2067_s9 + $0x38] sm:$0xff]  ;;  %276 = vmatpush.bf16.msra.mxu1 %v1408_v1  ;;  %v1432_v5 = vld [vmem:[%s2067_s9 + $0x30] sm:$0xff]  ;;  %v1431_v8 = vld [vmem:[%s2067_s9 + $0x28] sm:$0xff] }
   0x7   :  { %620 = vmatpush.bf16.msra.mxu3 %v1433_v2  ;;  %v1413_v9 = vld [vmem:[%s2062_s4 + $0x20] sm:$0xff] }
   0x8   :  { %v1405_v10 = vld [vmem:[%s2061_s3 + $0x20] sm:$0xff] }
   0x9   :  { %185 = vmatpush.bf16.msra.mxu0 %v1415_v3  ;;  %v1430_v11 = vld [vmem:[%s2067_s9 + $0x20] sm:$0xff] }
   0xa   :  { %277 = vmatpush.bf16.msra.mxu1 %v1407_v4 }
   0xb   :  { %621 = vmatpush.bf16.msra.mxu3 %v1432_v5 }
   0xd   :  { %186 = vmatpush.bf16.msra.mxu0 %v1414_v6 }
   0xe   :  { %278 = vmatpush.bf16.msra.mxu1 %v1406_v7 }
   0xf   :  { %622 = vmatpush.bf16.msra.mxu3 %v1431_v8 }
  0x10   :  { %23 = vsyncpa [#allocation3], 0  ;;  %v1412_v12 = vld [vmem:[%s2062_s4 + $0x18] sm:$0xff]  ;;  %v1411_v15 = vld [vmem:[%s2062_s4 + $0x10] sm:$0xff]  ;;  %s2083_s30 = sld [smem:[#allocation6_spill]]  ;;  %vm371_vm0 = vcmask 130048  }
  0x11   :  { %187 = vmatpush.bf16.msra.mxu0 %v1413_v9  ;;  %v1404_v13 = vld [vmem:[%s2061_s3 + $0x18] sm:$0xff]  ;;  %v1403_v16 = vld [vmem:[%s2061_s3 + $0x10] sm:$0xff]  ;;  %v1410_v18 = vld [vmem:[%s2062_s4 + $0x8] sm:$0xff]  ;;  %s2084_s21 = sld [smem:[#allocation5_spill]]  ;;  %vm480_vm1 = vcmask 31744   ;;  %vm1113_vm3 = vcmask 0  }
  0x12   :  { %279 = vmatpush.bf16.msra.mxu1 %v1405_v10  ;;  %v1429_v14 = vld [vmem:[%s2067_s9 + $0x18] sm:$0xff]  ;;  %v1428_v17 = vld [vmem:[%s2067_s9 + $0x10] sm:$0xff]  ;;  %v1402_v19 = vld [vmem:[%s2061_s3 + $0x8] sm:$0xff]  ;;  %s2085_s25 = sld [smem:[#allocation7_spill]] }
  0x13   :  { %623 = vmatpush.bf16.msra.mxu3 %v1430_v11  ;;  %v1427_v20 = vld [vmem:[%s2067_s9 + $0x8] sm:$0xff]  ;;  %v1409_v21 = vld [vmem:[%s2062_s4] sm:$0xff]  ;;  %v1425_v30 = vld [vmem:[%s2066_s8 + $0x38] sm:$0xff] }
  0x14   :  { %v1401_v22 = vld [vmem:[%s2061_s3] sm:$0xff]  ;;  %v1424_v34 = vld [vmem:[%s2066_s8 + $0x30] sm:$0xff]  ;;  %v1423_v35 = vld [vmem:[%s2066_s8 + $0x28] sm:$0xff] }
  0x15   :  { %188 = vmatpush.bf16.msra.mxu0 %v1412_v12  ;;  %v1426_v27 = vld [vmem:[%s2067_s9] sm:$0xff]  ;;  %v1421_v52 = vld [vmem:[%s2066_s8 + $0x18] sm:$0xff]  ;;  %v1420_v54 = vld [vmem:[%s2066_s8 + $0x10] sm:$0xff] }
  0x16   :  { %280 = vmatpush.bf16.msra.mxu1 %v1404_v13  ;;  %v1131_v23 = vld [vmem:[%s2083_s30 + $0x10] sm:$0xff]  ;;  %v1132_v24 = vld [vmem:[%s2083_s30 + $0x18] sm:$0xff]  ;;  %v1133_v36 = vld [vmem:[%s2083_s30 + $0x20] sm:$0xff] }
  0x17   :  { %624 = vmatpush.bf16.msra.mxu3 %v1429_v14  ;;  %v61_v25 = vld [vmem:[%s2084_s21] sm:$0xff]  ;;  %v62_v26 = vld [vmem:[%s2084_s21 + $0x8] sm:$0xff]  ;;  %v1234_v28 = vld [vmem:[%s2083_s30 + $0x30] sm:$0xff]  ;;  %v113_v31 = vpack.c.bf16 %v1132_v24, %v1131_v23 }
  0x18   :  { %v1235_v29 = vld [vmem:[%s2083_s30 + $0x38] sm:$0xff]  ;;  %v1676_v32 = vpack.c.bf16 %v62_v26, %v61_v25  ;;  %v1134_v37 = vld [vmem:[%s2083_s30 + $0x28] sm:$0xff]  ;;  %v63_v38 = vld [vmem:[%s2084_s21 + $0x10] sm:$0xff] }
  0x19   :  { %189 = vmatpush.bf16.msra.mxu0 %v1411_v15  ;;  %v551_v33 = vpack.c.bf16 %v1235_v29, %v1234_v28  ;;  %v64_v39 = vld [vmem:[%s2084_s21 + $0x18] sm:$0xff]  ;;  %v1236_v40 = vld [vmem:[%s2083_s30 + $0x40] sm:$0xff]  ;;  %v1237_v41 = vld [vmem:[%s2083_s30 + $0x48] sm:$0xff]  ;;  %v114_v42 = vpack.c.bf16 %v1134_v37, %v1133_v36 }
  0x1a   :  { %281 = vmatpush.bf16.msra.mxu1 %v1403_v16  ;;  %v1703_v43 = vpack.c.bf16 %v64_v39, %v63_v38  ;;  %v552_v44 = vpack.c.bf16 %v1237_v41, %v1236_v40  ;;  %v1422_v45 = vld [vmem:[%s2066_s8 + $0x20] sm:$0xff]  ;;  %v66_v47 = vld [vmem:[%s2084_s21 + $0x28] sm:$0xff]  ;;  %v1238_v48 = vld [vmem:[%s2083_s30 + $0x50] sm:$0xff] }
  0x1b   :  { %625 = vmatpush.bf16.msra.mxu3 %v1428_v17  ;;  %v65_v46 = vld [vmem:[%s2084_s21 + $0x20] sm:$0xff]  ;;  %v1239_v49 = vld [vmem:[%s2083_s30 + $0x58] sm:$0xff]  ;;  %v1419_v56 = vld [vmem:[%s2066_s8 + $0x8] sm:$0xff] }
  0x1c   :  { %v1721_v50 = vpack.c.bf16 %v66_v47, %v65_v46  ;;  %v553_v51 = vpack.c.bf16 %v1239_v49, %v1238_v48  ;;  %v1450_v53 = vld [vmem:[%s2072_s14 + $0x38] sm:$0xff]  ;;  %v67_v57 = vld [vmem:[%s2084_s21 + $0x30] sm:$0xff]  ;;  %v1240_v59 = vld [vmem:[%s2083_s30 + $0x60] sm:$0xff] }
  0x1d   :  { %190 = vmatpush.bf16.msra.mxu0 %v1410_v18  ;;  %v1442_v55 = vld [vmem:[%s2071_s13 + $0x38] sm:$0xff]  ;;  %v1241_v60 = vld [vmem:[%s2083_s30 + $0x68] sm:$0xff]  ;;  %v1418_v61 = vld [vmem:[%s2066_s8] sm:$0xff] }
  0x1e   :  { %282 = vmatpush.bf16.msra.mxu1 %v1402_v19  ;;  %v68_v58 = vld [vmem:[%s2084_s21 + $0x38] sm:$0xff]  ;;  %v554_v63 = vpack.c.bf16 %v1241_v60, %v1240_v59  ;;  %v1449_v0 = vld [vmem:[%s2072_s14 + $0x30] sm:$0xff]  ;;  %v69_v2 = vld [vmem:[%s2084_s21 + $0x40] sm:$0xff] }
  0x1f   :  { %626 = vmatpush.bf16.msra.mxu3 %v1427_v20  ;;  %v93_v62 = vpack.c.bf16 %v68_v58, %v67_v57  ;;  %v1441_v1 = vld [vmem:[%s2071_s13 + $0x30] sm:$0xff]  ;;  %v70_v3 = vld [vmem:[%s2084_s21 + $0x48] sm:$0xff]  ;;  %v1243_v5 = vld [vmem:[%s2083_s30 + $0x78] sm:$0xff] }
  0x20   :  { %v1242_v4 = vld [vmem:[%s2083_s30 + $0x70] sm:$0xff]  ;;  %v1772_v6 = vpack.c.bf16 %v70_v3, %v69_v2  ;;  %v1448_v8 = vld [vmem:[%s2072_s14 + $0x28] sm:$0xff]  ;;  %v72_v11 = vld [vmem:[%s2084_s21 + $0x58] sm:$0xff]  ;;  %s1122_s30 = sshll.u32 %s2076_s18, 4  ;;  %s1123_s30 = int_to_ptr.hbm [resolvable:$true] %s1122_s30 }
  0x21   :  { %191 = vmatpush.bf16.msra.mxu0 %v1409_v21  ;;  %v555_v7 = vpack.c.bf16 %v1243_v5, %v1242_v4  ;;  %v1440_v9 = vld [vmem:[%s2071_s13 + $0x28] sm:$0xff]  ;;  %v71_v10 = vld [vmem:[%s2084_s21 + $0x50] sm:$0xff]  ;;  %v1447_v13 = vld [vmem:[%s2072_s14 + $0x20] sm:$0xff] }
  0x22   :  { %283 = vmatpush.bf16.msra.mxu1 %v1401_v22  ;;  %v95_v12 = vpack.c.bf16 %v72_v11, %v71_v10  ;;  %v1439_v14 = vld [vmem:[%s2071_s13 + $0x20] sm:$0xff]  ;;  %v74_v16 = vld [vmem:[%s2084_s21 + $0x68] sm:$0xff]  ;;  %v1446_v18 = vld [vmem:[%s2072_s14 + $0x18] sm:$0xff] }
  0x23   :  { %627 = vmatpush.bf16.msra.mxu3 %v1426_v27  ;;  %v73_v15 = vld [vmem:[%s2084_s21 + $0x60] sm:$0xff]  ;;  %v1438_v19 = vld [vmem:[%s2071_s13 + $0x18] sm:$0xff]  ;;  %v1445_v22 = vld [vmem:[%s2072_s14 + $0x10] sm:$0xff] }
  0x24   :  { %192 = vmatmul.bf16.vlgmr.msra.gmra.mxu0 %v113_v31  ;;  %v96_v17 = vpack.c.bf16 %v74_v16, %v73_v15  ;;  %v1417_v20 = vld [vmem:[%s2064_s6] sm:$0xff]  ;;  %v1437_v23 = vld [vmem:[%s2071_s13 + $0x10] sm:$0xff]  ;;  %v1444_v28 = vld [vmem:[%s2072_s14 + $0x8] sm:$0xff] }
  0x25   :  { %284 = vmatmul.bf16.vlgmr.msra.gmra.mxu1 %v1676_v32  ;;  %964 = vmatpush.bf16.msrb.mxu0 %v1450_v53  ;;  %v1434_v21 = vld [vmem:[%s2069_s11] sm:$0xff]  ;;  %v1436_v29 = vld [vmem:[%s2071_s13 + $0x8] sm:$0xff] }
  0x26   :  { %628 = vmatmul.bf16.vlgmr.msra.gmra.mxu3 %v551_v33  ;;  %1026 = vmatpush.bf16.msrb.mxu1 %v1442_v55  ;;  %v1823_v27 = vld [vmem:[%s2063_s5] ss:$0 sm:$0xff] }
  0x27   :  { %702 = vmatpush.bf16.msrb.mxu3 %v1425_v30  ;;  %400 = vmatpush.bf16.msra.mxu2 %v1417_v20  ;;  %v1443_v36 = vld [vmem:[%s2072_s14] sm:$0xff] }
  0x28   :  { %v1435_v37 = vld [vmem:[%s2071_s13] sm:$0xff] }
  0x29   :  { %965 = vmatpush.bf16.msrb.mxu0 %v1449_v0 }
  0x2a   :  { %1027 = vmatpush.bf16.msrb.mxu1 %v1441_v1 }
  0x2b   :  { %703 = vmatpush.bf16.msrb.mxu3 %v1424_v34  ;;  %799 = vmatpush.bf16.msrb.mxu2 %v1434_v21 }
  0x2d   :  { %966 = vmatpush.bf16.msrb.mxu0 %v1448_v8 }
  0x2e   :  { %1028 = vmatpush.bf16.msrb.mxu1 %v1440_v9 }
  0x2f   :  { %704 = vmatpush.bf16.msrb.mxu3 %v1423_v35 }
  0x31   :  { %967 = vmatpush.bf16.msrb.mxu0 %v1447_v13 }
  0x32   :  { %1029 = vmatpush.bf16.msrb.mxu1 %v1439_v14 }
  0x33   :  { %705 = vmatpush.bf16.msrb.mxu3 %v1422_v45 }
  0x34   :  { %197 = vmatmul.bf16.gmra.mxu0 %v114_v42 }
  0x35   :  { %289 = vmatmul.bf16.gmra.mxu1 %v1703_v43  ;;  %968 = vmatpush.bf16.msrb.mxu0 %v1446_v18 }
  0x36   :  { %633 = vmatmul.bf16.gmra.mxu3 %v552_v44  ;;  %1030 = vmatpush.bf16.msrb.mxu1 %v1438_v19 }
  0x37   :  { %706 = vmatpush.bf16.msrb.mxu3 %v1421_v52 }
  0x39   :  { %969 = vmatpush.bf16.msrb.mxu0 %v1445_v22 }
  0x3a   :  { %1031 = vmatpush.bf16.msrb.mxu1 %v1437_v23 }
  0x3b   :  { %707 = vmatpush.bf16.msrb.mxu3 %v1420_v54 }
  0x3d   :  { %970 = vmatpush.bf16.msrb.mxu0 %v1444_v28 }
  0x3e   :  { %1032 = vmatpush.bf16.msrb.mxu1 %v1436_v29 }
  0x3f   :  { %708 = vmatpush.bf16.msrb.mxu3 %v1419_v56 }
  0x41   :  { %971 = vmatpush.bf16.msrb.mxu0 %v1443_v36 }
  0x42   :  { %1033 = vmatpush.bf16.msrb.mxu1 %v1435_v37 }
  0x43   :  { %709 = vmatpush.bf16.msrb.mxu3 %v1418_v61 }
  0x44   :  { %202 = vmatmul.bf16.gmra.mxu0 %v551_v33 }
  0x45   :  { %294 = vmatmul.bf16.gmra.mxu1 %v1721_v50 }
  0x46   :  { %638 = vmatmul.bf16.gmra.mxu3 %v553_v51 }
  0x54   :  { %207 = vmatmul.bf16.gmra.mxu0 %v552_v44 }
  0x55   :  { %299 = vmatmul.bf16.gmra.mxu1 %v93_v62 }
  0x56   :  { %643 = vmatmul.bf16.gmra.mxu3 %v554_v63 }
  0x64   :  { %212 = vmatmul.bf16.gmra.mxu0 %v553_v51 }
  0x65   :  { %304 = vmatmul.bf16.gmra.mxu1 %v1772_v6 }
  0x66   :  { %648 = vmatmul.bf16.gmra.mxu3 %v555_v7 }
  0x74   :  { %217 = vmatmul.bf16.gmra.mxu0 %v554_v63 }
  0x75   :  { %309 = vmatmul.bf16.gmra.mxu1 %v95_v12 }
  0x76   :  { %710 = vmatmul.bf16.vlgmr.msrb.gmra.mxu3 %v1676_v32 }
  0x84   :  { %222 = vmatmul.bf16.gmra.mxu0 %v555_v7 }
  0x85   :  { %314 = vmatmul.bf16.gmra.mxu1 %v96_v17 }
  0x86   :  { %715 = vmatmul.bf16.gmra.mxu3 %v1703_v43 }
  0x94   :  { %972 = vmatmul.bf16.vlgmr.msrb.gmra.mxu0 %v555_v7 }
  0x95   :  { %1034 = vmatmul.bf16.vlgmr.msrb.gmra.mxu1 %v1676_v32 }
  0x96   :  { %720 = vmatmul.bf16.gmra.mxu3 %v1721_v50 }
  0xa1   :  { %v193_v24 = vpop.f32.mrf.mxu0 }
  0xa2   :  { %v285_v25 = vpop.f32.mrf.mxu1 }
  0xa3   :  { %v286_v26 = vadd.f32 %v285_v25, %v193_v24 }
  0xa5   :  { %v324_v34 = vadd.f32 %v1823_v27, %v286_v26 }
  0xa6   :  { %725 = vmatmul.bf16.gmra.mxu3 %v93_v62 }
  0xa7   :  { %v338_v39 = vmax.f32 %v324_v34, 0.0 }
  0xa9   :  { %v1831_v30 = vpop.f32.mrf.mxu3  ;;  %v195_v31 = vpop.f32.mrf.mxu0 }
  0xaa   :  { %v287_v33 = vpop.f32.mrf.mxu1 }
  0xab   :  { %v288_v35 = vadd.f32 %v287_v33, %v195_v31 }
  0xad   :  { %v325_v38 = vadd.f32 %v1823_v27, %v288_v35 }
  0xaf   :  { %v339_v40 = vmax.f32 %v325_v38, 0.0 }
  0xb1   :  { %v1841_v41 = vpop.f32.mrf.mxu3  ;;  %v352_v42 = vpack.c.bf16 %v339_v40, %v338_v39  ;;  %v198_v43 = vpop.f32.mrf.mxu0 }
  0xb2   :  { %v290_v44 = vpop.f32.mrf.mxu1 }
  0xb3   :  { %1213 = vmatmul.msk.bf16.vlgmr.msra.gmra.mxu2 %vm371_vm0, %v352_v42  ;;  %v291_v45 = vadd.f32 %v290_v44, %v198_v43 }
  0xb5   :  { %v326_v49 = vadd.f32 %v1823_v27, %v291_v45 }
  0xb6   :  { %730 = vmatmul.bf16.gmra.mxu3 %v1772_v6 }
  0xb7   :  { %v340_v52 = vmax.f32 %v326_v49, 0.0 }
  0xb9   :  { %v1846_v46 = vpop.f32.mrf.mxu3  ;;  %v200_v47 = vpop.f32.mrf.mxu0 }
  0xba   :  { %v292_v48 = vpop.f32.mrf.mxu1 }
  0xbb   :  { %v293_v50 = vadd.f32 %v292_v48, %v200_v47 }
  0xbd   :  { %v327_v51 = vadd.f32 %v1823_v27, %v293_v50 }
  0xbf   :  { %v341_v53 = vmax.f32 %v327_v51, 0.0 }
  0xc1   :  { %v1850_v54 = vpop.f32.mrf.mxu3  ;;  %v353_v32 = vpack.c.bf16 %v341_v53, %v340_v52  ;;  %v203_v55 = vpop.f32.mrf.mxu0 }
  0xc2   :  { %v295_v56 = vpop.f32.mrf.mxu1 }
  0xc3   :  { %1214 = vmatmul.msk.bf16.gmra.mxu2 %vm371_vm0, %v353_v32  ;;  %v296_v57 = vadd.f32 %v295_v56, %v203_v55 }
  0xc5   :  { %v328_v61 = vadd.f32 %v1823_v27, %v296_v57 }
  0xc7   :  { %v342_v0 = vmax.f32 %v328_v61, 0.0 }
  0xc9   :  { %v1853_v58 = vpop.f32.mrf.mxu3  ;;  %v205_v59 = vpop.f32.mrf.mxu0 }
  0xca   :  { %v297_v60 = vpop.f32.mrf.mxu1 }
  0xcb   :  { %v298_v62 = vadd.f32 %v297_v60, %v205_v59 }
  0xcd   :  { %v329_v63 = vadd.f32 %v1823_v27, %v298_v62 }
  0xcf   :  { %v343_v1 = vmax.f32 %v329_v63, 0.0 }
  0xd1   :  { %v1857_v2 = vpop.f32.mrf.mxu3  ;;  %v354_v3 = vpack.c.bf16 %v343_v1, %v342_v0  ;;  %v208_v4 = vpop.f32.mrf.mxu0  ;;  %v1885_v0 = vld [vmem:[%s2068_s10] ss:$0 sm:$0xff] }
  0xd2   :  { %v300_v5 = vpop.f32.mrf.mxu1 }
  0xd3   :  { %1215 = vmatmul.msk.bf16.gmra.mxu2 %vm371_vm0, %v354_v3  ;;  %v301_v6 = vadd.f32 %v300_v5, %v208_v4 }
  0xd5   :  { %v330_v10 = vadd.f32 %v1823_v27, %v301_v6 }
  0xd7   :  { %v344_v13 = vmax.f32 %v330_v10, 0.0 }
  0xd9   :  { %v1860_v7 = vpop.f32.mrf.mxu3  ;;  %v210_v8 = vpop.f32.mrf.mxu0 }
  0xda   :  { %v302_v9 = vpop.f32.mrf.mxu1 }
  0xdb   :  { %v303_v11 = vadd.f32 %v302_v9, %v210_v8 }
  0xdd   :  { %v331_v12 = vadd.f32 %v1823_v27, %v303_v11 }
  0xdf   :  { %v345_v14 = vmax.f32 %v331_v12, 0.0 }
  0xe1   :  { %v1864_v15 = vpop.f32.mrf.mxu3  ;;  %v355_v16 = vpack.c.bf16 %v345_v14, %v344_v13  ;;  %v213_v17 = vpop.f32.mrf.mxu0 }
  0xe2   :  { %v305_v18 = vpop.f32.mrf.mxu1 }
  0xe3   :  { %1216 = vmatmul.msk.bf16.gmra.mxu2 %vm371_vm0, %v355_v16  ;;  %v306_v19 = vadd.f32 %v305_v18, %v213_v17  ;;  %v1457_v18 = vld [vmem:[%s2073_s15] ss:$0 sm:$0xff] }
  0xe5   :  { %v332_v23 = vadd.f32 %v1823_v27, %v306_v19 }
  0xe7   :  { %v346_v26 = vmax.f32 %v332_v23, 0.0 }
  0xe9   :  { %v1867_v20 = vpop.f32.mrf.mxu3  ;;  %v215_v21 = vpop.f32.mrf.mxu0 }
  0xea   :  { %v307_v22 = vpop.f32.mrf.mxu1 }
  0xeb   :  { %v308_v24 = vadd.f32 %v307_v22, %v215_v21 }
  0xed   :  { %v333_v25 = vadd.f32 %v1823_v27, %v308_v24 }
  0xef   :  { %v347_v28 = vmax.f32 %v333_v25, 0.0 }
  0xf1   :  { %v1871_v29 = vpop.f32.mrf.mxu3  ;;  %v356_v31 = vpack.c.bf16 %v347_v28, %v346_v26  ;;  %v218_v33 = vpop.f32.mrf.mxu0 }
  0xf2   :  { %v310_v34 = vpop.f32.mrf.mxu1 }
  0xf3   :  { %1217 = vmatmul.msk.bf16.gmra.mxu2 %vm371_vm0, %v356_v31  ;;  %v311_v35 = vadd.f32 %v310_v34, %v218_v33  ;;  %v1451_v33 = vld [vmem:[%s2074_s16] sm:$0xff] }
  0xf4   :  { %1071 = vmatpush.bf16.msra.mxu0 %v1451_v33 }
  0xf5   :  { %v334_v39 = vadd.f32 %v1823_v27, %v311_v35 }
  0xf7   :  { %v348_v43 = vmax.f32 %v334_v39, 0.0 }
  0xf9   :  { %v711_v36 = vpop.f32.mrf.mxu3  ;;  %v220_v37 = vpop.f32.mrf.mxu0 }
  0xfa   :  { %v312_v38 = vpop.f32.mrf.mxu1  ;;  %v712_v63 = vadd.f32 %v711_v36, %v1831_v30  ;;  %v1908_v36 = vld [vmem:[%s2065_s7] ss:$0 sm:$0xff] }
  0xfb   :  { %v313_v40 = vadd.f32 %v312_v38, %v220_v37 }
  0xfc   :  { %v740_v3 = vadd.f32 %v1885_v0, %v712_v63 }
  0xfd   :  { %v335_v42 = vadd.f32 %v1823_v27, %v313_v40 }
  0xfe   :  { %v750_v4 = vmax.f32 %v740_v3, 0.0 }
  0xff   :  { %v349_v44 = vmax.f32 %v335_v42, 0.0 }
 0x101   :  { %v713_v45 = vpop.f32.mrf.mxu3  ;;  %v357_v47 = vpack.c.bf16 %v349_v44, %v348_v43  ;;  %v223_v48 = vpop.f32.mrf.mxu0  ;;  %v1220_v43 = vld [vmem:[%s2085_s25 + $0x10] sm:$0xff] }
 0x102   :  { %v315_v49 = vpop.f32.mrf.mxu1  ;;  %v714_v61 = vadd.f32 %v713_v45, %v1841_v41 }
 0x103   :  { %1218 = vmatmul.msk.bf16.gmra.mxu2 %vm371_vm0, %v357_v47  ;;  %v316_v50 = vadd.f32 %v315_v49, %v223_v48  ;;  %v1920_v48 = vld [vmem:[%s2085_s25 + $0x20] sm:$0xff] }
 0x104   :  { %v741_v1 = vadd.f32 %v1885_v0, %v714_v61 }
 0x105   :  { %v336_v53 = vadd.f32 %v1823_v27, %v316_v50 }
 0x107   :  { %v350_v57 = vmax.f32 %v336_v53, 0.0 }
 0x109   :  { %v225_v51 = vpop.f32.mrf.mxu0  ;;  %v716_v55 = vpop.f32.mrf.mxu3 }
 0x10a   :  { %v317_v52 = vpop.f32.mrf.mxu1  ;;  %v717_v8 = vadd.f32 %v716_v55, %v1846_v46 }
 0x10b   :  { %v318_v32 = vadd.f32 %v317_v52, %v225_v51 }
 0x10c   :  { %v742_v10 = vadd.f32 %v1885_v0, %v717_v8 }
 0x10d   :  { %v337_v56 = vadd.f32 %v1823_v27, %v318_v32  ;;  %v751_v27 = vmax.f32 %v741_v1, 0.0  ;;  %v1936_v1 = vld [vmem:[%s2085_s25 + $0x28] sm:$0xff] }
 0x10e   :  { %v752_v14 = vmax.f32 %v742_v10, 0.0 }
 0x10f   :  { %v351_v59 = vmax.f32 %v337_v56, 0.0  ;;  %v760_v6 = vpack.c.bf16 %v751_v27, %v750_v4 }
 0x111   :  { %v358_v60 = vpack.c.bf16 %v351_v59, %v350_v57  ;;  %v718_v62 = vpop.f32.mrf.mxu3  ;;  %v973_v12 = vpop.f32.mrf.mxu0 }
 0x112   :  { %v719_v41 = vadd.f32 %v718_v62, %v1850_v54  ;;  %v1035_v13 = vpop.f32.mrf.mxu1 }
 0x113   :  { %1219 = vmatmul.msk.bf16.gmra.mxu2 %vm371_vm0, %v358_v60  ;;  %v1036_v17 = vadd.f32 %v1035_v13, %v973_v12  ;;  %v1947_v13 = vld [vmem:[%s2085_s25 + $0x30] sm:$0xff] }
 0x114   :  { %v743_v30 = vadd.f32 %v1885_v0, %v719_v41 }
 0x115   :  { %v1044_v21 = vadd.f32 %v1457_v18, %v1036_v17 }
 0x116   :  { %v753_v11 = vmax.f32 %v743_v30, 0.0 }
 0x117   :  { %v1046_v28 = vmax.f32 %v1044_v21, 0.0 }
 0x118   :  { %v761_v16 = vpack.c.bf16 %v753_v11, %v752_v14 }
 0x119   :  { %v721_v5 = vpop.f32.mrf.mxu3  ;;  %v975_v22 = vpop.f32.mrf.mxu0 }
 0x11a   :  { %v722_v23 = vadd.f32 %v721_v5, %v1853_v58  ;;  %v1037_v24 = vpop.f32.mrf.mxu1 }
 0x11b   :  { %v1038_v25 = vadd.f32 %v1037_v24, %v975_v22 }
 0x11c   :  { %v744_v34 = vadd.f32 %v1885_v0, %v722_v23  ;;  %v1958_v23 = vld [vmem:[%s2085_s25 + $0x38] sm:$0xff] }
 0x11d   :  { %v1045_v31 = vadd.f32 %v1457_v18, %v1038_v25 }
 0x11e   :  { %v754_v39 = vmax.f32 %v744_v34, 0.0  ;;  %v1967_v34 = vld [vmem:[%s2085_s25 + $0x40] sm:$0xff] }
 0x11f   :  { %v1047_v35 = vmax.f32 %v1045_v31, 0.0 }
 0x121   :  { %v723_v9 = vpop.f32.mrf.mxu3  ;;  %v1048_v38 = vpack.c.bf16 %v1047_v35, %v1046_v28 }
 0x122   :  { %v724_v46 = vadd.f32 %v723_v9, %v1857_v2 }
 0x123   :  { %1312 = vmatmul.msk.bf16.vlgmr.msrb.gmra.mxu2 %vm371_vm0, %v760_v6  ;;  %1397 = vmatmul.msk.bf16.vlgmr.msra.gmra.mxu0 %vm371_vm0, %v1048_v38 }
 0x124   :  { %v745_v26 = vadd.f32 %v1885_v0, %v724_v46 }
 0x126   :  { %v755_v2 = vmax.f32 %v745_v26, 0.0 }
 0x128   :  { %v762_v42 = vpack.c.bf16 %v755_v2, %v754_v39 }
 0x129   :  { %v726_v54 = vpop.f32.mrf.mxu3 }
 0x12a   :  { %v727_v49 = vadd.f32 %v726_v54, %v1860_v7 }
 0x12c   :  { %v746_v56 = vadd.f32 %v1885_v0, %v727_v49 }
 0x12e   :  { %v756_v3 = vmax.f32 %v746_v56, 0.0  ;;  %v1988_v56 = vld [vmem:[%s2085_s25 + $0x58] sm:$0xff] }
 0x131   :  { %v728_v58 = vpop.f32.mrf.mxu3 }
 0x132   :  { %v729_v44 = vadd.f32 %v728_v58, %v1864_v15  ;;  %v1221_v15 = vld [vmem:[%s2085_s25 + $0x18] sm:$0xff] }
 0x133   :  { %1313 = vmatmul.msk.bf16.gmra.mxu2 %vm371_vm0, %v761_v16 }
 0x134   :  { %v747_v52 = vadd.f32 %v1885_v0, %v729_v44 }
 0x136   :  { %v402_v19 = vpop.f32.mrf.mxu2  ;;  %v757_v59 = vmax.f32 %v747_v52, 0.0 }
 0x137   :  { %v403_v40 = vadd.f32 %v1908_v36, %v402_v19 }
 0x138   :  { %v763_v6 = vpack.c.bf16 %v757_v59, %v756_v3 }
 0x139   :  { %v452_v45 = vsub.f32 %v403_v40, %v1220_v43  ;;  %v731_v51 = vpop.f32.mrf.mxu3  ;;  %v1975_v40 = vld [vmem:[%s2085_s25 + $0x48] sm:$0xff] }
 0x13a   :  { %v732_v14 = vadd.f32 %v731_v51, %v1867_v20 }
 0x13b   :  { %v466_v53 = vmul.f32 %v452_v45, %v452_v45 }
 0x13c   :  { %v748_v54 = vadd.f32 %v1885_v0, %v732_v14 }
 0x13d   :  { %v481_v7 = vsel %vm480_vm1, %v466_v53, 0.0 }
 0x13e   :  { %v404_v37 = vpop.f32.mrf.mxu2  ;;  %v758_v20 = vmax.f32 %v748_v54, 0.0 }
 0x13f   :  { %v405_v32 = vadd.f32 %v1908_v36, %v404_v37 }
 0x141   :  { %v453_v60 = vsub.f32 %v405_v32, %v1221_v15  ;;  %v733_v41 = vpop.f32.mrf.mxu3 }
 0x142   :  { %v734_v9 = vadd.f32 %v733_v41, %v1871_v29 }
 0x143   :  { %1314 = vmatmul.msk.bf16.gmra.mxu2 %vm371_vm0, %v762_v42  ;;  %v467_v4 = vmul.f32 %v453_v60, %v453_v60 }
 0x144   :  { %v749_v17 = vadd.f32 %v1885_v0, %v734_v9 }
 0x145   :  { %v494_v30 = vsel %vm480_vm1, %v467_v4, 0.0 }
 0x146   :  { %v407_v47 = vpop.f32.mrf.mxu2  ;;  %v759_v46 = vmax.f32 %v749_v17, 0.0 }
 0x147   :  { %v408_v50 = vadd.f32 %v1908_v36, %v407_v47 }
 0x148   :  { %v764_v26 = vpack.c.bf16 %v759_v46, %v758_v20 }
 0x149   :  { %v454_v55 = vsub.f32 %v408_v50, %v1920_v48  ;;  %v1228_v50 = vld [vmem:[%s2085_s25 + $0x50] sm:$0xff] }
 0x14b   :  { %v468_v57 = vmul.f32 %v454_v55, %v454_v55 }
 0x14d   :  { %v482_v61 = vsel %vm480_vm1, %v468_v57, 0.0 }
 0x14e   :  { %v483_v62 = vadd.f32 %v482_v61, %v481_v7  ;;  %v409_v63 = vpop.f32.mrf.mxu2 }
 0x14f   :  { %v410_v27 = vadd.f32 %v1908_v36, %v409_v63  ;;  %v1996_v63 = vld [vmem:[%s2085_s25 + $0x60] sm:$0xff] }
 0x151   :  { %v455_v5 = vsub.f32 %v410_v27, %v1936_v1 }
 0x153   :  { %v469_v8 = vmul.f32 %v455_v5, %v455_v5  ;;  %1315 = vmatmul.msk.bf16.gmra.mxu2 %vm371_vm0, %v763_v6 }
 0x155   :  { %v495_v10 = vsel %vm480_vm1, %v469_v8, 0.0  ;;  %v2004_v8 = vld [vmem:[%s2085_s25 + $0x68] sm:$0xff] }
 0x156   :  { %v496_v11 = vadd.f32 %v495_v10, %v494_v30  ;;  %v412_v12 = vpop.f32.mrf.mxu2 }
 0x157   :  { %v413_v16 = vadd.f32 %v1908_v36, %v412_v12 }
 0x159   :  { %v456_v18 = vsub.f32 %v413_v16, %v1947_v13  ;;  %v1232_v16 = vld [vmem:[%s2085_s25 + $0x70] sm:$0xff] }
 0x15b   :  { %v470_v29 = vmul.f32 %v456_v18, %v456_v18 }
 0x15d   :  { %v484_v19 = vsel %vm480_vm1, %v470_v29, 0.0 }
 0x15e   :  { %v485_v21 = vadd.f32 %v484_v19, %v483_v62  ;;  %v414_v22 = vpop.f32.mrf.mxu2 }
 0x15f   :  { %v415_v24 = vadd.f32 %v1908_v36, %v414_v22 }
 0x161   :  { %v457_v25 = vsub.f32 %v415_v24, %v1958_v23 }
 0x163   :  { %v471_v28 = vmul.f32 %v457_v25, %v457_v25  ;;  %1316 = vmatmul.msk.bf16.gmra.mxu2 %vm371_vm0, %v764_v26 }
 0x165   :  { %v497_v0 = vsel %vm480_vm1, %v471_v28, 0.0 }
 0x166   :  { %v498_v31 = vadd.f32 %v497_v0, %v496_v11  ;;  %v417_v33 = vpop.f32.mrf.mxu2 }
 0x167   :  { %v418_v35 = vadd.f32 %v1908_v36, %v417_v33 }
 0x169   :  { %v458_v2 = vsub.f32 %v418_v35, %v1967_v34 }
 0x16b   :  { %v472_v58 = vmul.f32 %v458_v2, %v458_v2 }
 0x16d   :  { %v486_v37 = vsel %vm480_vm1, %v472_v58, 0.0  ;;  %v1458_v58 = vld [vmem:[%s2070_s12] ss:$0 sm:$0xff] }
 0x16e   :  { %v487_v38 = vadd.f32 %v486_v37, %v485_v21  ;;  %v419_v39 = vpop.f32.mrf.mxu2  ;;  %v1233_v21 = vld [vmem:[%s2085_s25 + $0x78] sm:$0xff] }
 0x16f   :  { %v420_v42 = vadd.f32 %v1908_v36, %v419_v39 }
 0x171   :  { %v459_v43 = vsub.f32 %v420_v42, %v1975_v40 }
 0x173   :  { %v473_v44 = vmul.f32 %v459_v43, %v459_v43 }
 0x175   :  { %v499_v45 = vsel %vm480_vm1, %v473_v44, 0.0 }
 0x176   :  { %v500_v47 = vadd.f32 %v499_v45, %v498_v31  ;;  %v422_v49 = vpop.f32.mrf.mxu2 }
 0x177   :  { %v423_v51 = vadd.f32 %v1908_v36, %v422_v49 }
 0x179   :  { %v460_v52 = vsub.f32 %v423_v51, %v1228_v50 }
 0x17b   :  { %v474_v53 = vmul.f32 %v460_v52, %v460_v52 }
 0x17d   :  { %v488_v32 = vsel %vm480_vm1, %v474_v53, 0.0 }
 0x17e   :  { %v489_v55 = vadd.f32 %v488_v32, %v487_v38  ;;  %v424_v15 = vpop.f32.mrf.mxu2 }
 0x17f   :  { %v425_v57 = vadd.f32 %v1908_v36, %v424_v15 }
 0x181   :  { %v461_v59 = vsub.f32 %v425_v57, %v1988_v56 }
 0x183   :  { %v475_v7 = vmul.f32 %v461_v59, %v461_v59 }
 0x185   :  { %v501_v60 = vsel %vm480_vm1, %v475_v7, 0.0 }
 0x186   :  { %v502_v61 = vadd.f32 %v501_v60, %v500_v47  ;;  %v427_v62 = vpop.f32.mrf.mxu2 }
 0x187   :  { %v428_v3 = vadd.f32 %v1908_v36, %v427_v62 }
 0x189   :  { %v462_v27 = vsub.f32 %v428_v3, %v1996_v63 }
 0x18b   :  { %v476_v4 = vmul.f32 %v462_v27, %v462_v27  ;;  %v1459_v27 = vld [vmem:[%s2075_s17] ss:$0 sm:$0xff]  ;;  %s1487_s17 = smov [#allocation2]  }
 0x18c   :  { %s1120_s21 = sshll.u32 %s1487_s17, 4  ;;  %s1121_s21 = int_to_ptr.vmem [resolvable:$true] %s1120_s21 }
 0x18d   :  { %v490_v5 = vsel %vm480_vm1, %v476_v4, 0.0 }
 0x18e   :  { %v491_v6 = vadd.f32 %v490_v5, %v489_v55  ;;  %v429_v41 = vpop.f32.mrf.mxu2 }
 0x18f   :  { %v430_v30 = vadd.f32 %v1908_v36, %v429_v41 }
 0x191   :  { %v463_v9 = vsub.f32 %v430_v30, %v2004_v8 }
 0x193   :  { %v477_v10 = vmul.f32 %v463_v9, %v463_v9 }
 0x195   :  { %v503_v11 = vsel %vm480_vm1, %v477_v10, 0.0 }
 0x196   :  { %v504_v12 = vadd.f32 %v503_v11, %v502_v61  ;;  %v432_v14 = vpop.f32.mrf.mxu2 }
 0x197   :  { %v433_v17 = vadd.f32 %v1908_v36, %v432_v14 }
 0x199   :  { %v464_v18 = vsub.f32 %v433_v17, %v1232_v16  ;;  %v1089_v16 = vlaneseq }
 0x19b   :  { %v478_v54 = vmul.f32 %v464_v18, %v464_v18 }
 0x19d   :  { %v492_v29 = vsel %vm480_vm1, %v478_v54, 0.0 }
 0x19e   :  { %v2014_v46 = vadd.f32 %v492_v29, %v491_v6  ;;  %v434_v19 = vpop.f32.mrf.mxu2 }
 0x19f   :  { %v435_v22 = vadd.f32 %v1908_v36, %v434_v19 }
 0x1a0   :  { %v1073_v57 = vpop.f32.mrf.mxu0 }
 0x1a1   :  { %v465_v20 = vsub.f32 %v435_v22, %v1233_v21  ;;  %v1074_v11 = vadd.f32 %v1459_v27, %v1073_v57 }
 0x1a3   :  { %v479_v24 = vmul.f32 %v465_v20, %v465_v20 }
 0x1a5   :  { %v505_v25 = vsel %vm480_vm1, %v479_v24, 0.0 }
 0x1a6   :  { %v2021_v26 = vadd.f32 %v505_v25, %v504_v12  ;;  %v801_v28 = vpop.f32.mrf.mxu2 }
 0x1a7   :  { %v802_v39 = vadd.f32 %v1458_v58, %v801_v28 }
 0x1a8   :  { %v1075_v54 = vpop.f32.mrf.mxu0 }
 0x1a9   :  { %v837_v44 = vsub.f32 %v802_v39, %v1920_v48  ;;  %v1076_v25 = vadd.f32 %v1459_v27, %v1075_v54 }
 0x1ab   :  { %v847_v53 = vmul.f32 %v837_v44, %v837_v44  ;;  %v1082_v39 = vsub.f32 %v1076_v25, %v1975_v40 }
 0x1ad   :  { %v857_v61 = vsel %vm480_vm1, %v847_v53, 0.0  ;;  %v1084_v44 = vmul.f32 %v1082_v39, %v1082_v39 }
 0x1ae   :  { %v803_v0 = vpop.f32.mrf.mxu2 }
 0x1af   :  { %v804_v32 = vadd.f32 %v1458_v58, %v803_v0  ;;  %v1090_v0 = vshrl.u32 %v1089_v16, 7 }
 0x1b1   :  { %v838_v62 = vsub.f32 %v804_v32, %v1936_v1  ;;  %vm1092_vm2 = vcmp.lt.s32.totalorder %v1090_v0, 2 }
 0x1b3   :  { %v848_v10 = vmul.f32 %v838_v62, %v838_v62 }
 0x1b5   :  { %v866_v22 = vsel %vm480_vm1, %v848_v10, 0.0 }
 0x1b6   :  { %v806_v31 = vpop.f32.mrf.mxu2 }
 0x1b7   :  { %v807_v38 = vadd.f32 %v1458_v58, %v806_v31 }
 0x1b9   :  { %v839_v42 = vsub.f32 %v807_v38, %v1947_v13 }
 0x1bb   :  { %v849_v49 = vmul.f32 %v839_v42, %v839_v42  ;;  %v1486_v42 = vmov 0.0  }
 0x1bd   :  { %v858_v59 = vsel %vm480_vm1, %v849_v49, 0.0 }
 0x1be   :  { %v808_v33 = vpop.f32.mrf.mxu2  ;;  %v859_v5 = vadd.f32 %v858_v59, %v857_v61 }
 0x1bf   :  { %v809_v51 = vadd.f32 %v1458_v58, %v808_v33 }
 0x1c1   :  { %v840_v7 = vsub.f32 %v809_v51, %v1958_v23 }
 0x1c3   :  { %v850_v6 = vmul.f32 %v840_v7, %v840_v7 }
 0x1c5   :  { %v867_v17 = vsel %vm480_vm1, %v850_v6, 0.0 }
 0x1c6   :  { %v811_v35 = vpop.f32.mrf.mxu2  ;;  %v868_v24 = vadd.f32 %v867_v17, %v866_v22 }
 0x1c7   :  { %v812_v36 = vadd.f32 %v1458_v58, %v811_v35 }
 0x1c9   :  { %v841_v47 = vsub.f32 %v812_v36, %v1967_v34 }
 0x1cb   :  { %v851_v55 = vmul.f32 %v841_v47, %v841_v47 }
 0x1cd   :  { %v860_v3 = vsel %vm480_vm1, %v851_v55, 0.0 }
 0x1ce   :  { %v813_v2 = vpop.f32.mrf.mxu2  ;;  %v861_v9 = vadd.f32 %v860_v3, %v859_v5 }
 0x1cf   :  { %v814_v15 = vadd.f32 %v1458_v58, %v813_v2 }
 0x1d6   :  { %v816_v37 = vpop.f32.mrf.mxu2 }
 0x1d7   :  { %v817_v43 = vadd.f32 %v1458_v58, %v816_v37 }
 0x1d9   :  { %v843_v52 = vsub.f32 %v817_v43, %v1228_v50  ;;  %v842_v50 = vsub.f32 %v814_v15, %v1975_v40  ;;  %v1400_v43 = vsel %vm1092_vm2, 1.0, %v1486_v42 }
 0x1db   :  { %v853_v60 = vmul.f32 %v843_v52, %v843_v52  ;;  %v852_v1 = vmul.f32 %v842_v50, %v842_v50 }
 0x1dd   :  { %v862_v23 = vsel %vm480_vm1, %v853_v60, 0.0 }
 0x1de   :  { %v818_v45 = vpop.f32.mrf.mxu2  ;;  %v863_v14 = vadd.f32 %v862_v23, %v861_v9 }
 0x1df   :  { %v819_v13 = vadd.f32 %v1458_v58, %v818_v45 }
 0x1e1   :  { %v844_v41 = vsub.f32 %v819_v13, %v1988_v56  ;;  %v869_v56 = vsel %vm480_vm1, %v852_v1, 0.0 }
 0x1e2   :  { %v870_v35 = vadd.f32 %v869_v56, %v868_v24 }
 0x1e3   :  { %v854_v18 = vmul.f32 %v844_v41, %v844_v41 }
 0x1e5   :  { %v871_v31 = vsel %vm480_vm1, %v854_v18, 0.0 }
 0x1e6   :  { %v821_v48 = vpop.f32.mrf.mxu2  ;;  %v872_v38 = vadd.f32 %v871_v31, %v870_v35 }
 0x1e7   :  { %v822_v4 = vadd.f32 %v1458_v58, %v821_v48 }
 0x1e9   :  { %v845_v30 = vsub.f32 %v822_v4, %v1996_v63  ;;  %v1081_v63 = vsub.f32 %v1074_v11, %v1967_v34 }
 0x1eb   :  { %v855_v12 = vmul.f32 %v845_v30, %v845_v30  ;;  %v1083_v2 = vmul.f32 %v1081_v63, %v1081_v63 }
 0x1ed   :  { %v864_v29 = vsel %vm480_vm1, %v855_v12, 0.0 }
 0x1ee   :  { %v865_v19 = vadd.f32 %v864_v29, %v863_v14  ;;  %v823_v21 = vpop.f32.mrf.mxu2 }
 0x1ef   :  { %v824_v20 = vadd.f32 %v1458_v58, %v823_v21 }
 0x1f0   :  { %v875_v28 = vadd.f32 %v865_v19, %v2014_v46 }
 0x1f1   :  { %v846_v33 = vsub.f32 %v824_v20, %v2004_v8 }
 0x1f2   :  { %v1087_v34 = vadd.f32 %v1083_v2, %v875_v28 }
 0x1f3   :  { %v856_v37 = vmul.f32 %v846_v33, %v846_v33 }
 0x1f4   :  { %v1098_v47 = vmul.f32 %v1400_v43, %v1087_v34 }
 0x1f5   :  { %v873_v36 = vsel %vm480_vm1, %v856_v37, 0.0 }
 0x1f6   :  { %v874_v58 = vadd.f32 %v873_v36, %v872_v38  ;;  %v1100_v8 = vsel %vm480_vm1, %v1098_v47, 0.0 }
 0x1f8   :  { %v876_v46 = vadd.f32 %v874_v58, %v2021_v26 }
 0x1fa   :  { %v1088_v45 = vadd.f32 %v1084_v44, %v876_v46 }
 0x1fc   :  { %v1099_v49 = vmul.f32 0.0, %v1088_v45 }
 0x1fe   :  { %v1101_v51 = vsel %vm480_vm1, %v1099_v49, 0.0 }
 0x1ff   :  { %v1102_v52 = vadd.f32 %v1101_v51, %v1100_v8 }
 0x201   :  { %v1103_v53 = vrot.slane %v1102_v52, 4 }
 0x203   :  { %v1104_v40 = vadd.f32 %v1103_v53, %v1102_v52 }
 0x205   :  { %v1105_v32 = vrot.slane %v1104_v40, 2 }
 0x207   :  { %v1106_v55 = vadd.f32 %v1105_v32, %v1104_v40 }
 0x209   :  { %v1107_v15 = vrot.slane %v1106_v55, 1 }
 0x20b   :  { %v1108_v57 = vadd.f32 %v1107_v15, %v1106_v55 }
 0x20d   :  { %v1109_v59 = vsel %vm480_vm1, %v1108_v57, 0.0 }
 0x20e   :  { %1110 = vadd.xlane.f32.xlu0 %v1109_v59 }
 0x281   :  { %v1111_v26 = vpop.xlane.xlu0 %1110 }
 0x282   :  { %v1112_v7 = vmul.f32 0.0625, %v1111_v26 }
 0x284   :  { %1114 = vst.msk [vmem:[#allocation2] sm:$0x1] %vm1113_vm3, %v1112_v7 }
 0x285   :  { %1125 = dma.vmem_to_hbm [thread:$0]  %s1121_s21, 16, %s1123_s30, [#allocation3]  }
 0x286   :  { %1484 = dma.done.wait [#allocation3], 16  }
 0x287   :  { %1485 = vsyncadd [#allocation3], 4294967280 }
 0x288   :  { %1130 = vsyncpa [#allocation3], 1 }

// kernel: _lambda_.2
= control target key start
LH: loop header
LB: loop body
LE: loop exit
PB: predicated region body
PF: predicated region fallthrough
CT: control target
= control target key end

     0   :  { %s17244_s0 = inlined_call_operand.vmem [shape: bf16[8,16,5], index: 0, kind: input, shape index: {}]   ;;  %s17245_s1 = inlined_call_operand.vmem [shape: bf16[8,16,4], index: 1, kind: input, shape index: {}]   ;;  %s17246_s2 = inlined_call_operand.vmem [shape: bf16[5,384], index: 2, kind: input, shape index: {}]   ;;  %s17247_s3 = inlined_call_operand.vmem [shape: bf16[128,384], index: 3, kind: input, shape index: {}]   ;;  %s17248_s4 = inlined_call_operand.vmem [shape: f32[1,384], index: 4, kind: input, shape index: {}]   ;;  %s17249_s5 = inlined_call_operand.vmem [shape: f32[1,384], index: 5, kind: input, shape index: {}]   ;;  %s17250_s6 = inlined_call_operand.vmem [shape: bf16[128,384], index: 6, kind: input, shape index: {}]   ;;  %s17251_s7 = inlined_call_operand.vmem [shape: bf16[128,384], index: 7, kind: input, shape index: {}]   ;;  %s17252_s8 = inlined_call_operand.vmem [shape: f32[1,384], index: 8, kind: input, shape index: {}]   ;;  %s17253_s9 = inlined_call_operand.vmem [shape: f32[1,384], index: 9, kind: input, shape index: {}]   ;;  %s17254_s10 = inlined_call_operand.vmem [shape: bf16[4,384], index: 10, kind: input, shape index: {}]   ;;  %s17255_s11 = inlined_call_operand.vmem [shape: bf16[128,384], index: 11, kind: input, shape index: {}]   ;;  %s17256_s12 = inlined_call_operand.vmem [shape: f32[1,384], index: 12, kind: input, shape index: {}]   ;;  %s17257_s13 = inlined_call_operand.vmem [shape: f32[1,384], index: 13, kind: input, shape index: {}]   ;;  %s17258_s14 = inlined_call_operand.vmem [shape: bf16[128,384], index: 14, kind: input, shape index: {}]   ;;  %s17259_s15 = inlined_call_operand.vmem [shape: bf16[128,384], index: 15, kind: input, shape index: {}]   ;;  %s17260_s16 = inlined_call_operand.vmem [shape: f32[1,384], index: 16, kind: input, shape index: {}]   ;;  %s17261_s17 = inlined_call_operand.vmem [shape: f32[1,384], index: 17, kind: input, shape index: {}]   ;;  %s17262_s18 = inlined_call_operand.vmem [shape: f32[8,16,128], index: 18, kind: output, shape index: {0}]   ;;  %s17263_s19 = inlined_call_operand.vmem [shape: f32[8,16,128], index: 19, kind: output, shape index: {1}]  }
   0x1   :  { %17267 = sst [smem:[#allocation6_spill]] %s17244_s0  ;;  %s11321_s0 = smov 0  }
   0x2   :  { %17268 = sst [smem:[#allocation7_spill]] %s17245_s1 }
   0x3   :  { %17269 = sst [smem:[#allocation8_spill]] %s17246_s2 }
   0x4   :  { %17270 = sst [smem:[#allocation9_spill]] %s17247_s3 }
   0x5   :  { %17271 = sst [smem:[#allocation10_spill]] %s17254_s10 }
   0x6   :  { %17272 = sst [smem:[#allocation11_spill]] %s17262_s18 }
   0x7   :  { %17273 = sst [smem:[#allocation12_spill]] %s17263_s19 }
   0x8 LB: > { %17274 = sst [smem:[#allocation5_spill]] %s11217_s0  ;;  %s7800_s30 = sadd.s32 4294967295, %s11217_s0   ;;  %s11217_s0 = sphi %s11321_s0, %s30_s0  }
   0x9   : > { %p7803_p0 = scmp.ge.s32.totalorder %s11217_s0, 1  ;;  %p532_p1 = scmp.lt.s32.totalorder %s11217_s0, 3 }
   0xb   : > { %p533_p2 = pnand %p7803_p0, %p532_p1 }
   0xc   : > { %s11329_s20 = sshll.u32 (!%p533_p2), %s7800_s30, 2  ;;  %s598_s21 = ssub.s32 (!%p533_p2), 1, %s7800_s30 }
   0xd   : > { %536 = sbr.rel (%p533_p2) target bundleno = 1938 (0x792), region = 92  ;;  %p592_p3 = scmp.lt.s32.totalorder (!%p533_p2), %s11329_s20, 7 }
   0xe   : > { %s7807_s1 = sshll.u32 (!%p533_p2), %s598_s21, 2  ;;  %s17275_s18 = sld [smem:[#allocation11_spill]] (!%p533_p2) }
   0xf   : > { %p600_p4 = scmp.lt.s32.totalorder (!%p533_p2), %s7807_s1, 7  ;;  %s17276_s19 = sld [smem:[#allocation12_spill]] (!%p533_p2) }
  0x10   : > { %p7810_p5 = scmp.ne.s32.totalorder (!%p533_p2), %s7800_s30, 0 }
  0x12   : > { %s593_s22 = scalar_select %p592_p3, %s11329_s20, 7 }
  0x13   : > { %s17419_s1 = smov (!%p600_p4, %s7807_s1), 7  ;;  %611 = sbr.rel (%p7810_p5) target bundleno = 33 (0x21), region = 96 }
  0x14   : > { %s10263_s2 = sshll.u32 %s593_s22, 4  ;;  %s10264_s3 = sshll.u32 %s17419_s1, 4 }
  0x15   : > { %s11336_s25 = scalar_lea.vmem %s17275_s18, %s10263_s2  ;;  %s11341_s28 = scalar_lea.vmem %s17276_s19, %s10264_s3 }
  0x18   : > { %v11219_v0 = vmov 0.0  }
  0x19   : > { %612 = vst [vmem:[#allocation4 + $0x30] sm:$0xff] %v11219_v0 }
  0x1a   : > { %613 = vst [vmem:[#allocation4] sm:$0xff] %v11219_v0 }
  0x1b   : > { %614 = vst [vmem:[#allocation4 + $0x18] sm:$0xff] %v11219_v0 }
  0x1c   : > { %615 = vst [vmem:[#allocation4 + $0x10] sm:$0xff] %v11219_v0 }
  0x1d   : > { %616 = vst [vmem:[#allocation4 + $0x8] sm:$0xff] %v11219_v0 }
  0x1e   : > { %617 = vst [vmem:[#allocation4 + $0x20] sm:$0xff] %v11219_v0 }
  0x1f   : > { %618 = vst [vmem:[#allocation4 + $0x28] sm:$0xff] %v11219_v0 }
  0x20   : > { %619 = vst [vmem:[#allocation4 + $0x38] sm:$0xff] %v11219_v0 }
  0x21 PF: > { %vm686_vm0 = vcmask 1041408   ;;  %s17277_s1 = sld [smem:[#allocation8_spill]]  ;;  %vm866_vm1 = vcmask 1042432   ;;  %s10266_s30 = sadd.s32 4, %s11329_s20  ;;  %v11220_v3 = vmov 65535   ;;  %vm853_vm2 = vcmask 39936  }
  0x22   : > { %v867_v4 = vsel %vm686_vm0, 4294967295, %v11220_v3  ;;  %s17278_s10 = sld [smem:[#allocation10_spill]]  ;;  %s625_s23 = ssub.s32 8, %s10266_s30  ;;  %v7960_v9 = vld [vmem:[%s17255_s11 + $0xa8] sm:$0xf]  ;;  %vm673_vm3 = vcmask 31744  }
  0x23   : > { %v11354_v6 = vsel %vm866_vm1, %v867_v4, 0  ;;  %p626_p6 = scmp.gt.s32.totalorder %s625_s23, 0  ;;  %v10300_v10 = vld [vmem:[%s17255_s11 + $0xb0] sm:$0xf0]  ;;  %s17279_s22 = sld [smem:[#allocation6_spill]] }
  0x24   : > { %v7948_v12 = vld [vmem:[%s17255_s11 + $0x90] sm:$0xf]  ;;  %v10297_v13 = vld [vmem:[%s17255_s11 + $0x98] sm:$0xf0]  ;;  %v10299_v14 = vld [vmem:[%s17255_s11 + $0xac] sm:$0xf]  ;;  %v7961_v18 = vor.u32 %v10300_v10, %v7960_v9 }
  0x25   : > { %s17421_s23 = smov (!%p626_p6, %s625_s23), 0  ;;  %v7962_v15 = vld [vmem:[%s17255_s11 + $0xb4] sm:$0xf0]  ;;  %v7949_v24 = vor.u32 %v10297_v13, %v7948_v12  ;;  %v10296_v25 = vld [vmem:[%s17255_s11 + $0x94] sm:$0xf]  ;;  %p621_p7 = scmp.lt.s32.totalorder %s11329_s20, 4 }
  0x26   : > { %s10272_s24 = sshll.u32 %s17421_s23, 3  ;;  %v7965_v19 = vor.u32 %v10299_v14, %v7962_v15  ;;  %v7950_v26 = vld [vmem:[%s17255_s11 + $0x9c] sm:$0xf0]  ;;  %v7936_v27 = vld [vmem:[%s17255_s11 + $0x78] sm:$0xf]  ;;  %s17280_s19 = sld [smem:[#allocation7_spill]] }
  0x27   : > { %v11346_v1 = vld [vmem:[%s17277_s1] sm:$0x77]  ;;  %v7953_v29 = vor.u32 %v10296_v25, %v7950_v26  ;;  %v10293_v30 = vld [vmem:[%s17255_s11 + $0x7c] sm:$0xf]  ;;  %v7938_v31 = vld [vmem:[%s17255_s11 + $0x84] sm:$0xf0] }
  0x28   : > { %v847_v2 = vunpack.c.l.b16 %v11346_v1  ;;  %v639_v5 = vld [vmem:[%s17278_s10] sm:$0x3f]  ;;  %v7941_v33 = vor.u32 %v10293_v30, %v7938_v31  ;;  %v10291_v35 = vld [vmem:[%s17255_s11 + $0x68] sm:$0xf0]  ;;  %v7912_v38 = vld [vmem:[%s17255_s11 + $0x48] sm:$0xf]  ;;  %v848_v9 = vunpack.c.h.b16 %v11346_v1 }
  0x29   : > { %669 = vst [vmem:[#allocation1] ss:$4 sm:$0xff] %v639_v5  ;;  %s11369_s2 = scalar_lea.vmem %s17279_s22, %s10272_s24  ;;  %v10294_v28 = vld [vmem:[%s17255_s11 + $0x80] sm:$0xf0]  ;;  %v7924_v34 = vld [vmem:[%s17255_s11 + $0x60] sm:$0xf] }
  0x2a   : > { %v850_v7 = vpack.c.b16 %v847_v2, %v847_v2  ;;  %v11372_v11 = vld [vmem:[%s11369_s2] sm:$0xff]  ;;  %v7937_v32 = vor.u32 %v10294_v28, %v7936_v27  ;;  %v7925_v36 = vor.u32 %v10291_v35, %v7924_v34  ;;  %s11417_s22 = scalar_select %p621_p7, %s11329_s20, 4  ;;  %v11420_v37 = vld [vmem:[%s11369_s2 + $0x8] sm:$0xff]  ;;  %v10288_v39 = vld [vmem:[%s17255_s11 + $0x50] sm:$0xf0] }
  0x2b   : > { %v7913_v41 = vor.u32 %v10288_v39, %v7912_v38  ;;  %v7900_v42 = vld [vmem:[%s17255_s11 + $0x30] sm:$0xf]  ;;  %v10285_v43 = vld [vmem:[%s17255_s11 + $0x38] sm:$0xf0]  ;;  %v10290_v44 = vld [vmem:[%s17255_s11 + $0x64] sm:$0xf] }
  0x2c   : > { %v870_v8 = vand.u32 %v11354_v6, %v850_v7  ;;  %s10267_s21 = sshll.u32 %s11417_s22, 3  ;;  %v7926_v45 = vld [vmem:[%s17255_s11 + $0x6c] sm:$0xf0]  ;;  %v7901_v46 = vor.u32 %v10285_v43, %v7900_v42  ;;  %v7888_v48 = vld [vmem:[%s17255_s11 + $0x18] sm:$0xf]  ;;  %v990_v39 = vld [vmem:[#allocation4] sm:$0xff] }
  0x2d   : > { %s11432_s24 = scalar_lea.vmem %s17280_s19, %s10267_s21  ;;  %v7929_v47 = vor.u32 %v10290_v44, %v7926_v45  ;;  %v10282_v49 = vld [vmem:[%s17255_s11 + $0x20] sm:$0xf0]  ;;  %v10287_v50 = vld [vmem:[%s17255_s11 + $0x4c] sm:$0xf]  ;;  %v7914_v51 = vld [vmem:[%s17255_s11 + $0x54] sm:$0xf0]  ;;  %s1000_s19 = ssub.s32 %s11329_s20, %s11417_s22 }
  0x2e   : > { %885 = vmatpush.bf16.msra.mxu3 %v870_v8  ;;  %v10268_v40 = vld [vmem:[%s11432_s24] sm:$0xff]  ;;  %v7917_v52 = vor.u32 %v10287_v50, %v7914_v51  ;;  %v7889_v53 = vor.u32 %v10282_v49, %v7888_v48  ;;  %v10279_v55 = vld [vmem:[%s17255_s11 + $0x8] sm:$0xf0]  ;;  %v7968_v56 = vld [vmem:[%s17255_s11 + $0xb0] sm:$0xf]  ;;  %s17281_s29 = sld [smem:[#allocation9_spill]] }
  0x2f   : > { %v7876_v54 = vld [vmem:[%s17255_s11] sm:$0xf]  ;;  %v10301_v57 = vld [vmem:[%s17255_s11 + $0xb8] sm:$0xf0]  ;;  %v11477_v58 = vld [vmem:[%s11369_s2 + $0x10] sm:$0xff]  ;;  %p1001_p8 = scmp.lt.s32.totalorder %s1000_s19, 3 }
  0x30   : > { %v670_v16 = vld.sshfl [vmem:[#allocation1] sm:$0xff pattern:$0x73625140]  ;;  %v671_v17 = vld.sshfl [vmem:[#allocation1 + $0x8] sm:$0xff pattern:$0x73625140]  ;;  %v7877_v59 = vor.u32 %v10279_v55, %v7876_v54  ;;  %v7969_v60 = vor.u32 %v10301_v57, %v7968_v56 }
  0x31   : > { %v687_v20 = vsel %vm686_vm0, %v670_v16, 0  ;;  %v689_v21 = vsel %vm686_vm0, %v671_v17, 0  ;;  %v672_v22 = vld.sshfl [vmem:[#allocation1 + $0x10] sm:$0xff pattern:$0x73625140]  ;;  %7861 = vmatmul.msk.bf16.vlgmr.msra.gmra.mxu3 %vm853_vm2, %v11372_v11  ;;  %v10269_v61 = vld [vmem:[%s11432_s24 + $0x8] sm:$0xff]  ;;  %v851_v16 = vpack.c.b16 %v848_v9, %v848_v9 }
  0x32   : > { %700 = vmatpush.bf16.msra.mxu0 %v687_v20  ;;  %729 = vmatpush.bf16.msra.mxu1 %v689_v21  ;;  %v691_v23 = vsel %vm686_vm0, %v672_v22, 0  ;;  %v7956_v62 = vld [vmem:[%s17255_s11 + $0x98] sm:$0xf]  ;;  %v10298_v63 = vld [vmem:[%s17255_s11 + $0xa0] sm:$0xf0]  ;;  %s17423_s19 = smov (!%p1001_p8, %s1000_s19), 3 }
  0x33   : > { %758 = vmatpush.bf16.msra.mxu2 %v691_v23  ;;  %1195 = vmatpush.bf16.msrb.mxu3 %v7965_v19  ;;  %v7957_v0 = vor.u32 %v10298_v63, %v7956_v62  ;;  %v7944_v2 = vld [vmem:[%s17255_s11 + $0x80] sm:$0xf]  ;;  %v10295_v3 = vld [vmem:[%s17255_s11 + $0x88] sm:$0xf0]  ;;  %v10284_v4 = vld [vmem:[%s17255_s11 + $0x34] sm:$0xf]  ;;  %v873_v19 = vand.u32 %v11354_v6, %v851_v16 }
  0x34   : > { %v7902_v5 = vld [vmem:[%s17255_s11 + $0x3c] sm:$0xf0]  ;;  %v10281_v8 = vld [vmem:[%s17255_s11 + $0x1c] sm:$0xf]  ;;  %v7890_v10 = vld [vmem:[%s17255_s11 + $0x24] sm:$0xf0]  ;;  %v7945_v12 = vor.u32 %v10295_v3, %v7944_v2 }
  0x35   : > { %7831 = vmatmul.msk.bf16.vlgmr.msra.gmra.mxu0 %vm673_vm3, %v10268_v40  ;;  %7835 = vmatmul.msk.bf16.vlgmr.msra.gmra.mxu1 %vm673_vm3, %v10268_v40  ;;  %v7905_v7 = vor.u32 %v10284_v4, %v7902_v5  ;;  %v7932_v13 = vld [vmem:[%s17255_s11 + $0x68] sm:$0xf]  ;;  %v10292_v14 = vld [vmem:[%s17255_s11 + $0x70] sm:$0xf0]  ;;  %v7893_v15 = vor.u32 %v10281_v8, %v7890_v10  ;;  %v10278_v1 = vld [vmem:[%s17255_s11 + $0x4] sm:$0xf] }
  0x36   : > { %7839 = vmatmul.msk.bf16.vlgmr.msra.gmra.mxu2 %vm673_vm3, %v10268_v40  ;;  %v7878_v17 = vld [vmem:[%s17255_s11 + $0xc] sm:$0xf0]  ;;  %v7933_v21 = vor.u32 %v10292_v14, %v7932_v13  ;;  %v10289_v25 = vld [vmem:[%s17255_s11 + $0x58] sm:$0xf0]  ;;  %914 = vmatpush.bf16.msrb.mxu0 %v873_v19  ;;  %v7908_v30 = vld [vmem:[%s17255_s11 + $0x38] sm:$0xf] }
  0x37   : > { %1181 = vmatpush.bf16.msrb.mxu2 %v7961_v18  ;;  %1196 = vmatpush.bf16.msrb.mxu3 %v7953_v29  ;;  %v816_v18 = vld [vmem:[%s17277_s1 + $0x8] sm:$0x7]  ;;  %v7881_v22 = vor.u32 %v10278_v1, %v7878_v17  ;;  %v11534_v27 = vld [vmem:[%s11369_s2 + $0x18] sm:$0xff]  ;;  %v10270_v29 = vld [vmem:[%s11432_s24 + $0x10] sm:$0xff]  ;;  %s17282_s30 = smul.u32 48, %s17423_s19  ;;  %s1838_s21 = ssub.s32 7, %s11329_s20 }
  0x38   : > { %v849_v20 = vunpack.c.l.b16 %v816_v18  ;;  %v10286_v31 = vld [vmem:[%s17255_s11 + $0x40] sm:$0xf0]  ;;  %v7884_v35 = vld [vmem:[%s17255_s11 + $0x8] sm:$0xf]  ;;  %v989_v38 = vld [vmem:[#allocation4 + $0x30] sm:$0xff]  ;;  %s1839_s10 = ssub.s32 %s1838_s21, %s17421_s23  ;;  %s3511_s18 = ssub.s32 6, %s11329_s20 }
  0x39   : > { %v10271_v42 = vld [vmem:[%s11432_s24 + $0x18] sm:$0xff]  ;;  %v8156_v43 = vld [vmem:[%s17259_s15 + $0xa8] sm:$0xf]  ;;  %v10348_v44 = vld [vmem:[%s17259_s15 + $0xb0] sm:$0xf0]  ;;  %s11849_s3 = scalar_lea.vmem [#allocation2], %s17282_s30 }
  0x3a   : > { %v852_v23 = vpack.c.b16 %v849_v20, %v849_v20  ;;  %v8157_v45 = vor.u32 %v10348_v44, %v8156_v43  ;;  %v8132_v49 = vld [vmem:[%s17259_s15 + $0x78] sm:$0xf]  ;;  %v10342_v50 = vld [vmem:[%s17259_s15 + $0x80] sm:$0xf0]  ;;  %v8108_v54 = vld [vmem:[%s17259_s15 + $0x48] sm:$0xf] }
  0x3b   : > { %1182 = vmatpush.bf16.msrb.mxu2 %v7949_v24  ;;  %1197 = vmatpush.bf16.msrb.mxu3 %v7941_v33  ;;  %v7920_v24 = vld [vmem:[%s17255_s11 + $0x50] sm:$0xf]  ;;  %v10283_v33 = vld [vmem:[%s17255_s11 + $0x28] sm:$0xf0]  ;;  %v8133_v51 = vor.u32 %v10342_v50, %v8132_v49  ;;  %v10336_v55 = vld [vmem:[%s17259_s15 + $0x50] sm:$0xf0] }
  0x3c   : > { %v876_v26 = vand.u32 %v11354_v6, %v852_v23  ;;  %v7921_v28 = vor.u32 %v10289_v25, %v7920_v24  ;;  %v7909_v6 = vor.u32 %v10286_v31, %v7908_v30  ;;  %v8109_v56 = vor.u32 %v10336_v55, %v8108_v54  ;;  %v8096_v57 = vld [vmem:[%s17259_s15 + $0x30] sm:$0xf]  ;;  %v10330_v62 = vld [vmem:[%s17259_s15 + $0x20] sm:$0xf0]  ;;  %v10372_v2 = vld [vmem:[%s17281_s29 + $0xac] sm:$0xf] }
  0x3d   : > { %v8261_v3 = vld [vmem:[%s17281_s29 + $0xb4] sm:$0xf0]  ;;  %v992_v5 = vld [vmem:[#allocation4 + $0x18] sm:$0xff]  ;;  %v10369_v9 = vld [vmem:[%s17281_s29 + $0x94] sm:$0xf]  ;;  %p1840_p9 = scmp.gt.s32.totalorder %s1839_s10, 0 }
  0x3e   : > { %943 = vmatpush.bf16.msrb.mxu1 %v876_v26  ;;  %v8264_v8 = vor.u32 %v10372_v2, %v8261_v3  ;;  %v8249_v10 = vld [vmem:[%s17281_s29 + $0x9c] sm:$0xf0]  ;;  %v10366_v14 = vld [vmem:[%s17281_s29 + $0x7c] sm:$0xf]  ;;  %v10363_v1 = vld [vmem:[%s17281_s29 + $0x64] sm:$0xf] }
  0x3f   : > { %1183 = vmatpush.bf16.msrb.mxu2 %v7937_v32  ;;  %1198 = vmatpush.bf16.msrb.mxu3 %v7929_v47  ;;  %v7896_v32 = vld [vmem:[%s17255_s11 + $0x20] sm:$0xf]  ;;  %v10345_v47 = vld [vmem:[%s17259_s15 + $0x98] sm:$0xf0]  ;;  %v8252_v13 = vor.u32 %v10369_v9, %v8249_v10  ;;  %v10360_v18 = vld [vmem:[%s17281_s29 + $0x4c] sm:$0xf] }
  0x40   : > { %v7897_v34 = vor.u32 %v10283_v33, %v7896_v32  ;;  %v8213_v19 = vld [vmem:[%s17281_s29 + $0x54] sm:$0xf0]  ;;  %v8201_v23 = vld [vmem:[%s17281_s29 + $0x3c] sm:$0xf0]  ;;  %v10354_v26 = vld [vmem:[%s17281_s29 + $0x1c] sm:$0xf] }
  0x41   : > { %7862 = vmatmul.msk.bf16.gmra.mxu3 %vm853_vm2, %v11420_v37  ;;  %v8216_v20 = vor.u32 %v10360_v18, %v8213_v19  ;;  %v995_v33 = vld [vmem:[#allocation4 + $0x8] sm:$0xff]  ;;  %v10325_v18 = vld [vmem:[%s17258_s14 + $0xb8] sm:$0xf0]  ;;  %s17425_s10 = smov (!%p1840_p9, %s1839_s10), 0  ;;  %s2672_s30 = sadd.s32 1, %s11329_s20 }
  0x42   : > { %s10350_s2 = smul.u32 48, %s17425_s10  ;;  %s2673_s26 = ssub.s32 %s2672_s30, %s11417_s22 }
  0x43   : > { %1184 = vmatpush.bf16.msrb.mxu2 %v7925_v36  ;;  %1199 = vmatpush.bf16.msrb.mxu3 %v7917_v52  ;;  %v10280_v36 = vld [vmem:[%s17255_s11 + $0x10] sm:$0xf0]  ;;  %v8120_v52 = vld [vmem:[%s17259_s15 + $0x60] sm:$0xf]  ;;  %p2674_p10 = scmp.lt.s32.totalorder %s2673_s26, 3 }
  0x44   : > { %v7885_v40 = vor.u32 %v10280_v36, %v7884_v35  ;;  %v640_v35 = vld [vmem:[%s17256_s12] sm:$0x7]  ;;  %s12317_s0 = scalar_lea.vmem [#allocation3], %s10350_s2  ;;  %s3512_s2 = ssub.s32 %s3511_s18, %s17421_s23 }
  0x45   : > { %7832 = vmatmul.msk.bf16.gmra.mxu0 %vm673_vm3, %v10269_v61  ;;  %7836 = vmatmul.msk.bf16.gmra.mxu1 %vm673_vm3, %v10269_v61  ;;  %s17427_s26 = smov (!%p2674_p10, %s2673_s26), 3  ;;  %p3513_p11 = scmp.gt.s32.totalorder %s3512_s2, 0 }
  0x46   : > { %7840 = vmatmul.msk.bf16.gmra.mxu2 %vm673_vm3, %v10269_v61  ;;  %v8084_v61 = vld [vmem:[%s17259_s15 + $0x18] sm:$0xf]  ;;  %s10423_s10 = smul.u32 48, %s17427_s26 }
  0x47   : > { %1185 = vmatpush.bf16.msrb.mxu2 %v7913_v41  ;;  %1200 = vmatpush.bf16.msrb.mxu3 %v7905_v7  ;;  %v1012_v41 = vpack.c.bf16 %v990_v39, %v989_v38  ;;  %v8085_v63 = vor.u32 %v10330_v62, %v8084_v61  ;;  %v993_v7 = vld [vmem:[#allocation4 + $0x10] sm:$0xff]  ;;  %v11693_v39 = vperm.slane %v640_v35, 0  ;;  %s17429_s2 = smov (!%p3513_p11, %s3512_s2), 0 }
  0x48   : > { %s10496_s21 = smul.u32 48, %s17429_s2  ;;  %s6854_s2 = ssub.s32 4, %s11329_s20 }
  0x4a   : > { %s13819_s26 = scalar_lea.vmem [#allocation3], %s10496_s21 }
  0x4b   : > { %1186 = vmatpush.bf16.msrb.mxu2 %v7901_v46  ;;  %1201 = vmatpush.bf16.msrb.mxu3 %v7893_v15  ;;  %v8144_v46 = vld [vmem:[%s17259_s15 + $0x90] sm:$0xf]  ;;  %v8237_v15 = vld [vmem:[%s17281_s29 + $0x84] sm:$0xf0] }
  0x4c   : > { %v8145_v48 = vor.u32 %v10345_v47, %v8144_v46  ;;  %v8240_v16 = vor.u32 %v10366_v14, %v8237_v15  ;;  %v11701_v46 = vperm.slane %v640_v35, 2 }
  0x4f   : > { %1187 = vmatpush.bf16.msrb.mxu2 %v7889_v53  ;;  %1202 = vmatpush.bf16.msrb.mxu3 %v7881_v22  ;;  %v10357_v22 = vld [vmem:[%s17281_s29 + $0x34] sm:$0xf] }
  0x50   : > { %v8204_v25 = vor.u32 %v10357_v22, %v8201_v23  ;;  %v8060_v22 = vld [vmem:[%s17258_s14 + $0xa8] sm:$0xf]  ;;  %v10324_v23 = vld [vmem:[%s17258_s14 + $0xb0] sm:$0xf0] }
  0x51   : > { %7863 = vmatmul.msk.bf16.gmra.mxu3 %vm853_vm2, %v11477_v58 }
  0x53   : > { %1188 = vmatpush.bf16.msrb.mxu2 %v7877_v59  ;;  %v10333_v59 = vld [vmem:[%s17259_s15 + $0x38] sm:$0xf0] }
  0x55   : > { %7833 = vmatmul.msk.bf16.gmra.mxu0 %vm673_vm3, %v10270_v29  ;;  %7837 = vmatmul.msk.bf16.gmra.mxu1 %vm673_vm3, %v10270_v29 }
  0x56   : > { %7841 = vmatmul.msk.bf16.gmra.mxu2 %vm673_vm3, %v10270_v29 }
  0x57   : > { %1209 = vmatpush.bf16.msra.mxu2 %v7969_v60  ;;  %v8097_v60 = vor.u32 %v10333_v59, %v8096_v57 }
  0x5b   : > { %1210 = vmatpush.bf16.msra.mxu2 %v7957_v0  ;;  %v8072_v0 = vld [vmem:[%s17259_s15] sm:$0xf] }
  0x5f   : > { %1211 = vmatpush.bf16.msra.mxu2 %v7945_v12  ;;  %v11632_v12 = vpack.c.bf16 %v993_v7, %v992_v5 }
  0x61   : > { %7864 = vmatmul.msk.bf16.gmra.mxu3 %vm853_vm2, %v11534_v27 }
  0x63   : > { %1212 = vmatpush.bf16.msra.mxu2 %v7933_v21  ;;  %v11660_v21 = vld [vmem:[%s17248_s4] sm:$0x7] }
  0x64   : > { %v11669_v24 = vperm.slane %v11660_v21, 0 }
  0x65   : > { %7834 = vmatmul.msk.bf16.gmra.mxu0 %vm673_vm3, %v10271_v42  ;;  %7838 = vmatmul.msk.bf16.gmra.mxu1 %vm673_vm3, %v10271_v42 }
  0x66   : > { %7842 = vmatmul.msk.bf16.gmra.mxu2 %vm673_vm3, %v10271_v42 }
  0x67   : > { %1213 = vmatpush.bf16.msra.mxu2 %v7921_v28  ;;  %v8189_v28 = vld [vmem:[%s17281_s29 + $0x24] sm:$0xf0] }
  0x68   : > { %v8192_v31 = vor.u32 %v10354_v26, %v8189_v28 }
  0x6b   : > { %1214 = vmatpush.bf16.msra.mxu2 %v7909_v6  ;;  %v10351_v6 = vld [vmem:[%s17281_s29 + $0x4] sm:$0xf] }
  0x6f   : > { %1215 = vmatpush.bf16.msra.mxu2 %v7897_v34  ;;  %v996_v34 = vld [vmem:[#allocation4 + $0x20] sm:$0xff] }
  0x70   : > { %v11691_v38 = vpack.c.bf16 %v996_v34, %v995_v33 }
  0x71   : > { %1203 = vmatmul.bf16.vlgmr.msrb.gmra.mxu3 %v1012_v41 }
  0x73   : > { %1216 = vmatpush.bf16.msra.mxu2 %v7885_v40  ;;  %v11695_v40 = vperm.slane %v640_v35, 1 }
  0x75   : > { %7865 = vmatmul.msk.bf16.vlgmr.msrb.gmra.mxu0 %vm853_vm2, %v11372_v11  ;;  %7869 = vmatmul.msk.bf16.vlgmr.msrb.gmra.mxu1 %vm853_vm2, %v11372_v11  ;;  %v10339_v11 = vld [vmem:[%s17259_s15 + $0x68] sm:$0xf0] }
  0x76   : > { %1189 = vmatmul.bf16.vlgmr.msrb.gmra.mxu2 %v1012_v41  ;;  %v8121_v53 = vor.u32 %v10339_v11, %v8120_v52 }
  0x77   : > { %1697 = vmatpush.bf16.msrb.mxu2 %v8157_v45 }
  0x7b   : > { %1698 = vmatpush.bf16.msrb.mxu2 %v8145_v48 }
  0x7f   : > { %1699 = vmatpush.bf16.msrb.mxu2 %v8133_v51 }
  0x83   : > { %1700 = vmatpush.bf16.msrb.mxu2 %v8121_v53 }
  0x85   : > { %7866 = vmatmul.msk.bf16.gmra.mxu0 %vm853_vm2, %v11420_v37  ;;  %7870 = vmatmul.msk.bf16.gmra.mxu1 %vm853_vm2, %v11420_v37  ;;  %v10327_v37 = vld [vmem:[%s17259_s15 + $0x8] sm:$0xf0] }
  0x86   : > { %1217 = vmatmul.bf16.vlgmr.msra.gmra.mxu2 %v1012_v41  ;;  %v8073_v4 = vor.u32 %v10327_v37, %v8072_v0 }
  0x87   : > { %1701 = vmatpush.bf16.msrb.mxu2 %v8109_v56 }
  0x8b   : > { %1702 = vmatpush.bf16.msrb.mxu2 %v8097_v60 }
  0x8f   : > { %1703 = vmatpush.bf16.msrb.mxu2 %v8085_v63 }
  0x93   : > { %1704 = vmatpush.bf16.msrb.mxu2 %v8073_v4 }
  0x95   : > { %7867 = vmatmul.msk.bf16.gmra.mxu0 %vm853_vm2, %v11477_v58  ;;  %7871 = vmatmul.msk.bf16.gmra.mxu1 %vm853_vm2, %v11477_v58  ;;  %v8225_v58 = vld [vmem:[%s17281_s29 + $0x6c] sm:$0xf0] }
  0x96   : > { %1705 = vmatmul.bf16.vlgmr.msrb.gmra.mxu2 %v11632_v12  ;;  %v8228_v17 = vor.u32 %v10363_v1, %v8225_v58 }
  0x97   : > { %2034 = vmatpush.bf16.msra.mxu2 %v8264_v8 }
  0x9b   : > { %2035 = vmatpush.bf16.msra.mxu2 %v8252_v13 }
  0x9f   : > { %2036 = vmatpush.bf16.msra.mxu2 %v8240_v16 }
  0xa3   : > { %2037 = vmatpush.bf16.msra.mxu2 %v8228_v17  ;;  %v8068_v17 = vld [vmem:[%s17258_s14 + $0xb0] sm:$0xf] }
  0xa5   : > { %7868 = vmatmul.msk.bf16.gmra.mxu0 %vm853_vm2, %v11534_v27  ;;  %7872 = vmatmul.msk.bf16.gmra.mxu1 %vm853_vm2, %v11534_v27  ;;  %v8177_v27 = vld [vmem:[%s17281_s29 + $0xc] sm:$0xf0] }
  0xa6   : > { %v8180_v32 = vor.u32 %v10351_v6, %v8177_v27  ;;  %v8048_v27 = vld [vmem:[%s17258_s14 + $0x90] sm:$0xf] }
  0xa7   : > { %2038 = vmatpush.bf16.msra.mxu2 %v8216_v20  ;;  %v8069_v20 = vor.u32 %v10325_v18, %v8068_v17 }
  0xa9   : > { %1514 = vmatpush.bf16.msra.mxu1 %v8069_v20 }
  0xab   : > { %2039 = vmatpush.bf16.msra.mxu2 %v8204_v25  ;;  %v8061_v25 = vor.u32 %v10324_v23, %v8060_v22  ;;  %v10323_v22 = vld [vmem:[%s17258_s14 + $0xac] sm:$0xf]  ;;  %v8062_v23 = vld [vmem:[%s17258_s14 + $0xb4] sm:$0xf0] }
  0xad   : > { %1486 = vmatpush.bf16.msra.mxu3 %v8061_v25 }
  0xaf   : > { %2040 = vmatpush.bf16.msra.mxu2 %v8192_v31 }
  0xb2   : > { %v702_v42 = vpop.f32.mrf.mxu0  ;;  %v731_v43 = vpop.f32.mrf.mxu1 }
  0xb3   : > { %2041 = vmatpush.bf16.msra.mxu2 %v8180_v32  ;;  %v703_v44 = vadd.f32 %v702_v42, %v11693_v39  ;;  %v732_v45 = vadd.f32 %v731_v43, %v11695_v40  ;;  %v10321_v32 = vld [vmem:[%s17258_s14 + $0x98] sm:$0xf0] }
  0xb4   : > { %v887_v29 = vpop.f32.mrf.mxu3  ;;  %v8049_v33 = vor.u32 %v10321_v32, %v8048_v27 }
  0xb5   : > { %v888_v30 = vadd.f32 %v887_v29, %v11669_v24  ;;  %780 = vst [vmem:[#allocation2] sm:$0xff] %v703_v44 }
  0xb6   : > { %2042 = vmatmul.bf16.vlgmr.msra.gmra.mxu2 %v11691_v38  ;;  %781 = vst [vmem:[#allocation2 + $0x8] sm:$0xff] %v732_v45  ;;  %1487 = vmatpush.bf16.msra.mxu3 %v8049_v33  ;;  %v8020_v33 = vld [vmem:[%s17258_s14 + $0x50] sm:$0xf] }
  0xb7   : > { %965 = vst [vmem:[#allocation3] sm:$0xff] %v888_v30 }
  0xb9   : > { %v760_v49 = vpop.f32.mrf.mxu2 }
  0xba   : > { %v761_v50 = vadd.f32 %v760_v49, %v11701_v46  ;;  %v704_v51 = vpop.f32.mrf.mxu0  ;;  %v733_v52 = vpop.f32.mrf.mxu1  ;;  %v8024_v49 = vld [vmem:[%s17258_s14 + $0x60] sm:$0xf] }
  0xbb   : > { %v705_v11 = vadd.f32 %v704_v51, %v11693_v39  ;;  %v734_v53 = vadd.f32 %v733_v52, %v11695_v40  ;;  %v8012_v52 = vld [vmem:[%s17258_s14 + $0x48] sm:$0xf] }
  0xbc   : > { %v889_v36 = vpop.f32.mrf.mxu3  ;;  %782 = vst [vmem:[#allocation2 + $0x10] sm:$0xff] %v761_v50  ;;  %v10315_v50 = vld [vmem:[%s17258_s14 + $0x68] sm:$0xf0] }
  0xbd   : > { %v890_v41 = vadd.f32 %v889_v36, %v11669_v24  ;;  %783 = vst [vmem:[#allocation2 + $0x18] sm:$0xff] %v705_v11  ;;  %v8036_v36 = vld [vmem:[%s17258_s14 + $0x78] sm:$0xf]  ;;  %v8025_v51 = vor.u32 %v10315_v50, %v8024_v49  ;;  %v10312_v11 = vld [vmem:[%s17258_s14 + $0x50] sm:$0xf0] }
  0xbe   : > { %784 = vst [vmem:[#allocation2 + $0x20] sm:$0xff] %v734_v53  ;;  %v8013_v53 = vor.u32 %v10312_v11, %v8012_v52 }
  0xbf   : > { %968 = vst [vmem:[#allocation3 + $0x18] sm:$0xff] %v890_v41  ;;  %v10318_v41 = vld [vmem:[%s17258_s14 + $0x80] sm:$0xf0] }
  0xc0   : > { %v8037_v42 = vor.u32 %v10318_v41, %v8036_v36 }
  0xc1   : > { %v762_v56 = vpop.f32.mrf.mxu2 }
  0xc2   : > { %v763_v57 = vadd.f32 %v762_v56, %v11701_v46  ;;  %v707_v59 = vpop.f32.mrf.mxu0  ;;  %v736_v60 = vpop.f32.mrf.mxu1  ;;  %1488 = vmatpush.bf16.msra.mxu3 %v8037_v42  ;;  %v10322_v56 = vld [vmem:[%s17258_s14 + $0xa0] sm:$0xf0]  ;;  %v10320_v42 = vld [vmem:[%s17258_s14 + $0x94] sm:$0xf] }
  0xc3   : > { %v708_v61 = vadd.f32 %v707_v59, %v11693_v39  ;;  %v737_v62 = vadd.f32 %v736_v60, %v11695_v40 }
  0xc4   : > { %v892_v47 = vpop.f32.mrf.mxu3  ;;  %785 = vst [vmem:[#allocation2 + $0x28] sm:$0xff] %v763_v57 }
  0xc5   : > { %v893_v48 = vadd.f32 %v892_v47, %v11669_v24  ;;  %786 = vst [vmem:[#allocation2 + $0x30] sm:$0xff] %v708_v61 }
  0xc6   : > { %787 = vst [vmem:[#allocation2 + $0x38] sm:$0xff] %v737_v62  ;;  %1489 = vmatpush.bf16.msra.mxu3 %v8025_v51 }
  0xc7   : > { %971 = vst [vmem:[#allocation3 + $0x30] sm:$0xff] %v893_v48 }
  0xc9   : > { %v765_v37 = vpop.f32.mrf.mxu2 }
  0xca   : > { %v766_v2 = vadd.f32 %v765_v37, %v11701_v46  ;;  %v709_v3 = vpop.f32.mrf.mxu0  ;;  %v738_v4 = vpop.f32.mrf.mxu1  ;;  %1490 = vmatpush.bf16.msra.mxu3 %v8013_v53  ;;  %v8000_v37 = vld [vmem:[%s17258_s14 + $0x30] sm:$0xf] }
  0xcb   : > { %v710_v5 = vadd.f32 %v709_v3, %v11693_v39  ;;  %v739_v7 = vadd.f32 %v738_v4, %v11695_v40 }
  0xcc   : > { %v894_v54 = vpop.f32.mrf.mxu3  ;;  %788 = vst [vmem:[#allocation2 + $0x40] sm:$0xff] %v766_v2  ;;  %v10309_v2 = vld [vmem:[%s17258_s14 + $0x38] sm:$0xf0] }
  0xcd   : > { %v895_v55 = vadd.f32 %v894_v54, %v11669_v24  ;;  %789 = vst [vmem:[#allocation2 + $0x48] sm:$0xff] %v710_v5  ;;  %v8001_v3 = vor.u32 %v10309_v2, %v8000_v37  ;;  %v11787_v5 = vperm.slane %v11660_v21, 1  ;;  %v10317_v37 = vld [vmem:[%s17258_s14 + $0x7c] sm:$0xf]  ;;  %v8038_v2 = vld [vmem:[%s17258_s14 + $0x84] sm:$0xf0] }
  0xce   : > { %790 = vst [vmem:[#allocation2 + $0x50] sm:$0xff] %v739_v7  ;;  %v11790_v7 = vperm.slane %v11660_v21, 2 }
  0xcf   : > { %974 = vst [vmem:[#allocation3 + $0x48] sm:$0xff] %v895_v55  ;;  %v8056_v55 = vld [vmem:[%s17258_s14 + $0x98] sm:$0xf]  ;;  %1491 = vmatpush.bf16.msra.mxu3 %v8001_v3  ;;  %v10341_v3 = vld [vmem:[%s17259_s15 + $0x7c] sm:$0xf] }
  0xd0   : > { %v8057_v61 = vor.u32 %v10322_v56, %v8056_v55  ;;  %v10344_v55 = vld [vmem:[%s17259_s15 + $0x94] sm:$0xf]  ;;  %v8146_v56 = vld [vmem:[%s17259_s15 + $0x9c] sm:$0xf0] }
  0xd1   : > { %v767_v10 = vpop.f32.mrf.mxu2 }
  0xd2   : > { %v768_v13 = vadd.f32 %v767_v10, %v11701_v46  ;;  %v712_v14 = vpop.f32.mrf.mxu0  ;;  %v741_v15 = vpop.f32.mrf.mxu1  ;;  %1515 = vmatpush.bf16.msra.mxu1 %v8057_v61  ;;  %v8032_v10 = vld [vmem:[%s17258_s14 + $0x68] sm:$0xf] }
  0xd3   : > { %v713_v16 = vadd.f32 %v712_v14, %v11693_v39  ;;  %v742_v1 = vadd.f32 %v741_v15, %v11695_v40 }
  0xd4   : > { %v897_v63 = vpop.f32.mrf.mxu3  ;;  %791 = vst [vmem:[#allocation2 + $0x58] sm:$0xff] %v768_v13  ;;  %v10316_v13 = vld [vmem:[%s17258_s14 + $0x70] sm:$0xf0] }
  0xd5   : > { %v898_v0 = vadd.f32 %v897_v63, %v11669_v24  ;;  %792 = vst [vmem:[#allocation2 + $0x60] sm:$0xff] %v713_v16  ;;  %v8033_v16 = vor.u32 %v10316_v13, %v8032_v10  ;;  %v10307_v10 = vld [vmem:[%s17258_s14 + $0x28] sm:$0xf0] }
  0xd6   : > { %793 = vst [vmem:[#allocation2 + $0x68] sm:$0xff] %v742_v1  ;;  %v7988_v1 = vld [vmem:[%s17258_s14 + $0x18] sm:$0xf] }
  0xd7   : > { %977 = vst [vmem:[#allocation3 + $0x60] sm:$0xff] %v898_v0 }
  0xd9   : > { %v770_v26 = vpop.f32.mrf.mxu2 }
  0xda   : > { %v771_v28 = vadd.f32 %v770_v26, %v11701_v46  ;;  %v714_v29 = vpop.f32.mrf.mxu0  ;;  %v743_v30 = vpop.f32.mrf.mxu1  ;;  %v8065_v26 = vor.u32 %v10323_v22, %v8062_v23  ;;  %v8122_v22 = vld [vmem:[%s17259_s15 + $0x6c] sm:$0xf0] }
  0xdb   : > { %v715_v31 = vadd.f32 %v714_v29, %v11693_v39  ;;  %v744_v6 = vadd.f32 %v743_v30, %v11695_v40  ;;  %v10303_v29 = vld [vmem:[%s17258_s14 + $0x8] sm:$0xf0] }
  0xdc   : > { %v899_v8 = vpop.f32.mrf.mxu3  ;;  %794 = vst [vmem:[#allocation2 + $0x70] sm:$0xff] %v771_v28  ;;  %v7976_v28 = vld [vmem:[%s17258_s14] sm:$0xf]  ;;  %1500 = vmatpush.bf16.msra.mxu0 %v8065_v26  ;;  %v7984_v26 = vld [vmem:[%s17258_s14 + $0x8] sm:$0xf] }
  0xdd   : > { %v900_v9 = vadd.f32 %v899_v8, %v11669_v24  ;;  %795 = vst [vmem:[#allocation2 + $0x78] sm:$0xff] %v715_v31  ;;  %v7977_v30 = vor.u32 %v10303_v29, %v7976_v28  ;;  %v10347_v31 = vld [vmem:[%s17259_s15 + $0xac] sm:$0xf]  ;;  %v10304_v28 = vld [vmem:[%s17258_s14 + $0x10] sm:$0xf0] }
  0xde   : > { %796 = vst [vmem:[#allocation2 + $0x80] sm:$0xff] %v744_v6  ;;  %v8158_v6 = vld [vmem:[%s17259_s15 + $0xb4] sm:$0xf0]  ;;  %v10311_v29 = vld [vmem:[%s17258_s14 + $0x4c] sm:$0xf] }
  0xdf   : > { %980 = vst [vmem:[#allocation3 + $0x78] sm:$0xff] %v900_v9  ;;  %v11797_v9 = vld [vmem:[%s17257_s13] sm:$0x7] }
  0xe0   : > { %v1047_v25 = vperm.slane %v11797_v9, 0 }
  0xe1   : > { %v772_v43 = vpop.f32.mrf.mxu2 }
  0xe2   : > { %v773_v44 = vadd.f32 %v772_v43, %v11701_v46  ;;  %v717_v45 = vpop.f32.mrf.mxu0  ;;  %v746_v47 = vpop.f32.mrf.mxu1  ;;  %v8050_v43 = vld [vmem:[%s17258_s14 + $0x9c] sm:$0xf0] }
  0xe3   : > { %v747_v48 = vadd.f32 %v746_v47, %v11695_v40 }
  0xe4   : > { %v902_v58 = vpop.f32.mrf.mxu3  ;;  %797 = vst [vmem:[#allocation2 + $0x88] sm:$0xff] %v773_v44 }
  0xe5   : > { %v903_v19 = vadd.f32 %v902_v58, %v11669_v24  ;;  %799 = vst [vmem:[#allocation2 + $0x98] sm:$0xff] %v747_v48  ;;  %v10306_v58 = vld [vmem:[%s17258_s14 + $0x20] sm:$0xf0] }
  0xe7   : > { %983 = vst [vmem:[#allocation3 + $0x90] sm:$0xff] %v903_v19  ;;  %v7989_v19 = vor.u32 %v10306_v58, %v7988_v1  ;;  %v10314_v1 = vld [vmem:[%s17258_s14 + $0x64] sm:$0xf]  ;;  %v8026_v58 = vld [vmem:[%s17258_s14 + $0x6c] sm:$0xf0] }
  0xe9   : > { %v775_v54 = vpop.f32.mrf.mxu2  ;;  %1492 = vmatpush.bf16.msra.mxu3 %v7989_v19 }
  0xea   : > { %v776_v57 = vadd.f32 %v775_v54, %v11701_v46  ;;  %v719_v59 = vpop.f32.mrf.mxu0  ;;  %v748_v60 = vpop.f32.mrf.mxu1 }
  0xeb   : > { %v720_v62 = vadd.f32 %v719_v59, %v11693_v39  ;;  %v749_v63 = vadd.f32 %v748_v60, %v11695_v40  ;;  %v10319_v40 = vld [vmem:[%s17258_s14 + $0x88] sm:$0xf0]  ;;  %v8149_v60 = vor.u32 %v10344_v55, %v8146_v56  ;;  %v8098_v55 = vld [vmem:[%s17259_s15 + $0x3c] sm:$0xf0] }
  0xec   : > { %v904_v34 = vpop.f32.mrf.mxu3  ;;  %800 = vst [vmem:[#allocation2 + $0xa0] sm:$0xff] %v776_v57 }
  0xed   : > { %v905_v35 = vadd.f32 %v904_v34, %v11669_v24  ;;  %v718_v24 = vadd.f32 %v717_v45, %v11693_v39  ;;  %801 = vst [vmem:[#allocation2 + $0xa8] sm:$0xff] %v720_v62  ;;  %v8044_v39 = vld [vmem:[%s17258_s14 + $0x80] sm:$0xf]  ;;  %v10313_v34 = vld [vmem:[%s17258_s14 + $0x58] sm:$0xf0]  ;;  %1493 = vmatpush.bf16.msra.mxu3 %v7977_v30 }
  0xee   : > { %802 = vst [vmem:[#allocation2 + $0xb0] sm:$0xff] %v749_v63  ;;  %v8045_v4 = vor.u32 %v10319_v40, %v8044_v39  ;;  %v8021_v41 = vor.u32 %v10313_v34, %v8020_v33  ;;  %v8008_v62 = vld [vmem:[%s17258_s14 + $0x38] sm:$0xf]  ;;  %v10310_v63 = vld [vmem:[%s17258_s14 + $0x40] sm:$0xf0]  ;;  %v8041_v40 = vor.u32 %v10317_v37, %v8038_v2 }
  0xef   : > { %986 = vst [vmem:[#allocation3 + $0xa8] sm:$0xff] %v905_v35  ;;  %v8161_v35 = vor.u32 %v10347_v31, %v8158_v6  ;;  %v8014_v30 = vld [vmem:[%s17258_s14 + $0x54] sm:$0xf0] }
  0xf0   : > { %798 = vst [vmem:[#allocation2 + $0x90] sm:$0xff] %v718_v24  ;;  %1516 = vmatpush.bf16.msra.mxu1 %v8045_v4  ;;  %v8053_v24 = vor.u32 %v10320_v42, %v8050_v43  ;;  %v8134_v4 = vld [vmem:[%s17259_s15 + $0x84] sm:$0xf0] }
  0xf1   : > { %v777_v8 = vpop.f32.mrf.mxu2  ;;  %1711 = vmatpush.bf16.msrb.mxu3 %v8161_v35  ;;  %v8017_v35 = vor.u32 %v10311_v29, %v8014_v30 }
  0xf2   : > { %v778_v21 = vadd.f32 %v777_v8, %v11701_v46  ;;  %v916_v14 = vpop.f32.mrf.mxu0  ;;  %v945_v15 = vpop.f32.mrf.mxu1  ;;  %v1048_v46 = vperm.slane %v11797_v9, 1  ;;  %1501 = vmatpush.bf16.msra.mxu0 %v8053_v24  ;;  %v7996_v8 = vld [vmem:[%s17258_s14 + $0x20] sm:$0xf]  ;;  %v10335_v24 = vld [vmem:[%s17259_s15 + $0x4c] sm:$0xf] }
  0xf3   : > { %v917_v17 = vadd.f32 %v916_v14, %v11787_v5  ;;  %v946_v18 = vadd.f32 %v945_v15, %v11790_v7  ;;  %v8137_v15 = vor.u32 %v10341_v3, %v8134_v4  ;;  %v8235_v4 = vld [vmem:[%s17281_s29 + $0x78] sm:$0xf] }
  0xf4   : > { %v1204_v0 = vpop.f32.mrf.mxu3  ;;  %803 = vst [vmem:[#allocation2 + $0xb8] sm:$0xff] %v778_v21  ;;  %1517 = vmatpush.bf16.msra.mxu1 %v8033_v16  ;;  %v7997_v16 = vor.u32 %v10307_v10, %v7996_v8 }
  0xf5   : > { %966 = vst [vmem:[#allocation3 + $0x8] sm:$0xff] %v917_v17  ;;  %v1205_v27 = vadd.f32 %v1204_v0, %v1048_v46  ;;  %1712 = vmatpush.bf16.msrb.mxu3 %v8149_v60  ;;  %v8009_v0 = vor.u32 %v10310_v63, %v8008_v62  ;;  %v7990_v62 = vld [vmem:[%s17258_s14 + $0x24] sm:$0xf0] }
  0xf6   : > { %967 = vst [vmem:[#allocation3 + $0x10] sm:$0xff] %v946_v18  ;;  %1502 = vmatpush.bf16.msra.mxu0 %v8041_v40 }
  0xf8   : > { %1518 = vmatpush.bf16.msra.mxu1 %v8021_v41 }
  0xf9   : > { %v1190_v36 = vpop.f32.mrf.mxu2  ;;  %1713 = vmatpush.bf16.msrb.mxu3 %v8137_v15  ;;  %v10329_v15 = vld [vmem:[%s17259_s15 + $0x1c] sm:$0xf] }
  0xfa   : > { %v1191_v44 = vadd.f32 %v1190_v36, %v1047_v25  ;;  %v918_v45 = vpop.f32.mrf.mxu0  ;;  %v947_v47 = vpop.f32.mrf.mxu1  ;;  %v10373_v36 = vld [vmem:[%s17281_s29 + $0xb0] sm:$0xf0] }
  0xfb   : > { %v1007_v48 = vld [vmem:[%s11849_s3 + $0x8] sm:$0xff]  ;;  %v1006_v49 = vld [vmem:[%s11849_s3] sm:$0xff]  ;;  %v919_v50 = vadd.f32 %v918_v45, %v11787_v5  ;;  %v948_v51 = vadd.f32 %v947_v47, %v11790_v7  ;;  %v1009_v17 = vld [vmem:[%s11849_s3 + $0x18] sm:$0xff] }
  0xfc   : > { %v1206_v20 = vpop.f32.mrf.mxu3  ;;  %v1010_v52 = vld [vmem:[%s11849_s3 + $0x20] sm:$0xff]  ;;  %v1263_v11 = vadd.f32 %v1205_v27, %v1007_v48  ;;  %v1223_v53 = vadd.f32 %v1191_v44, %v1006_v49  ;;  %1519 = vmatpush.bf16.msra.mxu1 %v8009_v0  ;;  %v7985_v27 = vor.u32 %v10304_v28, %v7984_v26  ;;  %v8110_v48 = vld [vmem:[%s17259_s15 + $0x54] sm:$0xf0]  ;;  %v10308_v49 = vld [vmem:[%s17258_s14 + $0x34] sm:$0xf] }
  0xfd   : > { %v1207_v32 = vadd.f32 %v1206_v20, %v1048_v46  ;;  %969 = vst [vmem:[#allocation3 + $0x20] sm:$0xff] %v919_v50  ;;  %v8029_v46 = vor.u32 %v10314_v1, %v8026_v58  ;;  %v10338_v20 = vld [vmem:[%s17259_s15 + $0x64] sm:$0xf]  ;;  %v8002_v50 = vld [vmem:[%s17258_s14 + $0x3c] sm:$0xf0]  ;;  %v8113_v56 = vor.u32 %v10335_v24, %v8110_v48  ;;  %v1049_v1 = vperm.slane %v11797_v9, 2 }
  0xfe   : > { %v7972_v57 = vmul.f32 -1.442695, %v1263_v11  ;;  %v7970_v59 = vmul.f32 -1.442695, %v1223_v53  ;;  %970 = vst [vmem:[#allocation3 + $0x28] sm:$0xff] %v948_v51 }
  0xff   : > { %v1264_v54 = vadd.f32 %v1207_v32, %v1010_v52  ;;  %v8259_v32 = vld [vmem:[%s17281_s29 + $0xa8] sm:$0xf]  ;;  %1503 = vmatpush.bf16.msra.mxu0 %v8029_v46  ;;  %v8247_v51 = vld [vmem:[%s17281_s29 + $0x90] sm:$0xf]  ;;  %v10370_v52 = vld [vmem:[%s17281_s29 + $0x98] sm:$0xf0] }
 0x100   : > { %10871 = vpow2.f32 %v7972_v57  ;;  %1520 = vmatpush.bf16.msra.mxu1 %v7997_v16  ;;  %v8260_v43 = vor.u32 %v10373_v36, %v8259_v32  ;;  %v8248_v60 = vor.u32 %v10370_v52, %v8247_v51  ;;  %v8086_v16 = vld [vmem:[%s17259_s15 + $0x24] sm:$0xf0]  ;;  %v10302_v46 = vld [vmem:[%s17258_s14 + $0x4] sm:$0xf] }
 0x101   : > { %v7973_v61 = vmul.f32 -1.442695, %v1264_v54  ;;  %10873 = vpow2.f32 %v7970_v59  ;;  %v1192_v39 = vpop.f32.mrf.mxu2  ;;  %v10332_v54 = vld [vmem:[%s17259_s15 + $0x34] sm:$0xf]  ;;  %v8005_v59 = vor.u32 %v10308_v49, %v8002_v50  ;;  %v8089_v30 = vor.u32 %v10329_v15, %v8086_v16  ;;  %v8211_v24 = vld [vmem:[%s17281_s29 + $0x48] sm:$0xf] }
 0x102   : > { %v1193_v13 = vadd.f32 %v1192_v39, %v1047_v25  ;;  %v921_v21 = vpop.f32.mrf.mxu0  ;;  %v950_v14 = vpop.f32.mrf.mxu1  ;;  %v8125_v25 = vor.u32 %v10338_v20, %v8122_v22  ;;  %v8101_v37 = vor.u32 %v10332_v54, %v8098_v55  ;;  %v7978_v20 = vld [vmem:[%s17258_s14 + $0xc] sm:$0xf0] }
 0x103   : > { %10875 = vpow2.f32 %v7973_v61  ;;  %v922_v18 = vadd.f32 %v921_v21, %v11787_v5  ;;  %v951_v19 = vadd.f32 %v950_v14, %v11790_v7  ;;  %1504 = vmatpush.bf16.msra.mxu0 %v8017_v35  ;;  %v10305_v61 = vld [vmem:[%s17258_s14 + $0x1c] sm:$0xf]  ;;  %v10367_v14 = vld [vmem:[%s17281_s29 + $0x80] sm:$0xf0]  ;;  %v7981_v32 = vor.u32 %v10302_v46, %v7978_v20  ;;  %v1008_v55 = vld [vmem:[%s11849_s3 + $0x10] sm:$0xff] }
 0x104   : > { %v1224_v23 = vadd.f32 %v1193_v13, %v1009_v17  ;;  %1714 = vmatpush.bf16.msrb.mxu3 %v8125_v25  ;;  %1521 = vmatpush.bf16.msra.mxu1 %v7985_v27  ;;  %v7993_v3 = vor.u32 %v10305_v61, %v7990_v62  ;;  %v10364_v25 = vld [vmem:[%s17281_s29 + $0x68] sm:$0xf0]  ;;  %v8236_v29 = vor.u32 %v10367_v14, %v8235_v4  ;;  %v8164_v61 = vld [vmem:[%s17259_s15 + $0xb0] sm:$0xf]  ;;  %v10349_v62 = vld [vmem:[%s17259_s15 + $0xb8] sm:$0xf0] }
 0x105   : > { %972 = vst [vmem:[#allocation3 + $0x38] sm:$0xff] %v922_v18  ;;  %v8165_v16 = vor.u32 %v10349_v62, %v8164_v61  ;;  %v8187_v20 = vld [vmem:[%s17281_s29 + $0x18] sm:$0xf] }
 0x106   : > { %v10872_v31 = vpop.eup %10871  ;;  %v7971_v6 = vmul.f32 -1.442695, %v1224_v23  ;;  %973 = vst [vmem:[#allocation3 + $0x40] sm:$0xff] %v951_v19  ;;  %v8223_v23 = vld [vmem:[%s17281_s29 + $0x60] sm:$0xf] }
 0x107   : > { %v10874_v33 = vpop.eup %10873  ;;  %v11916_v34 = vadd.f32 1.0, %v10872_v31  ;;  %1505 = vmatpush.bf16.msra.mxu0 %v8005_v59  ;;  %v10326_v31 = vld [vmem:[%s17259_s15 + $0x4] sm:$0xf] }
 0x108   : > { %v11921_v42 = vadd.f32 1.0, %v10874_v33  ;;  %10877 = vpow2.f32 %v7971_v6  ;;  %2020 = vmatpush.bf16.msrb.mxu1 %v8260_v43  ;;  %1715 = vmatpush.bf16.msrb.mxu3 %v8113_v56  ;;  %v8074_v6 = vld [vmem:[%s17259_s15 + $0xc] sm:$0xf0] }
 0x109   : > { %v10876_v41 = vpop.eup %10875  ;;  %10879 = vrcp.f32 %v11916_v34  ;;  %v1218_v58 = vpop.f32.mrf.mxu2  ;;  %vm1278_vm9 = vweird.f32 %v11916_v34 }
 0x10a   : > { %v11924_v44 = vadd.f32 1.0, %v10876_v41  ;;  %10881 = vrcp.f32 %v11921_v42  ;;  %v923_v45 = vpop.f32.mrf.mxu0  ;;  %v952_v47 = vpop.f32.mrf.mxu1  ;;  %v1242_v40 = vand.u32 2147483647, %v11921_v42  ;;  %v1244_v22 = vand.u32 2147483648, %v11921_v42 }
 0x10b   : > { %v924_v11 = vadd.f32 %v923_v45, %v11787_v5  ;;  %v953_v53 = vadd.f32 %v952_v47, %v11790_v7  ;;  %1506 = vmatpush.bf16.msra.mxu0 %v7993_v3  ;;  %v1219_v35 = vadd.f32 %v1218_v58, %v1049_v1  ;;  %vm1238_vm5 = vweird.f32 %v11921_v42  ;;  %v8199_v3 = vld [vmem:[%s17281_s29 + $0x30] sm:$0xf] }
 0x10c   : > { %10883 = vrcp.f32 %v11924_v44  ;;  %2021 = vmatpush.bf16.msrb.mxu1 %v8248_v60  ;;  %1716 = vmatpush.bf16.msrb.mxu3 %v8101_v37  ;;  %v8224_v41 = vor.u32 %v10364_v25, %v8223_v23  ;;  %v1245_v43 = vor.u32 1.1754944e-38, %v1244_v22  ;;  %v8077_v47 = vor.u32 %v10326_v31, %v8074_v6  ;;  %v10355_v22 = vld [vmem:[%s17281_s29 + $0x20] sm:$0xf0]  ;;  %v8140_v25 = vld [vmem:[%s17259_s15 + $0x80] sm:$0xf] }
 0x10d   : > { %975 = vst [vmem:[#allocation3 + $0x50] sm:$0xff] %v924_v11  ;;  %vm1243_vm7 = vcmp.eq.f32.partialorder %v1242_v40, 8.507059e+37  ;;  %v1284_v40 = vand.u32 2147483648, %v11916_v34  ;;  %vm1293_vm10 = vweird.f32 %v11924_v44  ;;  %v1282_v23 = vand.u32 2147483647, %v11916_v34 }
 0x10e   : > { %v10878_v57 = vpop.eup %10877  ;;  %976 = vst [vmem:[#allocation3 + $0x58] sm:$0xff] %v953_v53 }
 0x10f   : > { %v11960_v63 = vpop.eup %10879  ;;  %v11962_v0 = vadd.f32 1.0, %v10878_v57  ;;  %1507 = vmatpush.bf16.msra.mxu0 %v7981_v32  ;;  %vm1283_vm2 = vcmp.eq.f32.partialorder %v1282_v23, 8.507059e+37  ;;  %v10368_v23 = vld [vmem:[%s17281_s29 + $0x88] sm:$0xf0] }
 0x110   : > { %v10882_v2 = vpop.eup %10881  ;;  %v1274_v10 = vmul.f32 %v11960_v63, %v11916_v34  ;;  %2022 = vmatpush.bf16.msrb.mxu1 %v8236_v29  ;;  %1717 = vmatpush.bf16.msrb.mxu3 %v8089_v30  ;;  %vm1279_vm12 = vweird.f32 %v11960_v63  ;;  %v1299_v29 = vand.u32 2147483648, %v11924_v44  ;;  %v1297_v30 = vand.u32 2147483647, %v11924_v44 }
 0x111   : > { %10885 = vrcp.f32 %v11962_v0  ;;  %v1234_v39 = vmul.f32 %v10882_v2, %v11921_v42  ;;  %vm1239_vm4 = vweird.f32 %v10882_v2  ;;  %v10361_v42 = vld [vmem:[%s17281_s29 + $0x50] sm:$0xf0]  ;;  %v1259_v11 = vand.u32 2147483648, %v11962_v0  ;;  %vm12079_vm0 = vmor %vm1278_vm9, %vm1279_vm12 }
 0x112   : > { %v11970_v8 = vpop.eup %10883  ;;  %v926_v13 = vpop.f32.mrf.mxu0  ;;  %v1275_v27 = vsub.f32 1.0, %v1274_v10  ;;  %vm1240_vm6 = vmor %vm1238_vm5, %vm1239_vm4  ;;  %v8212_v60 = vor.u32 %v10361_v42, %v8211_v24  ;;  %vm1253_vm11 = vweird.f32 %v11962_v0  ;;  %v10352_v24 = vld [vmem:[%s17281_s29 + $0x8] sm:$0xf0]  ;;  %v8128_v42 = vld [vmem:[%s17259_s15 + $0x68] sm:$0xf]  ;;  %vm1298_vm3 = vcmp.eq.f32.partialorder %v1297_v30, 8.507059e+37 }
 0x113   : > { %v955_v21 = vpop.f32.mrf.mxu1  ;;  %v1235_v17 = vsub.f32 1.0, %v1234_v39  ;;  %v927_v18 = vadd.f32 %v926_v13, %v11787_v5  ;;  %v1289_v26 = vmul.f32 %v11970_v8, %v11924_v44  ;;  %v10358_v39 = vld [vmem:[%s17281_s29 + $0x38] sm:$0xf0]  ;;  %v1220_v10 = vpop.f32.mrf.mxu2  ;;  %v8152_v13 = vld [vmem:[%s17259_s15 + $0x98] sm:$0xf]  ;;  %1725 = vmatpush.bf16.msrb.mxu0 %v8165_v16  ;;  %vm1294_vm15 = vweird.f32 %v11970_v8 }
 0x114   : > { %v956_v19 = vadd.f32 %v955_v21, %v11790_v7  ;;  %v1276_v50 = vmul.f32 %v11960_v63, %v1275_v27  ;;  %2023 = vmatpush.bf16.msrb.mxu1 %v8224_v41  ;;  %1718 = vmatpush.bf16.msrb.mxu3 %v8077_v47  ;;  %v10346_v21 = vld [vmem:[%s17259_s15 + $0xa0] sm:$0xf0]  ;;  %v1285_v41 = vor.u32 1.1754944e-38, %v1284_v40  ;;  %vm12095_vm1 = vmor %vm1293_vm10, %vm1294_vm15 }
 0x115   : > { %v1236_v28 = vmul.f32 %v10882_v2, %v1235_v17  ;;  %978 = vst [vmem:[#allocation3 + $0x68] sm:$0xff] %v927_v18  ;;  %v1290_v48 = vsub.f32 1.0, %v1289_v26  ;;  %v1260_v17 = vor.u32 1.1754944e-38, %v1259_v11  ;;  %v8200_v18 = vor.u32 %v10358_v39, %v8199_v3  ;;  %v10343_v26 = vld [vmem:[%s17259_s15 + $0x88] sm:$0xf0]  ;;  %v11191_v3 = vld [vmem:[#allocation4 + $0x30] sm:$0xff] }
 0x116   : > { %979 = vst [vmem:[#allocation3 + $0x70] sm:$0xff] %v956_v19  ;;  %v1277_v58 = vadd.f32 %v11960_v63, %v1276_v50  ;;  %v1221_v19 = vadd.f32 %v1220_v10, %v1049_v1  ;;  %v8141_v47 = vor.u32 %v10343_v26, %v8140_v25  ;;  %v10328_v25 = vld [vmem:[%s17259_s15 + $0x10] sm:$0xf0] }
 0x117   : > { %v12007_v33 = vpop.eup %10885  ;;  %v1237_v36 = vadd.f32 %v10882_v2, %v1236_v28  ;;  %v1291_v4 = vmul.f32 %v11970_v8, %v1290_v48  ;;  %v10340_v48 = vld [vmem:[%s17259_s15 + $0x70] sm:$0xf0]  ;;  %v8231_v28 = vld [vmem:[%s17281_s29 + $0x68] sm:$0xf] }
 0x118   : > { %v1249_v45 = vmul.f32 %v12007_v33, %v11962_v0  ;;  %vm1254_vm8 = vweird.f32 %v12007_v33  ;;  %2024 = vmatpush.bf16.msrb.mxu1 %v8212_v60  ;;  %v1281_v32 = vsel %vm12079_vm0, %v11960_v63, %v1277_v58  ;;  %v8175_v63 = vld [vmem:[%s17281_s29] sm:$0xf] }
 0x119   : > { %v1241_v49 = vsel %vm1240_vm6, %v10882_v2, %v1237_v36  ;;  %v1257_v2 = vand.u32 2147483647, %v11962_v0  ;;  %vm1255_vm13 = vmor %vm1253_vm11, %vm1254_vm8  ;;  %v8153_v0 = vor.u32 %v10346_v21, %v8152_v13  ;;  %v1292_v1 = vadd.f32 %v11970_v8, %v1291_v4  ;;  %v11192_v4 = vld [vmem:[#allocation4] sm:$0xff]  ;;  %v8267_v13 = vld [vmem:[%s17281_s29 + $0xb0] sm:$0xf] }
 0x11a   : > { %v1246_v51 = vsel %vm1243_vm7, %v1245_v43, %v1241_v49  ;;  %v1250_v52 = vsub.f32 1.0, %v1249_v45  ;;  %v928_v53 = vpop.f32.mrf.mxu0  ;;  %v8188_v36 = vor.u32 %v10355_v22, %v8187_v20  ;;  %v1300_v49 = vor.u32 1.1754944e-38, %v1299_v29  ;;  %v10334_v21 = vld [vmem:[%s17259_s15 + $0x40] sm:$0xf0]  ;;  %v8243_v22 = vld [vmem:[%s17281_s29 + $0x80] sm:$0xf] }
 0x11b   : > { %v957_v54 = vpop.f32.mrf.mxu1  ;;  %v1303_v56 = vmul.f32 %v1246_v51, %v1219_v35  ;;  %v929_v57 = vadd.f32 %v928_v53, %v11787_v5  ;;  %vm1258_vm14 = vcmp.eq.f32.partialorder %v1257_v2, 8.507059e+37  ;;  %1726 = vmatpush.bf16.msrb.mxu0 %v8153_v0  ;;  %v1296_v44 = vsel %vm12095_vm1, %v11970_v8, %v1292_v1  ;;  %v10331_v0 = vld [vmem:[%s17259_s15 + $0x28] sm:$0xf0]  ;;  %v8080_v1 = vld [vmem:[%s17259_s15 + $0x8] sm:$0xf] }
 0x11c   : > { %v958_v59 = vadd.f32 %v957_v54, %v11790_v7  ;;  %v1251_v37 = vmul.f32 %v12007_v33, %v1250_v52  ;;  %2025 = vmatpush.bf16.msrb.mxu1 %v8200_v18  ;;  %v1286_v50 = vsel %vm1283_vm2, %v1285_v41, %v1281_v32  ;;  %v8176_v51 = vor.u32 %v10352_v24, %v8175_v63  ;;  %v8116_v54 = vld [vmem:[%s17259_s15 + $0x50] sm:$0xf]  ;;  %v10371_v18 = vld [vmem:[%s17281_s29 + $0xa0] sm:$0xf0]  ;;  %v10365_v29 = vld [vmem:[%s17281_s29 + $0x70] sm:$0xf0] }
 0x11d   : > { %981 = vst [vmem:[#allocation3 + $0x80] sm:$0xff] %v929_v57  ;;  %v1305_v14 = vadd.f32 %v1303_v56, %v1008_v55  ;;  %v1301_v11 = vsel %vm1298_vm3, %v1300_v49, %v1296_v44  ;;  %v8129_v8 = vor.u32 %v10340_v48, %v8128_v42  ;;  %v1309_v53 = vsub.f32 1.0, %v1286_v50  ;;  %v10337_v55 = vld [vmem:[%s17259_s15 + $0x58] sm:$0xf0]  ;;  %v10356_v41 = vld [vmem:[%s17281_s29 + $0x28] sm:$0xf0] }
 0x11e   : > { %v1252_v15 = vadd.f32 %v12007_v33, %v1251_v37  ;;  %982 = vst [vmem:[#allocation3 + $0x88] sm:$0xff] %v958_v59  ;;  %v1310_v60 = vsub.f32 1.0, %v1301_v11  ;;  %v8117_v2 = vor.u32 %v10337_v55, %v8116_v54  ;;  %v1313_v39 = vmul.f32 %v11191_v3, %v1286_v50  ;;  %v10421_v63 = vld [vmem:[%s17251_s7 + $0xb0] sm:$0xf0]  ;;  %v8443_v42 = vld [vmem:[%s17251_s7 + $0x90] sm:$0xf] }
 0x11f   : > { %10887 = vtanh.f32 %v1305_v14  ;;  %1727 = vmatpush.bf16.msrb.mxu0 %v8141_v47  ;;  %v1314_v10 = vmul.f32 %v11192_v4, %v1301_v11  ;;  %v8244_v26 = vor.u32 %v10368_v23, %v8243_v22  ;;  %v8081_v30 = vor.u32 %v10328_v25, %v8080_v1  ;;  %v8455_v47 = vld [vmem:[%s17251_s7 + $0xa8] sm:$0xf]  ;;  %v10418_v48 = vld [vmem:[%s17251_s7 + $0x98] sm:$0xf0]  ;;  %v8431_v50 = vld [vmem:[%s17251_s7 + $0x78] sm:$0xf] }
 0x120   : > { %v1256_v46 = vsel %vm1255_vm13, %v12007_v33, %v1252_v15  ;;  %v1011_v33 = vld [vmem:[%s11849_s3 + $0x28] sm:$0xff]  ;;  %2026 = vmatpush.bf16.msrb.mxu1 %v8188_v36  ;;  %v8195_v36 = vld [vmem:[%s17281_s29 + $0x20] sm:$0xf]  ;;  %v8456_v44 = vor.u32 %v10421_v63, %v8455_v47  ;;  %v8444_v49 = vor.u32 %v10418_v48, %v8443_v42  ;;  %v998_v55 = vld [vmem:[#allocation4 + $0x28] sm:$0xff]  ;;  %s13092_s3 = scalar_lea.vmem [#allocation2], %s10423_s10  ;;  %s5183_s10 = ssub.s32 5, %s11329_s20 }
 0x121   : > { %v1261_v9 = vsel %vm1258_vm14, %v1260_v17, %v1256_v46  ;;  %v8255_v17 = vld [vmem:[%s17281_s29 + $0x98] sm:$0xf]  ;;  %v8092_v46 = vld [vmem:[%s17259_s15 + $0x20] sm:$0xf]  ;;  %v8196_v43 = vor.u32 %v10356_v41, %v8195_v36  ;;  %v8407_v54 = vld [vmem:[%s17251_s7 + $0x48] sm:$0xf] }
 0x122   : > { %v1304_v31 = vmul.f32 %v1261_v9, %v1221_v19  ;;  %v931_v6 = vpop.f32.mrf.mxu0  ;;  %v8256_v20 = vor.u32 %v10371_v18, %v8255_v17  ;;  %v8093_v9 = vor.u32 %v10331_v0, %v8092_v46  ;;  %v8419_v11 = vld [vmem:[%s17251_s7 + $0x60] sm:$0xf]  ;;  %8170 = vst [vmem:[%s11341_s28 + $0x30] sm:$0xff] %v998_v55  ;;  %v8558_v4 = vld [vmem:[%s17255_s11 + $0xb4] sm:$0xf0] }
 0x123   : > { %v960_v27 = vpop.f32.mrf.mxu1  ;;  %v932_v35 = vadd.f32 %v931_v6, %v11787_v5  ;;  %1728 = vmatpush.bf16.msrb.mxu0 %v8129_v8  ;;  %v8219_v6 = vld [vmem:[%s17281_s29 + $0x50] sm:$0xf]  ;;  %v10412_v8 = vld [vmem:[%s17251_s7 + $0x68] sm:$0xf0]  ;;  %v8371_v3 = vld [vmem:[%s17251_s7] sm:$0xf] }
 0x124   : > { %v961_v34 = vadd.f32 %v960_v27, %v11790_v7  ;;  %v1306_v45 = vadd.f32 %v1304_v31, %v1011_v33  ;;  %2027 = vmatpush.bf16.msrb.mxu1 %v8176_v51  ;;  %v8232_v31 = vor.u32 %v10365_v29, %v8231_v28  ;;  %v10362_v27 = vld [vmem:[%s17281_s29 + $0x58] sm:$0xf0]  ;;  %v8207_v33 = vld [vmem:[%s17281_s29 + $0x38] sm:$0xf]  ;;  %v10415_v51 = vld [vmem:[%s17251_s7 + $0x80] sm:$0xf0] }
 0x125   : > { %984 = vst [vmem:[#allocation3 + $0x98] sm:$0xff] %v932_v35  ;;  %v10888_v52 = vpop.eup %10887  ;;  %v8220_v32 = vor.u32 %v10362_v27, %v8219_v6  ;;  %v10359_v35 = vld [vmem:[%s17281_s29 + $0x40] sm:$0xf0]  ;;  %v10439_v17 = vld [vmem:[%s17255_s11 + $0x7c] sm:$0xf] }
 0x126   : > { %10889 = vtanh.f32 %v1306_v45  ;;  %985 = vst [vmem:[#allocation3 + $0xa0] sm:$0xff] %v961_v34  ;;  %v1311_v59 = vmul.f32 %v10888_v52, %v1309_v53  ;;  %v8208_v34 = vor.u32 %v10359_v35, %v8207_v33  ;;  %v8183_v45 = vld [vmem:[%s17281_s29 + $0x8] sm:$0xf]  ;;  %v8432_v52 = vor.u32 %v10415_v51, %v8431_v50  ;;  %v10436_v46 = vld [vmem:[%s17255_s11 + $0x64] sm:$0xf] }
 0x127   : > { %1729 = vmatpush.bf16.msrb.mxu0 %v8117_v2  ;;  %v8420_v53 = vor.u32 %v10412_v8, %v8419_v11  ;;  %v8534_v18 = vld [vmem:[%s17255_s11 + $0x84] sm:$0xf0]  ;;  %v8522_v0 = vld [vmem:[%s17255_s11 + $0x6c] sm:$0xf0]  ;;  %v10433_v22 = vld [vmem:[%s17255_s11 + $0x4c] sm:$0xf] }
 0x128   : > { %v12134_v14 = vadd.f32 %v1313_v39, %v1311_v59  ;;  %v8395_v59 = vld [vmem:[%s17251_s7 + $0x30] sm:$0xf]  ;;  %v10400_v39 = vld [vmem:[%s17251_s7 + $0x8] sm:$0xf0]  ;;  %v8510_v23 = vld [vmem:[%s17255_s11 + $0x54] sm:$0xf0] }
 0x129   : > { %v8513_v1 = vor.u32 %v10433_v22, %v8510_v23  ;;  %v10430_v25 = vld [vmem:[%s17255_s11 + $0x34] sm:$0xf]  ;;  %v10427_v29 = vld [vmem:[%s17255_s11 + $0x1c] sm:$0xf]  ;;  %v10424_v6 = vld [vmem:[%s17255_s11 + $0x4] sm:$0xf] }
 0x12a   : > { %v933_v56 = vpop.f32.mrf.mxu0  ;;  %v8474_v27 = vld [vmem:[%s17255_s11 + $0xc] sm:$0xf0]  ;;  %v10397_v42 = vld [vmem:[%s17250_s6 + $0xb0] sm:$0xf0]  ;;  %v8335_v8 = vld [vmem:[%s17250_s6 + $0x78] sm:$0xf] }
 0x12b   : > { %v962_v57 = vpop.f32.mrf.mxu1  ;;  %v934_v61 = vadd.f32 %v933_v56, %v11787_v5  ;;  %v10374_v5 = vld [vmem:[%s17281_s29 + $0xb8] sm:$0xf0]  ;;  %v999_v56 = vld [vmem:[#allocation4 + $0x38] sm:$0xff]  ;;  %v8477_v33 = vor.u32 %v10424_v6, %v8474_v27  ;;  %v8347_v51 = vld [vmem:[%s17250_s6 + $0x90] sm:$0xf] }
 0x12c   : > { %v963_v62 = vadd.f32 %v962_v57, %v11790_v7  ;;  %v10890_v37 = vpop.eup %10889  ;;  %v8104_v7 = vld [vmem:[%s17259_s15 + $0x38] sm:$0xf]  ;;  %v8268_v16 = vor.u32 %v10374_v5, %v8267_v13  ;;  %8171 = vst [vmem:[%s11341_s28 + $0x38] sm:$0xff] %v999_v56  ;;  %v10442_v5 = vld [vmem:[%s17255_s11 + $0x94] sm:$0xf] }
 0x12d   : > { %v1312_v40 = vmul.f32 %v10890_v37, %v1310_v60  ;;  %987 = vst [vmem:[#allocation3 + $0xb0] sm:$0xff] %v934_v61  ;;  %v8105_v19 = vor.u32 %v10334_v21, %v8104_v7  ;;  %v10406_v60 = vld [vmem:[%s17251_s7 + $0x38] sm:$0xf0]  ;;  %v10403_v37 = vld [vmem:[%s17251_s7 + $0x20] sm:$0xf0]  ;;  %v12265_v21 = vpack.c.bf16 %v999_v56, %v998_v55 }
 0x12e   : > { %988 = vst [vmem:[#allocation3 + $0xb8] sm:$0xff] %v963_v62  ;;  %v8396_v61 = vor.u32 %v10406_v60, %v8395_v59  ;;  %v8383_v62 = vld [vmem:[%s17251_s7 + $0x18] sm:$0xf]  ;;  %v8546_v7 = vld [vmem:[%s17255_s11 + $0x9c] sm:$0xf0] }
 0x12f   : > { %v12136_v15 = vadd.f32 %v1314_v10, %v1312_v40  ;;  %1730 = vmatpush.bf16.msrb.mxu0 %v8105_v19  ;;  %v8384_v2 = vor.u32 %v10403_v37, %v8383_v62  ;;  %v10445_v40 = vld [vmem:[%s17255_s11 + $0xac] sm:$0xf]  ;;  %v8372_v10 = vor.u32 %v10400_v39, %v8371_v3  ;;  %v8537_v19 = vor.u32 %v10439_v17, %v8534_v18  ;;  %v8323_v56 = vld [vmem:[%s17250_s6 + $0x60] sm:$0xf]  ;;  %v8367_v62 = vld [vmem:[%s17250_s6 + $0xb0] sm:$0xf] }
 0x130   : > { %v8561_v13 = vor.u32 %v10445_v40, %v8558_v4  ;;  %v12348_v59 = vld [vmem:[%s17261_s17] sm:$0x7]  ;;  %v10398_v37 = vld [vmem:[%s17250_s6 + $0xb8] sm:$0xf0]  ;;  %v8311_v4 = vld [vmem:[%s17250_s6 + $0x48] sm:$0xf] }
 0x131   : > { %v12140_v58 = vpack.c.bf16 %v12136_v15, %v12134_v14  ;;  %v8368_v3 = vor.u32 %v10398_v37, %v8367_v62  ;;  %v1563_v39 = vperm.slane %v12348_v59, 0  ;;  %v10395_v17 = vld [vmem:[%s17250_s6 + $0xa0] sm:$0xf0] }
 0x132   : > { %v10379_v6 = vld [vmem:[%s17250_s6 + $0x20] sm:$0xf0] }
 0x133   : > { %1494 = vmatmul.bf16.vlgmr.msra.gmra.mxu3 %v12140_v58  ;;  %1508 = vmatmul.bf16.vlgmr.msra.gmra.mxu0 %v12140_v58 }
 0x134   : > { %1522 = vmatmul.bf16.vlgmr.msra.gmra.mxu1 %v12140_v58  ;;  %2048 = vmatpush.bf16.msra.mxu3 %v8268_v16  ;;  %v8549_v16 = vor.u32 %v10442_v5, %v8546_v7 }
 0x135   : > { %1731 = vmatpush.bf16.msrb.mxu0 %v8093_v9  ;;  %v12286_v9 = vpop.f32.mrf.mxu2  ;;  %v1849_v63 = vld [vmem:[%s12317_s0 + $0x20] sm:$0xff]  ;;  %2353 = vmatpush.bf16.msrb.mxu2 %v8368_v3 }
 0x136   : > { %v1845_v3 = vld [vmem:[%s12317_s0] sm:$0xff] }
 0x138   : > { %2049 = vmatpush.bf16.msra.mxu3 %v8256_v20  ;;  %v8525_v20 = vor.u32 %v10436_v46, %v8522_v0  ;;  %v8299_v46 = vld [vmem:[%s17250_s6 + $0x30] sm:$0xf]  ;;  %v10382_v0 = vld [vmem:[%s17250_s6 + $0x38] sm:$0xf0] }
 0x139   : > { %1732 = vmatpush.bf16.msrb.mxu0 %v8081_v30  ;;  %v8486_v30 = vld [vmem:[%s17255_s11 + $0x24] sm:$0xf0]  ;;  %v8300_v22 = vor.u32 %v10382_v0, %v8299_v46  ;;  %v8307_v0 = vld [vmem:[%s17250_s6 + $0x38] sm:$0xf] }
 0x13c   : > { %2050 = vmatpush.bf16.msra.mxu3 %v8244_v26  ;;  %v8498_v26 = vld [vmem:[%s17255_s11 + $0x3c] sm:$0xf0] }
 0x13d   : > { %v8501_v28 = vor.u32 %v10430_v25, %v8498_v26  ;;  %v8343_v25 = vld [vmem:[%s17250_s6 + $0x80] sm:$0xf] }
 0x140   : > { %2051 = vmatpush.bf16.msra.mxu3 %v8232_v31  ;;  %v8489_v31 = vor.u32 %v10427_v29, %v8486_v30 }
 0x143   : > { %1719 = vmatmul.bf16.vlgmr.msrb.gmra.mxu3 %v11632_v12  ;;  %1733 = vmatmul.bf16.vlgmr.msrb.gmra.mxu0 %v11632_v12  ;;  %v10353_v12 = vld [vmem:[%s17281_s29 + $0x10] sm:$0xf0] }
 0x144   : > { %2028 = vmatmul.bf16.vlgmr.msrb.gmra.mxu1 %v11691_v38  ;;  %2052 = vmatpush.bf16.msra.mxu3 %v8220_v32  ;;  %v8184_v24 = vor.u32 %v10353_v12, %v8183_v45  ;;  %v12306_v32 = vpop.f32.mrf.mxu2  ;;  %v1846_v12 = vld [vmem:[%s12317_s0 + $0x8] sm:$0xff] }
 0x148   : > { %2053 = vmatpush.bf16.msra.mxu3 %v8208_v34  ;;  %v12314_v34 = vld [vmem:[%s17249_s5] sm:$0x7] }
 0x149   : > { %v1887_v36 = vperm.slane %v12314_v34, 1 }
 0x14c   : > { %2054 = vmatpush.bf16.msra.mxu3 %v8196_v43  ;;  %v2043_v35 = vpop.f32.mrf.mxu2 }
 0x14d   : > { %v2044_v43 = vadd.f32 %v2043_v35, %v1887_v36 }
 0x14f   : > { %v2102_v47 = vadd.f32 %v2044_v43, %v1846_v12  ;;  %v8361_v12 = vld [vmem:[%s17250_s6 + $0xb4] sm:$0xf0] }
 0x150   : > { %2055 = vmatpush.bf16.msra.mxu3 %v8184_v24 }
 0x151   : > { %v8271_v48 = vmul.f32 -1.442695, %v2102_v47 }
 0x153   : > { %2056 = vmatmul.bf16.vlgmr.msra.gmra.mxu3 %v11691_v38  ;;  %v10409_v38 = vld [vmem:[%s17251_s7 + $0x50] sm:$0xf0]  ;;  %10891 = vpow2.f32 %v8271_v48 }
 0x154   : > { %2536 = vmatpush.bf16.msrb.mxu3 %v8456_v44  ;;  %v8408_v57 = vor.u32 %v10409_v38, %v8407_v54  ;;  %v2045_v41 = vpop.f32.mrf.mxu2  ;;  %v8359_v44 = vld [vmem:[%s17250_s6 + $0xa8] sm:$0xf] }
 0x155   : > { %v2046_v45 = vadd.f32 %v2045_v41, %v1887_v36  ;;  %v8331_v36 = vld [vmem:[%s17250_s6 + $0x68] sm:$0xf]  ;;  %v10389_v41 = vld [vmem:[%s17250_s6 + $0x70] sm:$0xf0] }
 0x156   : > { %v8332_v43 = vor.u32 %v10389_v41, %v8331_v36 }
 0x157   : > { %v2103_v24 = vadd.f32 %v2046_v45, %v1849_v63  ;;  %v10396_v45 = vld [vmem:[%s17250_s6 + $0xac] sm:$0xf] }
 0x158   : > { %2537 = vmatpush.bf16.msrb.mxu3 %v8444_v49  ;;  %v8360_v49 = vor.u32 %v10397_v42, %v8359_v44  ;;  %v8275_v44 = vld [vmem:[%s17250_s6] sm:$0xf]  ;;  %v10376_v42 = vld [vmem:[%s17250_s6 + $0x8] sm:$0xf0] }
 0x159   : > { %v8272_v50 = vmul.f32 -1.442695, %v2103_v24  ;;  %v10892_v38 = vpop.eup %10891  ;;  %v8364_v24 = vor.u32 %v10396_v45, %v8361_v12  ;;  %v8433_v12 = vld [vmem:[%s17251_s7 + $0x84] sm:$0xf0] }
 0x15a   : > { %2325 = vmatpush.bf16.msra.mxu0 %v8360_v49  ;;  %v1886_v49 = vperm.slane %v12314_v34, 0 }
 0x15b   : > { %10893 = vpow2.f32 %v8272_v50  ;;  %v8276_v50 = vor.u32 %v10376_v42, %v8275_v44  ;;  %2339 = vmatpush.bf16.msra.mxu1 %v8364_v24  ;;  %v10387_v44 = vld [vmem:[%s17250_s6 + $0x64] sm:$0xf] }
 0x15c   : > { %2538 = vmatpush.bf16.msrb.mxu3 %v8432_v52  ;;  %v10394_v52 = vld [vmem:[%s17250_s6 + $0x98] sm:$0xf0] }
 0x15d   : > { %v8348_v11 = vor.u32 %v10394_v52, %v8347_v51  ;;  %v10420_v51 = vld [vmem:[%s17251_s7 + $0xac] sm:$0xf]  ;;  %v8457_v52 = vld [vmem:[%s17251_s7 + $0xb4] sm:$0xf0] }
 0x15f   : > { %2326 = vmatpush.bf16.msra.mxu0 %v8348_v11  ;;  %v1709_v11 = vadd.f32 %v12306_v32, %v1563_v39  ;;  %v8349_v32 = vld [vmem:[%s17250_s6 + $0x9c] sm:$0xf0] }
 0x160   : > { %2539 = vmatpush.bf16.msrb.mxu3 %v8420_v53  ;;  %v10391_v53 = vld [vmem:[%s17250_s6 + $0x80] sm:$0xf0] }
 0x161   : > { %v8336_v54 = vor.u32 %v10391_v53, %v8335_v8  ;;  %v10894_v55 = vpop.eup %10893  ;;  %v8460_v53 = vor.u32 %v10420_v51, %v8457_v52 }
 0x163   : > { %2327 = vmatpush.bf16.msra.mxu0 %v8336_v54  ;;  %v8319_v54 = vld [vmem:[%s17250_s6 + $0x50] sm:$0xf] }
 0x164   : > { %2540 = vmatpush.bf16.msrb.mxu3 %v8408_v57  ;;  %v10388_v57 = vld [vmem:[%s17250_s6 + $0x68] sm:$0xf0] }
 0x165   : > { %v8324_v60 = vor.u32 %v10388_v57, %v8323_v56  ;;  %v10393_v56 = vld [vmem:[%s17250_s6 + $0x94] sm:$0xf] }
 0x167   : > { %2328 = vmatpush.bf16.msra.mxu0 %v8324_v60 }
 0x168   : > { %2541 = vmatpush.bf16.msrb.mxu3 %v8396_v61  ;;  %v12350_v61 = vadd.f32 1.0, %v10892_v38  ;;  %v10386_v38 = vld [vmem:[%s17250_s6 + $0x58] sm:$0xf0] }
 0x16a   : > { %10895 = vrcp.f32 %v12350_v61 }
 0x16c   : > { %2542 = vmatpush.bf16.msrb.mxu3 %v8384_v2  ;;  %v12358_v2 = vadd.f32 1.0, %v10894_v55  ;;  %v8320_v55 = vor.u32 %v10386_v38, %v8319_v54 }
 0x16e   : > { %10897 = vrcp.f32 %v12358_v2  ;;  %v2138_v54 = vand.u32 2147483648, %v12358_v2 }
 0x170   : > { %2543 = vmatpush.bf16.msrb.mxu3 %v8372_v10  ;;  %v10385_v10 = vld [vmem:[%s17250_s6 + $0x50] sm:$0xf0] }
 0x171   : > { %v8312_v5 = vor.u32 %v10385_v10, %v8311_v4  ;;  %v8352_v4 = vor.u32 %v10393_v56, %v8349_v32  ;;  %v10411_v32 = vld [vmem:[%s17251_s7 + $0x64] sm:$0xf] }
 0x173   : > { %2544 = vmatmul.bf16.vlgmr.msrb.gmra.mxu3 %v12265_v21  ;;  %2329 = vmatpush.bf16.msra.mxu0 %v8312_v5 }
 0x174   : > { %2867 = vmatpush.bf16.msra.mxu3 %v8561_v13  ;;  %v12372_v13 = vld [vmem:[%s17260_s16] sm:$0x7]  ;;  %2340 = vmatpush.bf16.msra.mxu1 %v8352_v4  ;;  %v8283_v4 = vld [vmem:[%s17250_s6 + $0x8] sm:$0xf] }
 0x175   : > { %v1352_v7 = vperm.slane %v12372_v13, 0  ;;  %v1353_v10 = vperm.slane %v12372_v13, 1 }
 0x177   : > { %2330 = vmatpush.bf16.msra.mxu0 %v8300_v22 }
 0x178   : > { %2868 = vmatpush.bf16.msra.mxu3 %v8549_v16  ;;  %v8355_v16 = vld [vmem:[%s17250_s6 + $0x98] sm:$0xf] }
 0x179   : > { %v8356_v18 = vor.u32 %v10395_v17, %v8355_v16  ;;  %v10417_v16 = vld [vmem:[%s17251_s7 + $0x94] sm:$0xf]  ;;  %v8445_v17 = vld [vmem:[%s17251_s7 + $0x9c] sm:$0xf0] }
 0x17a   : > { %v8448_v46 = vor.u32 %v10417_v16, %v8445_v17 }
 0x17b   : > { %2354 = vmatpush.bf16.msrb.mxu2 %v8356_v18 }
 0x17c   : > { %2869 = vmatpush.bf16.msra.mxu3 %v8537_v19  ;;  %v1707_v19 = vadd.f32 %v12286_v9, %v1563_v39  ;;  %v10392_v9 = vld [vmem:[%s17250_s6 + $0x88] sm:$0xf0] }
 0x17d   : > { %v8344_v26 = vor.u32 %v10392_v9, %v8343_v25  ;;  %v10390_v9 = vld [vmem:[%s17250_s6 + $0x7c] sm:$0xf] }
 0x17f   : > { %2355 = vmatpush.bf16.msrb.mxu2 %v8344_v26  ;;  %v8337_v26 = vld [vmem:[%s17250_s6 + $0x84] sm:$0xf0] }
 0x180   : > { %2870 = vmatpush.bf16.msra.mxu3 %v8525_v20 }
 0x183   : > { %2356 = vmatpush.bf16.msrb.mxu2 %v8332_v43 }
 0x184   : > { %2871 = vmatpush.bf16.msra.mxu3 %v8513_v1 }
 0x187   : > { %2357 = vmatpush.bf16.msrb.mxu2 %v8320_v55  ;;  %v1565_v55 = vperm.slane %v12348_v59, 2 }
 0x188   : > { %2872 = vmatpush.bf16.msra.mxu3 %v8501_v28  ;;  %v12398_v28 = vpop.eup %10895 }
 0x189   : > { %v12408_v27 = vpop.eup %10897  ;;  %v2113_v47 = vmul.f32 %v12398_v28, %v12350_v61  ;;  %vm2118_vm0 = vweird.f32 %v12398_v28 }
 0x18a   : > { %v2128_v63 = vmul.f32 %v12408_v27, %v12358_v2  ;;  %vm2133_vm3 = vweird.f32 %v12408_v27 }
 0x18b   : > { %v2114_v57 = vsub.f32 1.0, %v2113_v47  ;;  %v8295_v47 = vld [vmem:[%s17250_s6 + $0x20] sm:$0xf] }
 0x18c   : > { %2873 = vmatpush.bf16.msra.mxu3 %v8489_v31  ;;  %v8287_v31 = vld [vmem:[%s17250_s6 + $0x18] sm:$0xf]  ;;  %v2129_v60 = vsub.f32 1.0, %v2128_v63  ;;  %v1354_v63 = vperm.slane %v12372_v13, 2 }
 0x18d   : > { %v2115_v36 = vmul.f32 %v12398_v28, %v2114_v57  ;;  %v8421_v57 = vld [vmem:[%s17251_s7 + $0x6c] sm:$0xf0] }
 0x18e   : > { %v2130_v41 = vmul.f32 %v12408_v27, %v2129_v60 }
 0x190   : > { %2874 = vmatpush.bf16.msra.mxu3 %v8477_v33  ;;  %v8288_v33 = vor.u32 %v10379_v6, %v8287_v31  ;;  %v8340_v31 = vor.u32 %v10390_v9, %v8337_v26  ;;  %v8556_v9 = vld [vmem:[%s17255_s11 + $0xa8] sm:$0xf]  ;;  %v10446_v26 = vld [vmem:[%s17255_s11 + $0xb0] sm:$0xf0] }
 0x192   : > { %2331 = vmatpush.bf16.msra.mxu0 %v8288_v33  ;;  %2341 = vmatpush.bf16.msra.mxu1 %v8340_v31 }
 0x193   : > { %2875 = vmatmul.bf16.vlgmr.msra.gmra.mxu3 %v12140_v58 }
 0x196   : > { %2332 = vmatpush.bf16.msra.mxu0 %v8276_v50  ;;  %v1848_v50 = vld [vmem:[%s12317_s0 + $0x18] sm:$0xff] }
 0x19a   : > { %2550 = vmatpush.bf16.msrb.mxu0 %v8460_v53  ;;  %v8325_v53 = vld [vmem:[%s17250_s6 + $0x6c] sm:$0xf0] }
 0x19b   : > { %v8328_v56 = vor.u32 %v10387_v44, %v8325_v53  ;;  %v10443_v44 = vld [vmem:[%s17255_s11 + $0x98] sm:$0xf0] }
 0x19d   : > { %2342 = vmatpush.bf16.msra.mxu1 %v8328_v56 }
 0x19e   : > { %2551 = vmatpush.bf16.msrb.mxu0 %v8448_v46 }
 0x1b0   : > { %v12390_v23 = vpop.f32.mrf.mxu0 }
 0x1b1   : > { %v12361_v40 = vpop.f32.mrf.mxu1  ;;  %v1510_v43 = vadd.f32 %v12390_v23, %v1353_v10  ;;  %v10380_v23 = vld [vmem:[%s17250_s6 + $0x28] sm:$0xf0] }
 0x1b2   : > { %v12536_v17 = vadd.f32 %v12361_v40, %v1354_v63 }
 0x1b6   : > { %v1495_v20 = vpop.f32.mrf.mxu3 }
 0x1b7   : > { %v1496_v1 = vadd.f32 %v1495_v20, %v1352_v7  ;;  %v10383_v20 = vld [vmem:[%s17250_s6 + $0x40] sm:$0xf0] }
 0x1b8   : > { %v12452_v62 = vpop.f32.mrf.mxu0  ;;  %v8308_v25 = vor.u32 %v10383_v20, %v8307_v0  ;;  %v10384_v0 = vld [vmem:[%s17250_s6 + $0x4c] sm:$0xf]  ;;  %v8313_v20 = vld [vmem:[%s17250_s6 + $0x54] sm:$0xf0] }
 0x1b9   : > { %v1739_v29 = vadd.f32 %v1707_v19, %v1496_v1  ;;  %v12400_v30 = vpop.f32.mrf.mxu1 }
 0x1ba   : > { %2358 = vmatpush.bf16.msrb.mxu2 %v8308_v25  ;;  %v8316_v25 = vor.u32 %v10384_v0, %v8313_v20  ;;  %v12558_v31 = vadd.f32 %v12400_v30, %v1354_v63 }
 0x1bb   : > { %v8166_v35 = vmul.f32 -1.442695, %v1739_v29  ;;  %v2123_v29 = vand.u32 2147483648, %v12350_v61 }
 0x1bc   : > { %2343 = vmatpush.bf16.msra.mxu1 %v8316_v25 }
 0x1bd   : > { %10899 = vpow2.f32 %v8166_v35  ;;  %v10414_v35 = vld [vmem:[%s17251_s7 + $0x7c] sm:$0xf]  ;;  %v12504_v42 = vor.u32 1.1754944e-38, %v2123_v29 }
 0x1be   : > { %v1497_v48 = vpop.f32.mrf.mxu3  ;;  %v8436_v24 = vor.u32 %v10414_v35, %v8433_v12 }
 0x1bf   : > { %v1498_v8 = vadd.f32 %v1497_v48, %v1352_v7  ;;  %v1564_v7 = vperm.slane %v12348_v59, 1 }
 0x1c0   : > { %v1734_v52 = vpop.f32.mrf.mxu0  ;;  %2552 = vmatpush.bf16.msrb.mxu0 %v8436_v24 }
 0x1c1   : > { %v1740_v37 = vadd.f32 %v1709_v11, %v1498_v8  ;;  %v2029_v39 = vpop.f32.mrf.mxu1  ;;  %v2121_v11 = vand.u32 2147483647, %v12350_v61  ;;  %v8296_v8 = vor.u32 %v10380_v23, %v8295_v47  ;;  %v1735_v30 = vadd.f32 %v1734_v52, %v1565_v55  ;;  %v10381_v47 = vld [vmem:[%s17250_s6 + $0x34] sm:$0xf]  ;;  %v8544_v23 = vld [vmem:[%s17255_s11 + $0x90] sm:$0xf] }
 0x1c2   : > { %v2030_v5 = vadd.f32 %v2029_v39, %v1886_v49  ;;  %v12525_v39 = vadd.f32 %v12408_v27, %v2130_v41  ;;  %v8409_v41 = vld [vmem:[%s17251_s7 + $0x54] sm:$0xf0]  ;;  %v10405_v52 = vld [vmem:[%s17251_s7 + $0x34] sm:$0xf] }
 0x1c3   : > { %v10900_v18 = vpop.eup %10899  ;;  %v8167_v19 = vmul.f32 -1.442695, %v1740_v37  ;;  %2359 = vmatpush.bf16.msrb.mxu2 %v8296_v8 }
 0x1c4   : > { %v12471_v22 = vadd.f32 1.0, %v10900_v18  ;;  %v2062_v1 = vadd.f32 %v2030_v5, %v1845_v3  ;;  %v12522_v3 = vadd.f32 %v12398_v28, %v2115_v36  ;;  %v10377_v5 = vld [vmem:[%s17250_s6 + $0x10] sm:$0xf0] }
 0x1c5   : > { %10901 = vpow2.f32 %v8167_v19  ;;  %v8284_v46 = vor.u32 %v10377_v5, %v8283_v4 }
 0x1c6   : > { %10903 = vrcp.f32 %v12471_v22  ;;  %v8269_v6 = vmul.f32 -1.442695, %v2062_v1  ;;  %v1720_v33 = vpop.f32.mrf.mxu3  ;;  %v1512_v1 = vadd.f32 %v12452_v62, %v1353_v10  ;;  %v1758_v10 = vand.u32 2147483647, %v12471_v22 }
 0x1c7   : > { %v1721_v45 = vadd.f32 %v1720_v33, %v1564_v7  ;;  %2360 = vmatpush.bf16.msrb.mxu2 %v8284_v46  ;;  %vm1754_vm5 = vweird.f32 %v12471_v22 }
 0x1c8   : > { %10905 = vpow2.f32 %v8269_v6  ;;  %v10408_v6 = vld [vmem:[%s17251_s7 + $0x4c] sm:$0xf]  ;;  %vm12591_vm6 = vcmp.eq.f32.partialorder %v1758_v10, 8.507059e+37  ;;  %v1736_v56 = vpop.f32.mrf.mxu0  ;;  %v10440_v10 = vld [vmem:[%s17255_s11 + $0x80] sm:$0xf0] }
 0x1c9   : > { %v1779_v48 = vadd.f32 %v1721_v45, %v1510_v43  ;;  %v2031_v51 = vpop.f32.mrf.mxu1  ;;  %v1760_v43 = vand.u32 2147483648, %v12471_v22  ;;  %v8557_v45 = vor.u32 %v10446_v26, %v8556_v9  ;;  %v8412_v12 = vor.u32 %v10408_v6, %v8409_v41  ;;  %v8289_v9 = vld [vmem:[%s17250_s6 + $0x24] sm:$0xf0] }
 0x1ca   : > { %v2032_v38 = vadd.f32 %v2031_v51, %v1886_v49  ;;  %v8424_v49 = vor.u32 %v10411_v32, %v8421_v57  ;;  %v8545_v57 = vor.u32 %v10443_v44, %v8544_v23  ;;  %v12623_v25 = vadd.f32 %v1736_v56, %v1565_v55  ;;  %v8385_v41 = vld [vmem:[%s17251_s7 + $0x24] sm:$0xf0]  ;;  %v8277_v23 = vld [vmem:[%s17250_s6 + $0xc] sm:$0xf0] }
 0x1cb   : > { %v10902_v60 = vpop.eup %10901  ;;  %v8168_v37 = vmul.f32 -1.442695, %v1779_v48  ;;  %2853 = vmatpush.bf16.msra.mxu2 %v8557_v45  ;;  %v1761_v4 = vor.u32 1.1754944e-38, %v1760_v43 }
 0x1cc   : > { %v12533_v16 = vpop.eup %10903  ;;  %v12538_v18 = vadd.f32 1.0, %v10902_v60  ;;  %v2063_v19 = vadd.f32 %v2032_v38, %v1848_v50  ;;  %2553 = vmatpush.bf16.msrb.mxu0 %v8424_v49  ;;  %v8397_v60 = vld [vmem:[%s17251_s7 + $0x3c] sm:$0xf0] }
 0x1cd   : > { %10907 = vpow2.f32 %v8168_v37  ;;  %v1750_v40 = vmul.f32 %v12533_v16, %v12471_v22  ;;  %vm1755_vm4 = vweird.f32 %v12533_v16 }
 0x1ce   : > { %v10906_v29 = vpop.eup %10905  ;;  %10909 = vrcp.f32 %v12538_v18  ;;  %v8270_v13 = vmul.f32 -1.442695, %v2063_v19  ;;  %v1722_v62 = vpop.f32.mrf.mxu3  ;;  %v1773_v50 = vand.u32 2147483647, %v12538_v18  ;;  %v1775_v32 = vand.u32 2147483648, %v12538_v18  ;;  %vm1756_vm7 = vmor %vm1754_vm5, %vm1755_vm4 }
 0x1cf   : > { %v12565_v33 = vadd.f32 1.0, %v10906_v29  ;;  %v1723_v35 = vadd.f32 %v1722_v62, %v1564_v7  ;;  %v1751_v36 = vsub.f32 1.0, %v1750_v40  ;;  %v8301_v7 = vld [vmem:[%s17250_s6 + $0x3c] sm:$0xf0]  ;;  %v8400_v19 = vor.u32 %v10405_v52, %v8397_v60  ;;  %2854 = vmatpush.bf16.msra.mxu2 %v8545_v57  ;;  %v8532_v62 = vld [vmem:[%s17255_s11 + $0x78] sm:$0xf] }
 0x1d0   : > { %10911 = vpow2.f32 %v8270_v13  ;;  %2554 = vmatpush.bf16.msrb.mxu0 %v8412_v12  ;;  %v8304_v51 = vor.u32 %v10381_v47, %v8301_v7  ;;  %v1888_v40 = vperm.slane %v12314_v34, 2  ;;  %vm1769_vm8 = vweird.f32 %v12538_v18 }
 0x1d1   : > { %10913 = vrcp.f32 %v12565_v33  ;;  %v1780_v63 = vadd.f32 %v1723_v35, %v1512_v1  ;;  %v1752_v24 = vmul.f32 %v12533_v16, %v1751_v36  ;;  %v2081_v5 = vand.u32 2147483647, %v12565_v33  ;;  %v10402_v36 = vld [vmem:[%s17251_s7 + $0x1c] sm:$0xf] }
 0x1d2   : > { %2344 = vmatpush.bf16.msra.mxu1 %v8304_v51  ;;  %v2083_v0 = vand.u32 2147483648, %v12565_v33  ;;  %vm12636_vm9 = vcmp.eq.f32.partialorder %v1773_v50, 8.507059e+37  ;;  %v1776_v55 = vor.u32 1.1754944e-38, %v1775_v32  ;;  %vm2077_vm10 = vweird.f32 %v12565_v33 }
 0x1d3   : > { %v10908_v8 = vpop.eup %10907  ;;  %v8169_v53 = vmul.f32 -1.442695, %v1780_v63  ;;  %v1753_v38 = vadd.f32 %v12533_v16, %v1752_v24  ;;  %vm12649_vm11 = vcmp.eq.f32.partialorder %v2081_v5, 8.507059e+37  ;;  %v10375_v24 = vld [vmem:[%s17250_s6 + $0x4] sm:$0xf]  ;;  %v8533_v51 = vor.u32 %v10440_v10, %v8532_v62 }
 0x1d4   : > { %v12604_v37 = vpop.eup %10909  ;;  %v12606_v49 = vadd.f32 1.0, %v10908_v8  ;;  %2555 = vmatpush.bf16.msrb.mxu0 %v8400_v19  ;;  %v2084_v45 = vor.u32 1.1754944e-38, %v2083_v0  ;;  %v8388_v52 = vor.u32 %v10402_v36, %v8385_v41  ;;  %v8280_v60 = vor.u32 %v10375_v24, %v8277_v23  ;;  %v8520_v0 = vld [vmem:[%s17255_s11 + $0x60] sm:$0xf]  ;;  %v8508_v36 = vld [vmem:[%s17255_s11 + $0x48] sm:$0xf] }
 0x1d5   : > { %10915 = vpow2.f32 %v8169_v53  ;;  %v1757_v46 = vsel %vm1756_vm7, %v12533_v16, %v1753_v38  ;;  %v1765_v20 = vmul.f32 %v12604_v37, %v12538_v18  ;;  %v10378_v16 = vld [vmem:[%s17250_s6 + $0x1c] sm:$0xf]  ;;  %vm1770_vm12 = vweird.f32 %v12604_v37  ;;  %2855 = vmatpush.bf16.msra.mxu2 %v8533_v51  ;;  %v10434_v41 = vld [vmem:[%s17255_s11 + $0x50] sm:$0xf0]  ;;  %v8451_v24 = vld [vmem:[%s17251_s7 + $0x98] sm:$0xf] }
 0x1d6   : > { %v10912_v1 = vpop.eup %10911  ;;  %10917 = vrcp.f32 %v12606_v49  ;;  %v1762_v22 = vsel %vm12591_vm6, %v1761_v4, %v1757_v46  ;;  %v1798_v43 = vand.u32 2147483647, %v12606_v49  ;;  %v1800_v12 = vand.u32 2147483648, %v12606_v49  ;;  %v2057_v47 = vpop.f32.mrf.mxu3  ;;  %vm12690_vm15 = vmor %vm1769_vm8, %vm1770_vm12  ;;  %v10419_v23 = vld [vmem:[%s17251_s7 + $0xa0] sm:$0xf0] }
 0x1d7   : > { %v12631_v26 = vpop.eup %10913  ;;  %v12633_v29 = vadd.f32 1.0, %v10912_v1  ;;  %v1819_v13 = vmul.f32 %v1762_v22, %v1735_v30  ;;  %v1766_v30 = vsub.f32 1.0, %v1765_v20  ;;  %v8292_v50 = vor.u32 %v10378_v16, %v8289_v9  ;;  %v10437_v20 = vld [vmem:[%s17255_s11 + $0x68] sm:$0xf0]  ;;  %v10399_v9 = vld [vmem:[%s17251_s7 + $0x4] sm:$0xf] }
 0x1d8   : > { %v2073_v6 = vmul.f32 %v12631_v26, %v12565_v33  ;;  %vm2078_vm13 = vweird.f32 %v12631_v26  ;;  %vm1794_vm14 = vweird.f32 %v12606_v49  ;;  %v1801_v4 = vor.u32 1.1754944e-38, %v1800_v12  ;;  %2556 = vmatpush.bf16.msrb.mxu0 %v8388_v52 }
 0x1d9   : > { %10919 = vrcp.f32 %v12633_v29  ;;  %v1767_v63 = vmul.f32 %v12604_v37, %v1766_v30  ;;  %v1821_v48 = vadd.f32 %v1819_v13, %v12536_v17  ;;  %v2096_v32 = vand.u32 2147483647, %v12633_v29  ;;  %2345 = vmatpush.bf16.msra.mxu1 %v8292_v50  ;;  %vm2079_vm2 = vmor %vm2077_vm10, %vm2078_vm13  ;;  %v8373_v13 = vld [vmem:[%s17251_s7 + $0xc] sm:$0xf0]  ;;  %v10422_v30 = vld [vmem:[%s17251_s7 + $0xb8] sm:$0xf0] }
 0x1da   : > { %v2074_v7 = vsub.f32 1.0, %v2073_v6  ;;  %v2058_v17 = vadd.f32 %v2057_v47, %v1888_v40  ;;  %v2098_v46 = vand.u32 2147483648, %v12633_v29  ;;  %vm12704_vm1 = vcmp.eq.f32.partialorder %v1798_v43, 8.507059e+37  ;;  %v8463_v6 = vld [vmem:[%s17251_s7 + $0xb0] sm:$0xf] }
 0x1db   : > { %v10916_v44 = vpop.eup %10915  ;;  %v1768_v56 = vadd.f32 %v12604_v37, %v1767_v63  ;;  %vm12727_vm4 = vcmp.eq.f32.partialorder %v2096_v32, 8.507059e+37  ;;  %vm2117_vm5 = vweird.f32 %v12350_v61  ;;  %v1847_v50 = vld [vmem:[%s12317_s0 + $0x10] sm:$0xff]  ;;  %vm2132_vm13 = vweird.f32 %v12358_v2  ;;  %v8472_v61 = vld [vmem:[%s17255_s11] sm:$0xf] }
 0x1dc   : > { %v12672_v8 = vpop.eup %10917  ;;  %v12674_v53 = vadd.f32 1.0, %v10916_v44  ;;  %v2075_v38 = vmul.f32 %v12631_v26, %v2074_v7  ;;  %v2099_v47 = vor.u32 1.1754944e-38, %v2098_v46  ;;  %v8521_v7 = vor.u32 %v10437_v20, %v8520_v0  ;;  %v8439_v0 = vld [vmem:[%s17251_s7 + $0x80] sm:$0xf]  ;;  %v10416_v20 = vld [vmem:[%s17251_s7 + $0x88] sm:$0xf0]  ;;  %vm12814_vm12 = vmor %vm2117_vm5, %vm2118_vm0 }
 0x1dd   : > { %v1790_v57 = vmul.f32 %v12672_v8, %v12606_v49  ;;  %v1772_v16 = vsel %vm12690_vm15, %v12604_v37, %v1768_v56  ;;  %vm1795_vm6 = vweird.f32 %v12672_v8  ;;  %2346 = vmatpush.bf16.msra.mxu1 %v8280_v60  ;;  %v8509_v56 = vor.u32 %v10434_v41, %v8508_v36  ;;  %v10431_v60 = vld [vmem:[%s17255_s11 + $0x38] sm:$0xf0] }
 0x1de   : > { %10921 = vrcp.f32 %v12674_v53  ;;  %v2076_v5 = vadd.f32 %v12631_v26, %v2075_v38  ;;  %v1777_v33 = vsel %vm12636_vm9, %v1776_v55, %v1772_v16  ;;  %v1815_v63 = vand.u32 2147483648, %v12674_v53  ;;  %vm12763_vm7 = vmor %vm1794_vm14, %vm1795_vm6  ;;  %v2059_v52 = vpop.f32.mrf.mxu3  ;;  %2856 = vmatpush.bf16.msra.mxu2 %v8521_v7 }
 0x1df   : > { %v12701_v1 = vpop.eup %10919  ;;  %v1791_v18 = vsub.f32 1.0, %v1790_v57  ;;  %10923 = vtanh.f32 %v1821_v48  ;;  %v1820_v55 = vmul.f32 %v1777_v33, %v12623_v25  ;;  %v8464_v25 = vor.u32 %v10422_v30, %v8463_v6  ;;  %vm12828_vm14 = vmor %vm2132_vm13, %vm2133_vm3 }
 0x1e0   : > { %v2080_v62 = vsel %vm2079_vm2, %v12631_v26, %v2076_v5  ;;  %v2088_v10 = vmul.f32 %v12701_v1, %v12633_v29  ;;  %vm2093_vm8 = vweird.f32 %v12701_v1  ;;  %vm2092_vm9 = vweird.f32 %v12633_v29  ;;  %v10428_v29 = vld [vmem:[%s17255_s11 + $0x20] sm:$0xf0] }
 0x1e1   : > { %v1792_v26 = vmul.f32 %v12672_v8, %v1791_v18  ;;  %v2085_v59 = vsel %vm12649_vm11, %v2084_v45, %v2080_v62  ;;  %v8376_v45 = vor.u32 %v10399_v9, %v8373_v13  ;;  %v1822_v51 = vadd.f32 %v1820_v55, %v12558_v31  ;;  %2564 = vmatpush.bf16.msrb.mxu1 %v8464_v25  ;;  %v8496_v31 = vld [vmem:[%s17255_s11 + $0x30] sm:$0xf]  ;;  %vm2094_vm11 = vmor %vm2092_vm9, %vm2093_vm8  ;;  %v10438_v55 = vld [vmem:[%s17255_s11 + $0x70] sm:$0xf0] }
 0x1e2   : > { %v2142_v43 = vmul.f32 %v2085_v59, %v2058_v17  ;;  %v2089_v12 = vsub.f32 1.0, %v2088_v10  ;;  %v1813_v17 = vand.u32 2147483647, %v12674_v53  ;;  %v8452_v46 = vor.u32 %v10419_v23, %v8451_v24  ;;  %2857 = vmatpush.bf16.msra.mxu2 %v8509_v56  ;;  %v10413_v59 = vld [vmem:[%s17251_s7 + $0x70] sm:$0xf0] }
 0x1e3   : > { %v1793_v35 = vadd.f32 %v12672_v8, %v1792_v26  ;;  %2557 = vmatpush.bf16.msrb.mxu0 %v8376_v45  ;;  %v2060_v22 = vadd.f32 %v2059_v52, %v1888_v40  ;;  %10925 = vtanh.f32 %v1822_v51  ;;  %v8497_v62 = vor.u32 %v10431_v60, %v8496_v31  ;;  %v8484_v40 = vld [vmem:[%s17255_s11 + $0x18] sm:$0xf]  ;;  %v8427_v26 = vld [vmem:[%s17251_s7 + $0x68] sm:$0xf]  ;;  %v11195_v60 = vld [vmem:[#allocation4 + $0x8] sm:$0xff] }
 0x1e4   : > { %v12757_v44 = vpop.eup %10921  ;;  %v2090_v38 = vmul.f32 %v12701_v1, %v2089_v12  ;;  %v2144_v19 = vadd.f32 %v2142_v43, %v1847_v50  ;;  %v8440_v34 = vor.u32 %v10416_v20, %v8439_v0  ;;  %v2136_v37 = vand.u32 2147483647, %v12358_v2  ;;  %v1850_v12 = vld [vmem:[%s12317_s0 + $0x28] sm:$0xff]  ;;  %v8403_v56 = vld [vmem:[%s17251_s7 + $0x38] sm:$0xf]  ;;  %s4344_s0 = sadd.s32 2, %s11329_s20 }
 0x1e5   : > { %v10924_v32 = vpop.eup %10923  ;;  %v1805_v57 = vmul.f32 %v12757_v44, %v12674_v53  ;;  %v1797_v49 = vsel %vm12763_vm7, %v12672_v8, %v1793_v35  ;;  %vm1810_vm10 = vweird.f32 %v12757_v44  ;;  %2565 = vmatpush.bf16.msrb.mxu1 %v8452_v46  ;;  %vm1809_vm15 = vweird.f32 %v12674_v53  ;;  %v8564_v0 = vld [vmem:[%s17255_s11 + $0xb0] sm:$0xf]  ;;  %v10447_v20 = vld [vmem:[%s17255_s11 + $0xb8] sm:$0xf0] }
 0x1e6   : > { %v1802_v5 = vsel %vm12704_vm1, %v1801_v4, %v1797_v49  ;;  %v2091_v8 = vadd.f32 %v12701_v1, %v2090_v38  ;;  %v11193_v4 = vld [vmem:[#allocation4 + $0x18] sm:$0xff]  ;;  %10927 = vtanh.f32 %v2144_v19  ;;  %v2120_v41 = vsel %vm12814_vm12, %v12398_v28, %v12522_v3  ;;  %vm12843_vm0 = vmor %vm1809_vm15, %vm1810_vm10  ;;  %2858 = vmatpush.bf16.msra.mxu2 %v8497_v62 }
 0x1e7   : > { %v1806_v18 = vsub.f32 1.0, %v1805_v57  ;;  %v1825_v16 = vsub.f32 1.0, %v1802_v5  ;;  %v1829_v9 = vmul.f32 %v11193_v4, %v1802_v5  ;;  %v1816_v7 = vor.u32 1.1754944e-38, %v1815_v63 }
 0x1e8   : > { %v2095_v13 = vsel %vm2094_vm11, %v12701_v1, %v2091_v8  ;;  %vm2122_vm1 = vcmp.eq.f32.partialorder %v2121_v11, 8.507059e+37  ;;  %v8485_v35 = vor.u32 %v10428_v29, %v8484_v40  ;;  %vm1814_vm2 = vcmp.eq.f32.partialorder %v1813_v17, 8.507059e+37  ;;  %v10425_v11 = vld [vmem:[%s17255_s11 + $0x8] sm:$0xf0]  ;;  %v10401_v40 = vld [vmem:[%s17251_s7 + $0x10] sm:$0xf0] }
 0x1e9   : > { %v1807_v33 = vmul.f32 %v12757_v44, %v1806_v18  ;;  %v1827_v10 = vmul.f32 %v10924_v32, %v1825_v16  ;;  %v2100_v6 = vsel %vm12727_vm4, %v2099_v47, %v2095_v13  ;;  %v2135_v3 = vsel %vm12828_vm14, %v12408_v27, %v12525_v39  ;;  %2566 = vmatpush.bf16.msrb.mxu1 %v8440_v34  ;;  %v10926_v45 = vpop.eup %10925  ;;  %v8415_v27 = vld [vmem:[%s17251_s7 + $0x50] sm:$0xf]  ;;  %v10410_v39 = vld [vmem:[%s17251_s7 + $0x58] sm:$0xf0]  ;;  %v10407_v32 = vld [vmem:[%s17251_s7 + $0x40] sm:$0xf0] }
 0x1ea   : > { %v2143_v30 = vmul.f32 %v2100_v6, %v2060_v22  ;;  %v8428_v63 = vor.u32 %v10413_v59, %v8427_v26  ;;  %v2139_v25 = vor.u32 1.1754944e-38, %v2138_v54  ;;  %v2125_v24 = vsel %vm2122_vm1, %v12504_v42, %v2120_v41  ;;  %2859 = vmatpush.bf16.msra.mxu2 %v8485_v35  ;;  %v11194_v42 = vld [vmem:[#allocation4 + $0x10] sm:$0xff]  ;;  %v11196_v8 = vld [vmem:[#allocation4 + $0x20] sm:$0xff]  ;;  %v8391_v16 = vld [vmem:[%s17251_s7 + $0x20] sm:$0xf] }
 0x1eb   : > { %v12833_v36 = vadd.f32 %v1829_v9, %v1827_v10  ;;  %v1808_v43 = vadd.f32 %v12757_v44, %v1807_v33  ;;  %vm2137_vm3 = vcmp.eq.f32.partialorder %v2136_v37, 8.507059e+37  ;;  %v8473_v51 = vor.u32 %v10425_v11, %v8472_v61  ;;  %v10404_v22 = vld [vmem:[%s17251_s7 + $0x28] sm:$0xf0]  ;;  %v8552_v33 = vld [vmem:[%s17255_s11 + $0x98] sm:$0xf] }
 0x1ec   : > { %v2145_v53 = vadd.f32 %v2143_v30, %v1850_v12  ;;  %v10928_v48 = vpop.eup %10927  ;;  %v2140_v50 = vsel %vm2137_vm3, %v2139_v25, %v2135_v3  ;;  %v2148_v2 = vsub.f32 1.0, %v2125_v24  ;;  %v8416_v38 = vor.u32 %v10410_v39, %v8415_v27  ;;  %v10444_v10 = vld [vmem:[%s17255_s11 + $0xa0] sm:$0xf0]  ;;  %v8379_v34 = vld [vmem:[%s17251_s7 + $0x8] sm:$0xf] }
 0x1ed   : > { %1833 = vst [vmem:[%s11336_s25] sm:$0xff] %v12833_v36  ;;  %v1812_v28 = vsel %vm12843_vm0, %v12757_v44, %v1808_v43  ;;  %2567 = vmatpush.bf16.msrb.mxu1 %v8428_v63  ;;  %v2149_v17 = vsub.f32 1.0, %v2140_v50  ;;  %v2152_v5 = vmul.f32 %v11195_v60, %v2125_v24  ;;  %v2153_v46 = vmul.f32 %v11196_v8, %v2140_v50  ;;  %v8540_v1 = vld [vmem:[%s17255_s11 + $0x80] sm:$0xf]  ;;  %v10441_v37 = vld [vmem:[%s17255_s11 + $0x88] sm:$0xf0] }
 0x1ee   : > { %v1817_v23 = vsel %vm1814_vm2, %v1816_v7, %v1812_v28  ;;  %10929 = vtanh.f32 %v2145_v53  ;;  %v2150_v57 = vmul.f32 %v10928_v48, %v2148_v2  ;;  %2860 = vmatpush.bf16.msra.mxu2 %v8473_v51  ;;  %v8404_v18 = vor.u32 %v10407_v32, %v8403_v56  ;;  %v8528_v59 = vld [vmem:[%s17255_s11 + $0x68] sm:$0xf]  ;;  %v8516_v43 = vld [vmem:[%s17255_s11 + $0x50] sm:$0xf]  ;;  %v10435_v12 = vld [vmem:[%s17255_s11 + $0x58] sm:$0xf0] }
 0x1ef   : > { %v1826_v44 = vsub.f32 1.0, %v1817_v23  ;;  %v1830_v52 = vmul.f32 %v11194_v42, %v1817_v23  ;;  %v8565_v13 = vor.u32 %v10447_v20, %v8564_v0  ;;  %v8392_v6 = vor.u32 %v10404_v22, %v8391_v16  ;;  %v8504_v7 = vld [vmem:[%s17255_s11 + $0x38] sm:$0xf]  ;;  %v10432_v53 = vld [vmem:[%s17255_s11 + $0x40] sm:$0xf0] }
 0x1f0   : > { %v12895_v4 = vadd.f32 %v2152_v5, %v2150_v57  ;;  %v8553_v29 = vor.u32 %v10444_v10, %v8552_v33  ;;  %v8380_v30 = vor.u32 %v10401_v40, %v8379_v34  ;;  %v8541_v26 = vor.u32 %v10441_v37, %v8540_v1  ;;  %v8492_v28 = vld [vmem:[%s17255_s11 + $0x20] sm:$0xf]  ;;  %v10429_v3 = vld [vmem:[%s17255_s11 + $0x28] sm:$0xf0]  ;;  %v8480_v61 = vld [vmem:[%s17255_s11 + $0x8] sm:$0xf] }
 0x1f1   : > { %v1828_v54 = vmul.f32 %v10926_v45, %v1826_v44  ;;  %2568 = vmatpush.bf16.msrb.mxu1 %v8416_v38  ;;  %v8529_v41 = vor.u32 %v10438_v55, %v8528_v59  ;;  %v8517_v47 = vor.u32 %v10435_v12, %v8516_v43  ;;  %v8505_v35 = vor.u32 %v10432_v53, %v8504_v7  ;;  %v8752_v11 = vld [vmem:[%s17259_s15 + $0xa8] sm:$0xf]  ;;  %v10494_v45 = vld [vmem:[%s17259_s15 + $0xb0] sm:$0xf0]  ;;  %v8740_v23 = vld [vmem:[%s17259_s15 + $0x90] sm:$0xf] }
 0x1f2   : > { %v8493_v63 = vor.u32 %v10429_v3, %v8492_v28  ;;  %v8753_v24 = vor.u32 %v10494_v45, %v8752_v11  ;;  %v10491_v27 = vld [vmem:[%s17259_s15 + $0x98] sm:$0xf0]  ;;  %v8728_v44 = vld [vmem:[%s17259_s15 + $0x78] sm:$0xf]  ;;  %v10488_v48 = vld [vmem:[%s17259_s15 + $0x80] sm:$0xf0] }
 0x1f3   : > { %v12879_v49 = vadd.f32 %v1830_v52, %v1828_v54  ;;  %v8741_v39 = vor.u32 %v10491_v27, %v8740_v23  ;;  %v8729_v50 = vor.u32 %v10488_v48, %v8728_v44  ;;  %v8716_v51 = vld [vmem:[%s17259_s15 + $0x60] sm:$0xf]  ;;  %v10485_v2 = vld [vmem:[%s17259_s15 + $0x68] sm:$0xf0]  ;;  %v8704_v42 = vld [vmem:[%s17259_s15 + $0x48] sm:$0xf] }
 0x1f4   : > { %v10930_v31 = vpop.eup %10929  ;;  %v8717_v54 = vor.u32 %v10485_v2, %v8716_v51  ;;  %v8692_v38 = vld [vmem:[%s17259_s15 + $0x30] sm:$0xf]  ;;  %v10479_v56 = vld [vmem:[%s17259_s15 + $0x38] sm:$0xf0]  ;;  %v8680_v57 = vld [vmem:[%s17259_s15 + $0x18] sm:$0xf] }
 0x1f5   : > { %1834 = vst [vmem:[%s11336_s25 + $0x8] sm:$0xff] %v12879_v49  ;;  %v2151_v19 = vmul.f32 %v10930_v31, %v2149_v17  ;;  %2569 = vmatpush.bf16.msrb.mxu1 %v8404_v18  ;;  %v8693_v32 = vor.u32 %v10479_v56, %v8692_v38  ;;  %v10476_v17 = vld [vmem:[%s17259_s15 + $0x20] sm:$0xf0]  ;;  %v8668_v60 = vld [vmem:[%s17259_s15] sm:$0xf]  ;;  %v13020_v16 = vpack.c.bf16 %v12879_v49, %v12833_v36 }
 0x1f6   : > { %v8681_v31 = vor.u32 %v10476_v17, %v8680_v57  ;;  %v10473_v5 = vld [vmem:[%s17259_s15 + $0x8] sm:$0xf0]  ;;  %v8859_v8 = vld [vmem:[%s17281_s29 + $0xb4] sm:$0xf0]  ;;  %v10515_v20 = vld [vmem:[%s17281_s29 + $0x94] sm:$0xf] }
 0x1f7   : > { %v12897_v9 = vadd.f32 %v2153_v46, %v2151_v19  ;;  %v10518_v19 = vld [vmem:[%s17281_s29 + $0xac] sm:$0xf]  ;;  %v8669_v46 = vor.u32 %v10473_v5, %v8668_v60  ;;  %v8847_v18 = vld [vmem:[%s17281_s29 + $0x9c] sm:$0xf0]  ;;  %v8835_v33 = vld [vmem:[%s17281_s29 + $0x84] sm:$0xf0] }
 0x1f8   : > { %v8862_v0 = vor.u32 %v10518_v19, %v8859_v8  ;;  %v8850_v22 = vor.u32 %v10515_v20, %v8847_v18  ;;  %v8823_v36 = vld [vmem:[%s17281_s29 + $0x6c] sm:$0xf0]  ;;  %v10506_v34 = vld [vmem:[%s17281_s29 + $0x4c] sm:$0xf]  ;;  %v8811_v40 = vld [vmem:[%s17281_s29 + $0x54] sm:$0xf0] }
 0x1f9   : > { %v12901_v62 = vpack.c.bf16 %v12897_v9, %v12895_v4  ;;  %2570 = vmatpush.bf16.msrb.mxu1 %v8392_v6  ;;  %v10509_v6 = vld [vmem:[%s17281_s29 + $0x64] sm:$0xf]  ;;  %v10503_v1 = vld [vmem:[%s17281_s29 + $0x34] sm:$0xf]  ;;  %v8799_v37 = vld [vmem:[%s17281_s29 + $0x3c] sm:$0xf0] }
 0x1fa   : > { %v8826_v49 = vor.u32 %v10509_v6, %v8823_v36  ;;  %v8787_v59 = vld [vmem:[%s17281_s29 + $0x24] sm:$0xf0]  ;;  %v8775_v43 = vld [vmem:[%s17281_s29 + $0xc] sm:$0xf0]  ;;  %v13070_v28 = vld [vmem:[%s17253_s9] sm:$0x7] }
 0x1fb   : > { %2333 = vmatmul.bf16.vlgmr.msra.gmra.mxu0 %v12901_v62  ;;  %2347 = vmatmul.bf16.vlgmr.msra.gmra.mxu1 %v12901_v62  ;;  %v2402_v45 = vperm.slane %v13070_v28, 0  ;;  %v8644_v27 = vld [vmem:[%s17258_s14 + $0x90] sm:$0xf]  ;;  %v2683_v38 = vld [vmem:[%s13092_s3 + $0x20] sm:$0xff]  ;;  %v10471_v36 = vld [vmem:[%s17258_s14 + $0xb8] sm:$0xf0] }
 0x1fc   : > { %2361 = vmatmul.bf16.vlgmr.msrb.gmra.mxu2 %v12901_v62  ;;  %2881 = vmatpush.bf16.msra.mxu0 %v8565_v13  ;;  %v10512_v13 = vld [vmem:[%s17281_s29 + $0x7c] sm:$0xf]  ;;  %v8620_v8 = vld [vmem:[%s17258_s14 + $0x60] sm:$0xf] }
 0x1fd   : > { %2571 = vmatpush.bf16.msrb.mxu1 %v8380_v30  ;;  %v8838_v10 = vor.u32 %v10512_v13, %v8835_v33  ;;  %v8802_v30 = vor.u32 %v10503_v1, %v8799_v37  ;;  %v10469_v13 = vld [vmem:[%s17258_s14 + $0xac] sm:$0xf]  ;;  %v8658_v33 = vld [vmem:[%s17258_s14 + $0xb4] sm:$0xf0] }
 0x1fe   : > { %v8661_v6 = vor.u32 %v10469_v13, %v8658_v33  ;;  %v8628_v33 = vld [vmem:[%s17258_s14 + $0x68] sm:$0xf] }
 0x200   : > { %2882 = vmatpush.bf16.msra.mxu0 %v8553_v29  ;;  %v8814_v29 = vor.u32 %v10506_v34, %v8811_v40  ;;  %v8608_v40 = vld [vmem:[%s17258_s14 + $0x48] sm:$0xf]  ;;  %3172 = vmatpush.bf16.msrb.mxu2 %v8661_v6 }
 0x204   : > { %2883 = vmatpush.bf16.msra.mxu0 %v8541_v26  ;;  %v10500_v26 = vld [vmem:[%s17281_s29 + $0x1c] sm:$0xf] }
 0x205   : > { %v8790_v55 = vor.u32 %v10500_v26, %v8787_v59  ;;  %v2403_v59 = vperm.slane %v13070_v28, 1 }
 0x208   : > { %2884 = vmatpush.bf16.msra.mxu0 %v8529_v41  ;;  %v10497_v41 = vld [vmem:[%s17281_s29 + $0x4] sm:$0xf] }
 0x209   : > { %v8778_v12 = vor.u32 %v10497_v41, %v8775_v43  ;;  %v10466_v41 = vld [vmem:[%s17258_s14 + $0x94] sm:$0xf]  ;;  %v8646_v43 = vld [vmem:[%s17258_s14 + $0x9c] sm:$0xf0] }
 0x20b   : > { %2558 = vmatmul.bf16.vlgmr.msrb.gmra.mxu0 %v12265_v21  ;;  %2572 = vmatmul.bf16.vlgmr.msrb.gmra.mxu1 %v12265_v21  ;;  %v10426_v21 = vld [vmem:[%s17255_s11 + $0x10] sm:$0xf0] }
 0x20c   : > { %2861 = vmatmul.bf16.vlgmr.msra.gmra.mxu2 %v12140_v58  ;;  %2885 = vmatpush.bf16.msra.mxu0 %v8517_v47  ;;  %v8481_v25 = vor.u32 %v10426_v21, %v8480_v61  ;;  %v2545_v47 = vpop.f32.mrf.mxu3  ;;  %v10470_v61 = vld [vmem:[%s17258_s14 + $0xb0] sm:$0xf0]  ;;  %v13082_v21 = vld [vmem:[%s17252_s8] sm:$0x7] }
 0x20d   : > { %v2191_v23 = vperm.slane %v13082_v21, 0  ;;  %v2546_v48 = vadd.f32 %v2545_v47, %v2402_v45 }
 0x210   : > { %2886 = vmatpush.bf16.msra.mxu0 %v8505_v35  ;;  %v13065_v35 = vld [vmem:[%s17257_s13] sm:$0x7] }
 0x211   : > { %v2720_v3 = vperm.slane %v13065_v35, 1 }
 0x214   : > { %2887 = vmatpush.bf16.msra.mxu0 %v8493_v63  ;;  %v2547_v7 = vpop.f32.mrf.mxu3  ;;  %v8656_v63 = vld [vmem:[%s17258_s14 + $0xa8] sm:$0xf] }
 0x215   : > { %v8657_v11 = vor.u32 %v10470_v61, %v8656_v63  ;;  %v2548_v5 = vadd.f32 %v2547_v7, %v2402_v45  ;;  %v8649_v7 = vor.u32 %v10466_v41, %v8646_v43  ;;  %v10455_v45 = vld [vmem:[%s17258_s14 + $0x38] sm:$0xf0]  ;;  %v10493_v43 = vld [vmem:[%s17259_s15 + $0xac] sm:$0xf] }
 0x217   : > { %3158 = vmatpush.bf16.msra.mxu1 %v8657_v11  ;;  %v8596_v11 = vld [vmem:[%s17258_s14 + $0x30] sm:$0xf]  ;;  %3173 = vmatpush.bf16.msrb.mxu2 %v8649_v7 }
 0x218   : > { %2888 = vmatpush.bf16.msra.mxu0 %v8481_v25 }
 0x21b   : > { %2889 = vmatmul.bf16.vlgmr.msra.gmra.mxu0 %v12140_v58  ;;  %v10482_v58 = vld [vmem:[%s17259_s15 + $0x50] sm:$0xf0] }
 0x21c   : > { %3369 = vmatpush.bf16.msrb.mxu0 %v8753_v24  ;;  %v8705_v52 = vor.u32 %v10482_v58, %v8704_v42  ;;  %v2876_v53 = vpop.f32.mrf.mxu3  ;;  %v8632_v58 = vld [vmem:[%s17258_s14 + $0x78] sm:$0xf] }
 0x21d   : > { %v2877_v25 = vadd.f32 %v2876_v53, %v2720_v3  ;;  %v8652_v53 = vld [vmem:[%s17258_s14 + $0x98] sm:$0xf] }
 0x220   : > { %3370 = vmatpush.bf16.msrb.mxu0 %v8741_v39  ;;  %v10467_v39 = vld [vmem:[%s17258_s14 + $0x98] sm:$0xf0] }
 0x221   : > { %v8645_v44 = vor.u32 %v10467_v39, %v8644_v27  ;;  %v8597_v39 = vor.u32 %v10455_v45, %v8596_v11 }
 0x223   : > { %3159 = vmatpush.bf16.msra.mxu1 %v8645_v44  ;;  %v10463_v44 = vld [vmem:[%s17258_s14 + $0x7c] sm:$0xf] }
 0x224   : > { %3371 = vmatpush.bf16.msrb.mxu0 %v8729_v50  ;;  %v2878_v24 = vpop.f32.mrf.mxu3  ;;  %v2680_v50 = vld [vmem:[%s13092_s3 + $0x8] sm:$0xff] }
 0x225   : > { %v2879_v51 = vadd.f32 %v2878_v24, %v2720_v3  ;;  %v10468_v3 = vld [vmem:[%s17258_s14 + $0xa0] sm:$0xf0] }
 0x227   : > { %v2936_v57 = vadd.f32 %v2879_v51, %v2683_v38  ;;  %v8584_v38 = vld [vmem:[%s17258_s14 + $0x18] sm:$0xf] }
 0x228   : > { %3372 = vmatpush.bf16.msrb.mxu0 %v8717_v54  ;;  %v2935_v54 = vadd.f32 %v2877_v25, %v2680_v50 }
 0x22a   : > { %v8568_v17 = vmul.f32 -1.442695, %v2935_v54  ;;  %v8640_v54 = vld [vmem:[%s17258_s14 + $0x80] sm:$0xf] }
 0x22c   : > { %3373 = vmatpush.bf16.msrb.mxu0 %v8705_v52  ;;  %v10464_v52 = vld [vmem:[%s17258_s14 + $0x80] sm:$0xf0] }
 0x230   : > { %3374 = vmatpush.bf16.msrb.mxu0 %v8693_v32  ;;  %v8633_v32 = vor.u32 %v10464_v52, %v8632_v58  ;;  %v2719_v58 = vperm.slane %v13065_v35, 0 }
 0x232   : > { %3160 = vmatpush.bf16.msra.mxu1 %v8633_v32 }
 0x234   : > { %3375 = vmatpush.bf16.msrb.mxu0 %v8681_v31 }
 0x238   : > { %3376 = vmatpush.bf16.msrb.mxu0 %v8669_v46  ;;  %v10461_v46 = vld [vmem:[%s17258_s14 + $0x68] sm:$0xf0] }
 0x239   : > { %v8621_v18 = vor.u32 %v10461_v46, %v8620_v8  ;;  %v10460_v8 = vld [vmem:[%s17258_s14 + $0x64] sm:$0xf]  ;;  %v8622_v46 = vld [vmem:[%s17258_s14 + $0x6c] sm:$0xf0] }
 0x23a   : > { %v8625_v13 = vor.u32 %v10460_v8, %v8622_v46 }
 0x23b   : > { %3377 = vmatmul.bf16.vlgmr.msrb.gmra.mxu0 %v13020_v16  ;;  %3161 = vmatpush.bf16.msra.mxu1 %v8621_v18 }
 0x23c   : > { %3706 = vmatpush.bf16.msra.mxu0 %v8862_v0  ;;  %v8569_v0 = vmul.f32 -1.442695, %v2936_v57 }
 0x240   : > { %3707 = vmatpush.bf16.msra.mxu0 %v8850_v22 }
 0x244   : > { %3708 = vmatpush.bf16.msra.mxu0 %v8838_v10  ;;  %v8664_v10 = vld [vmem:[%s17258_s14 + $0xb0] sm:$0xf] }
 0x245   : > { %v8665_v34 = vor.u32 %v10471_v36, %v8664_v10  ;;  %v10462_v10 = vld [vmem:[%s17258_s14 + $0x70] sm:$0xf0] }
 0x247   : > { %3186 = vmatpush.bf16.msrb.mxu3 %v8665_v34 }
 0x248   : > { %3709 = vmatpush.bf16.msra.mxu0 %v8826_v49 }
 0x24c   : > { %3710 = vmatpush.bf16.msra.mxu0 %v8814_v29  ;;  %v10458_v29 = vld [vmem:[%s17258_s14 + $0x50] sm:$0xf0] }
 0x24d   : > { %v8609_v1 = vor.u32 %v10458_v29, %v8608_v40  ;;  %v8572_v40 = vld [vmem:[%s17258_s14] sm:$0xf]  ;;  %v10449_v29 = vld [vmem:[%s17258_s14 + $0x8] sm:$0xf0] }
 0x24f   : > { %3162 = vmatpush.bf16.msra.mxu1 %v8609_v1 }
 0x250   : > { %3711 = vmatpush.bf16.msra.mxu0 %v8802_v30  ;;  %v2192_v30 = vperm.slane %v13082_v21, 1 }
 0x253   : > { %3163 = vmatpush.bf16.msra.mxu1 %v8597_v39 }
 0x254   : > { %3712 = vmatpush.bf16.msra.mxu0 %v8790_v55 }
 0x258   : > { %3713 = vmatpush.bf16.msra.mxu0 %v8778_v12 }
 0x25b   : > { %3714 = vmatmul.bf16.vlgmr.msra.gmra.mxu0 %v12901_v62 }
 0x278   : > { %v2334_v2 = vpop.f32.mrf.mxu0  ;;  %v2348_v60 = vpop.f32.mrf.mxu1 }
 0x279   : > { %v2335_v42 = vadd.f32 %v2334_v2, %v2191_v23  ;;  %v2349_v25 = vadd.f32 %v2348_v60, %v2192_v30 }
 0x27b   : > { %v2578_v56 = vadd.f32 %v2546_v48, %v2335_v42  ;;  %v8634_v48 = vld [vmem:[%s17258_s14 + $0x84] sm:$0xf0]  ;;  %v10465_v42 = vld [vmem:[%s17258_s14 + $0x88] sm:$0xf0] }
 0x27c   : > { %v8637_v2 = vor.u32 %v10463_v44, %v8634_v48  ;;  %v8641_v52 = vor.u32 %v10465_v42, %v8640_v54  ;;  %v10490_v42 = vld [vmem:[%s17259_s15 + $0x94] sm:$0xf] }
 0x27d   : > { %v8465_v31 = vmul.f32 -1.442695, %v2578_v56  ;;  %v10452_v56 = vld [vmem:[%s17258_s14 + $0x20] sm:$0xf0] }
 0x27e   : > { %3174 = vmatpush.bf16.msrb.mxu2 %v8637_v2 }
 0x27f   : > { %10931 = vpow2.f32 %v8465_v31  ;;  %v13102_v19 = vpop.f32.mrf.mxu2 }
 0x280   : > { %v2336_v20 = vpop.f32.mrf.mxu0  ;;  %10933 = vpow2.f32 %v8568_v17  ;;  %v2350_v63 = vpop.f32.mrf.mxu1  ;;  %v8585_v17 = vor.u32 %v10452_v56, %v8584_v38 }
 0x281   : > { %v2337_v22 = vadd.f32 %v2336_v20, %v2191_v23  ;;  %10935 = vpow2.f32 %v8569_v0  ;;  %v8653_v23 = vor.u32 %v10468_v3, %v8652_v53  ;;  %v2193_v0 = vperm.slane %v13082_v21, 2  ;;  %v2679_v20 = vld [vmem:[%s13092_s3] sm:$0xff] }
 0x282   : > { %3164 = vmatpush.bf16.msra.mxu1 %v8585_v17  ;;  %v2351_v1 = vadd.f32 %v2350_v63, %v2192_v30  ;;  %3175 = vmatpush.bf16.msrb.mxu2 %v8625_v13  ;;  %v8629_v3 = vor.u32 %v10462_v10, %v8628_v33  ;;  %v8573_v30 = vor.u32 %v10449_v29, %v8572_v40  ;;  %v8610_v63 = vld [vmem:[%s17258_s14 + $0x54] sm:$0xf0]  ;;  %v10456_v13 = vld [vmem:[%s17258_s14 + $0x40] sm:$0xf0]  ;;  %v2721_v10 = vperm.slane %v13065_v35, 2 }
 0x283   : > { %v2579_v49 = vadd.f32 %v2548_v5, %v2337_v22  ;;  %3187 = vmatpush.bf16.msrb.mxu3 %v8653_v23  ;;  %v2682_v33 = vld [vmem:[%s13092_s3 + $0x18] sm:$0xff]  ;;  %v8730_v40 = vld [vmem:[%s17259_s15 + $0x84] sm:$0xf0]  ;;  %v9041_v35 = vld [vmem:[%s17251_s7 + $0x90] sm:$0xf] }
 0x285   : > { %v10932_v37 = vpop.eup %10931  ;;  %v8466_v26 = vmul.f32 -1.442695, %v2579_v49 }
 0x286   : > { %v13130_v55 = vadd.f32 1.0, %v10932_v37  ;;  %v10934_v12 = vpop.eup %10933  ;;  %3165 = vmatpush.bf16.msra.mxu1 %v8573_v30 }
 0x287   : > { %10937 = vpow2.f32 %v8466_v26  ;;  %v13138_v47 = vpop.f32.mrf.mxu2  ;;  %v13157_v27 = vadd.f32 1.0, %v10934_v12  ;;  %v10936_v50 = vpop.eup %10935  ;;  %3188 = vmatpush.bf16.msrb.mxu3 %v8641_v52  ;;  %v2404_v26 = vperm.slane %v13070_v28, 2  ;;  %v8754_v12 = vld [vmem:[%s17259_s15 + $0xb4] sm:$0xf0]  ;;  %v8742_v52 = vld [vmem:[%s17259_s15 + $0x9c] sm:$0xf0] }
 0x288   : > { %10939 = vrcp.f32 %v13130_v55  ;;  %v2559_v61 = vpop.f32.mrf.mxu0  ;;  %v13181_v60 = vadd.f32 1.0, %v10936_v50  ;;  %v2573_v49 = vpop.f32.mrf.mxu1  ;;  %v2597_v34 = vand.u32 2147483647, %v13130_v55  ;;  %v2599_v53 = vand.u32 2147483648, %v13130_v55 }
 0x289   : > { %v2560_v24 = vadd.f32 %v2559_v61, %v2403_v59  ;;  %10941 = vrcp.f32 %v13157_v27  ;;  %v8757_v45 = vor.u32 %v10493_v43, %v8754_v12  ;;  %vm2593_vm6 = vweird.f32 %v13130_v55  ;;  %v8586_v43 = vld [vmem:[%s17258_s14 + $0x24] sm:$0xf0] }
 0x28a   : > { %vm13239_vm5 = vcmp.eq.f32.partialorder %v2597_v34, 8.507059e+37  ;;  %v2574_v17 = vadd.f32 %v2573_v49, %v2404_v26  ;;  %v10487_v34 = vld [vmem:[%s17259_s15 + $0x7c] sm:$0xf] }
 0x28b   : > { %v2618_v51 = vadd.f32 %v2560_v24, %v2349_v25  ;;  %v8616_v25 = vld [vmem:[%s17258_s14 + $0x50] sm:$0xf]  ;;  %v10459_v24 = vld [vmem:[%s17258_s14 + $0x58] sm:$0xf0]  ;;  %3189 = vmatpush.bf16.msrb.mxu3 %v8629_v3  ;;  %3383 = vmatpush.bf16.msrb.mxu1 %v8757_v45  ;;  %v8733_v30 = vor.u32 %v10487_v34, %v8730_v40  ;;  %v10519_v34 = vld [vmem:[%s17281_s29 + $0xb0] sm:$0xf0] }
 0x28c   : > { %v8617_v50 = vor.u32 %v10459_v24, %v8616_v25  ;;  %v8706_v40 = vld [vmem:[%s17259_s15 + $0x54] sm:$0xf0] }
 0x28d   : > { %v10938_v32 = vpop.eup %10937  ;;  %v8467_v57 = vmul.f32 -1.442695, %v2618_v51 }
 0x28e   : > { %v13178_v31 = vpop.eup %10939  ;;  %v13183_v5 = vadd.f32 1.0, %v10938_v32  ;;  %v2600_v32 = vor.u32 1.1754944e-38, %v2599_v53 }
 0x28f   : > { %10943 = vpow2.f32 %v8467_v57  ;;  %v2862_v18 = vpop.f32.mrf.mxu2  ;;  %v2589_v22 = vmul.f32 %v13178_v31, %v13130_v55  ;;  %vm2594_vm4 = vweird.f32 %v13178_v31  ;;  %v13237_v23 = vpop.eup %10941  ;;  %v8745_v55 = vor.u32 %v10490_v42, %v8742_v52  ;;  %v10454_v57 = vld [vmem:[%s17258_s14 + $0x34] sm:$0xf]  ;;  %3190 = vmatpush.bf16.msrb.mxu3 %v8617_v50 }
 0x290   : > { %10945 = vrcp.f32 %v13183_v5  ;;  %v2863_v6 = vadd.f32 %v2862_v18, %v2719_v58  ;;  %v2561_v36 = vpop.f32.mrf.mxu0  ;;  %vm2595_vm7 = vmor %vm2593_vm6, %vm2594_vm4  ;;  %v8598_v18 = vld [vmem:[%s17258_s14 + $0x3c] sm:$0xf0]  ;;  %vm2608_vm8 = vweird.f32 %v13183_v5  ;;  %v2612_v49 = vand.u32 2147483647, %v13183_v5  ;;  %v2575_v29 = vpop.f32.mrf.mxu1 }
 0x291   : > { %v2562_v37 = vadd.f32 %v2561_v36, %v2403_v59  ;;  %v2590_v41 = vsub.f32 1.0, %v2589_v22  ;;  %v10457_v59 = vld [vmem:[%s17258_s14 + $0x4c] sm:$0xf]  ;;  %10947 = vrcp.f32 %v13181_v60  ;;  %v8604_v22 = vld [vmem:[%s17258_s14 + $0x38] sm:$0xf]  ;;  %3384 = vmatpush.bf16.msrb.mxu1 %v8745_v55  ;;  %v2576_v50 = vadd.f32 %v2575_v29, %v2404_v26 }
 0x292   : > { %v2895_v7 = vadd.f32 %v2863_v6, %v2679_v20  ;;  %v8613_v48 = vor.u32 %v10457_v59, %v8610_v63  ;;  %v2363_v6 = vadd.f32 %v13102_v19, %v2193_v0  ;;  %v2614_v19 = vand.u32 2147483648, %v13183_v5  ;;  %v8592_v59 = vld [vmem:[%s17258_s14 + $0x20] sm:$0xf]  ;;  %v10453_v63 = vld [vmem:[%s17258_s14 + $0x28] sm:$0xf0] }
 0x293   : > { %v2619_v61 = vadd.f32 %v2562_v37, %v2351_v1  ;;  %v2591_v11 = vmul.f32 %v13178_v31, %v2590_v41  ;;  %v8601_v37 = vor.u32 %v10454_v57, %v8598_v18  ;;  %v8605_v41 = vor.u32 %v10456_v13, %v8604_v22  ;;  %v10484_v57 = vld [vmem:[%s17259_s15 + $0x64] sm:$0xf]  ;;  %v10450_v13 = vld [vmem:[%s17258_s14 + $0x10] sm:$0xf0]  ;;  %v8833_v18 = vld [vmem:[%s17281_s29 + $0x78] sm:$0xf] }
 0x294   : > { %v8566_v39 = vmul.f32 -1.442695, %v2895_v7  ;;  %3176 = vmatpush.bf16.msrb.mxu2 %v8613_v48  ;;  %v8593_v25 = vor.u32 %v10453_v63, %v8592_v59  ;;  %vm13321_vm10 = vcmp.eq.f32.partialorder %v2612_v49, 8.507059e+37  ;;  %v2615_v52 = vor.u32 1.1754944e-38, %v2614_v19  ;;  %v8857_v49 = vld [vmem:[%s17281_s29 + $0xa8] sm:$0xf] }
 0x295   : > { %v10944_v51 = vpop.eup %10943  ;;  %v8468_v2 = vmul.f32 -1.442695, %v2619_v61  ;;  %v2592_v54 = vadd.f32 %v13178_v31, %v2591_v11  ;;  %3191 = vmatpush.bf16.msrb.mxu3 %v8605_v41  ;;  %3385 = vmatpush.bf16.msrb.mxu1 %v8733_v30  ;;  %v8748_v41 = vld [vmem:[%s17259_s15 + $0x98] sm:$0xf]  ;;  %v8858_v30 = vor.u32 %v10519_v34, %v8857_v49  ;;  %v8845_v59 = vld [vmem:[%s17281_s29 + $0x90] sm:$0xf] }
 0x296   : > { %v13252_v38 = vpop.eup %10945  ;;  %v13254_v56 = vadd.f32 1.0, %v10944_v51  ;;  %10949 = vpow2.f32 %v8566_v39  ;;  %v10516_v63 = vld [vmem:[%s17281_s29 + $0x98] sm:$0xf0] }
 0x297   : > { %10951 = vpow2.f32 %v8468_v2  ;;  %v2596_v8 = vsel %vm2595_vm7, %v13178_v31, %v2592_v54  ;;  %v2864_v46 = vpop.f32.mrf.mxu2  ;;  %v2604_v20 = vmul.f32 %v13252_v38, %v13183_v5  ;;  %v13300_v12 = vpop.eup %10947  ;;  %vm2609_vm9 = vweird.f32 %v13252_v38  ;;  %v10448_v5 = vld [vmem:[%s17258_s14 + $0x4] sm:$0xf] }
 0x298   : > { %10953 = vrcp.f32 %v13254_v56  ;;  %v2601_v31 = vsel %vm13239_vm5, %v2600_v32, %v2596_v8  ;;  %v2865_v36 = vadd.f32 %v2864_v46, %v2719_v58  ;;  %v10451_v58 = vld [vmem:[%s17258_s14 + $0x1c] sm:$0xf]  ;;  %v2639_v7 = vand.u32 2147483648, %v13254_v56  ;;  %3177 = vmatpush.bf16.msrb.mxu2 %v8601_v37  ;;  %vm13332_vm11 = vmor %vm2608_vm8, %vm2609_vm9  ;;  %v8574_v8 = vld [vmem:[%s17258_s14 + $0xc] sm:$0xf0] }
 0x299   : > { %v2605_v1 = vsub.f32 1.0, %v2604_v20  ;;  %v2658_v53 = vmul.f32 %v2601_v31, %v2574_v17  ;;  %v8589_v45 = vor.u32 %v10451_v58, %v8586_v43  ;;  %v2637_v44 = vand.u32 2147483647, %v13254_v56  ;;  %v8718_v17 = vld [vmem:[%s17259_s15 + $0x6c] sm:$0xf0]  ;;  %3192 = vmatpush.bf16.msrb.mxu3 %v8593_v25 }
 0x29a   : > { %v2896_v3 = vadd.f32 %v2865_v36, %v2682_v33  ;;  %v2640_v55 = vor.u32 1.1754944e-38, %v2639_v7  ;;  %v8580_v46 = vld [vmem:[%s17258_s14 + $0x8] sm:$0xf]  ;;  %v8760_v31 = vld [vmem:[%s17259_s15 + $0xb0] sm:$0xf]  ;;  %v13367_v33 = vmul.f32 %v13237_v23, %v13157_v27  ;;  %vm2633_vm13 = vweird.f32 %v13254_v56 }
 0x29b   : > { %v2606_v11 = vmul.f32 %v13252_v38, %v2605_v1  ;;  %v2660_v28 = vadd.f32 %v2658_v53, %v2363_v6  ;;  %vm13352_vm12 = vcmp.eq.f32.partialorder %v2637_v44, 8.507059e+37  ;;  %v2365_v6 = vadd.f32 %v13138_v47, %v2193_v0  ;;  %v10495_v36 = vld [vmem:[%s17259_s15 + $0xb8] sm:$0xf0]  ;;  %v10481_v0 = vld [vmem:[%s17259_s15 + $0x4c] sm:$0xf] }
 0x29c   : > { %v10950_v61 = vpop.eup %10949  ;;  %v8567_v48 = vmul.f32 -1.442695, %v2896_v3  ;;  %3178 = vmatpush.bf16.msrb.mxu2 %v8589_v45  ;;  %v8721_v1 = vor.u32 %v10484_v57, %v8718_v17  ;;  %v8577_v19 = vor.u32 %v10448_v5, %v8574_v8  ;;  %v8581_v37 = vor.u32 %v10450_v13, %v8580_v46  ;;  %v10492_v58 = vld [vmem:[%s17259_s15 + $0xa0] sm:$0xf0]  ;;  %v8736_v17 = vld [vmem:[%s17259_s15 + $0x80] sm:$0xf] }
 0x29d   : > { %v10952_v24 = vpop.eup %10951  ;;  %v13311_v39 = vadd.f32 1.0, %v10950_v61  ;;  %v2607_v54 = vadd.f32 %v13252_v38, %v2606_v11  ;;  %v8761_v3 = vor.u32 %v10495_v36, %v8760_v31  ;;  %v8709_v44 = vor.u32 %v10481_v0, %v8706_v40  ;;  %v10489_v5 = vld [vmem:[%s17259_s15 + $0x88] sm:$0xf0]  ;;  %v11197_v36 = vld [vmem:[%s11341_s28 + $0x30] sm:$0xff]  ;;  %v2890_v0 = vpop.f32.mrf.mxu0 }
 0x29e   : > { %v13316_v51 = vpop.eup %10953  ;;  %v13318_v2 = vadd.f32 1.0, %v10952_v24  ;;  %3386 = vmatpush.bf16.msrb.mxu1 %v8721_v1  ;;  %3193 = vmatpush.bf16.msrb.mxu3 %v8581_v37  ;;  %v8749_v42 = vor.u32 %v10492_v58, %v8748_v41  ;;  %v13446_v46 = vmul.f32 %v13300_v12, %v13181_v60  ;;  %v8737_v34 = vor.u32 %v10489_v5, %v8736_v17  ;;  %v10486_v37 = vld [vmem:[%s17259_s15 + $0x70] sm:$0xf0] }
 0x29f   : > { %v2629_v32 = vmul.f32 %v13316_v51, %v13254_v56  ;;  %10955 = vrcp.f32 %v13311_v39  ;;  %v2611_v22 = vsel %vm13332_vm11, %v13252_v38, %v2607_v54  ;;  %vm2634_vm14 = vweird.f32 %v13316_v51 }
 0x2a0   : > { %10957 = vrcp.f32 %v13318_v2  ;;  %v2616_v38 = vsel %vm13321_vm10, %v2615_v52, %v2611_v22  ;;  %v2654_v29 = vand.u32 2147483648, %v13318_v2  ;;  %v2914_v53 = vand.u32 2147483647, %v13311_v39  ;;  %vm13415_vm15 = vmor %vm2633_vm13, %vm2634_vm14  ;;  %3179 = vmatpush.bf16.msrb.mxu2 %v8577_v19  ;;  %v10478_v52 = vld [vmem:[%s17259_s15 + $0x34] sm:$0xf] }
 0x2a1   : > { %v2630_v20 = vsub.f32 1.0, %v2629_v32  ;;  %10959 = vpow2.f32 %v8567_v48  ;;  %v2659_v47 = vmul.f32 %v2616_v38, %v2576_v50  ;;  %v2916_v25 = vand.u32 2147483648, %v13311_v39  ;;  %v8694_v32 = vld [vmem:[%s17259_s15 + $0x3c] sm:$0xf0]  ;;  %v10513_v22 = vld [vmem:[%s17281_s29 + $0x80] sm:$0xf0] }
 0x2a2   : > { %10961 = vtanh.f32 %v2660_v28  ;;  %v2652_v54 = vand.u32 2147483647, %v13318_v2  ;;  %3692 = vmatpush.bf16.msra.mxu3 %v8858_v30  ;;  %3387 = vmatpush.bf16.msrb.mxu1 %v8709_v44  ;;  %v8697_v31 = vor.u32 %v10478_v52, %v8694_v32  ;;  %vm2910_vm2 = vweird.f32 %v13311_v39  ;;  %v8724_v19 = vld [vmem:[%s17259_s15 + $0x68] sm:$0xf]  ;;  %v8821_v30 = vld [vmem:[%s17281_s29 + $0x60] sm:$0xf] }
 0x2a3   : > { %v2631_v21 = vmul.f32 %v13316_v51, %v2630_v20  ;;  %v2661_v24 = vadd.f32 %v2659_v47, %v2365_v6  ;;  %v8682_v47 = vld [vmem:[%s17259_s15 + $0x24] sm:$0xf0]  ;;  %v8834_v1 = vor.u32 %v10513_v22, %v8833_v18  ;;  %vm2648_vm3 = vweird.f32 %v13318_v2 }
 0x2a4   : > { %3397 = vmatpush.bf16.msra.mxu2 %v8761_v3  ;;  %v2655_v41 = vor.u32 1.1754944e-38, %v2654_v29  ;;  %vm2915_vm6 = vcmp.eq.f32.partialorder %v2914_v53, 8.507059e+37  ;;  %vm2653_vm7 = vcmp.eq.f32.partialorder %v2652_v54, 8.507059e+37  ;;  %v8712_v53 = vld [vmem:[%s17259_s15 + $0x50] sm:$0xf]  ;;  %v2891_v54 = vadd.f32 %v2890_v0, %v2721_v10 }
 0x2a5   : > { %v13399_v43 = vpop.eup %10955  ;;  %v2632_v7 = vadd.f32 %v13316_v51, %v2631_v21  ;;  %v10475_v21 = vld [vmem:[%s17259_s15 + $0x1c] sm:$0xf]  ;;  %v8809_v32 = vld [vmem:[%s17281_s29 + $0x48] sm:$0xf]  ;;  %vm2950_vm9 = vweird.f32 %v13157_v27  ;;  %v2681_v0 = vld [vmem:[%s13092_s3 + $0x10] sm:$0xff]  ;;  %vm2951_vm11 = vweird.f32 %v13237_v23  ;;  %vm2966_vm14 = vweird.f32 %v13300_v12 }
 0x2a6   : > { %v13409_v61 = vpop.eup %10957  ;;  %v2906_v45 = vmul.f32 %v13399_v43, %v13311_v39  ;;  %vm2911_vm0 = vweird.f32 %v13399_v43  ;;  %3388 = vmatpush.bf16.msrb.mxu1 %v8697_v31  ;;  %v8685_v11 = vor.u32 %v10475_v21, %v8682_v47  ;;  %v8725_v39 = vor.u32 %v10486_v37, %v8724_v19  ;;  %v10504_v21 = vld [vmem:[%s17281_s29 + $0x38] sm:$0xf0] }
 0x2a7   : > { %v10960_v48 = vpop.eup %10959  ;;  %v2644_v50 = vmul.f32 %v13409_v61, %v13318_v2  ;;  %v2636_v56 = vsel %vm13415_vm15, %v13316_v51, %v2632_v7  ;;  %v8846_v51 = vor.u32 %v10516_v63, %v8845_v59  ;;  %vm2649_vm1 = vweird.f32 %v13409_v61  ;;  %vm13481_vm4 = vmor %vm2910_vm2, %vm2911_vm0  ;;  %v10510_v59 = vld [vmem:[%s17281_s29 + $0x68] sm:$0xf0] }
 0x2a8   : > { %v2641_v28 = vsel %vm13352_vm12, %v2640_v55, %v2636_v56  ;;  %v13436_v26 = vadd.f32 1.0, %v10960_v48  ;;  %v2907_v57 = vsub.f32 1.0, %v2906_v45  ;;  %v10962_v8 = vpop.eup %10961  ;;  %3398 = vmatpush.bf16.msra.mxu2 %v8749_v42  ;;  %vm13494_vm5 = vmor %vm2648_vm3, %vm2649_vm1  ;;  %v2917_v63 = vor.u32 1.1754944e-38, %v2916_v25  ;;  %v10472_v45 = vld [vmem:[%s17259_s15 + $0x4] sm:$0xf] }
 0x2a9   : > { %v2645_v55 = vsub.f32 1.0, %v2644_v50  ;;  %v2664_v20 = vsub.f32 1.0, %v2641_v28  ;;  %v2668_v49 = vmul.f32 %v11197_v36, %v2641_v28  ;;  %3693 = vmatpush.bf16.msra.mxu3 %v8846_v51  ;;  %v10483_v25 = vld [vmem:[%s17259_s15 + $0x58] sm:$0xf0]  ;;  %v2947_v48 = vsub.f32 1.0, %v13367_v33  ;;  %vm13588_vm15 = vmor %vm2950_vm9, %vm2951_vm11 }
 0x2aa   : > { %10963 = vrcp.f32 %v13436_v26  ;;  %v2908_v13 = vmul.f32 %v13399_v43, %v2907_v57  ;;  %v10507_v33 = vld [vmem:[%s17281_s29 + $0x50] sm:$0xf0]  ;;  %v2962_v57 = vsub.f32 1.0, %v13446_v46  ;;  %3389 = vmatpush.bf16.msrb.mxu1 %v8685_v11  ;;  %v8713_v17 = vor.u32 %v10483_v25, %v8712_v53  ;;  %v8700_v46 = vld [vmem:[%s17259_s15 + $0x38] sm:$0xf] }
 0x2ab   : > { %v2646_v6 = vmul.f32 %v13409_v61, %v2645_v55  ;;  %v2666_v38 = vmul.f32 %v10962_v8, %v2664_v20  ;;  %10965 = vtanh.f32 %v2661_v24  ;;  %v8670_v24 = vld [vmem:[%s17259_s15 + $0xc] sm:$0xf0]  ;;  %v11198_v55 = vld [vmem:[%s11341_s28 + $0x38] sm:$0xff]  ;;  %v2948_v22 = vmul.f32 %v13237_v23, %v2947_v48  ;;  %v10501_v11 = vld [vmem:[%s17281_s29 + $0x20] sm:$0xf0] }
 0x2ac   : > { %v2909_v40 = vadd.f32 %v13399_v43, %v2908_v13  ;;  %3399 = vmatpush.bf16.msra.mxu2 %v8737_v34  ;;  %v8673_v51 = vor.u32 %v10472_v45, %v8670_v24  ;;  %v2931_v13 = vand.u32 2147483648, %v13436_v26  ;;  %v8810_v31 = vor.u32 %v10507_v33, %v8809_v32  ;;  %v8797_v34 = vld [vmem:[%s17281_s29 + $0x30] sm:$0xf] }
 0x2ad   : > { %v13477_v58 = vadd.f32 %v2668_v49, %v2666_v38  ;;  %v2647_v3 = vadd.f32 %v13409_v61, %v2646_v6  ;;  %3694 = vmatpush.bf16.msra.mxu3 %v8834_v1  ;;  %v10480_v6 = vld [vmem:[%s17259_s15 + $0x40] sm:$0xf0]  ;;  %v2929_v49 = vand.u32 2147483647, %v13436_v26  ;;  %v2963_v47 = vmul.f32 %v13300_v12, %v2962_v57 }
 0x2ae   : > { %v2913_v29 = vsel %vm13481_vm4, %v13399_v43, %v2909_v40  ;;  %v2892_v40 = vpop.f32.mrf.mxu0  ;;  %3390 = vmatpush.bf16.msrb.mxu1 %v8673_v51  ;;  %vm2925_vm10 = vweird.f32 %v13436_v26  ;;  %v8701_v37 = vor.u32 %v10480_v6, %v8700_v46  ;;  %v2932_v7 = vor.u32 1.1754944e-38, %v2931_v13  ;;  %v8865_v13 = vld [vmem:[%s17281_s29 + $0xb0] sm:$0xf] }
 0x2af   : > { %8768 = vst [vmem:[%s11341_s28 + $0x20] sm:$0xff] %v13477_v58  ;;  %v2651_v43 = vsel %vm13494_vm5, %v13409_v61, %v2647_v3  ;;  %v2918_v50 = vsel %vm2915_vm6, %v2917_v63, %v2913_v29  ;;  %v8822_v61 = vor.u32 %v10510_v59, %v8821_v30  ;;  %v8798_v3 = vor.u32 %v10504_v21, %v8797_v34  ;;  %v8688_v30 = vld [vmem:[%s17259_s15 + $0x20] sm:$0xf]  ;;  %v8785_v63 = vld [vmem:[%s17281_s29 + $0x18] sm:$0xf] }
 0x2b0   : > { %v13520_v44 = vpop.eup %10963  ;;  %v2656_v56 = vsel %vm2653_vm7, %v2655_v41, %v2651_v43  ;;  %v2975_v5 = vmul.f32 %v2918_v50, %v2891_v54  ;;  %3400 = vmatpush.bf16.msra.mxu2 %v8725_v39  ;;  %v2949_v41 = vadd.f32 %v13237_v23, %v2948_v22  ;;  %v2956_v59 = vand.u32 2147483648, %v13157_v27  ;;  %v2684_v39 = vld [vmem:[%s13092_s3 + $0x28] sm:$0xff]  ;;  %v8841_v21 = vld [vmem:[%s17281_s29 + $0x80] sm:$0xf]  ;;  %v8993_v54 = vld [vmem:[%s17251_s7 + $0x30] sm:$0xf]  ;;  %s4345_s3 = ssub.s32 %s4344_s0, %s11417_s22 }
 0x2b1   : > { %v2665_v42 = vsub.f32 1.0, %v2656_v56  ;;  %v2921_v52 = vmul.f32 %v13520_v44, %v13436_v26  ;;  %v10966_v28 = vpop.eup %10965  ;;  %v2669_v20 = vmul.f32 %v11198_v55, %v2656_v56  ;;  %3695 = vmatpush.bf16.msra.mxu3 %v8822_v61  ;;  %vm2926_vm8 = vweird.f32 %v13520_v44  ;;  %v10477_v26 = vld [vmem:[%s17259_s15 + $0x28] sm:$0xf0]  ;;  %v8676_v50 = vld [vmem:[%s17259_s15 + $0x8] sm:$0xf]  ;;  %p4346_p12 = scmp.lt.s32.totalorder %s4345_s3, 3 }
 0x2b2   : > { %v2977_v1 = vadd.f32 %v2975_v5, %v2681_v0  ;;  %vm2927_vm12 = vmor %vm2925_vm10, %vm2926_vm8  ;;  %v2893_v2 = vadd.f32 %v2892_v40, %v2721_v10  ;;  %vm2930_vm13 = vcmp.eq.f32.partialorder %v2929_v49, 8.507059e+37  ;;  %v2954_v45 = vand.u32 2147483647, %v13157_v27  ;;  %v10474_v56 = vld [vmem:[%s17259_s15 + $0x10] sm:$0xf0] }
 0x2b3   : > { %v2667_v8 = vmul.f32 %v10966_v28, %v2665_v42  ;;  %v2922_v18 = vsub.f32 1.0, %v2921_v52  ;;  %v2964_v43 = vadd.f32 %v13300_v12, %v2963_v47  ;;  %v2971_v10 = vand.u32 2147483648, %v13181_v60  ;;  %v10498_v42 = vld [vmem:[%s17281_s29 + $0x8] sm:$0xf0]  ;;  %v8829_v40 = vld [vmem:[%s17281_s29 + $0x68] sm:$0xf] }
 0x2b4   : > { %3401 = vmatpush.bf16.msra.mxu2 %v8713_v17  ;;  %10967 = vtanh.f32 %v2977_v1  ;;  %v8689_v25 = vor.u32 %v10477_v26, %v8688_v30  ;;  %vm2965_vm0 = vweird.f32 %v13181_v60  ;;  %v2969_v48 = vand.u32 2147483647, %v13181_v60  ;;  %v8773_v60 = vld [vmem:[%s17281_s29] sm:$0xf]  ;;  %v10514_v47 = vld [vmem:[%s17281_s29 + $0x88] sm:$0xf0] }
 0x2b5   : > { %v13543_v38 = vadd.f32 %v2669_v20, %v2667_v8  ;;  %v2923_v36 = vmul.f32 %v13520_v44, %v2922_v18  ;;  %3696 = vmatpush.bf16.msra.mxu3 %v8810_v31  ;;  %v8786_v27 = vor.u32 %v10501_v11, %v8785_v63  ;;  %v2957_v61 = vor.u32 1.1754944e-38, %v2956_v59  ;;  %vm13607_vm1 = vmor %vm2965_vm0, %vm2966_vm14  ;;  %v10520_v31 = vld [vmem:[%s17281_s29 + $0xb8] sm:$0xf0]  ;;  %v10511_v1 = vld [vmem:[%s17281_s29 + $0x70] sm:$0xf0]  ;;  %s17431_s3 = smov (!%p4346_p12, %s4345_s3), 3 }
 0x2b6   : > { %vm2955_vm2 = vcmp.eq.f32.partialorder %v2954_v45, 8.507059e+37  ;;  %v2968_v52 = vsel %vm13607_vm1, %v13300_v12, %v2964_v43  ;;  %v2972_v32 = vor.u32 1.1754944e-38, %v2971_v10  ;;  %v8677_v28 = vor.u32 %v10474_v56, %v8676_v50  ;;  %v10505_v30 = vld [vmem:[%s17281_s29 + $0x40] sm:$0xf0]  ;;  %v8793_v59 = vld [vmem:[%s17281_s29 + $0x20] sm:$0xf] }
 0x2b7   : > { %8769 = vst [vmem:[%s11341_s28 + $0x28] sm:$0xff] %v13543_v38  ;;  %v2924_v19 = vadd.f32 %v13520_v44, %v2923_v36  ;;  %vm2970_vm3 = vcmp.eq.f32.partialorder %v2969_v48, 8.507059e+37  ;;  %v8774_v57 = vor.u32 %v10498_v42, %v8773_v60  ;;  %v8866_v36 = vor.u32 %v10520_v31, %v8865_v13  ;;  %v8781_v63 = vld [vmem:[%s17281_s29 + $0x8] sm:$0xf]  ;;  %v10567_v45 = vld [vmem:[%s17251_s7 + $0xb0] sm:$0xf0] }
 0x2b8   : > { %3402 = vmatpush.bf16.msra.mxu2 %v8701_v37  ;;  %v2973_v17 = vsel %vm2970_vm3, %v2972_v32, %v2968_v52  ;;  %v8842_v0 = vor.u32 %v10514_v47, %v8841_v21  ;;  %v8817_v37 = vld [vmem:[%s17281_s29 + $0x50] sm:$0xf]  ;;  %v9053_v11 = vld [vmem:[%s17251_s7 + $0xa8] sm:$0xf]  ;;  %v10564_v10 = vld [vmem:[%s17251_s7 + $0x98] sm:$0xf0] }
 0x2b9   : > { %v2928_v29 = vsel %vm2927_vm12, %v13520_v44, %v2924_v19  ;;  %v2953_v44 = vsel %vm13588_vm15, %v13237_v23, %v2949_v41  ;;  %3697 = vmatpush.bf16.msra.mxu3 %v8798_v3  ;;  %v2982_v55 = vsub.f32 1.0, %v2973_v17  ;;  %v2986_v12 = vmul.f32 %v2973_v17, %v12136_v15  ;;  %v10517_v15 = vld [vmem:[%s17281_s29 + $0xa0] sm:$0xf0]  ;;  %v10508_v41 = vld [vmem:[%s17281_s29 + $0x58] sm:$0xf0]  ;;  %s10569_s21 = smul.u32 48, %s17431_s3 }
 0x2ba   : > { %v2933_v24 = vsel %vm2930_vm13, %v2932_v7, %v2928_v29  ;;  %v2958_v33 = vsel %vm2955_vm2, %v2957_v61, %v2953_v44  ;;  %v10968_v51 = vpop.eup %10967  ;;  %v8830_v19 = vor.u32 %v10511_v1, %v8829_v40  ;;  %v8818_v7 = vor.u32 %v10508_v41, %v8817_v37  ;;  %v8805_v3 = vld [vmem:[%s17281_s29 + $0x38] sm:$0xf]  ;;  %v9017_v48 = vld [vmem:[%s17251_s7 + $0x60] sm:$0xf]  ;;  %v9005_v56 = vld [vmem:[%s17251_s7 + $0x48] sm:$0xf] }
 0x2bb   : > { %v2976_v53 = vmul.f32 %v2933_v24, %v2893_v2  ;;  %v2981_v5 = vsub.f32 1.0, %v2958_v33  ;;  %v2985_v18 = vmul.f32 %v2958_v33, %v12134_v14  ;;  %v8853_v14 = vld [vmem:[%s17281_s29 + $0x98] sm:$0xf]  ;;  %v8806_v26 = vor.u32 %v10505_v30, %v8805_v3  ;;  %v10502_v2 = vld [vmem:[%s17281_s29 + $0x28] sm:$0xf0]  ;;  %s14494_s24 = scalar_lea.vmem [#allocation2], %s10569_s21 }
 0x2bc   : > { %3403 = vmatpush.bf16.msra.mxu2 %v8689_v25  ;;  %v8854_v34 = vor.u32 %v10517_v15, %v8853_v14  ;;  %v8794_v29 = vor.u32 %v10502_v2, %v8793_v59  ;;  %v9054_v43 = vor.u32 %v10567_v45, %v9053_v11  ;;  %v10561_v25 = vld [vmem:[%s17251_s7 + $0x80] sm:$0xf0]  ;;  %v8981_v42 = vld [vmem:[%s17251_s7 + $0x18] sm:$0xf]  ;;  %v8969_v33 = vld [vmem:[%s17251_s7] sm:$0xf] }
 0x2bd   : > { %v2978_v23 = vadd.f32 %v2976_v53, %v2684_v39  ;;  %3698 = vmatpush.bf16.msra.mxu3 %v8786_v27  ;;  %v2983_v8 = vmul.f32 %v10968_v51, %v2981_v5  ;;  %v9042_v39 = vor.u32 %v10564_v10, %v9041_v35  ;;  %v9029_v53 = vld [vmem:[%s17251_s7 + $0x78] sm:$0xf]  ;;  %v10558_v27 = vld [vmem:[%s17251_s7 + $0x68] sm:$0xf0]  ;;  %v10549_v52 = vld [vmem:[%s17251_s7 + $0x20] sm:$0xf0] }
 0x2be   : > { %v9030_v44 = vor.u32 %v10561_v25, %v9029_v53  ;;  %v9018_v50 = vor.u32 %v10558_v27, %v9017_v48  ;;  %v8982_v32 = vor.u32 %v10549_v52, %v8981_v42  ;;  %v9156_v51 = vld [vmem:[%s17255_s11 + $0xb4] sm:$0xf0]  ;;  %v10582_v31 = vld [vmem:[%s17255_s11 + $0x64] sm:$0xf]  ;;  %v9096_v21 = vld [vmem:[%s17255_s11 + $0x3c] sm:$0xf0] }
 0x2bf   : > { %10969 = vtanh.f32 %v2978_v23  ;;  %v13628_v46 = vadd.f32 %v2985_v18, %v2983_v8  ;;  %v10552_v23 = vld [vmem:[%s17251_s7 + $0x38] sm:$0xf0]  ;;  %v10588_v8 = vld [vmem:[%s17255_s11 + $0x94] sm:$0xf]  ;;  %v9108_v14 = vld [vmem:[%s17255_s11 + $0x54] sm:$0xf0] }
 0x2c0   : > { %3404 = vmatpush.bf16.msra.mxu2 %v8677_v28  ;;  %v8994_v60 = vor.u32 %v10552_v23, %v8993_v54  ;;  %v10546_v28 = vld [vmem:[%s17251_s7 + $0x8] sm:$0xf0]  ;;  %v9084_v40 = vld [vmem:[%s17255_s11 + $0x24] sm:$0xf0]  ;;  %v9072_v37 = vld [vmem:[%s17255_s11 + $0xc] sm:$0xf0] }
 0x2c1   : > { %3699 = vmatpush.bf16.msra.mxu3 %v8774_v57  ;;  %v10591_v57 = vld [vmem:[%s17255_s11 + $0xac] sm:$0xf]  ;;  %v8970_v17 = vor.u32 %v10546_v28, %v8969_v33  ;;  %v8957_v59 = vld [vmem:[%s17250_s6 + $0xa8] sm:$0xf]  ;;  %v10543_v2 = vld [vmem:[%s17250_s6 + $0xb0] sm:$0xf0] }
 0x2c2   : > { %v9159_v5 = vor.u32 %v10591_v57, %v9156_v51  ;;  %v13809_v11 = vld [vmem:[%s17260_s16] sm:$0x7]  ;;  %v8933_v27 = vld [vmem:[%s17250_s6 + $0x78] sm:$0xf]  ;;  %v10534_v52 = vld [vmem:[%s17250_s6 + $0x68] sm:$0xf0] }
 0x2c3   : > { %v3024_v10 = vperm.slane %v13809_v11, 0  ;;  %v8921_v42 = vld [vmem:[%s17250_s6 + $0x60] sm:$0xf]  ;;  %v10542_v51 = vld [vmem:[%s17250_s6 + $0xac] sm:$0xf] }
 0x2c4   : > { %v8922_v57 = vor.u32 %v10534_v52, %v8921_v42  ;;  %v8929_v52 = vld [vmem:[%s17250_s6 + $0x68] sm:$0xf] }
 0x2c5   : > { %v10970_v20 = vpop.eup %10969 }
 0x2c6   : > { %v2984_v22 = vmul.f32 %v10970_v20, %v2982_v55  ;;  %v9144_v55 = vld [vmem:[%s17255_s11 + $0x9c] sm:$0xf0]  ;;  %v13747_v20 = vpack.c.bf16 %v13543_v38, %v13477_v58  ;;  %v9120_v58 = vld [vmem:[%s17255_s11 + $0x6c] sm:$0xf0] }
 0x2c7   : > { %v9147_v18 = vor.u32 %v10588_v8, %v9144_v55  ;;  %v9123_v38 = vor.u32 %v10582_v31, %v9120_v58  ;;  %v8909_v31 = vld [vmem:[%s17250_s6 + $0x48] sm:$0xf]  ;;  %v10531_v58 = vld [vmem:[%s17250_s6 + $0x50] sm:$0xf0] }
 0x2c8   : > { %v13630_v6 = vadd.f32 %v2986_v12, %v2984_v22  ;;  %v10585_v22 = vld [vmem:[%s17255_s11 + $0x7c] sm:$0xf]  ;;  %v9132_v12 = vld [vmem:[%s17255_s11 + $0x84] sm:$0xf0] }
 0x2c9   : > { %v9135_v13 = vor.u32 %v10585_v22, %v9132_v12 }
 0x2ca   : > { %v13634_v49 = vpack.c.bf16 %v13630_v6, %v13628_v46 }
 0x2cc   : > { %3166 = vmatmul.bf16.vlgmr.msra.gmra.mxu1 %v13634_v49  ;;  %3180 = vmatmul.bf16.vlgmr.msrb.gmra.mxu2 %v13634_v49 }
 0x2cd   : > { %3194 = vmatmul.bf16.vlgmr.msrb.gmra.mxu3 %v13634_v49  ;;  %3720 = vmatpush.bf16.msra.mxu1 %v8866_v36  ;;  %v10579_v36 = vld [vmem:[%s17255_s11 + $0x4c] sm:$0xf] }
 0x2ce   : > { %v9111_v15 = vor.u32 %v10579_v36, %v9108_v14 }
 0x2d1   : > { %3721 = vmatpush.bf16.msra.mxu1 %v8854_v34  ;;  %v10576_v34 = vld [vmem:[%s17255_s11 + $0x34] sm:$0xf] }
 0x2d2   : > { %v9099_v47 = vor.u32 %v10576_v34, %v9096_v21  ;;  %v10539_v34 = vld [vmem:[%s17250_s6 + $0x94] sm:$0xf]  ;;  %v8947_v21 = vld [vmem:[%s17250_s6 + $0x9c] sm:$0xf0] }
 0x2d5   : > { %3722 = vmatpush.bf16.msra.mxu1 %v8842_v0  ;;  %v10573_v0 = vld [vmem:[%s17255_s11 + $0x1c] sm:$0xf] }
 0x2d6   : > { %v9087_v1 = vor.u32 %v10573_v0, %v9084_v40  ;;  %v8950_v40 = vor.u32 %v10539_v34, %v8947_v21  ;;  %v8917_v34 = vld [vmem:[%s17250_s6 + $0x50] sm:$0xf]  ;;  %v10532_v21 = vld [vmem:[%s17250_s6 + $0x58] sm:$0xf0] }
 0x2d9   : > { %3723 = vmatpush.bf16.msra.mxu1 %v8830_v19  ;;  %v10570_v19 = vld [vmem:[%s17255_s11 + $0x4] sm:$0xf] }
 0x2da   : > { %v9075_v41 = vor.u32 %v10570_v19, %v9072_v37  ;;  %v8897_v37 = vld [vmem:[%s17250_s6 + $0x30] sm:$0xf] }
 0x2dc   : > { %3391 = vmatmul.bf16.vlgmr.msrb.gmra.mxu1 %v13020_v16  ;;  %3405 = vmatmul.bf16.vlgmr.msra.gmra.mxu2 %v13020_v16  ;;  %v10499_v16 = vld [vmem:[%s17281_s29 + $0x10] sm:$0xf0] }
 0x2dd   : > { %3700 = vmatmul.bf16.vlgmr.msra.gmra.mxu3 %v12901_v62  ;;  %3724 = vmatpush.bf16.msra.mxu1 %v8818_v7  ;;  %v8782_v24 = vor.u32 %v10499_v16, %v8781_v63  ;;  %v3378_v7 = vpop.f32.mrf.mxu0  ;;  %v8958_v16 = vor.u32 %v10543_v2, %v8957_v59 }
 0x2df   : > { %3997 = vmatpush.bf16.msrb.mxu2 %v8958_v16  ;;  %v10536_v16 = vld [vmem:[%s17250_s6 + $0x7c] sm:$0xf] }
 0x2e1   : > { %3725 = vmatpush.bf16.msra.mxu1 %v8806_v26  ;;  %v13792_v26 = vld [vmem:[%s17249_s5] sm:$0x7] }
 0x2e2   : > { %v3559_v63 = vperm.slane %v13792_v26, 1 }
 0x2e5   : > { %3726 = vmatpush.bf16.msra.mxu1 %v8794_v29  ;;  %v3380_v3 = vpop.f32.mrf.mxu0  ;;  %v13803_v29 = vld [vmem:[%s17261_s17] sm:$0x7] }
 0x2e6   : > { %v3235_v45 = vperm.slane %v13803_v29, 0  ;;  %v3236_v59 = vperm.slane %v13803_v29, 1 }
 0x2e8   : > { %v3379_v25 = vadd.f32 %v3378_v7, %v3235_v45  ;;  %v3381_v22 = vadd.f32 %v3380_v3, %v3235_v45  ;;  %v3025_v3 = vperm.slane %v13809_v11, 1  ;;  %v8935_v45 = vld [vmem:[%s17250_s6 + $0x84] sm:$0xf0] }
 0x2e9   : > { %3727 = vmatpush.bf16.msra.mxu1 %v8782_v24  ;;  %v8945_v24 = vld [vmem:[%s17250_s6 + $0x90] sm:$0xf] }
 0x2ec   : > { %3728 = vmatmul.bf16.vlgmr.msra.gmra.mxu1 %v12901_v62  ;;  %v10555_v62 = vld [vmem:[%s17251_s7 + $0x50] sm:$0xf0] }
 0x2ed   : > { %4208 = vmatpush.bf16.msrb.mxu1 %v9054_v43  ;;  %v9006_v61 = vor.u32 %v10555_v62, %v9005_v56  ;;  %v3715_v30 = vpop.f32.mrf.mxu0  ;;  %v10540_v43 = vld [vmem:[%s17250_s6 + $0x98] sm:$0xf0] }
 0x2ee   : > { %v3716_v35 = vadd.f32 %v3715_v30, %v3559_v63 }
 0x2f1   : > { %4209 = vmatpush.bf16.msrb.mxu1 %v9042_v39  ;;  %v8946_v39 = vor.u32 %v10540_v43, %v8945_v24 }
 0x2f3   : > { %3998 = vmatpush.bf16.msrb.mxu2 %v8946_v39  ;;  %v10538_v39 = vld [vmem:[%s17250_s6 + $0x88] sm:$0xf0] }
 0x2f5   : > { %4210 = vmatpush.bf16.msrb.mxu1 %v9030_v44  ;;  %v3717_v53 = vpop.f32.mrf.mxu0  ;;  %v3519_v44 = vld [vmem:[%s13819_s26 + $0x8] sm:$0xff] }
 0x2f6   : > { %v3774_v56 = vadd.f32 %v3716_v35, %v3519_v44  ;;  %v3718_v62 = vadd.f32 %v3717_v53, %v3559_v63  ;;  %v8938_v35 = vor.u32 %v10536_v16, %v8935_v45  ;;  %v10525_v44 = vld [vmem:[%s17250_s6 + $0x20] sm:$0xf0]  ;;  %v9043_v16 = vld [vmem:[%s17251_s7 + $0x9c] sm:$0xf0] }
 0x2f9   : > { %4211 = vmatpush.bf16.msrb.mxu1 %v9018_v50  ;;  %v10537_v50 = vld [vmem:[%s17250_s6 + $0x80] sm:$0xf0] }
 0x2fa   : > { %v8934_v54 = vor.u32 %v10537_v50, %v8933_v27 }
 0x2fc   : > { %3999 = vmatpush.bf16.msrb.mxu2 %v8934_v54  ;;  %v8923_v54 = vld [vmem:[%s17250_s6 + $0x6c] sm:$0xf0] }
 0x2fd   : > { %4212 = vmatpush.bf16.msrb.mxu1 %v9006_v61 }
 0x300   : > { %4000 = vmatpush.bf16.msrb.mxu2 %v8922_v57 }
 0x301   : > { %4213 = vmatpush.bf16.msrb.mxu1 %v8994_v60  ;;  %v3522_v60 = vld [vmem:[%s13819_s26 + $0x20] sm:$0xff] }
 0x302   : > { %v3775_v33 = vadd.f32 %v3718_v62, %v3522_v60 }
 0x305   : > { %4214 = vmatpush.bf16.msrb.mxu1 %v8982_v32  ;;  %v8869_v32 = vmul.f32 -1.442695, %v3774_v56 }
 0x309   : > { %4215 = vmatpush.bf16.msrb.mxu1 %v8970_v17  ;;  %v8959_v17 = vld [vmem:[%s17250_s6 + $0xb4] sm:$0xf0] }
 0x30a   : > { %v8962_v55 = vor.u32 %v10542_v51, %v8959_v17  ;;  %v8873_v51 = vld [vmem:[%s17250_s6] sm:$0xf]  ;;  %v10522_v17 = vld [vmem:[%s17250_s6 + $0x8] sm:$0xf0] }
 0x30c   : > { %4216 = vmatmul.bf16.vlgmr.msrb.gmra.mxu1 %v13747_v20  ;;  %4011 = vmatpush.bf16.msrb.mxu3 %v8962_v55 }
 0x30d   : > { %4539 = vmatpush.bf16.msra.mxu1 %v9159_v5  ;;  %v8965_v5 = vld [vmem:[%s17250_s6 + $0xb0] sm:$0xf] }
 0x310   : > { %4012 = vmatpush.bf16.msrb.mxu3 %v8950_v40 }
 0x311   : > { %4540 = vmatpush.bf16.msra.mxu1 %v9147_v18  ;;  %v10544_v18 = vld [vmem:[%s17250_s6 + $0xb8] sm:$0xf0] }
 0x314   : > { %4013 = vmatpush.bf16.msrb.mxu3 %v8938_v35  ;;  %v8918_v35 = vor.u32 %v10532_v21, %v8917_v34 }
 0x315   : > { %4541 = vmatpush.bf16.msra.mxu1 %v9135_v13  ;;  %v8966_v13 = vor.u32 %v10544_v18, %v8965_v5  ;;  %v8874_v18 = vor.u32 %v10522_v17, %v8873_v51 }
 0x317   : > { %4025 = vmatpush.bf16.msrb.mxu0 %v8966_v13 }
 0x319   : > { %4542 = vmatpush.bf16.msra.mxu1 %v9123_v38  ;;  %v8870_v38 = vmul.f32 -1.442695, %v3775_v33 }
 0x31d   : > { %4543 = vmatpush.bf16.msra.mxu1 %v9111_v15  ;;  %v8910_v15 = vor.u32 %v10531_v58, %v8909_v31 }
 0x31f   : > { %4001 = vmatpush.bf16.msrb.mxu2 %v8910_v15 }
 0x321   : > { %4544 = vmatpush.bf16.msra.mxu1 %v9099_v47  ;;  %v8953_v47 = vld [vmem:[%s17250_s6 + $0x98] sm:$0xf] }
 0x325   : > { %4545 = vmatpush.bf16.msra.mxu1 %v9087_v1  ;;  %v10541_v1 = vld [vmem:[%s17250_s6 + $0xa0] sm:$0xf0] }
 0x326   : > { %v8954_v19 = vor.u32 %v10541_v1, %v8953_v47 }
 0x328   : > { %4026 = vmatpush.bf16.msrb.mxu0 %v8954_v19 }
 0x329   : > { %4546 = vmatpush.bf16.msra.mxu1 %v9075_v41  ;;  %v10528_v41 = vld [vmem:[%s17250_s6 + $0x38] sm:$0xf0] }
 0x32a   : > { %v8898_v2 = vor.u32 %v10528_v41, %v8897_v37  ;;  %v3518_v41 = vld [vmem:[%s13819_s26] sm:$0xff] }
 0x32c   : > { %4547 = vmatmul.bf16.vlgmr.msra.gmra.mxu1 %v13634_v49  ;;  %4002 = vmatpush.bf16.msrb.mxu2 %v8898_v2  ;;  %v10563_v2 = vld [vmem:[%s17251_s7 + $0x94] sm:$0xf] }
 0x349   : > { %v3167_v48 = vpop.f32.mrf.mxu1 }
 0x34a   : > { %v3168_v61 = vadd.f32 %v3167_v48, %v3024_v10 }
 0x34c   : > { %v3411_v23 = vadd.f32 %v3379_v25, %v3168_v61  ;;  %v8885_v25 = vld [vmem:[%s17250_s6 + $0x18] sm:$0xf]  ;;  %v10533_v61 = vld [vmem:[%s17250_s6 + $0x64] sm:$0xf] }
 0x34d   : > { %v8886_v56 = vor.u32 %v10525_v44, %v8885_v25  ;;  %v8926_v42 = vor.u32 %v10533_v61, %v8923_v54  ;;  %v8905_v44 = vld [vmem:[%s17250_s6 + $0x38] sm:$0xf] }
 0x34e   : > { %v8762_v28 = vmul.f32 -1.442695, %v3411_v23 }
 0x34f   : > { %v3181_v36 = vpop.f32.mrf.mxu2  ;;  %4003 = vmatpush.bf16.msrb.mxu2 %v8886_v56  ;;  %4014 = vmatpush.bf16.msrb.mxu3 %v8926_v42  ;;  %v3237_v56 = vperm.slane %v13803_v29, 2  ;;  %v10589_v29 = vld [vmem:[%s17255_s11 + $0x98] sm:$0xf0] }
 0x350   : > { %10971 = vpow2.f32 %v8762_v28  ;;  %v13844_v8 = vpop.f32.mrf.mxu3  ;;  %v3182_v48 = vadd.f32 %v3181_v36, %v3025_v3  ;;  %v3558_v28 = vperm.slane %v13792_v26, 0  ;;  %v8911_v36 = vld [vmem:[%s17250_s6 + $0x54] sm:$0xf0] }
 0x351   : > { %v3169_v12 = vpop.f32.mrf.mxu1  ;;  %10973 = vpow2.f32 %v8869_v32  ;;  %v10535_v32 = vld [vmem:[%s17250_s6 + $0x70] sm:$0xf0] }
 0x352   : > { %v3170_v14 = vadd.f32 %v3169_v12, %v3024_v10  ;;  %10975 = vpow2.f32 %v8870_v38  ;;  %v8941_v10 = vld [vmem:[%s17250_s6 + $0x80] sm:$0xf]  ;;  %v8930_v57 = vor.u32 %v10535_v32, %v8929_v52  ;;  %v9055_v12 = vld [vmem:[%s17251_s7 + $0xb4] sm:$0xf0]  ;;  %v10530_v38 = vld [vmem:[%s17250_s6 + $0x4c] sm:$0xf] }
 0x353   : > { %v8942_v50 = vor.u32 %v10538_v39, %v8941_v10  ;;  %4004 = vmatpush.bf16.msrb.mxu2 %v8874_v18  ;;  %v9046_v10 = vor.u32 %v10563_v2, %v9043_v16  ;;  %v10560_v32 = vld [vmem:[%s17251_s7 + $0x7c] sm:$0xf] }
 0x354   : > { %v3412_v0 = vadd.f32 %v3381_v22, %v3170_v14  ;;  %v10566_v22 = vld [vmem:[%s17251_s7 + $0xac] sm:$0xf]  ;;  %v3521_v2 = vld [vmem:[%s13819_s26 + $0x18] sm:$0xff] }
 0x355   : > { %4027 = vmatpush.bf16.msrb.mxu0 %v8942_v50  ;;  %v9058_v58 = vor.u32 %v10566_v22, %v9055_v12  ;;  %v3026_v50 = vperm.slane %v13809_v11, 2  ;;  %v10524_v22 = vld [vmem:[%s17250_s6 + $0x1c] sm:$0xf]  ;;  %v8887_v12 = vld [vmem:[%s17250_s6 + $0x24] sm:$0xf0] }
 0x356   : > { %v10972_v7 = vpop.eup %10971  ;;  %v8763_v30 = vmul.f32 -1.442695, %v3412_v0  ;;  %v10551_v11 = vld [vmem:[%s17251_s7 + $0x34] sm:$0xf] }
 0x357   : > { %v13875_v63 = vadd.f32 1.0, %v10972_v7  ;;  %v10974_v24 = vpop.eup %10973  ;;  %v3183_v23 = vpop.f32.mrf.mxu2  ;;  %4222 = vmatpush.bf16.msra.mxu2 %v9058_v58 }
 0x358   : > { %10977 = vpow2.f32 %v8763_v30  ;;  %v13883_v43 = vpop.f32.mrf.mxu3  ;;  %v13902_v62 = vadd.f32 1.0, %v10974_v24  ;;  %v10976_v33 = vpop.eup %10975  ;;  %v3184_v19 = vadd.f32 %v3183_v23, %v3025_v3  ;;  %v8914_v30 = vor.u32 %v10530_v38, %v8911_v36  ;;  %v10527_v3 = vld [vmem:[%s17250_s6 + $0x34] sm:$0xf]  ;;  %v8893_v38 = vld [vmem:[%s17250_s6 + $0x20] sm:$0xf] }
 0x359   : > { %10979 = vrcp.f32 %v13875_v63  ;;  %v3392_v53 = vpop.f32.mrf.mxu1  ;;  %4028 = vmatpush.bf16.msrb.mxu0 %v8930_v57  ;;  %v13948_v47 = vadd.f32 1.0, %v10976_v33  ;;  %v3430_v0 = vand.u32 2147483647, %v13875_v63  ;;  %v3432_v45 = vand.u32 2147483648, %v13875_v63  ;;  %v9031_v33 = vld [vmem:[%s17251_s7 + $0x84] sm:$0xf0] }
 0x35a   : > { %v3393_v27 = vadd.f32 %v3392_v53, %v3236_v59  ;;  %10981 = vrcp.f32 %v13902_v62  ;;  %4015 = vmatpush.bf16.msrb.mxu3 %v8914_v30  ;;  %vm3426_vm5 = vweird.f32 %v13875_v63  ;;  %v10526_v36 = vld [vmem:[%s17250_s6 + $0x28] sm:$0xf0] }
 0x35b   : > { %4223 = vmatpush.bf16.msra.mxu2 %v9046_v10  ;;  %v3433_v17 = vor.u32 1.1754944e-38, %v3432_v45  ;;  %vm3431_vm7 = vcmp.eq.f32.partialorder %v3430_v0, 8.507059e+37  ;;  %v10557_v0 = vld [vmem:[%s17251_s7 + $0x64] sm:$0xf]  ;;  %v8894_v16 = vor.u32 %v10526_v36, %v8893_v38  ;;  %v8881_v45 = vld [vmem:[%s17250_s6 + $0x8] sm:$0xf] }
 0x35c   : > { %v3451_v60 = vadd.f32 %v3393_v27, %v3182_v48  ;;  %v10529_v48 = vld [vmem:[%s17250_s6 + $0x40] sm:$0xf0] }
 0x35d   : > { %4029 = vmatpush.bf16.msrb.mxu0 %v8918_v35  ;;  %v8906_v54 = vor.u32 %v10529_v48, %v8905_v44 }
 0x35e   : > { %v10978_v5 = vpop.eup %10977  ;;  %v8764_v55 = vmul.f32 -1.442695, %v3451_v60 }
 0x35f   : > { %v13929_v13 = vpop.eup %10979  ;;  %v13932_v31 = vadd.f32 1.0, %v10978_v5  ;;  %v3406_v60 = vpop.f32.mrf.mxu2  ;;  %v9034_v5 = vor.u32 %v10560_v32, %v9031_v33 }
 0x360   : > { %10983 = vpow2.f32 %v8764_v55  ;;  %v3422_v14 = vmul.f32 %v13929_v13, %v13875_v63  ;;  %v3701_v15 = vpop.f32.mrf.mxu3  ;;  %vm3427_vm4 = vweird.f32 %v13929_v13  ;;  %v13980_v27 = vpop.eup %10981 }
 0x361   : > { %10985 = vrcp.f32 %v13932_v31  ;;  %v3702_v40 = vadd.f32 %v3701_v15, %v3558_v28  ;;  %v3394_v1 = vpop.f32.mrf.mxu1  ;;  %vm3428_vm6 = vmor %vm3426_vm5, %vm3427_vm4  ;;  %4030 = vmatpush.bf16.msrb.mxu0 %v8906_v54  ;;  %4224 = vmatpush.bf16.msra.mxu2 %v9034_v5  ;;  %v3407_v15 = vadd.f32 %v3406_v60, %v3237_v56  ;;  %v3445_v21 = vand.u32 2147483647, %v13932_v31 }
 0x362   : > { %v3423_v37 = vsub.f32 1.0, %v3422_v14  ;;  %v3395_v7 = vadd.f32 %v3394_v1, %v3236_v59  ;;  %v8899_v59 = vld [vmem:[%s17250_s6 + $0x3c] sm:$0xf0]  ;;  %10987 = vrcp.f32 %v13948_v47  ;;  %v3196_v14 = vadd.f32 %v13844_v8, %v3026_v50  ;;  %v9019_v8 = vld [vmem:[%s17251_s7 + $0x6c] sm:$0xf0] }
 0x363   : > { %v3734_v24 = vadd.f32 %v3702_v40, %v3518_v41  ;;  %v8902_v25 = vor.u32 %v10527_v3, %v8899_v59  ;;  %vm3441_vm8 = vweird.f32 %v13932_v31  ;;  %v3447_v40 = vand.u32 2147483648, %v13932_v31 }
 0x364   : > { %v3424_v39 = vmul.f32 %v13929_v13, %v3423_v37  ;;  %v3452_v53 = vadd.f32 %v3395_v7, %v3184_v19  ;;  %v8890_v19 = vor.u32 %v10524_v22, %v8887_v12  ;;  %v10521_v37 = vld [vmem:[%s17250_s6 + $0x4] sm:$0xf]  ;;  %v9022_v3 = vor.u32 %v10557_v0, %v9019_v8  ;;  %v9154_v22 = vld [vmem:[%s17255_s11 + $0xa8] sm:$0xf]  ;;  %v10592_v12 = vld [vmem:[%s17255_s11 + $0xb0] sm:$0xf0] }
 0x365   : > { %v8867_v61 = vmul.f32 -1.442695, %v3734_v24  ;;  %4016 = vmatpush.bf16.msrb.mxu3 %v8902_v25  ;;  %4031 = vmatpush.bf16.msrb.mxu0 %v8894_v16  ;;  %v3448_v32 = vor.u32 1.1754944e-38, %v3447_v40  ;;  %vm3446_vm11 = vcmp.eq.f32.partialorder %v3445_v21, 8.507059e+37  ;;  %v9049_v0 = vld [vmem:[%s17251_s7 + $0x98] sm:$0xf]  ;;  %v9155_v8 = vor.u32 %v10592_v12, %v9154_v22 }
 0x366   : > { %v10984_v23 = vpop.eup %10983  ;;  %v3425_v42 = vadd.f32 %v13929_v13, %v3424_v39  ;;  %v8765_v52 = vmul.f32 -1.442695, %v3452_v53  ;;  %v10523_v39 = vld [vmem:[%s17250_s6 + $0x10] sm:$0xf0]  ;;  %v9061_v53 = vld [vmem:[%s17251_s7 + $0xb0] sm:$0xf]  ;;  %4225 = vmatpush.bf16.msra.mxu2 %v9022_v3 }
 0x367   : > { %v13993_v57 = vpop.eup %10985  ;;  %v13995_v51 = vadd.f32 1.0, %v10984_v23  ;;  %10989 = vpow2.f32 %v8867_v61  ;;  %v8882_v54 = vor.u32 %v10523_v39, %v8881_v45  ;;  %v10568_v23 = vld [vmem:[%s17251_s7 + $0xb8] sm:$0xf0]  ;;  %v10565_v40 = vld [vmem:[%s17251_s7 + $0xa0] sm:$0xf0] }
 0x368   : > { %v3429_v63 = vsel %vm3428_vm6, %v13929_v13, %v3425_v42  ;;  %10991 = vpow2.f32 %v8765_v52  ;;  %v3437_v55 = vmul.f32 %v13993_v57, %v13932_v31  ;;  %v3703_v18 = vpop.f32.mrf.mxu3  ;;  %v3560_v13 = vperm.slane %v13792_v26, 2  ;;  %v14035_v41 = vpop.eup %10987  ;;  %v10586_v52 = vld [vmem:[%s17255_s11 + $0x80] sm:$0xf0] }
 0x369   : > { %10993 = vrcp.f32 %v13995_v51  ;;  %v3434_v58 = vsel %vm3431_vm7, %v3433_v17, %v3429_v63  ;;  %v3704_v1 = vadd.f32 %v3703_v18, %v3558_v28  ;;  %vm3442_vm9 = vweird.f32 %v13993_v57  ;;  %v8875_v28 = vld [vmem:[%s17250_s6 + $0xc] sm:$0xf0]  ;;  %4017 = vmatpush.bf16.msrb.mxu3 %v8890_v19  ;;  %4032 = vmatpush.bf16.msrb.mxu0 %v8882_v54 }
 0x36a   : > { %v3438_v34 = vsub.f32 1.0, %v3437_v55  ;;  %v3491_v7 = vmul.f32 %v3434_v58, %v3407_v15  ;;  %v3472_v35 = vand.u32 2147483648, %v13995_v51  ;;  %v8878_v59 = vor.u32 %v10521_v37, %v8875_v28  ;;  %vm14068_vm10 = vmor %vm3441_vm8, %vm3442_vm9  ;;  %v3408_v55 = vpop.f32.mrf.mxu2 }
 0x36b   : > { %v3735_v10 = vadd.f32 %v3704_v1, %v3521_v2  ;;  %v3470_v44 = vand.u32 2147483647, %v13995_v51  ;;  %v9062_v17 = vor.u32 %v10568_v23, %v9061_v53  ;;  %v14097_v15 = vmul.f32 %v13980_v27, %v13902_v62  ;;  %v9142_v1 = vld [vmem:[%s17255_s11 + $0x90] sm:$0xf] }
 0x36c   : > { %v3439_v30 = vmul.f32 %v13993_v57, %v3438_v34  ;;  %v3493_v63 = vadd.f32 %v3491_v7, %v3196_v14  ;;  %v3473_v31 = vor.u32 1.1754944e-38, %v3472_v35  ;;  %v9007_v14 = vld [vmem:[%s17251_s7 + $0x54] sm:$0xf0]  ;;  %v3198_v34 = vadd.f32 %v13883_v43, %v3026_v50  ;;  %v8995_v43 = vld [vmem:[%s17251_s7 + $0x3c] sm:$0xf0] }
 0x36d   : > { %v10990_v24 = vpop.eup %10989  ;;  %v8868_v33 = vmul.f32 -1.442695, %v3735_v10  ;;  %4018 = vmatpush.bf16.msrb.mxu3 %v8878_v59  ;;  %vm14085_vm12 = vcmp.eq.f32.partialorder %v3470_v44, 8.507059e+37  ;;  %v3409_v21 = vadd.f32 %v3408_v55, %v3237_v56  ;;  %vm3466_vm13 = vweird.f32 %v13995_v51  ;;  %v9037_v7 = vld [vmem:[%s17251_s7 + $0x80] sm:$0xf]  ;;  %4525 = vmatpush.bf16.msra.mxu0 %v9155_v8 }
 0x36e   : > { %v10992_v25 = vpop.eup %10991  ;;  %v14054_v48 = vadd.f32 1.0, %v10990_v24  ;;  %v3440_v61 = vadd.f32 %v13993_v57, %v3439_v30  ;;  %v10562_v30 = vld [vmem:[%s17251_s7 + $0x88] sm:$0xf0]  ;;  %v9050_v24 = vor.u32 %v10565_v40, %v9049_v0  ;;  %v9143_v39 = vor.u32 %v10589_v29, %v9142_v1  ;;  %v9025_v55 = vld [vmem:[%s17251_s7 + $0x68] sm:$0xf] }
 0x36f   : > { %v14060_v60 = vpop.eup %10993  ;;  %v14062_v42 = vadd.f32 1.0, %v10992_v25  ;;  %v8998_v53 = vor.u32 %v10551_v11, %v8995_v43  ;;  %v9130_v25 = vld [vmem:[%s17255_s11 + $0x78] sm:$0xf]  ;;  %v9038_v23 = vor.u32 %v10562_v30, %v9037_v7  ;;  %v10583_v1 = vld [vmem:[%s17255_s11 + $0x68] sm:$0xf0]  ;;  %v3729_v11 = vpop.f32.mrf.mxu1  ;;  %vm3789_vm9 = vweird.f32 %v13902_v62 }
 0x370   : > { %v3462_v5 = vmul.f32 %v14060_v60, %v13995_v51  ;;  %10995 = vrcp.f32 %v14054_v48  ;;  %v3444_v18 = vsel %vm14068_vm10, %v13993_v57, %v3440_v61  ;;  %v10554_v57 = vld [vmem:[%s17251_s7 + $0x4c] sm:$0xf]  ;;  %vm3467_vm14 = vweird.f32 %v14060_v60  ;;  %v8971_v29 = vld [vmem:[%s17251_s7 + $0xc] sm:$0xf0]  ;;  %v10556_v8 = vld [vmem:[%s17251_s7 + $0x58] sm:$0xf0] }
 0x371   : > { %10997 = vrcp.f32 %v14062_v42  ;;  %v3449_v36 = vsel %vm3446_vm11, %v3448_v32, %v3444_v18  ;;  %4236 = vmatpush.bf16.msra.mxu3 %v9062_v17  ;;  %v3487_v50 = vand.u32 2147483648, %v14062_v42  ;;  %v9010_v37 = vor.u32 %v10554_v57, %v9007_v14  ;;  %vm14143_vm15 = vmor %vm3466_vm13, %vm3467_vm14  ;;  %v10548_v32 = vld [vmem:[%s17251_s7 + $0x1c] sm:$0xf]  ;;  %v10559_v18 = vld [vmem:[%s17251_s7 + $0x70] sm:$0xf0]  ;;  %4526 = vmatpush.bf16.msra.mxu0 %v9143_v39 }
 0x372   : > { %v3463_v58 = vsub.f32 1.0, %v3462_v5  ;;  %10999 = vpow2.f32 %v8868_v33  ;;  %v3492_v56 = vmul.f32 %v3449_v36, %v3409_v21  ;;  %v3485_v28 = vand.u32 2147483647, %v14062_v42  ;;  %v8983_v33 = vld [vmem:[%s17251_s7 + $0x24] sm:$0xf0] }
 0x373   : > { %11001 = vtanh.f32 %v3493_v63  ;;  %v3753_v45 = vand.u32 2147483647, %v14054_v48  ;;  %v3755_v59 = vand.u32 2147483648, %v14054_v48  ;;  %4226 = vmatpush.bf16.msra.mxu2 %v9010_v37  ;;  %v14155_v51 = vmul.f32 %v14035_v41, %v13948_v47  ;;  %v9118_v57 = vld [vmem:[%s17255_s11 + $0x60] sm:$0xf] }
 0x374   : > { %v3464_v19 = vmul.f32 %v14060_v60, %v3463_v58  ;;  %v3494_v17 = vadd.f32 %v3492_v56, %v3198_v34  ;;  %v9131_v38 = vor.u32 %v10586_v52, %v9130_v25  ;;  %v8986_v36 = vor.u32 %v10548_v32, %v8983_v33  ;;  %v11199_v34 = vld [vmem:[%s11336_s25] sm:$0xff]  ;;  %v9013_v56 = vld [vmem:[%s17251_s7 + $0x50] sm:$0xf] }
 0x375   : > { %4237 = vmatpush.bf16.msra.mxu3 %v9050_v24  ;;  %v9026_v40 = vor.u32 %v10559_v18, %v9025_v55  ;;  %vm3481_vm2 = vweird.f32 %v14062_v42  ;;  %vm3749_vm3 = vweird.f32 %v14054_v48  ;;  %v3488_v7 = vor.u32 1.1754944e-38, %v3487_v50  ;;  %v9094_v18 = vld [vmem:[%s17255_s11 + $0x30] sm:$0xf] }
 0x376   : > { %v14132_v2 = vpop.eup %10995  ;;  %v3465_v16 = vadd.f32 %v14060_v60, %v3464_v19  ;;  %v10545_v19 = vld [vmem:[%s17251_s7 + $0x4] sm:$0xf]  ;;  %vm3754_vm6 = vcmp.eq.f32.partialorder %v3753_v45, 8.507059e+37  ;;  %4527 = vmatpush.bf16.msra.mxu0 %v9131_v38  ;;  %v9119_v10 = vor.u32 %v10583_v1, %v9118_v57  ;;  %vm3486_vm7 = vcmp.eq.f32.partialorder %v3485_v28, 8.507059e+37  ;;  %v10580_v45 = vld [vmem:[%s17255_s11 + $0x50] sm:$0xf0] }
 0x377   : > { %v14137_v35 = vpop.eup %10997  ;;  %v3745_v3 = vmul.f32 %v14132_v2, %v14054_v48  ;;  %vm3750_vm1 = vweird.f32 %v14132_v2  ;;  %4227 = vmatpush.bf16.msra.mxu2 %v8998_v53  ;;  %v9014_v39 = vor.u32 %v10556_v8, %v9013_v56  ;;  %v3786_v25 = vsub.f32 1.0, %v14097_v15  ;;  %v9001_v28 = vld [vmem:[%s17251_s7 + $0x38] sm:$0xf] }
 0x378   : > { %v11000_v44 = vpop.eup %10999  ;;  %v3469_v61 = vsel %vm14143_vm15, %v14060_v60, %v3465_v16  ;;  %v3477_v54 = vmul.f32 %v14137_v35, %v14062_v42  ;;  %vm3482_vm0 = vweird.f32 %v14137_v35  ;;  %vm3751_vm4 = vmor %vm3749_vm3, %vm3750_vm1  ;;  %v3756_v16 = vor.u32 1.1754944e-38, %v3755_v59 }
 0x379   : > { %v3474_v60 = vsel %vm14085_vm12, %v3473_v31, %v3469_v61  ;;  %v14173_v5 = vadd.f32 1.0, %v11000_v44  ;;  %v3746_v63 = vsub.f32 1.0, %v3745_v3  ;;  %v11002_v22 = vpop.eup %11001  ;;  %4238 = vmatpush.bf16.msra.mxu3 %v9038_v23  ;;  %vm14217_vm5 = vmor %vm3481_vm2, %vm3482_vm0  ;;  %v8974_v3 = vor.u32 %v10545_v19, %v8971_v29  ;;  %v9082_v29 = vld [vmem:[%s17255_s11 + $0x18] sm:$0xf] }
 0x37a   : > { %v3497_v12 = vsub.f32 1.0, %v3474_v60  ;;  %v3478_v58 = vsub.f32 1.0, %v3477_v54  ;;  %v3501_v21 = vmul.f32 %v11199_v34, %v3474_v60  ;;  %v3730_v42 = vadd.f32 %v3729_v11, %v3560_v13  ;;  %4528 = vmatpush.bf16.msra.mxu0 %v9119_v10  ;;  %v11200_v60 = vld [vmem:[%s11336_s25 + $0x8] sm:$0xff]  ;;  %v3520_v34 = vld [vmem:[%s13819_s26 + $0x10] sm:$0xff]  ;;  %v10574_v11 = vld [vmem:[%s17255_s11 + $0x20] sm:$0xf0] }
 0x37b   : > { %11003 = vrcp.f32 %v14173_v5  ;;  %v3747_v31 = vmul.f32 %v14132_v2, %v3746_v63  ;;  %4228 = vmatpush.bf16.msra.mxu2 %v8986_v36  ;;  %v3801_v52 = vsub.f32 1.0, %v14155_v51  ;;  %v10577_v51 = vld [vmem:[%s17255_s11 + $0x38] sm:$0xf0]  ;;  %v3768_v57 = vand.u32 2147483647, %v14173_v5 }
 0x37c   : > { %v3499_v14 = vmul.f32 %v11002_v22, %v3497_v12  ;;  %v3479_v0 = vmul.f32 %v14137_v35, %v3478_v58  ;;  %11005 = vtanh.f32 %v3494_v17  ;;  %v3787_v22 = vmul.f32 %v13980_v27, %v3786_v25  ;;  %v8989_v58 = vld [vmem:[%s17251_s7 + $0x20] sm:$0xf] }
 0x37d   : > { %v3748_v43 = vadd.f32 %v14132_v2, %v3747_v31  ;;  %4239 = vmatpush.bf16.msra.mxu3 %v9026_v40  ;;  %v3770_v12 = vand.u32 2147483648, %v14173_v5  ;;  %v10550_v31 = vld [vmem:[%s17251_s7 + $0x28] sm:$0xf0]  ;;  %vm3764_vm10 = vweird.f32 %v14173_v5  ;;  %vm3790_vm11 = vweird.f32 %v13980_v27 }
 0x37e   : > { %v14208_v37 = vadd.f32 %v3501_v21, %v3499_v14  ;;  %v3480_v30 = vadd.f32 %v14137_v35, %v3479_v0  ;;  %v3802_v14 = vmul.f32 %v14035_v41, %v3801_v52  ;;  %v3731_v21 = vpop.f32.mrf.mxu1  ;;  %v9095_v0 = vor.u32 %v10577_v51, %v9094_v18  ;;  %vm14295_vm15 = vmor %vm3789_vm9, %vm3790_vm11 }
 0x37f   : > { %v3752_v24 = vsel %vm3751_vm4, %v14132_v2, %v3748_v43  ;;  %v9106_v2 = vld [vmem:[%s17255_s11 + $0x48] sm:$0xf]  ;;  %4229 = vmatpush.bf16.msra.mxu2 %v8974_v3  ;;  %v8990_v19 = vor.u32 %v10550_v31, %v8989_v58  ;;  %v3795_v43 = vand.u32 2147483648, %v13902_v62  ;;  %v3788_v56 = vadd.f32 %v13980_v27, %v3787_v22  ;;  %v10587_v58 = vld [vmem:[%s17255_s11 + $0x88] sm:$0xf0] }
 0x380   : > { %8766 = vst [vmem:[%s11336_s25 + $0x10] sm:$0xff] %v14208_v37  ;;  %v3484_v50 = vsel %vm14217_vm5, %v14137_v35, %v3480_v30  ;;  %v3757_v59 = vsel %vm3754_vm6, %v3756_v16, %v3752_v24  ;;  %v10553_v35 = vld [vmem:[%s17251_s7 + $0x40] sm:$0xf0]  ;;  %v9107_v15 = vor.u32 %v10580_v45, %v9106_v2  ;;  %v3771_v8 = vor.u32 1.1754944e-38, %v3770_v12  ;;  %v10571_v2 = vld [vmem:[%s17255_s11 + $0x8] sm:$0xf0] }
 0x381   : > { %v11004_v53 = vpop.eup %11003  ;;  %v3489_v44 = vsel %vm3486_vm7, %v3488_v7, %v3484_v50  ;;  %v3814_v32 = vmul.f32 %v3757_v59, %v3730_v42  ;;  %4240 = vmatpush.bf16.msra.mxu3 %v9014_v39  ;;  %v9002_v55 = vor.u32 %v10553_v35, %v9001_v28  ;;  %v10547_v7 = vld [vmem:[%s17251_s7 + $0x10] sm:$0xf0]  ;;  %v3793_v30 = vand.u32 2147483647, %v13902_v62  ;;  %v9070_v39 = vld [vmem:[%s17255_s11] sm:$0xf] }
 0x382   : > { %v3498_v61 = vsub.f32 1.0, %v3489_v44  ;;  %v3760_v54 = vmul.f32 %v11004_v53, %v14173_v5  ;;  %v11006_v23 = vpop.eup %11005  ;;  %v3502_v17 = vmul.f32 %v11200_v60, %v3489_v44  ;;  %vm3765_vm8 = vweird.f32 %v11004_v53  ;;  %4529 = vmatpush.bf16.msra.mxu0 %v9107_v15  ;;  %v8977_v5 = vld [vmem:[%s17251_s7 + $0x8] sm:$0xf]  ;;  %v9138_v12 = vld [vmem:[%s17255_s11 + $0x80] sm:$0xf] }
 0x383   : > { %v3816_v40 = vadd.f32 %v3814_v32, %v3520_v34  ;;  %vm3766_vm12 = vmor %vm3764_vm10, %vm3765_vm8  ;;  %v3732_v16 = vadd.f32 %v3731_v21, %v3560_v13  ;;  %vm3769_vm13 = vcmp.eq.f32.partialorder %v3768_v57, 8.507059e+37  ;;  %vm3805_vm14 = vweird.f32 %v14035_v41  ;;  %v3523_v45 = vld [vmem:[%s13819_s26 + $0x28] sm:$0xff]  ;;  %v10584_v57 = vld [vmem:[%s17255_s11 + $0x70] sm:$0xf0]  ;;  %s6016_s26 = sadd.s32 3, %s11329_s20 }
 0x384   : > { %v3500_v33 = vmul.f32 %v11006_v23, %v3498_v61  ;;  %v3761_v63 = vsub.f32 1.0, %v3760_v54  ;;  %v3803_v10 = vadd.f32 %v14035_v41, %v3802_v14  ;;  %v9083_v3 = vor.u32 %v10574_v11, %v9082_v29  ;;  %v9114_v34 = vld [vmem:[%s17255_s11 + $0x50] sm:$0xf]  ;;  %v10581_v21 = vld [vmem:[%s17255_s11 + $0x58] sm:$0xf0]  ;;  %s6017_s21 = ssub.s32 %s6016_s26, %s11417_s22  ;;  %s6855_s22 = ssub.s32 %s6854_s2, %s17421_s23 }
 0x385   : > { %4241 = vmatpush.bf16.msra.mxu3 %v9002_v55  ;;  %v3810_v26 = vand.u32 2147483648, %v13948_v47  ;;  %11007 = vtanh.f32 %v3816_v40  ;;  %v8978_v59 = vor.u32 %v10547_v7, %v8977_v5  ;;  %vm3804_vm0 = vweird.f32 %v13948_v47  ;;  %v9102_v40 = vld [vmem:[%s17255_s11 + $0x38] sm:$0xf]  ;;  %v9090_v29 = vld [vmem:[%s17255_s11 + $0x20] sm:$0xf]  ;;  %p6018_p0 = scmp.lt.s32.totalorder %s6017_s21, 3 }
 0x386   : > { %v14261_v38 = vadd.f32 %v3502_v17, %v3500_v33  ;;  %v3762_v36 = vmul.f32 %v11004_v53, %v3761_v63  ;;  %4530 = vmatpush.bf16.msra.mxu0 %v9095_v0  ;;  %v3792_v62 = vsel %vm14295_vm15, %v13980_v27, %v3788_v56  ;;  %v3796_v25 = vor.u32 1.1754944e-38, %v3795_v43  ;;  %vm3806_vm1 = vmor %vm3804_vm0, %vm3805_vm14  ;;  %v10593_v17 = vld [vmem:[%s17255_s11 + $0xb8] sm:$0xf0]  ;;  %v10575_v11 = vld [vmem:[%s17255_s11 + $0x28] sm:$0xf0]  ;;  %p6856_p1 = scmp.gt.s32.totalorder %s6855_s22, 0 }
 0x387   : > { %vm3794_vm2 = vcmp.eq.f32.partialorder %v3793_v30, 8.507059e+37  ;;  %v3807_v42 = vsel %vm3806_vm1, %v14035_v41, %v3803_v10  ;;  %v9071_v28 = vor.u32 %v10571_v2, %v9070_v39  ;;  %v3811_v35 = vor.u32 1.1754944e-38, %v3810_v26  ;;  %v9162_v41 = vld [vmem:[%s17255_s11 + $0xb0] sm:$0xf]  ;;  %v9078_v56 = vld [vmem:[%s17255_s11 + $0x8] sm:$0xf] }
 0x388   : > { %8767 = vst [vmem:[%s11336_s25 + $0x18] sm:$0xff] %v14261_v38  ;;  %v3763_v1 = vadd.f32 %v11004_v53, %v3762_v36  ;;  %v3797_v61 = vsel %vm3794_vm2, %v3796_v25, %v3792_v62  ;;  %v9163_v18 = vor.u32 %v10593_v17, %v9162_v41  ;;  %v9139_v31 = vor.u32 %v10587_v58, %v9138_v12  ;;  %v9126_v36 = vld [vmem:[%s17255_s11 + $0x68] sm:$0xf]  ;;  %v10640_v5 = vld [vmem:[%s17259_s15 + $0xb0] sm:$0xf0]  ;;  %s17435_s21 = smov (!%p6018_p0, %s6017_s21), 3 }
 0x389   : > { %4242 = vmatpush.bf16.msra.mxu3 %v8990_v19  ;;  %v3820_v23 = vsub.f32 1.0, %v3797_v61  ;;  %v3824_v15 = vmul.f32 %v3797_v61, %v12895_v4  ;;  %v9150_v4 = vld [vmem:[%s17255_s11 + $0x98] sm:$0xf]  ;;  %v9127_v14 = vor.u32 %v10584_v57, %v9126_v36  ;;  %v9115_v0 = vor.u32 %v10581_v21, %v9114_v34  ;;  %v9314_v26 = vld [vmem:[%s17259_s15 + $0x60] sm:$0xf]  ;;  %v14469_v58 = vpop.f32.mrf.mxu1  ;;  %s17437_s22 = smov (!%p6856_p1, %s6855_s22), 0 }
 0x38a   : > { %v3767_v48 = vsel %vm3766_vm12, %v11004_v53, %v3763_v1  ;;  %v3808_v53 = vand.u32 2147483647, %v13948_v47  ;;  %4531 = vmatpush.bf16.msra.mxu0 %v9083_v3  ;;  %v10578_v1 = vld [vmem:[%s17255_s11 + $0x40] sm:$0xf0]  ;;  %v9091_v43 = vor.u32 %v10575_v11, %v9090_v29  ;;  %v9326_v10 = vld [vmem:[%s17259_s15 + $0x78] sm:$0xf] }
 0x38b   : > { %v3772_v24 = vsel %vm3769_vm13, %v3771_v8, %v3767_v48  ;;  %v11008_v54 = vpop.eup %11007  ;;  %v9103_v19 = vor.u32 %v10578_v1, %v9102_v40  ;;  %v9350_v8 = vld [vmem:[%s17259_s15 + $0xa8] sm:$0xf]  ;;  %v10637_v48 = vld [vmem:[%s17259_s15 + $0x98] sm:$0xf0]  ;;  %v10634_v3 = vld [vmem:[%s17259_s15 + $0x80] sm:$0xf0] }
 0x38c   : > { %v3815_v13 = vmul.f32 %v3772_v24, %v3732_v16  ;;  %vm3809_vm3 = vcmp.eq.f32.partialorder %v3808_v53, 8.507059e+37  ;;  %v3822_v47 = vmul.f32 %v11008_v54, %v3820_v23  ;;  %v9351_v30 = vor.u32 %v10640_v5, %v9350_v8  ;;  %v9338_v16 = vld [vmem:[%s17259_s15 + $0x90] sm:$0xf]  ;;  %v9302_v39 = vld [vmem:[%s17259_s15 + $0x48] sm:$0xf]  ;;  %v4355_v5 = vld [vmem:[%s14494_s24 + $0x20] sm:$0xff] }
 0x38d   : > { %4243 = vmatpush.bf16.msra.mxu3 %v8978_v59  ;;  %v3812_v27 = vsel %vm3809_vm3, %v3811_v35, %v3807_v42  ;;  %v9339_v24 = vor.u32 %v10637_v48, %v9338_v16  ;;  %v9327_v50 = vor.u32 %v10634_v3, %v9326_v10  ;;  %v9290_v62 = vld [vmem:[%s17259_s15 + $0x30] sm:$0xf]  ;;  %v9278_v25 = vld [vmem:[%s17259_s15 + $0x18] sm:$0xf]  ;;  %v10619_v35 = vld [vmem:[%s17259_s15 + $0x8] sm:$0xf0] }
 0x38e   : > { %v3817_v44 = vadd.f32 %v3815_v13, %v3523_v45  ;;  %4532 = vmatpush.bf16.msra.mxu0 %v9071_v28  ;;  %v3821_v52 = vsub.f32 1.0, %v3812_v27  ;;  %v3825_v60 = vmul.f32 %v3812_v27, %v12897_v9  ;;  %v14323_v63 = vadd.f32 %v3824_v15, %v3822_v47  ;;  %v10590_v9 = vld [vmem:[%s17255_s11 + $0xa0] sm:$0xf0]  ;;  %v10631_v13 = vld [vmem:[%s17259_s15 + $0x68] sm:$0xf0] }
 0x38f   : > { %v9151_v22 = vor.u32 %v10590_v9, %v9150_v4  ;;  %v9315_v59 = vor.u32 %v10631_v13, %v9314_v26  ;;  %v10625_v45 = vld [vmem:[%s17259_s15 + $0x38] sm:$0xf0]  ;;  %v9266_v28 = vld [vmem:[%s17259_s15] sm:$0xf]  ;;  %v10664_v61 = vld [vmem:[%s17281_s29 + $0xac] sm:$0xf] }
 0x390   : > { %11009 = vtanh.f32 %v3817_v44  ;;  %v9291_v53 = vor.u32 %v10625_v45, %v9290_v62  ;;  %v10622_v44 = vld [vmem:[%s17259_s15 + $0x20] sm:$0xf0]  ;;  %v9457_v54 = vld [vmem:[%s17281_s29 + $0xb4] sm:$0xf0]  ;;  %v9267_v27 = vor.u32 %v10619_v35, %v9266_v28  ;;  %v10661_v47 = vld [vmem:[%s17281_s29 + $0x94] sm:$0xf] }
 0x391   : > { %v9279_v42 = vor.u32 %v10622_v44, %v9278_v25  ;;  %v9460_v23 = vor.u32 %v10664_v61, %v9457_v54  ;;  %v10655_v17 = vld [vmem:[%s17281_s29 + $0x64] sm:$0xf]  ;;  %v9409_v4 = vld [vmem:[%s17281_s29 + $0x54] sm:$0xf0]  ;;  %v9397_v12 = vld [vmem:[%s17281_s29 + $0x3c] sm:$0xf0] }
 0x392   : > { %v10646_v36 = vld [vmem:[%s17281_s29 + $0x1c] sm:$0xf]  ;;  %v9385_v57 = vld [vmem:[%s17281_s29 + $0x24] sm:$0xf0]  ;;  %v10643_v34 = vld [vmem:[%s17281_s29 + $0x4] sm:$0xf] }
 0x393   : > { %v9373_v21 = vld [vmem:[%s17281_s29 + $0xc] sm:$0xf0]  ;;  %v9254_v16 = vld [vmem:[%s17258_s14 + $0xa8] sm:$0xf]  ;;  %v10616_v48 = vld [vmem:[%s17258_s14 + $0xb0] sm:$0xf0] }
 0x394   : > { %v9376_v40 = vor.u32 %v10643_v34, %v9373_v21  ;;  %v9242_v3 = vld [vmem:[%s17258_s14 + $0x90] sm:$0xf]  ;;  %v9230_v13 = vld [vmem:[%s17258_s14 + $0x78] sm:$0xf]  ;;  %v9218_v62 = vld [vmem:[%s17258_s14 + $0x60] sm:$0xf] }
 0x395   : > { %v10607_v45 = vld [vmem:[%s17258_s14 + $0x68] sm:$0xf0]  ;;  %v9256_v28 = vld [vmem:[%s17258_s14 + $0xb4] sm:$0xf0]  ;;  %v9262_v35 = vld [vmem:[%s17258_s14 + $0xb0] sm:$0xf] }
 0x396   : > { %v11010_v32 = vpop.eup %11009  ;;  %v9219_v44 = vor.u32 %v10607_v45, %v9218_v62 }
 0x397   : > { %v3823_v33 = vmul.f32 %v11010_v32, %v3821_v52  ;;  %v9445_v52 = vld [vmem:[%s17281_s29 + $0x9c] sm:$0xf0]  ;;  %v14442_v32 = vpack.c.bf16 %v14261_v38, %v14208_v37  ;;  %v9421_v37 = vld [vmem:[%s17281_s29 + $0x6c] sm:$0xf0] }
 0x398   : > { %v9448_v15 = vor.u32 %v10661_v47, %v9445_v52  ;;  %v9424_v38 = vor.u32 %v10655_v17, %v9421_v37  ;;  %v10612_v37 = vld [vmem:[%s17258_s14 + $0x94] sm:$0xf] }
 0x399   : > { %v14325_v55 = vadd.f32 %v3825_v60, %v3823_v33  ;;  %v10658_v33 = vld [vmem:[%s17281_s29 + $0x7c] sm:$0xf]  ;;  %v9433_v60 = vld [vmem:[%s17281_s29 + $0x84] sm:$0xf0] }
 0x39a   : > { %v9436_v41 = vor.u32 %v10658_v33, %v9433_v60  ;;  %v10604_v33 = vld [vmem:[%s17258_s14 + $0x50] sm:$0xf0] }
 0x39b   : > { %v14329_v51 = vpack.c.bf16 %v14325_v55, %v14323_v63 }
 0x39d   : > { %4005 = vmatmul.bf16.vlgmr.msrb.gmra.mxu2 %v14329_v51  ;;  %4019 = vmatmul.bf16.vlgmr.msrb.gmra.mxu3 %v14329_v51 }
 0x39e   : > { %4033 = vmatmul.bf16.vlgmr.msrb.gmra.mxu0 %v14329_v51  ;;  %4553 = vmatpush.bf16.msrb.mxu2 %v9163_v18  ;;  %v10652_v18 = vld [vmem:[%s17281_s29 + $0x4c] sm:$0xf] }
 0x39f   : > { %v9412_v9 = vor.u32 %v10652_v18, %v9409_v4  ;;  %v9250_v18 = vld [vmem:[%s17258_s14 + $0x98] sm:$0xf] }
 0x3a2   : > { %4554 = vmatpush.bf16.msrb.mxu2 %v9151_v22  ;;  %v10649_v22 = vld [vmem:[%s17281_s29 + $0x34] sm:$0xf] }
 0x3a6   : > { %4555 = vmatpush.bf16.msrb.mxu2 %v9139_v31  ;;  %v9400_v31 = vor.u32 %v10649_v22, %v9397_v12  ;;  %v9194_v12 = vld [vmem:[%s17258_s14 + $0x30] sm:$0xf] }
 0x3aa   : > { %4556 = vmatpush.bf16.msrb.mxu2 %v9127_v14  ;;  %v9388_v14 = vor.u32 %v10646_v36, %v9385_v57 }
 0x3ad   : > { %4230 = vmatmul.bf16.vlgmr.msra.gmra.mxu2 %v13747_v20  ;;  %4244 = vmatmul.bf16.vlgmr.msra.gmra.mxu3 %v13747_v20  ;;  %v10572_v20 = vld [vmem:[%s17255_s11 + $0x10] sm:$0xf0] }
 0x3ae   : > { %4533 = vmatmul.bf16.vlgmr.msra.gmra.mxu0 %v13634_v49  ;;  %4557 = vmatpush.bf16.msrb.mxu2 %v9115_v0  ;;  %v9079_v7 = vor.u32 %v10572_v20, %v9078_v56  ;;  %v14483_v0 = vpop.f32.mrf.mxu1  ;;  %v4352_v20 = vld [vmem:[%s14494_s24 + $0x8] sm:$0xff] }
 0x3b2   : > { %4558 = vmatpush.bf16.msrb.mxu2 %v9103_v19  ;;  %v14491_v19 = vld [vmem:[%s17257_s13] sm:$0x7] }
 0x3b3   : > { %v4392_v29 = vperm.slane %v14491_v19, 1 }
 0x3b6   : > { %4559 = vmatpush.bf16.msrb.mxu2 %v9091_v43  ;;  %v4548_v1 = vpop.f32.mrf.mxu1 }
 0x3b7   : > { %v4549_v43 = vadd.f32 %v4548_v1, %v4392_v29 }
 0x3b9   : > { %v4607_v8 = vadd.f32 %v4549_v43, %v4352_v20 }
 0x3ba   : > { %4560 = vmatpush.bf16.msrb.mxu2 %v9079_v7 }
 0x3bd   : > { %4561 = vmatmul.bf16.vlgmr.msrb.gmra.mxu2 %v13634_v49  ;;  %v10628_v49 = vld [vmem:[%s17259_s15 + $0x50] sm:$0xf0] }
 0x3be   : > { %5041 = vmatpush.bf16.msra.mxu2 %v9351_v30  ;;  %v9303_v2 = vor.u32 %v10628_v49, %v9302_v39  ;;  %v4550_v11 = vpop.f32.mrf.mxu1  ;;  %v9166_v30 = vmul.f32 -1.442695, %v4607_v8  ;;  %v9238_v8 = vld [vmem:[%s17258_s14 + $0x80] sm:$0xf] }
 0x3bf   : > { %v4551_v56 = vadd.f32 %v4550_v11, %v4392_v29 }
 0x3c0   : > { %11011 = vpow2.f32 %v9166_v30 }
 0x3c1   : > { %v4608_v7 = vadd.f32 %v4551_v56, %v4355_v5  ;;  %v10609_v56 = vld [vmem:[%s17258_s14 + $0x7c] sm:$0xf]  ;;  %v10611_v5 = vld [vmem:[%s17258_s14 + $0x88] sm:$0xf0] }
 0x3c2   : > { %5042 = vmatpush.bf16.msra.mxu2 %v9339_v24  ;;  %v9255_v24 = vor.u32 %v10616_v48, %v9254_v16  ;;  %v9239_v16 = vor.u32 %v10611_v5, %v9238_v8  ;;  %v9182_v48 = vld [vmem:[%s17258_s14 + $0x18] sm:$0xf] }
 0x3c3   : > { %v9167_v10 = vmul.f32 -1.442695, %v4608_v7 }
 0x3c4   : > { %4830 = vmatpush.bf16.msrb.mxu3 %v9255_v24  ;;  %v10598_v24 = vld [vmem:[%s17258_s14 + $0x20] sm:$0xf0] }
 0x3c5   : > { %11013 = vpow2.f32 %v9167_v10 }
 0x3c6   : > { %5043 = vmatpush.bf16.msra.mxu2 %v9327_v50  ;;  %v10613_v50 = vld [vmem:[%s17258_s14 + $0x98] sm:$0xf0]  ;;  %v11012_v49 = vpop.eup %11011 }
 0x3c7   : > { %v9243_v26 = vor.u32 %v10613_v50, %v9242_v3  ;;  %v14527_v25 = vadd.f32 1.0, %v11012_v49  ;;  %v4391_v3 = vperm.slane %v14491_v19, 0  ;;  %v9183_v50 = vor.u32 %v10598_v24, %v9182_v48  ;;  %v9226_v49 = vld [vmem:[%s17258_s14 + $0x68] sm:$0xf]  ;;  %v9196_v24 = vld [vmem:[%s17258_s14 + $0x3c] sm:$0xf0] }
 0x3c9   : > { %4831 = vmatpush.bf16.msrb.mxu3 %v9243_v26  ;;  %11015 = vrcp.f32 %v14527_v25 }
 0x3ca   : > { %5044 = vmatpush.bf16.msra.mxu2 %v9315_v59  ;;  %v10610_v59 = vld [vmem:[%s17258_s14 + $0x80] sm:$0xf0] }
 0x3cb   : > { %v9231_v39 = vor.u32 %v10610_v59, %v9230_v13  ;;  %v10606_v59 = vld [vmem:[%s17258_s14 + $0x64] sm:$0xf] }
 0x3cd   : > { %4832 = vmatpush.bf16.msrb.mxu3 %v9231_v39  ;;  %v9220_v39 = vld [vmem:[%s17258_s14 + $0x6c] sm:$0xf0] }
 0x3ce   : > { %5045 = vmatpush.bf16.msra.mxu2 %v9303_v2  ;;  %v11014_v2 = vpop.eup %11013 }
 0x3cf   : > { %v14538_v61 = vadd.f32 1.0, %v11014_v2  ;;  %v9223_v2 = vor.u32 %v10606_v59, %v9220_v39  ;;  %v4626_v59 = vand.u32 2147483647, %v14527_v25 }
 0x3d1   : > { %4833 = vmatpush.bf16.msrb.mxu3 %v9219_v44  ;;  %11017 = vrcp.f32 %v14538_v61 }
 0x3d2   : > { %5046 = vmatpush.bf16.msra.mxu2 %v9291_v53  ;;  %v14525_v53 = vld [vmem:[%s17253_s9] sm:$0x7] }
 0x3d3   : > { %v4074_v60 = vperm.slane %v14525_v53, 0 }
 0x3d5   : > { %v4220_v26 = vadd.f32 %v14483_v0, %v4074_v60  ;;  %v10608_v0 = vld [vmem:[%s17258_s14 + $0x70] sm:$0xf0] }
 0x3d6   : > { %5047 = vmatpush.bf16.msra.mxu2 %v9279_v42  ;;  %v10615_v42 = vld [vmem:[%s17258_s14 + $0xac] sm:$0xf] }
 0x3d7   : > { %v9259_v54 = vor.u32 %v10615_v42, %v9256_v28  ;;  %v4351_v28 = vld [vmem:[%s14494_s24] sm:$0xff] }
 0x3d9   : > { %4844 = vmatpush.bf16.msrb.mxu0 %v9259_v54  ;;  %v9227_v54 = vor.u32 %v10608_v0, %v9226_v49  ;;  %v10602_v49 = vld [vmem:[%s17258_s14 + $0x40] sm:$0xf0]  ;;  %v4643_v0 = vand.u32 2147483648, %v14538_v61 }
 0x3da   : > { %5048 = vmatpush.bf16.msra.mxu2 %v9267_v27  ;;  %v10617_v27 = vld [vmem:[%s17258_s14 + $0xb8] sm:$0xf0] }
 0x3db   : > { %v9263_v52 = vor.u32 %v10617_v27, %v9262_v35  ;;  %v9170_v27 = vld [vmem:[%s17258_s14] sm:$0xf] }
 0x3dd   : > { %5049 = vmatmul.bf16.vlgmr.msra.gmra.mxu2 %v14442_v32  ;;  %4858 = vmatpush.bf16.msrb.mxu1 %v9263_v52  ;;  %v10595_v52 = vld [vmem:[%s17258_s14 + $0x8] sm:$0xf0] }
 0x3de   : > { %5378 = vmatpush.bf16.msrb.mxu2 %v9460_v23  ;;  %v14546_v23 = vld [vmem:[%s17252_s8] sm:$0x7] }
 0x3e2   : > { %5379 = vmatpush.bf16.msrb.mxu2 %v9448_v15  ;;  %v9206_v15 = vld [vmem:[%s17258_s14 + $0x48] sm:$0xf] }
 0x3e3   : > { %v9207_v17 = vor.u32 %v10604_v33, %v9206_v15  ;;  %v3864_v15 = vperm.slane %v14546_v23, 1 }
 0x3e5   : > { %4834 = vmatpush.bf16.msrb.mxu3 %v9207_v17  ;;  %v10639_v17 = vld [vmem:[%s17259_s15 + $0xac] sm:$0xf] }
 0x3e6   : > { %5380 = vmatpush.bf16.msrb.mxu2 %v9436_v41  ;;  %v3863_v41 = vperm.slane %v14546_v23, 0 }
 0x3ea   : > { %5381 = vmatpush.bf16.msrb.mxu2 %v9424_v38  ;;  %v9244_v38 = vld [vmem:[%s17258_s14 + $0x9c] sm:$0xf0] }
 0x3eb   : > { %v9247_v4 = vor.u32 %v10612_v37, %v9244_v38  ;;  %v9352_v37 = vld [vmem:[%s17259_s15 + $0xb4] sm:$0xf0] }
 0x3ed   : > { %4845 = vmatpush.bf16.msrb.mxu0 %v9247_v4  ;;  %v9355_v4 = vor.u32 %v10639_v17, %v9352_v37  ;;  %v9184_v17 = vld [vmem:[%s17258_s14 + $0x24] sm:$0xf0] }
 0x3ee   : > { %5382 = vmatpush.bf16.msrb.mxu2 %v9412_v9  ;;  %v10614_v9 = vld [vmem:[%s17258_s14 + $0xa0] sm:$0xf0] }
 0x3ef   : > { %v9251_v22 = vor.u32 %v10614_v9, %v9250_v18  ;;  %v10603_v9 = vld [vmem:[%s17258_s14 + $0x4c] sm:$0xf] }
 0x3f1   : > { %4859 = vmatpush.bf16.msrb.mxu1 %v9251_v22  ;;  %v9208_v22 = vld [vmem:[%s17258_s14 + $0x54] sm:$0xf0] }
 0x3f2   : > { %5383 = vmatpush.bf16.msrb.mxu2 %v9400_v31  ;;  %v10601_v31 = vld [vmem:[%s17258_s14 + $0x38] sm:$0xf0] }
 0x3f3   : > { %v9195_v57 = vor.u32 %v10601_v31, %v9194_v12 }
 0x3f5   : > { %4835 = vmatpush.bf16.msrb.mxu3 %v9195_v57  ;;  %4860 = vmatpush.bf16.msrb.mxu1 %v9239_v16  ;;  %v9214_v57 = vld [vmem:[%s17258_s14 + $0x50] sm:$0xf]  ;;  %v10600_v16 = vld [vmem:[%s17258_s14 + $0x34] sm:$0xf] }
 0x3f6   : > { %5384 = vmatpush.bf16.msrb.mxu2 %v9388_v14  ;;  %v4218_v14 = vadd.f32 %v14469_v58, %v4074_v60  ;;  %v9232_v58 = vld [vmem:[%s17258_s14 + $0x84] sm:$0xf0]  ;;  %v4075_v60 = vperm.slane %v14525_v53, 1  ;;  %v9199_v39 = vor.u32 %v10600_v16, %v9196_v24  ;;  %v10596_v24 = vld [vmem:[%s17258_s14 + $0x10] sm:$0xf0] }
 0x3f7   : > { %v9235_v20 = vor.u32 %v10609_v56, %v9232_v58  ;;  %v10636_v58 = vld [vmem:[%s17259_s15 + $0x94] sm:$0xf] }
 0x3f9   : > { %4846 = vmatpush.bf16.msrb.mxu0 %v9235_v20  ;;  %4836 = vmatpush.bf16.msrb.mxu3 %v9183_v50 }
 0x3fa   : > { %5385 = vmatpush.bf16.msrb.mxu2 %v9376_v40  ;;  %v14581_v40 = vpop.eup %11015  ;;  %4861 = vmatpush.bf16.msrb.mxu1 %v9227_v54 }
 0x3fb   : > { %v14585_v11 = vpop.eup %11017  ;;  %v4618_v7 = vmul.f32 %v14581_v40, %v14527_v25  ;;  %vm4623_vm0 = vweird.f32 %v14581_v40 }
 0x3fc   : > { %v4633_v30 = vmul.f32 %v14585_v11, %v14538_v61  ;;  %vm4638_vm2 = vweird.f32 %v14585_v11 }
 0x3fd   : > { %5386 = vmatmul.bf16.vlgmr.msrb.gmra.mxu2 %v14329_v51  ;;  %v4619_v62 = vsub.f32 1.0, %v4618_v7  ;;  %4847 = vmatpush.bf16.msrb.mxu0 %v9223_v2 }
 0x3fe   : > { %v4634_v45 = vsub.f32 1.0, %v4633_v30  ;;  %v9340_v30 = vld [vmem:[%s17259_s15 + $0x9c] sm:$0xf0] }
 0x3ff   : > { %v4620_v20 = vmul.f32 %v14581_v40, %v4619_v62  ;;  %v9343_v48 = vor.u32 %v10636_v58, %v9340_v30  ;;  %v10594_v30 = vld [vmem:[%s17258_s14 + $0x4] sm:$0xf] }
 0x400   : > { %v4635_v8 = vmul.f32 %v14585_v11, %v4634_v45 }
 0x41b   : > { %v14548_v47 = vpop.f32.mrf.mxu0 }
 0x420   : > { %v4006_v36 = vpop.f32.mrf.mxu2  ;;  %v14579_v21 = vpop.f32.mrf.mxu3 }
 0x421   : > { %v4007_v34 = vadd.f32 %v4006_v36, %v3863_v41  ;;  %v9211_v36 = vor.u32 %v10603_v9, %v9208_v22  ;;  %v4021_v5 = vadd.f32 %v14579_v21, %v3864_v15  ;;  %v9202_v21 = vld [vmem:[%s17258_s14 + $0x38] sm:$0xf]  ;;  %v9190_v22 = vld [vmem:[%s17258_s14 + $0x20] sm:$0xf] }
 0x422   : > { %v9203_v45 = vor.u32 %v10602_v49, %v9202_v21  ;;  %v9358_v21 = vld [vmem:[%s17259_s15 + $0xb0] sm:$0xf]  ;;  %v9455_v49 = vld [vmem:[%s17281_s29 + $0xa8] sm:$0xf] }
 0x423   : > { %v4250_v1 = vadd.f32 %v4218_v14, %v4007_v34  ;;  %v14583_v29 = vpop.f32.mrf.mxu0  ;;  %v10605_v14 = vld [vmem:[%s17258_s14 + $0x58] sm:$0xf0]  ;;  %4848 = vmatpush.bf16.msrb.mxu0 %v9211_v36 }
 0x424   : > { %v9215_v34 = vor.u32 %v10605_v14, %v9214_v57 }
 0x425   : > { %v9063_v43 = vmul.f32 -1.442695, %v4250_v1  ;;  %v4628_v1 = vand.u32 2147483648, %v14527_v25 }
 0x426   : > { %4862 = vmatpush.bf16.msrb.mxu1 %v9215_v34 }
 0x427   : > { %11019 = vpow2.f32 %v9063_v43  ;;  %v14686_v2 = vor.u32 1.1754944e-38, %v4628_v1  ;;  %4849 = vmatpush.bf16.msrb.mxu0 %v9199_v39 }
 0x428   : > { %v4008_v10 = vpop.f32.mrf.mxu2  ;;  %v14623_v42 = vpop.f32.mrf.mxu3 }
 0x429   : > { %v4009_v13 = vadd.f32 %v4008_v10, %v3863_v41  ;;  %v9171_v41 = vor.u32 %v10595_v52, %v9170_v27  ;;  %v3865_v10 = vperm.slane %v14546_v23, 2  ;;  %v14700_v52 = vadd.f32 %v14581_v40, %v4620_v20 }
 0x42a   : > { %4863 = vmatpush.bf16.msrb.mxu1 %v9203_v45  ;;  %v4023_v20 = vadd.f32 %v14623_v42, %v3864_v15  ;;  %v9172_v15 = vld [vmem:[%s17258_s14 + $0xc] sm:$0xf0] }
 0x42b   : > { %v4251_v44 = vadd.f32 %v4220_v26, %v4009_v13  ;;  %v4534_v35 = vpop.f32.mrf.mxu0  ;;  %4837 = vmatpush.bf16.msrb.mxu3 %v9171_v41  ;;  %v4354_v26 = vld [vmem:[%s14494_s24 + $0x18] sm:$0xff]  ;;  %v14723_v36 = vadd.f32 %v14548_v47, %v3865_v10  ;;  %v14728_v1 = vadd.f32 %v14583_v29, %v3865_v10  ;;  %v10630_v47 = vld [vmem:[%s17259_s15 + $0x64] sm:$0xf]  ;;  %v9175_v39 = vor.u32 %v10594_v30, %v9172_v15 }
 0x42c   : > { %v4535_v33 = vadd.f32 %v4534_v35, %v4391_v3  ;;  %v10597_v41 = vld [vmem:[%s17258_s14 + $0x1c] sm:$0xf]  ;;  %v9346_v15 = vld [vmem:[%s17259_s15 + $0x98] sm:$0xf] }
 0x42d   : > { %v11020_v38 = vpop.eup %11019  ;;  %v9064_v18 = vmul.f32 -1.442695, %v4251_v44  ;;  %v10633_v44 = vld [vmem:[%s17259_s15 + $0x7c] sm:$0xf]  ;;  %v9187_v9 = vor.u32 %v10597_v41, %v9184_v17 }
 0x42e   : > { %v14648_v12 = vadd.f32 1.0, %v11020_v38  ;;  %v4567_v31 = vadd.f32 %v4535_v33, %v4351_v28  ;;  %v9328_v28 = vld [vmem:[%s17259_s15 + $0x84] sm:$0xf0]  ;;  %v14703_v33 = vadd.f32 %v14585_v11, %v4635_v8  ;;  %v10641_v10 = vld [vmem:[%s17259_s15 + $0xb8] sm:$0xf0] }
 0x42f   : > { %11021 = vpow2.f32 %v9064_v18  ;;  %5055 = vmatpush.bf16.msra.mxu3 %v9355_v4  ;;  %v4076_v18 = vperm.slane %v14525_v53, 2  ;;  %4850 = vmatpush.bf16.msrb.mxu0 %v9187_v9 }
 0x430   : > { %11023 = vrcp.f32 %v14648_v12  ;;  %v9164_v43 = vmul.f32 -1.442695, %v4567_v31  ;;  %v4231_v56 = vpop.f32.mrf.mxu2  ;;  %v14697_v27 = vpop.f32.mrf.mxu3  ;;  %v10599_v31 = vld [vmem:[%s17258_s14 + $0x28] sm:$0xf0]  ;;  %vm4265_vm4 = vweird.f32 %v14648_v12  ;;  %v4271_v23 = vand.u32 2147483648, %v14648_v12 }
 0x431   : > { %v4232_v7 = vadd.f32 %v4231_v56, %v4075_v60  ;;  %v9191_v14 = vor.u32 %v10599_v31, %v9190_v22 }
 0x432   : > { %11025 = vpow2.f32 %v9164_v43  ;;  %v4269_v43 = vand.u32 2147483647, %v14648_v12 }
 0x433   : > { %v4290_v50 = vadd.f32 %v4232_v7, %v4021_v5  ;;  %v4536_v13 = vpop.f32.mrf.mxu0  ;;  %5056 = vmatpush.bf16.msra.mxu3 %v9343_v48  ;;  %v9316_v7 = vld [vmem:[%s17259_s15 + $0x6c] sm:$0xf0]  ;;  %4864 = vmatpush.bf16.msrb.mxu1 %v9191_v14 }
 0x434   : > { %v4537_v62 = vadd.f32 %v4536_v13, %v4391_v3  ;;  %v9331_v3 = vor.u32 %v10633_v44, %v9328_v28  ;;  %v9319_v42 = vor.u32 %v10630_v47, %v9316_v7  ;;  %vm14768_vm6 = vcmp.eq.f32.partialorder %v4269_v43, 8.507059e+37  ;;  %4851 = vmatpush.bf16.msrb.mxu0 %v9175_v39 }
 0x435   : > { %v11022_v35 = vpop.eup %11021  ;;  %v9065_v54 = vmul.f32 -1.442695, %v4290_v50  ;;  %v4246_v43 = vadd.f32 %v14697_v27, %v4076_v18  ;;  %v10627_v27 = vld [vmem:[%s17259_s15 + $0x4c] sm:$0xf] }
 0x436   : > { %v14711_v37 = vpop.eup %11023  ;;  %v14713_v38 = vadd.f32 1.0, %v11022_v35  ;;  %v4568_v4 = vadd.f32 %v4537_v62, %v4354_v26  ;;  %v9359_v35 = vor.u32 %v10641_v10, %v9358_v21 }
 0x437   : > { %11027 = vpow2.f32 %v9065_v54  ;;  %v4261_v57 = vmul.f32 %v14711_v37, %v14648_v12  ;;  %5057 = vmatpush.bf16.msra.mxu3 %v9331_v3  ;;  %vm4266_vm5 = vweird.f32 %v14711_v37  ;;  %v10665_v54 = vld [vmem:[%s17281_s29 + $0xb0] sm:$0xf0] }
 0x438   : > { %v11026_v34 = vpop.eup %11025  ;;  %11029 = vrcp.f32 %v14713_v38  ;;  %v9165_v56 = vmul.f32 -1.442695, %v4568_v4  ;;  %v4233_v58 = vpop.f32.mrf.mxu2  ;;  %v4284_v26 = vand.u32 2147483647, %v14713_v38  ;;  %v4286_v13 = vand.u32 2147483648, %v14713_v38  ;;  %vm14789_vm7 = vmor %vm4265_vm4, %vm4266_vm5  ;;  %5069 = vmatpush.bf16.msra.mxu0 %v9359_v35 }
 0x439   : > { %v14738_v8 = vadd.f32 1.0, %v11026_v34  ;;  %v4262_v5 = vsub.f32 1.0, %v4261_v57  ;;  %v4234_v29 = vadd.f32 %v4233_v58, %v4075_v60  ;;  %v9178_v60 = vld [vmem:[%s17258_s14 + $0x8] sm:$0xf]  ;;  %v4272_v4 = vor.u32 1.1754944e-38, %v4271_v23  ;;  %v4247_v57 = vpop.f32.mrf.mxu3 }
 0x43a   : > { %11031 = vpow2.f32 %v9165_v56  ;;  %v9179_v28 = vor.u32 %v10596_v24, %v9178_v60  ;;  %v9456_v22 = vor.u32 %v10665_v54, %v9455_v49  ;;  %vm14811_vm8 = vcmp.eq.f32.partialorder %v4284_v26, 8.507059e+37  ;;  %v10638_v60 = vld [vmem:[%s17259_s15 + $0xa0] sm:$0xf0]  ;;  %v10662_v26 = vld [vmem:[%s17281_s29 + $0x98] sm:$0xf0] }
 0x43b   : > { %11033 = vrcp.f32 %v14738_v8  ;;  %v4263_v16 = vmul.f32 %v14711_v37, %v4262_v5  ;;  %v4291_v48 = vadd.f32 %v4234_v29, %v4023_v20  ;;  %5058 = vmatpush.bf16.msra.mxu3 %v9319_v42  ;;  %v4586_v9 = vand.u32 2147483647, %v14738_v8  ;;  %v9304_v42 = vld [vmem:[%s17259_s15 + $0x54] sm:$0xf0]  ;;  %v10635_v5 = vld [vmem:[%s17259_s15 + $0x88] sm:$0xf0] }
 0x43c   : > { %v4588_v12 = vand.u32 2147483648, %v14738_v8  ;;  %4865 = vmatpush.bf16.msrb.mxu1 %v9179_v28  ;;  %v4287_v29 = vor.u32 1.1754944e-38, %v4286_v13  ;;  %v4248_v30 = vadd.f32 %v4247_v57, %v4076_v18  ;;  %vm4280_vm9 = vweird.f32 %v14713_v38  ;;  %v10624_v57 = vld [vmem:[%s17259_s15 + $0x34] sm:$0xf]  ;;  %v9419_v18 = vld [vmem:[%s17281_s29 + $0x60] sm:$0xf] }
 0x43d   : > { %v11028_v62 = vpop.eup %11027  ;;  %v4264_v45 = vadd.f32 %v14711_v37, %v4263_v16  ;;  %v9066_v44 = vmul.f32 -1.442695, %v4291_v48  ;;  %vm14835_vm11 = vcmp.eq.f32.partialorder %v4586_v9, 8.507059e+37  ;;  %v9443_v48 = vld [vmem:[%s17281_s29 + $0x90] sm:$0xf]  ;;  %vm4582_vm12 = vweird.f32 %v14738_v8 }
 0x43e   : > { %v14781_v3 = vpop.eup %11029  ;;  %v14783_v41 = vadd.f32 1.0, %v11028_v62  ;;  %v4589_v16 = vor.u32 1.1754944e-38, %v4588_v12  ;;  %v9307_v49 = vor.u32 %v10627_v27, %v9304_v42  ;;  %v9347_v62 = vor.u32 %v10638_v60, %v9346_v15  ;;  %v10621_v60 = vld [vmem:[%s17259_s15 + $0x1c] sm:$0xf] }
 0x43f   : > { %v4268_v31 = vsel %vm14789_vm7, %v14711_v37, %v4264_v45  ;;  %11035 = vpow2.f32 %v9066_v44  ;;  %v4276_v14 = vmul.f32 %v14781_v3, %v14713_v38  ;;  %v4393_v37 = vperm.slane %v14491_v19, 2 }
 0x440   : > { %v11032_v34 = vpop.eup %11031  ;;  %11037 = vrcp.f32 %v14783_v41  ;;  %v4273_v56 = vsel %vm14768_vm6, %v4272_v4, %v4268_v31  ;;  %5364 = vmatpush.bf16.msra.mxu1 %v9456_v22  ;;  %vm4281_vm10 = vweird.f32 %v14781_v3  ;;  %v4311_v24 = vand.u32 2147483648, %v14783_v41  ;;  %v4562_v10 = vpop.f32.mrf.mxu2  ;;  %5059 = vmatpush.bf16.msra.mxu3 %v9307_v49 }
 0x441   : > { %v14807_v58 = vpop.eup %11033  ;;  %v14809_v47 = vadd.f32 1.0, %v11032_v34  ;;  %v4277_v20 = vsub.f32 1.0, %v4276_v14  ;;  %v4330_v7 = vmul.f32 %v4273_v56, %v4246_v43  ;;  %v4309_v21 = vand.u32 2147483647, %v14783_v41  ;;  %vm4282_vm15 = vmor %vm4280_vm9, %vm4281_vm10  ;;  %5070 = vmatpush.bf16.msra.mxu0 %v9347_v62  ;;  %v9407_v34 = vld [vmem:[%s17281_s29 + $0x48] sm:$0xf] }
 0x442   : > { %v4578_v23 = vmul.f32 %v14807_v58, %v14738_v8  ;;  %vm4305_vm13 = vweird.f32 %v14783_v41  ;;  %vm4583_vm14 = vweird.f32 %v14807_v58  ;;  %v4312_v22 = vor.u32 1.1754944e-38, %v4311_v24  ;;  %v10659_v8 = vld [vmem:[%s17281_s29 + $0x80] sm:$0xf0] }
 0x443   : > { %11039 = vrcp.f32 %v14809_v47  ;;  %v4278_v53 = vmul.f32 %v14781_v3, %v4277_v20  ;;  %v4332_v44 = vadd.f32 %v4330_v7, %v14723_v36  ;;  %v4601_v54 = vand.u32 2147483647, %v14809_v47  ;;  %v9334_v20 = vld [vmem:[%s17259_s15 + $0x80] sm:$0xf]  ;;  %vm14896_vm3 = vmor %vm4582_vm12, %vm4583_vm14  ;;  %v9298_v7 = vld [vmem:[%s17259_s15 + $0x38] sm:$0xf] }
 0x444   : > { %v4579_v50 = vsub.f32 1.0, %v4578_v23  ;;  %v4603_v9 = vand.u32 2147483648, %v14809_v47  ;;  %v9444_v36 = vor.u32 %v10662_v26, %v9443_v48  ;;  %v4563_v31 = vadd.f32 %v4562_v10, %v4393_v37 }
 0x445   : > { %v11036_v13 = vpop.eup %11035  ;;  %v4279_v39 = vadd.f32 %v14781_v3, %v4278_v53  ;;  %vm14880_vm1 = vcmp.eq.f32.partialorder %v4309_v21, 8.507059e+37  ;;  %vm4597_vm4 = vweird.f32 %v14809_v47  ;;  %vm14903_vm5 = vcmp.eq.f32.partialorder %v4601_v54, 8.507059e+37  ;;  %v9280_v53 = vld [vmem:[%s17259_s15 + $0x24] sm:$0xf0] }
 0x446   : > { %v14851_v45 = vpop.eup %11037  ;;  %v14854_v28 = vadd.f32 1.0, %v11036_v13  ;;  %v4580_v35 = vmul.f32 %v14807_v58, %v4579_v50  ;;  %5365 = vmatpush.bf16.msra.mxu1 %v9444_v36  ;;  %vm4622_vm6 = vweird.f32 %v14527_v25  ;;  %v4604_v15 = vor.u32 1.1754944e-38, %v4603_v9  ;;  %v10632_v50 = vld [vmem:[%s17259_s15 + $0x70] sm:$0xf0] }
 0x447   : > { %v4301_v17 = vmul.f32 %v14851_v45, %v14783_v41  ;;  %v4283_v4 = vsel %vm4282_vm15, %v14781_v3, %v4279_v39  ;;  %v9292_v3 = vld [vmem:[%s17259_s15 + $0x3c] sm:$0xf0]  ;;  %vm4306_vm7 = vweird.f32 %v14851_v45  ;;  %v9335_v49 = vor.u32 %v10635_v5, %v9334_v20  ;;  %v9310_v20 = vld [vmem:[%s17259_s15 + $0x50] sm:$0xf]  ;;  %v10629_v5 = vld [vmem:[%s17259_s15 + $0x58] sm:$0xf0] }
 0x448   : > { %11041 = vrcp.f32 %v14854_v28  ;;  %v4288_v38 = vsel %vm14811_vm8, %v4287_v29, %v4283_v4  ;;  %v4581_v56 = vadd.f32 %v14807_v58, %v4580_v35  ;;  %vm4637_vm8 = vweird.f32 %v14538_v61  ;;  %vm14949_vm9 = vmor %vm4305_vm13, %vm4306_vm7  ;;  %v4564_v35 = vpop.f32.mrf.mxu2 }
 0x449   : > { %v14877_v14 = vpop.eup %11039  ;;  %v4302_v12 = vsub.f32 1.0, %v4301_v17  ;;  %v4331_v43 = vmul.f32 %v4288_v38, %v4248_v30  ;;  %11043 = vtanh.f32 %v4332_v44  ;;  %v9431_v30 = vld [vmem:[%s17281_s29 + $0x78] sm:$0xf]  ;;  %v4326_v48 = vand.u32 2147483648, %v14854_v28  ;;  %5071 = vmatpush.bf16.msra.mxu0 %v9335_v49  ;;  %vm15000_vm13 = vmor %vm4622_vm6, %vm4623_vm0  ;;  %v9395_v49 = vld [vmem:[%s17281_s29 + $0x30] sm:$0xf] }
 0x44a   : > { %v4593_v27 = vmul.f32 %v14877_v14, %v14809_v47  ;;  %v4585_v42 = vsel %vm14896_vm3, %v14807_v58, %v4581_v56  ;;  %v9295_v10 = vor.u32 %v10624_v57, %v9292_v3  ;;  %v9322_v58 = vld [vmem:[%s17259_s15 + $0x68] sm:$0xf]  ;;  %vm4598_vm10 = vweird.f32 %v14877_v14  ;;  %v9268_v57 = vld [vmem:[%s17259_s15 + $0xc] sm:$0xf0]  ;;  %vm15015_vm14 = vmor %vm4637_vm8, %vm4638_vm2 }
 0x44b   : > { %v4303_v23 = vmul.f32 %v14851_v45, %v4302_v12  ;;  %v4590_v24 = vsel %vm14835_vm11, %v4589_v16, %v4585_v42  ;;  %v4333_v13 = vadd.f32 %v4331_v43, %v14728_v1  ;;  %v10656_v16 = vld [vmem:[%s17281_s29 + $0x68] sm:$0xf0]  ;;  %v4353_v1 = vld [vmem:[%s14494_s24 + $0x10] sm:$0xff]  ;;  %v9432_v17 = vor.u32 %v10659_v8, %v9431_v30  ;;  %vm4599_vm11 = vmor %vm4597_vm4, %vm4598_vm10 }
 0x44c   : > { %v4594_v21 = vsub.f32 1.0, %v4593_v27  ;;  %v4647_v39 = vmul.f32 %v4590_v24, %v4563_v31  ;;  %5060 = vmatpush.bf16.msra.mxu3 %v9295_v10  ;;  %v9283_v4 = vor.u32 %v10621_v60, %v9280_v53  ;;  %v4324_v36 = vand.u32 2147483647, %v14854_v28  ;;  %v10618_v31 = vld [vmem:[%s17259_s15 + $0x4] sm:$0xf]  ;;  %v4356_v60 = vld [vmem:[%s14494_s24 + $0x28] sm:$0xff]  ;;  %s5184_s24 = ssub.s32 %s5183_s10, %s17421_s23 }
 0x44d   : > { %v4304_v26 = vadd.f32 %v14851_v45, %v4303_v23  ;;  %v9323_v38 = vor.u32 %v10632_v50, %v9322_v58  ;;  %5366 = vmatpush.bf16.msra.mxu1 %v9432_v17  ;;  %v9420_v56 = vor.u32 %v10656_v16, %v9419_v18  ;;  %11045 = vtanh.f32 %v4333_v13  ;;  %v10653_v30 = vld [vmem:[%s17281_s29 + $0x50] sm:$0xf0]  ;;  %v11201_v8 = vld [vmem:[%s11341_s28 + $0x20] sm:$0xff]  ;;  %v10650_v18 = vld [vmem:[%s17281_s29 + $0x38] sm:$0xf0]  ;;  %p5185_p13 = scmp.gt.s32.totalorder %s5184_s24, 0 }
 0x44e   : > { %v14943_v62 = vpop.eup %11041  ;;  %v4595_v54 = vmul.f32 %v14877_v14, %v4594_v21  ;;  %v4649_v12 = vadd.f32 %v4647_v39, %v4353_v1  ;;  %v9311_v24 = vor.u32 %v10629_v5, %v9310_v20  ;;  %v9408_v58 = vor.u32 %v10653_v30, %v9407_v34  ;;  %v10666_v34 = vld [vmem:[%s17281_s29 + $0xb8] sm:$0xf0]  ;;  %v9427_v21 = vld [vmem:[%s17281_s29 + $0x68] sm:$0xf]  ;;  %v9403_v50 = vld [vmem:[%s17281_s29 + $0x38] sm:$0xf] }
 0x44f   : > { %v4308_v9 = vsel %vm14949_vm9, %v14851_v45, %v4304_v26  ;;  %v4316_v41 = vmul.f32 %v14943_v62, %v14854_v28  ;;  %v11044_v3 = vpop.eup %11043  ;;  %vm4321_vm12 = vweird.f32 %v14943_v62  ;;  %5072 = vmatpush.bf16.msra.mxu0 %v9323_v38  ;;  %vm4320_vm15 = vweird.f32 %v14854_v28  ;;  %s17433_s24 = smov (!%p5185_p13, %s5184_s24), 0  ;;  %s10715_s10 = smul.u32 48, %s17435_s21 }
 0x450   : > { %v4313_v45 = vsel %vm14880_vm1, %v4312_v22, %v4308_v9  ;;  %v4596_v43 = vadd.f32 %v14877_v14, %v4595_v54  ;;  %v4565_v22 = vadd.f32 %v4564_v35, %v4393_v37  ;;  %5061 = vmatpush.bf16.msra.mxu3 %v9283_v4  ;;  %v9271_v37 = vor.u32 %v10618_v31, %v9268_v57  ;;  %vm4322_vm0 = vmor %vm4320_vm15, %vm4321_vm12  ;;  %v11202_v4 = vld [vmem:[%s11341_s28 + $0x28] sm:$0xff]  ;;  %v10620_v57 = vld [vmem:[%s17259_s15 + $0x10] sm:$0xf0]  ;;  %s10642_s27 = smul.u32 48, %s17433_s24 }
 0x451   : > { %v4336_v29 = vsub.f32 1.0, %v4313_v45  ;;  %v4317_v27 = vsub.f32 1.0, %v4316_v41  ;;  %v4340_v23 = vmul.f32 %v11201_v8, %v4313_v45  ;;  %11047 = vtanh.f32 %v4649_v12  ;;  %5367 = vmatpush.bf16.msra.mxu1 %v9420_v56  ;;  %v9274_v31 = vld [vmem:[%s17259_s15 + $0x8] sm:$0xf]  ;;  %v10644_v56 = vld [vmem:[%s17281_s29 + $0x8] sm:$0xf0] }
 0x452   : > { %v4600_v19 = vsel %vm4599_vm11, %v14877_v14, %v4596_v43  ;;  %v4641_v14 = vand.u32 2147483647, %v14538_v61  ;;  %v4625_v39 = vsel %vm15000_vm13, %v14581_v40, %v14700_v52  ;;  %v4644_v16 = vor.u32 1.1754944e-38, %v4643_v0  ;;  %v9371_v43 = vld [vmem:[%s17281_s29] sm:$0xf]  ;;  %s15257_s0 = scalar_lea.vmem [#allocation3], %s10642_s27 }
 0x453   : > { %v4338_v42 = vmul.f32 %v11044_v3, %v4336_v29  ;;  %v4318_v47 = vmul.f32 %v14943_v62, %v4317_v27  ;;  %v4605_v53 = vsel %vm14903_vm5, %v4604_v15, %v4600_v19  ;;  %v10626_v15 = vld [vmem:[%s17259_s15 + $0x40] sm:$0xf0]  ;;  %v4327_v44 = vor.u32 1.1754944e-38, %v4326_v48  ;;  %v11046_v52 = vpop.eup %11045  ;;  %5073 = vmatpush.bf16.msra.mxu0 %v9311_v24  ;;  %v9286_v48 = vld [vmem:[%s17259_s15 + $0x20] sm:$0xf]  ;;  %s16022_s24 = scalar_lea.vmem [#allocation2], %s10715_s10 }
 0x454   : > { %v4648_v10 = vmul.f32 %v4605_v53, %v4565_v22  ;;  %vm4627_vm1 = vcmp.eq.f32.partialorder %v4626_v59, 8.507059e+37  ;;  %5062 = vmatpush.bf16.msra.mxu3 %v9271_v37  ;;  %vm4325_vm2 = vcmp.eq.f32.partialorder %v4324_v36, 8.507059e+37  ;;  %v4640_v61 = vsel %vm15015_vm14, %v14585_v11, %v14703_v33  ;;  %v9383_v11 = vld [vmem:[%s17281_s29 + $0x18] sm:$0xf]  ;;  %v9463_v22 = vld [vmem:[%s17281_s29 + $0xb0] sm:$0xf] }
 0x455   : > { %v15019_v26 = vadd.f32 %v4340_v23, %v4338_v42  ;;  %v4319_v13 = vadd.f32 %v14943_v62, %v4318_v47  ;;  %v9299_v0 = vor.u32 %v10626_v15, %v9298_v7  ;;  %v4630_v25 = vsel %vm4627_vm1, %v14686_v2, %v4625_v39  ;;  %5368 = vmatpush.bf16.msra.mxu1 %v9408_v58  ;;  %v10647_v2 = vld [vmem:[%s17281_s29 + $0x20] sm:$0xf0]  ;;  %v9451_v37 = vld [vmem:[%s17281_s29 + $0x98] sm:$0xf]  ;;  %v10660_v53 = vld [vmem:[%s17281_s29 + $0x88] sm:$0xf0] }
 0x456   : > { %v4650_v40 = vadd.f32 %v4648_v10, %v4356_v60  ;;  %v9396_v59 = vor.u32 %v10650_v18, %v9395_v49  ;;  %vm4642_vm3 = vcmp.eq.f32.partialorder %v4641_v14, 8.507059e+37  ;;  %v4653_v41 = vsub.f32 1.0, %v4630_v25  ;;  %v10663_v42 = vld [vmem:[%s17281_s29 + $0xa0] sm:$0xf0]  ;;  %v9439_v60 = vld [vmem:[%s17281_s29 + $0x80] sm:$0xf] }
 0x457   : > { %9366 = vst [vmem:[%s11341_s28 + $0x10] sm:$0xff] %v15019_v26  ;;  %v4323_v1 = vsel %vm4322_vm0, %v14943_v62, %v4319_v13  ;;  %v10623_v62 = vld [vmem:[%s17259_s15 + $0x28] sm:$0xf0]  ;;  %v11048_v33 = vpop.eup %11047  ;;  %v4645_v54 = vsel %vm4642_vm3, %v4644_v16, %v4640_v61  ;;  %5074 = vmatpush.bf16.msra.mxu0 %v9299_v0  ;;  %v9384_v38 = vor.u32 %v10647_v2, %v9383_v11  ;;  %v10657_v14 = vld [vmem:[%s17281_s29 + $0x70] sm:$0xf0]  ;;  %s10788_s27 = smul.u32 48, %s17437_s22 }
 0x458   : > { %v4328_v28 = vsel %vm4325_vm2, %v4327_v44, %v4323_v1  ;;  %11049 = vtanh.f32 %v4650_v40  ;;  %v9287_v36 = vor.u32 %v10623_v62, %v9286_v48  ;;  %v4655_v45 = vmul.f32 %v11048_v33, %v4653_v41  ;;  %v9415_v58 = vld [vmem:[%s17281_s29 + $0x50] sm:$0xf]  ;;  %v10654_v7 = vld [vmem:[%s17281_s29 + $0x58] sm:$0xf0]  ;;  %v10651_v13 = vld [vmem:[%s17281_s29 + $0x40] sm:$0xf0] }
 0x459   : > { %v4337_v35 = vsub.f32 1.0, %v4328_v28  ;;  %v4341_v9 = vmul.f32 %v11202_v4, %v4328_v28  ;;  %5369 = vmatpush.bf16.msra.mxu1 %v9396_v59  ;;  %v4654_v12 = vsub.f32 1.0, %v4645_v54  ;;  %v4657_v5 = vmul.f32 %v4630_v25, %v13628_v46  ;;  %v9391_v49 = vld [vmem:[%s17281_s29 + $0x20] sm:$0xf]  ;;  %v10648_v18 = vld [vmem:[%s17281_s29 + $0x28] sm:$0xf0] }
 0x45a   : > { %v4658_v27 = vmul.f32 %v4645_v54, %v13630_v6  ;;  %v9275_v30 = vor.u32 %v10620_v57, %v9274_v31  ;;  %v9372_v8 = vor.u32 %v10644_v56, %v9371_v43  ;;  %v9464_v19 = vor.u32 %v10666_v34, %v9463_v22  ;;  %v9379_v44 = vld [vmem:[%s17281_s29 + $0x8] sm:$0xf]  ;;  %v9639_v0 = vld [vmem:[%s17251_s7 + $0x90] sm:$0xf]  ;;  %v10710_v28 = vld [vmem:[%s17251_s7 + $0x98] sm:$0xf0] }
 0x45b   : > { %v4339_v17 = vmul.f32 %v11046_v52, %v4337_v35  ;;  %5075 = vmatpush.bf16.msra.mxu0 %v9287_v36  ;;  %v15086_v23 = vadd.f32 %v4657_v5, %v4655_v45  ;;  %v9452_v47 = vor.u32 %v10663_v42, %v9451_v37  ;;  %v9440_v24 = vor.u32 %v10660_v53, %v9439_v60  ;;  %v9651_v40 = vld [vmem:[%s17251_s7 + $0xa8] sm:$0xf]  ;;  %v10713_v52 = vld [vmem:[%s17251_s7 + $0xb0] sm:$0xf0]  ;;  %v9627_v59 = vld [vmem:[%s17251_s7 + $0x78] sm:$0xf] }
 0x45c   : > { %v9428_v10 = vor.u32 %v10657_v14, %v9427_v21  ;;  %v9416_v15 = vor.u32 %v10654_v7, %v9415_v58  ;;  %v9404_v39 = vor.u32 %v10651_v13, %v9403_v50  ;;  %v9392_v16 = vor.u32 %v10648_v18, %v9391_v49  ;;  %v10707_v48 = vld [vmem:[%s17251_s7 + $0x80] sm:$0xf0]  ;;  %v9615_v35 = vld [vmem:[%s17251_s7 + $0x60] sm:$0xf]  ;;  %v10704_v11 = vld [vmem:[%s17251_s7 + $0x68] sm:$0xf0] }
 0x45d   : > { %v15068_v3 = vadd.f32 %v4341_v9, %v4339_v17  ;;  %5370 = vmatpush.bf16.msra.mxu1 %v9384_v38  ;;  %v9652_v61 = vor.u32 %v10713_v52, %v9651_v40  ;;  %v9640_v25 = vor.u32 %v10710_v28, %v9639_v0  ;;  %v9628_v62 = vor.u32 %v10707_v48, %v9627_v59  ;;  %v9603_v33 = vld [vmem:[%s17251_s7 + $0x48] sm:$0xf]  ;;  %v9591_v17 = vld [vmem:[%s17251_s7 + $0x30] sm:$0xf]  ;;  %v10698_v4 = vld [vmem:[%s17251_s7 + $0x38] sm:$0xf0] }
 0x45e   : > { %v11050_v20 = vpop.eup %11049  ;;  %v9616_v2 = vor.u32 %v10704_v11, %v9615_v35  ;;  %v9592_v9 = vor.u32 %v10698_v4, %v9591_v17  ;;  %v9579_v41 = vld [vmem:[%s17251_s7 + $0x18] sm:$0xf]  ;;  %v10695_v36 = vld [vmem:[%s17251_s7 + $0x20] sm:$0xf0]  ;;  %v9567_v31 = vld [vmem:[%s17251_s7] sm:$0xf] }
 0x45f   : > { %9367 = vst [vmem:[%s11341_s28 + $0x18] sm:$0xff] %v15068_v3  ;;  %v4656_v29 = vmul.f32 %v11050_v20, %v4654_v12  ;;  %5076 = vmatpush.bf16.msra.mxu0 %v9275_v30  ;;  %v9580_v38 = vor.u32 %v10695_v36, %v9579_v41  ;;  %v10692_v57 = vld [vmem:[%s17251_s7 + $0x8] sm:$0xf0]  ;;  %v9754_v12 = vld [vmem:[%s17255_s11 + $0xb4] sm:$0xf0]  ;;  %v5194_v28 = vld [vmem:[%s15257_s0 + $0x20] sm:$0xff] }
 0x460   : > { %v10737_v45 = vld [vmem:[%s17255_s11 + $0xac] sm:$0xf]  ;;  %v9568_v43 = vor.u32 %v10692_v57, %v9567_v31  ;;  %v10734_v20 = vld [vmem:[%s17255_s11 + $0x94] sm:$0xf]  ;;  %v9742_v5 = vld [vmem:[%s17255_s11 + $0x9c] sm:$0xf0]  ;;  %v15244_v7 = vpop.f32.mrf.mxu2 }
 0x461   : > { %v15088_v46 = vadd.f32 %v4658_v27, %v4656_v29  ;;  %5371 = vmatpush.bf16.msra.mxu1 %v9372_v8  ;;  %v9757_v56 = vor.u32 %v10737_v45, %v9754_v12  ;;  %v15205_v29 = vpack.c.bf16 %v15068_v3, %v15019_v26  ;;  %v9745_v27 = vor.u32 %v10734_v20, %v9742_v5  ;;  %v10731_v22 = vld [vmem:[%s17255_s11 + $0x7c] sm:$0xf]  ;;  %v9730_v34 = vld [vmem:[%s17255_s11 + $0x84] sm:$0xf0]  ;;  %v10728_v8 = vld [vmem:[%s17255_s11 + $0x64] sm:$0xf] }
 0x462   : > { %v9733_v30 = vor.u32 %v10731_v22, %v9730_v34  ;;  %v9718_v26 = vld [vmem:[%s17255_s11 + $0x6c] sm:$0xf0]  ;;  %v9706_v37 = vld [vmem:[%s17255_s11 + $0x54] sm:$0xf0]  ;;  %v9694_v60 = vld [vmem:[%s17255_s11 + $0x3c] sm:$0xf0] }
 0x463   : > { %v15092_v6 = vpack.c.bf16 %v15088_v46, %v15086_v23  ;;  %v9721_v3 = vor.u32 %v10728_v8, %v9718_v26  ;;  %v9682_v21 = vld [vmem:[%s17255_s11 + $0x24] sm:$0xf0]  ;;  %v9670_v58 = vld [vmem:[%s17255_s11 + $0xc] sm:$0xf0]  ;;  %v15254_v13 = vld [vmem:[%s17249_s5] sm:$0x7] }
 0x464   : > { %v9543_v59 = vld [vmem:[%s17250_s6 + $0x90] sm:$0xf]  ;;  %v10686_v48 = vld [vmem:[%s17250_s6 + $0x98] sm:$0xf0]  ;;  %v15284_v17 = vld [vmem:[%s17261_s17] sm:$0x7] }
 0x465   : > { %4838 = vmatmul.bf16.vlgmr.msrb.gmra.mxu3 %v15092_v6  ;;  %4852 = vmatmul.bf16.vlgmr.msrb.gmra.mxu0 %v15092_v6  ;;  %v9519_v4 = vld [vmem:[%s17250_s6 + $0x60] sm:$0xf]  ;;  %v10688_v31 = vld [vmem:[%s17250_s6 + $0xac] sm:$0xf]  ;;  %v9557_v57 = vld [vmem:[%s17250_s6 + $0xb4] sm:$0xf0] }
 0x466   : > { %4866 = vmatmul.bf16.vlgmr.msrb.gmra.mxu1 %v15092_v6  ;;  %5392 = vmatpush.bf16.msrb.mxu3 %v9464_v19  ;;  %v10725_v19 = vld [vmem:[%s17255_s11 + $0x4c] sm:$0xf]  ;;  %v15295_v41 = vld [vmem:[%s17260_s16] sm:$0x7]  ;;  %v9563_v45 = vld [vmem:[%s17250_s6 + $0xb0] sm:$0xf] }
 0x467   : > { %v9709_v42 = vor.u32 %v10725_v19, %v9706_v37  ;;  %v4907_v12 = vperm.slane %v15284_v17, 0  ;;  %v10690_v20 = vld [vmem:[%s17250_s6 + $0xb8] sm:$0xf0]  ;;  %v10677_v22 = vld [vmem:[%s17250_s6 + $0x50] sm:$0xf0]  ;;  %s16707_s3 = scalar_lea.vmem [#allocation3], %s10788_s27 }
 0x468   : > { %v15249_v50 = vpop.f32.mrf.mxu2  ;;  %v9564_v5 = vor.u32 %v10690_v20, %v9563_v45  ;;  %v10685_v26 = vld [vmem:[%s17250_s6 + $0x94] sm:$0xf]  ;;  %v9551_v19 = vld [vmem:[%s17250_s6 + $0x98] sm:$0xf] }
 0x469   : > { %v5051_v37 = vadd.f32 %v15244_v7, %v4907_v12 }
 0x46a   : > { %5393 = vmatpush.bf16.msrb.mxu3 %v9452_v47  ;;  %v10722_v47 = vld [vmem:[%s17255_s11 + $0x34] sm:$0xf]  ;;  %5697 = vmatpush.bf16.msra.mxu2 %v9564_v5 }
 0x46b   : > { %v9697_v53 = vor.u32 %v10722_v47, %v9694_v60  ;;  %v10687_v60 = vld [vmem:[%s17250_s6 + $0xa0] sm:$0xf0] }
 0x46e   : > { %5394 = vmatpush.bf16.msrb.mxu3 %v9440_v24  ;;  %v10719_v24 = vld [vmem:[%s17255_s11 + $0x1c] sm:$0xf] }
 0x46f   : > { %v9685_v14 = vor.u32 %v10719_v24, %v9682_v21  ;;  %v9552_v24 = vor.u32 %v10687_v60, %v9551_v19  ;;  %v9495_v21 = vld [vmem:[%s17250_s6 + $0x30] sm:$0xf]  ;;  %v4908_v19 = vperm.slane %v15284_v17, 1 }
 0x471   : > { %5698 = vmatpush.bf16.msra.mxu2 %v9552_v24 }
 0x472   : > { %5395 = vmatpush.bf16.msrb.mxu3 %v9428_v10  ;;  %v10716_v10 = vld [vmem:[%s17255_s11 + $0x4] sm:$0xf] }
 0x475   : > { %5063 = vmatmul.bf16.vlgmr.msra.gmra.mxu3 %v14442_v32  ;;  %5077 = vmatmul.bf16.vlgmr.msra.gmra.mxu0 %v14442_v32  ;;  %v10645_v32 = vld [vmem:[%s17281_s29 + $0x10] sm:$0xf0] }
 0x476   : > { %5372 = vmatmul.bf16.vlgmr.msra.gmra.mxu1 %v14329_v51  ;;  %5396 = vmatpush.bf16.msrb.mxu3 %v9416_v15  ;;  %v9380_v1 = vor.u32 %v10645_v32, %v9379_v44  ;;  %v9673_v15 = vor.u32 %v10716_v10, %v9670_v58 }
 0x47a   : > { %5397 = vmatpush.bf16.msrb.mxu3 %v9404_v39  ;;  %v5231_v39 = vperm.slane %v15254_v13, 1 }
 0x47e   : > { %5398 = vmatpush.bf16.msrb.mxu3 %v9392_v16  ;;  %v5191_v16 = vld [vmem:[%s15257_s0 + $0x8] sm:$0xff] }
 0x480   : > { %v5387_v49 = vpop.f32.mrf.mxu2 }
 0x481   : > { %v5388_v18 = vadd.f32 %v5387_v49, %v5231_v39  ;;  %v9533_v49 = vld [vmem:[%s17250_s6 + $0x84] sm:$0xf0] }
 0x482   : > { %5399 = vmatpush.bf16.msrb.mxu3 %v9380_v1  ;;  %v9555_v1 = vld [vmem:[%s17250_s6 + $0xa8] sm:$0xf] }
 0x483   : > { %v5446_v44 = vadd.f32 %v5388_v18, %v5191_v16  ;;  %v9539_v18 = vld [vmem:[%s17250_s6 + $0x80] sm:$0xf] }
 0x485   : > { %5400 = vmatmul.bf16.vlgmr.msrb.gmra.mxu3 %v14329_v51  ;;  %v10701_v51 = vld [vmem:[%s17251_s7 + $0x50] sm:$0xf0]  ;;  %v9467_v40 = vmul.f32 -1.442695, %v5446_v44 }
 0x486   : > { %5880 = vmatpush.bf16.msra.mxu3 %v9652_v61  ;;  %v9604_v54 = vor.u32 %v10701_v51, %v9603_v33  ;;  %v10689_v61 = vld [vmem:[%s17250_s6 + $0xb0] sm:$0xf0]  ;;  %v10683_v33 = vld [vmem:[%s17250_s6 + $0x80] sm:$0xf0] }
 0x487   : > { %v9556_v0 = vor.u32 %v10689_v61, %v9555_v1  ;;  %11051 = vpow2.f32 %v9467_v40  ;;  %v9483_v1 = vld [vmem:[%s17250_s6 + $0x18] sm:$0xf]  ;;  %v10671_v61 = vld [vmem:[%s17250_s6 + $0x20] sm:$0xf0] }
 0x488   : > { %v5389_v32 = vpop.f32.mrf.mxu2 }
 0x489   : > { %v5390_v52 = vadd.f32 %v5389_v32, %v5231_v39  ;;  %5669 = vmatpush.bf16.msrb.mxu0 %v9556_v0  ;;  %v10682_v39 = vld [vmem:[%s17250_s6 + $0x7c] sm:$0xf]  ;;  %v10684_v32 = vld [vmem:[%s17250_s6 + $0x88] sm:$0xf0]  ;;  %v5230_v0 = vperm.slane %v15254_v13, 0 }
 0x48a   : > { %5881 = vmatpush.bf16.msra.mxu3 %v9640_v25  ;;  %v9536_v44 = vor.u32 %v10682_v39, %v9533_v49  ;;  %v10673_v49 = vld [vmem:[%s17250_s6 + $0x34] sm:$0xf] }
 0x48b   : > { %v5447_v25 = vadd.f32 %v5390_v52, %v5194_v28  ;;  %v9540_v52 = vor.u32 %v10684_v32, %v9539_v18  ;;  %v9484_v28 = vor.u32 %v10671_v61, %v9483_v1 }
 0x48d   : > { %v9468_v35 = vmul.f32 -1.442695, %v5447_v25  ;;  %v11052_v11 = vpop.eup %11051  ;;  %5699 = vmatpush.bf16.msra.mxu2 %v9540_v52  ;;  %v9503_v52 = vld [vmem:[%s17250_s6 + $0x38] sm:$0xf] }
 0x48e   : > { %5882 = vmatpush.bf16.msra.mxu3 %v9628_v62  ;;  %v9544_v62 = vor.u32 %v10686_v48, %v9543_v59  ;;  %v10679_v59 = vld [vmem:[%s17250_s6 + $0x64] sm:$0xf]  ;;  %v9521_v48 = vld [vmem:[%s17250_s6 + $0x6c] sm:$0xf0] }
 0x48f   : > { %11053 = vpow2.f32 %v9468_v35  ;;  %v5053_v35 = vadd.f32 %v15249_v50, %v4907_v12  ;;  %v5190_v50 = vld [vmem:[%s15257_s0] sm:$0xff] }
 0x490   : > { %5670 = vmatpush.bf16.msrb.mxu0 %v9544_v62  ;;  %v9527_v62 = vld [vmem:[%s17250_s6 + $0x68] sm:$0xf] }
 0x492   : > { %5883 = vmatpush.bf16.msra.mxu3 %v9616_v2  ;;  %v9531_v2 = vld [vmem:[%s17250_s6 + $0x78] sm:$0xf] }
 0x493   : > { %v9532_v51 = vor.u32 %v10683_v33, %v9531_v2  ;;  %v9524_v33 = vor.u32 %v10679_v59, %v9521_v48 }
 0x495   : > { %5671 = vmatpush.bf16.msrb.mxu0 %v9532_v51  ;;  %v11054_v34 = vpop.eup %11053  ;;  %v10681_v51 = vld [vmem:[%s17250_s6 + $0x70] sm:$0xf0] }
 0x496   : > { %5884 = vmatpush.bf16.msra.mxu3 %v9604_v54  ;;  %v15279_v54 = vadd.f32 1.0, %v11052_v11 }
 0x498   : > { %11055 = vrcp.f32 %v15279_v54  ;;  %v5467_v1 = vand.u32 2147483648, %v15279_v54  ;;  %vm5461_vm5 = vweird.f32 %v15279_v54 }
 0x49a   : > { %5885 = vmatpush.bf16.msra.mxu3 %v9592_v9  ;;  %v10680_v9 = vld [vmem:[%s17250_s6 + $0x68] sm:$0xf0] }
 0x49e   : > { %5886 = vmatpush.bf16.msra.mxu3 %v9580_v38  ;;  %v9520_v38 = vor.u32 %v10680_v9, %v9519_v4  ;;  %v15341_v10 = vpop.eup %11055  ;;  %v9528_v9 = vor.u32 %v10681_v51, %v9527_v62  ;;  %v9629_v51 = vld [vmem:[%s17251_s7 + $0x84] sm:$0xf0] }
 0x49f   : > { %v5457_v40 = vmul.f32 %v15341_v10, %v15279_v54  ;;  %vm5462_vm4 = vweird.f32 %v15341_v10 }
 0x4a0   : > { %5672 = vmatpush.bf16.msrb.mxu0 %v9520_v38  ;;  %v9471_v38 = vld [vmem:[%s17250_s6] sm:$0xf]  ;;  %5700 = vmatpush.bf16.msra.mxu2 %v9528_v9  ;;  %vm15471_vm6 = vmor %vm5461_vm5, %vm5462_vm4 }
 0x4a1   : > { %v5458_v4 = vsub.f32 1.0, %v5457_v40  ;;  %v9497_v40 = vld [vmem:[%s17250_s6 + $0x3c] sm:$0xf0] }
 0x4a2   : > { %5887 = vmatpush.bf16.msra.mxu3 %v9568_v43  ;;  %v4696_v43 = vperm.slane %v15295_v41, 0 }
 0x4a5   : > { %5888 = vmatmul.bf16.vlgmr.msra.gmra.mxu3 %v15205_v29 }
 0x4a6   : > { %6211 = vmatpush.bf16.msrb.mxu3 %v9757_v56  ;;  %v9560_v56 = vor.u32 %v10688_v31, %v9557_v57  ;;  %v10668_v31 = vld [vmem:[%s17250_s6 + $0x8] sm:$0xf0] }
 0x4a7   : > { %v9472_v12 = vor.u32 %v10668_v31, %v9471_v38  ;;  %v10670_v38 = vld [vmem:[%s17250_s6 + $0x1c] sm:$0xf]  ;;  %v9485_v31 = vld [vmem:[%s17250_s6 + $0x24] sm:$0xf0] }
 0x4a8   : > { %5683 = vmatpush.bf16.msrb.mxu1 %v9560_v56  ;;  %v9653_v56 = vld [vmem:[%s17251_s7 + $0xb4] sm:$0xf0] }
 0x4aa   : > { %6212 = vmatpush.bf16.msrb.mxu3 %v9745_v27  ;;  %v9507_v27 = vld [vmem:[%s17250_s6 + $0x48] sm:$0xf] }
 0x4ae   : > { %6213 = vmatpush.bf16.msrb.mxu3 %v9733_v30  ;;  %v9508_v30 = vor.u32 %v10677_v22, %v9507_v27  ;;  %v10676_v22 = vld [vmem:[%s17250_s6 + $0x4c] sm:$0xf] }
 0x4b0   : > { %5673 = vmatpush.bf16.msrb.mxu0 %v9508_v30  ;;  %v9515_v30 = vld [vmem:[%s17250_s6 + $0x50] sm:$0xf] }
 0x4b2   : > { %6214 = vmatpush.bf16.msrb.mxu3 %v9721_v3  ;;  %v9545_v3 = vld [vmem:[%s17250_s6 + $0x9c] sm:$0xf0] }
 0x4b3   : > { %v9548_v47 = vor.u32 %v10685_v26, %v9545_v3  ;;  %v4697_v26 = vperm.slane %v15295_v41, 1 }
 0x4b5   : > { %5684 = vmatpush.bf16.msrb.mxu1 %v9548_v47  ;;  %v5459_v47 = vmul.f32 %v15341_v10, %v5458_v4 }
 0x4b6   : > { %6215 = vmatpush.bf16.msrb.mxu3 %v9709_v42 }
 0x4b7   : > { %v15439_v61 = vadd.f32 %v15341_v10, %v5459_v47  ;;  %v9617_v47 = vld [vmem:[%s17251_s7 + $0x6c] sm:$0xf0] }
 0x4b9   : > { %5685 = vmatpush.bf16.msrb.mxu1 %v9536_v44 }
 0x4ba   : > { %6216 = vmatpush.bf16.msrb.mxu3 %v9697_v53  ;;  %v15333_v53 = vadd.f32 1.0, %v11054_v34  ;;  %v9509_v34 = vld [vmem:[%s17250_s6 + $0x54] sm:$0xf0] }
 0x4bc   : > { %11057 = vrcp.f32 %v15333_v53 }
 0x4bd   : > { %5686 = vmatpush.bf16.msrb.mxu1 %v9524_v33  ;;  %v10706_v33 = vld [vmem:[%s17251_s7 + $0x7c] sm:$0xf] }
 0x4be   : > { %6217 = vmatpush.bf16.msrb.mxu3 %v9685_v14  ;;  %v10674_v14 = vld [vmem:[%s17250_s6 + $0x38] sm:$0xf0]  ;;  %v9632_v9 = vor.u32 %v10706_v33, %v9629_v51  ;;  %v9752_v33 = vld [vmem:[%s17255_s11 + $0xa8] sm:$0xf] }
 0x4c2   : > { %6218 = vmatpush.bf16.msrb.mxu3 %v9673_v15  ;;  %v9496_v15 = vor.u32 %v10674_v14, %v9495_v21  ;;  %v15393_v20 = vpop.eup %11057 }
 0x4c3   : > { %v5472_v14 = vmul.f32 %v15393_v20, %v15333_v53 }
 0x4c4   : > { %5674 = vmatpush.bf16.msrb.mxu0 %v9496_v15  ;;  %v9641_v15 = vld [vmem:[%s17251_s7 + $0x9c] sm:$0xf0] }
 0x4c5   : > { %6219 = vmatmul.bf16.vlgmr.msrb.gmra.mxu3 %v15092_v6  ;;  %v5473_v59 = vsub.f32 1.0, %v5472_v14 }
 0x4c8   : > { %5675 = vmatpush.bf16.msrb.mxu0 %v9484_v28  ;;  %v9500_v28 = vor.u32 %v10673_v49, %v9497_v40 }
 0x4cc   : > { %5676 = vmatpush.bf16.msrb.mxu0 %v9472_v12  ;;  %v9488_v12 = vor.u32 %v10670_v38, %v9485_v31 }
 0x4e2   : > { %v4853_v11 = vpop.f32.mrf.mxu0 }
 0x4e3   : > { %v15297_v36 = vpop.f32.mrf.mxu1  ;;  %v4854_v18 = vadd.f32 %v4853_v11, %v4697_v26 }
 0x4e8   : > { %v4839_v8 = vpop.f32.mrf.mxu3 }
 0x4e9   : > { %v4840_v42 = vadd.f32 %v4839_v8, %v4696_v43 }
 0x4ea   : > { %v4855_v48 = vpop.f32.mrf.mxu0 }
 0x4eb   : > { %v5083_v58 = vadd.f32 %v5051_v37, %v4840_v42  ;;  %v15343_v7 = vpop.f32.mrf.mxu1  ;;  %v9512_v37 = vor.u32 %v10676_v22, %v9509_v34  ;;  %v10678_v42 = vld [vmem:[%s17250_s6 + $0x58] sm:$0xf0]  ;;  %v4856_v14 = vadd.f32 %v4855_v48, %v4697_v26  ;;  %v9473_v26 = vld [vmem:[%s17250_s6 + $0xc] sm:$0xf0]  ;;  %v10669_v48 = vld [vmem:[%s17250_s6 + $0x10] sm:$0xf0] }
 0x4ec   : > { %v9516_v21 = vor.u32 %v10678_v42, %v9515_v30  ;;  %v10703_v42 = vld [vmem:[%s17251_s7 + $0x64] sm:$0xf] }
 0x4ed   : > { %v9360_v16 = vmul.f32 -1.442695, %v5083_v58  ;;  %5687 = vmatpush.bf16.msrb.mxu1 %v9512_v37  ;;  %v10709_v58 = vld [vmem:[%s17251_s7 + $0x94] sm:$0xf]  ;;  %v5480_v37 = vand.u32 2147483647, %v15333_v53 }
 0x4ee   : > { %5701 = vmatpush.bf16.msra.mxu2 %v9516_v21  ;;  %v9644_v32 = vor.u32 %v10709_v58, %v9641_v15  ;;  %v4698_v21 = vperm.slane %v15295_v41, 2  ;;  %v10667_v15 = vld [vmem:[%s17250_s6 + $0x4] sm:$0xf]  ;;  %v10694_v41 = vld [vmem:[%s17251_s7 + $0x1c] sm:$0xf] }
 0x4ef   : > { %11059 = vpow2.f32 %v9360_v16 }
 0x4f0   : > { %v4841_v25 = vpop.f32.mrf.mxu3 }
 0x4f1   : > { %v4842_v2 = vadd.f32 %v4841_v25, %v4696_v43  ;;  %v10712_v43 = vld [vmem:[%s17251_s7 + $0xac] sm:$0xf]  ;;  %v10675_v25 = vld [vmem:[%s17250_s6 + $0x40] sm:$0xf0]  ;;  %5688 = vmatpush.bf16.msrb.mxu1 %v9500_v28  ;;  %v9476_v28 = vor.u32 %v10667_v15, %v9473_v26  ;;  %v9647_v15 = vld [vmem:[%s17251_s7 + $0x98] sm:$0xf] }
 0x4f2   : > { %v9656_v27 = vor.u32 %v10712_v43, %v9653_v56  ;;  %v10672_v43 = vld [vmem:[%s17250_s6 + $0x28] sm:$0xf0] }
 0x4f3   : > { %v5084_v57 = vadd.f32 %v5053_v35, %v4842_v2  ;;  %v5373_v45 = vpop.f32.mrf.mxu1  ;;  %v5193_v35 = vld [vmem:[%s15257_s0 + $0x18] sm:$0xff]  ;;  %v9504_v2 = vor.u32 %v10675_v25, %v9503_v52  ;;  %v9479_v25 = vld [vmem:[%s17250_s6 + $0x8] sm:$0xf] }
 0x4f4   : > { %v5374_v5 = vadd.f32 %v5373_v45, %v5230_v0  ;;  %5894 = vmatpush.bf16.msra.mxu0 %v9656_v27  ;;  %v5482_v27 = vand.u32 2147483648, %v15333_v53  ;;  %v9480_v31 = vor.u32 %v10669_v48, %v9479_v25 }
 0x4f5   : > { %v11060_v8 = vpop.eup %11059  ;;  %v9361_v3 = vmul.f32 -1.442695, %v5084_v57  ;;  %v9491_v57 = vld [vmem:[%s17250_s6 + $0x20] sm:$0xf]  ;;  %5702 = vmatpush.bf16.msra.mxu2 %v9504_v2  ;;  %5689 = vmatpush.bf16.msrb.mxu1 %v9488_v12 }
 0x4f6   : > { %v15412_v60 = vadd.f32 1.0, %v11060_v8  ;;  %v5406_v24 = vadd.f32 %v5374_v5, %v5190_v50  ;;  %v9492_v30 = vor.u32 %v10672_v43, %v9491_v57  ;;  %v10693_v5 = vld [vmem:[%s17251_s7 + $0x10] sm:$0xf0] }
 0x4f7   : > { %11061 = vpow2.f32 %v9361_v3  ;;  %v5464_v3 = vsel %vm15471_vm6, %v15341_v10, %v15439_v61  ;;  %v11204_v10 = vld [vmem:[%s11336_s25 + $0x18] sm:$0xff] }
 0x4f8   : > { %11063 = vrcp.f32 %v15412_v60  ;;  %v5064_v39 = vpop.f32.mrf.mxu3  ;;  %v9465_v16 = vmul.f32 -1.442695, %v5406_v24  ;;  %5895 = vmatpush.bf16.msra.mxu0 %v9644_v32  ;;  %v5474_v24 = vmul.f32 %v15393_v20, %v5473_v59  ;;  %v4909_v32 = vperm.slane %v15284_v17, 2 }
 0x4f9   : > { %v5065_v44 = vadd.f32 %v5064_v39, %v4908_v19  ;;  %5703 = vmatpush.bf16.msra.mxu2 %v9492_v30  ;;  %v5104_v40 = vand.u32 2147483648, %v15412_v60  ;;  %vm5098_vm8 = vweird.f32 %v15412_v60  ;;  %5690 = vmatpush.bf16.msrb.mxu1 %v9476_v28 }
 0x4fa   : > { %11065 = vpow2.f32 %v9465_v16 }
 0x4fb   : > { %v5123_v62 = vadd.f32 %v5065_v44, %v4854_v18  ;;  %v5375_v11 = vpop.f32.mrf.mxu1  ;;  %v9620_v44 = vor.u32 %v10703_v42, %v9617_v47  ;;  %v5105_v12 = vor.u32 1.1754944e-38, %v5104_v40 }
 0x4fc   : > { %v5376_v4 = vadd.f32 %v5375_v11, %v5230_v0  ;;  %v5465_v0 = vand.u32 2147483647, %v15279_v54  ;;  %5896 = vmatpush.bf16.msra.mxu0 %v9632_v9  ;;  %v5102_v11 = vand.u32 2147483647, %v15412_v60 }
 0x4fd   : > { %v11062_v50 = vpop.eup %11061  ;;  %v9362_v45 = vmul.f32 -1.442695, %v5123_v62  ;;  %v9659_v62 = vld [vmem:[%s17251_s7 + $0xb0] sm:$0xf]  ;;  %5704 = vmatpush.bf16.msra.mxu2 %v9480_v31 }
 0x4fe   : > { %v15467_v56 = vpop.eup %11063  ;;  %v15476_v22 = vadd.f32 1.0, %v11062_v50  ;;  %v5407_v34 = vadd.f32 %v5376_v4, %v5193_v35  ;;  %v10714_v35 = vld [vmem:[%s17251_s7 + $0xb8] sm:$0xf0]  ;;  %v5078_v4 = vpop.f32.mrf.mxu0  ;;  %vm5103_vm10 = vcmp.eq.f32.partialorder %v5102_v11, 8.507059e+37  ;;  %v10697_v11 = vld [vmem:[%s17251_s7 + $0x34] sm:$0xf] }
 0x4ff   : > { %v5094_v8 = vmul.f32 %v15467_v56, %v15412_v60  ;;  %11067 = vpow2.f32 %v9362_v45  ;;  %vm5099_vm7 = vweird.f32 %v15467_v56  ;;  %v9660_v57 = vor.u32 %v10714_v35, %v9659_v62  ;;  %v10738_v60 = vld [vmem:[%s17255_s11 + $0xb0] sm:$0xf0]  ;;  %v10735_v35 = vld [vmem:[%s17255_s11 + $0x98] sm:$0xf0] }
 0x500   : > { %11069 = vrcp.f32 %v15476_v22  ;;  %v5066_v58 = vpop.f32.mrf.mxu3  ;;  %v11066_v39 = vpop.eup %11065  ;;  %v9466_v18 = vmul.f32 -1.442695, %v5407_v34  ;;  %5897 = vmatpush.bf16.msra.mxu0 %v9620_v44  ;;  %v5117_v2 = vand.u32 2147483647, %v15476_v22  ;;  %vm15537_vm9 = vmor %vm5098_vm8, %vm5099_vm7  ;;  %v5119_v34 = vand.u32 2147483648, %v15476_v22 }
 0x501   : > { %v5095_v49 = vsub.f32 1.0, %v5094_v8  ;;  %v5067_v16 = vadd.f32 %v5066_v58, %v4908_v19  ;;  %v15506_v52 = vadd.f32 1.0, %v11066_v39  ;;  %v9753_v30 = vor.u32 %v10738_v60, %v9752_v33  ;;  %v10700_v8 = vld [vmem:[%s17251_s7 + $0x4c] sm:$0xf]  ;;  %5908 = vmatpush.bf16.msra.mxu1 %v9660_v57  ;;  %v9605_v58 = vld [vmem:[%s17251_s7 + $0x54] sm:$0xf0] }
 0x502   : > { %11071 = vpow2.f32 %v9466_v18  ;;  %v4868_v39 = vadd.f32 %v15297_v36, %v4698_v21  ;;  %v5079_v18 = vadd.f32 %v5078_v4, %v4909_v32  ;;  %vm15571_vm11 = vcmp.eq.f32.partialorder %v5117_v2, 8.507059e+37  ;;  %v9593_v2 = vld [vmem:[%s17251_s7 + $0x3c] sm:$0xf0] }
 0x503   : > { %v5096_v59 = vmul.f32 %v15467_v56, %v5095_v49  ;;  %v5124_v19 = vadd.f32 %v5067_v16, %v4856_v14  ;;  %11073 = vrcp.f32 %v15506_v52  ;;  %v15553_v14 = vadd.f32 %v15393_v20, %v5474_v24  ;;  %6197 = vmatpush.bf16.msrb.mxu2 %v9753_v30 }
 0x504   : > { %v5232_v24 = vperm.slane %v15254_v13, 2  ;;  %v5120_v28 = vor.u32 1.1754944e-38, %v5119_v34  ;;  %v9608_v25 = vor.u32 %v10700_v8, %v9605_v58  ;;  %vm5113_vm12 = vweird.f32 %v15476_v22 }
 0x505   : > { %v11068_v51 = vpop.eup %11067  ;;  %v5097_v9 = vadd.f32 %v15467_v56, %v5096_v59  ;;  %v9363_v38 = vmul.f32 -1.442695, %v5124_v19  ;;  %v9740_v19 = vld [vmem:[%s17255_s11 + $0x90] sm:$0xf]  ;;  %v5427_v4 = vand.u32 2147483648, %v15506_v52  ;;  %vm5421_vm14 = vweird.f32 %v15506_v52 }
 0x506   : > { %v15533_v50 = vpop.eup %11069  ;;  %v15541_v43 = vadd.f32 1.0, %v11068_v51  ;;  %v5425_v51 = vand.u32 2147483647, %v15506_v52  ;;  %5898 = vmatpush.bf16.msra.mxu0 %v9608_v25  ;;  %v9741_v30 = vor.u32 %v10735_v35, %v9740_v19  ;;  %v9596_v8 = vor.u32 %v10697_v11, %v9593_v2  ;;  %v9728_v19 = vld [vmem:[%s17255_s11 + $0x78] sm:$0xf] }
 0x507   : > { %v5101_v42 = vsel %vm15537_vm9, %v15467_v56, %v5097_v9  ;;  %v5109_v47 = vmul.f32 %v15533_v50, %v15476_v22  ;;  %11075 = vpow2.f32 %v9363_v38  ;;  %v10711_v56 = vld [vmem:[%s17251_s7 + $0xa0] sm:$0xf0]  ;;  %vm5114_vm13 = vweird.f32 %v15533_v50  ;;  %v9623_v11 = vld [vmem:[%s17251_s7 + $0x68] sm:$0xf]  ;;  %v10705_v2 = vld [vmem:[%s17251_s7 + $0x70] sm:$0xf0] }
 0x508   : > { %11077 = vrcp.f32 %v15541_v43  ;;  %v11072_v49 = vpop.eup %11071  ;;  %v5106_v16 = vsel %vm5103_vm10, %v5105_v12, %v5101_v42  ;;  %v9648_v59 = vor.u32 %v10711_v56, %v9647_v15  ;;  %v5144_v38 = vand.u32 2147483648, %v15541_v43  ;;  %vm15609_vm15 = vmor %vm5113_vm12, %vm5114_vm13  ;;  %v5401_v15 = vpop.f32.mrf.mxu3  ;;  %6198 = vmatpush.bf16.msrb.mxu2 %v9741_v30  ;;  %v10732_v35 = vld [vmem:[%s17255_s11 + $0x80] sm:$0xf0]  ;;  %v9569_v12 = vld [vmem:[%s17251_s7 + $0xc] sm:$0xf0] }
 0x509   : > { %v5110_v44 = vsub.f32 1.0, %v5109_v47  ;;  %v15575_v40 = vpop.eup %11073  ;;  %v15577_v36 = vadd.f32 1.0, %v11072_v49  ;;  %v5163_v33 = vmul.f32 %v5106_v16, %v5079_v18  ;;  %v5142_v45 = vand.u32 2147483647, %v15541_v43  ;;  %v5080_v47 = vpop.f32.mrf.mxu0  ;;  %v9635_v16 = vld [vmem:[%s17251_s7 + $0x80] sm:$0xf] }
 0x50a   : > { %v5417_v62 = vmul.f32 %v15575_v40, %v15506_v52  ;;  %5909 = vmatpush.bf16.msra.mxu1 %v9648_v59  ;;  %vm5422_vm0 = vweird.f32 %v15575_v40  ;;  %vm15623_vm1 = vcmp.eq.f32.partialorder %v5425_v51, 8.507059e+37  ;;  %v5428_v18 = vor.u32 1.1754944e-38, %v5427_v4  ;;  %5899 = vmatpush.bf16.msra.mxu0 %v9596_v8  ;;  %v10708_v59 = vld [vmem:[%s17251_s7 + $0x88] sm:$0xf0]  ;;  %v9581_v52 = vld [vmem:[%s17251_s7 + $0x24] sm:$0xf0] }
 0x50b   : > { %v5111_v48 = vmul.f32 %v15533_v50, %v5110_v44  ;;  %11079 = vrcp.f32 %v15577_v36  ;;  %v5165_v22 = vadd.f32 %v5163_v33, %v4868_v39  ;;  %v15630_v44 = vor.u32 1.1754944e-38, %v5144_v38  ;;  %vm5423_vm3 = vmor %vm5421_vm14, %vm5422_vm0  ;;  %v10729_v38 = vld [vmem:[%s17255_s11 + $0x68] sm:$0xf0] }
 0x50c   : > { %v5418_v57 = vsub.f32 1.0, %v5417_v62  ;;  %v4870_v62 = vadd.f32 %v15343_v7, %v4698_v21  ;;  %vm5138_vm2 = vweird.f32 %v15541_v43  ;;  %v5081_v26 = vadd.f32 %v5080_v47, %v4909_v32 }
 0x50d   : > { %v11076_v9 = vpop.eup %11075  ;;  %v5112_v31 = vadd.f32 %v15533_v50, %v5111_v48  ;;  %vm15661_vm4 = vcmp.eq.f32.partialorder %v5142_v45, 8.507059e+37  ;;  %v5402_v21 = vadd.f32 %v5401_v15, %v5232_v24  ;;  %vm5436_vm5 = vweird.f32 %v15577_v36  ;;  %v10691_v45 = vld [vmem:[%s17251_s7 + $0x4] sm:$0xf] }
 0x50e   : > { %v15602_v60 = vpop.eup %11077  ;;  %v15613_v34 = vadd.f32 1.0, %v11076_v9  ;;  %v5419_v56 = vmul.f32 %v15575_v40, %v5418_v57  ;;  %v9636_v4 = vor.u32 %v10708_v59, %v9635_v16  ;;  %v9716_v9 = vld [vmem:[%s17255_s11 + $0x60] sm:$0xf]  ;;  %vm5477_vm7 = vweird.f32 %v15393_v20  ;;  %v10702_v16 = vld [vmem:[%s17251_s7 + $0x58] sm:$0xf0] }
 0x50f   : > { %v5134_v42 = vmul.f32 %v15602_v60, %v15541_v43  ;;  %v5116_v58 = vsel %vm15609_vm15, %v15533_v50, %v5112_v31  ;;  %vm5139_vm8 = vweird.f32 %v15602_v60  ;;  %v9729_v57 = vor.u32 %v10732_v35, %v9728_v19  ;;  %v9704_v19 = vld [vmem:[%s17255_s11 + $0x48] sm:$0xf]  ;;  %v5192_v35 = vld [vmem:[%s15257_s0 + $0x10] sm:$0xff] }
 0x510   : > { %11081 = vrcp.f32 %v15613_v34  ;;  %v5121_v25 = vsel %vm15571_vm11, %v5120_v28, %v5116_v58  ;;  %v5420_v39 = vadd.f32 %v15575_v40, %v5419_v56  ;;  %v5440_v28 = vand.u32 2147483647, %v15577_v36  ;;  %5910 = vmatpush.bf16.msra.mxu1 %v9636_v4  ;;  %vm15717_vm11 = vmor %vm5138_vm2, %vm5139_vm8  ;;  %v10699_v4 = vld [vmem:[%s17251_s7 + $0x40] sm:$0xf0] }
 0x511   : > { %v5135_v50 = vsub.f32 1.0, %v5134_v42  ;;  %v15641_v48 = vpop.eup %11079  ;;  %v5164_v33 = vmul.f32 %v5121_v25, %v5081_v26  ;;  %11083 = vtanh.f32 %v5165_v22  ;;  %v9584_v47 = vor.u32 %v10694_v41, %v9581_v52  ;;  %6199 = vmatpush.bf16.msrb.mxu2 %v9729_v57  ;;  %v10726_v26 = vld [vmem:[%s17255_s11 + $0x50] sm:$0xf0]  ;;  %v5403_v41 = vpop.f32.mrf.mxu3 }
 0x512   : > { %v5424_v32 = vsel %vm5423_vm3, %v15575_v40, %v5420_v39  ;;  %v5432_v40 = vmul.f32 %v15641_v48, %v15577_v36  ;;  %v9624_v58 = vor.u32 %v10705_v2, %v9623_v11  ;;  %vm5476_vm9 = vweird.f32 %v15333_v53  ;;  %v9668_v53 = vld [vmem:[%s17255_s11] sm:$0xf] }
 0x513   : > { %v5136_v7 = vmul.f32 %v15602_v60, %v5135_v50  ;;  %v5429_v51 = vsel %vm15623_vm1, %v5428_v18, %v5424_v32  ;;  %vm15702_vm10 = vcmp.eq.f32.partialorder %v5440_v28, 8.507059e+37  ;;  %v5442_v22 = vand.u32 2147483648, %v15577_v36  ;;  %v9611_v18 = vld [vmem:[%s17251_s7 + $0x50] sm:$0xf]  ;;  %5900 = vmatpush.bf16.msra.mxu0 %v9584_v47  ;;  %v5195_v47 = vld [vmem:[%s15257_s0 + $0x28] sm:$0xff]  ;;  %vm15799_vm2 = vmor %vm5476_vm9, %vm5477_vm7 }
 0x514   : > { %v5486_v8 = vmul.f32 %v5429_v51, %v5402_v21  ;;  %v5433_v42 = vsub.f32 1.0, %v5432_v40  ;;  %v9717_v49 = vor.u32 %v10729_v38, %v9716_v9  ;;  %v5166_v25 = vadd.f32 %v5164_v33, %v4870_v62  ;;  %5911 = vmatpush.bf16.msra.mxu1 %v9624_v58  ;;  %v9599_v40 = vld [vmem:[%s17251_s7 + $0x38] sm:$0xf]  ;;  %v9692_v38 = vld [vmem:[%s17255_s11 + $0x30] sm:$0xf] }
 0x515   : > { %v5137_v31 = vadd.f32 %v15602_v60, %v5136_v7  ;;  %vm5437_vm12 = vweird.f32 %v15641_v48  ;;  %v9572_v59 = vor.u32 %v10691_v45, %v9569_v12  ;;  %vm5153_vm13 = vweird.f32 %v15613_v34  ;;  %v9680_v50 = vld [vmem:[%s17255_s11 + $0x18] sm:$0xf]  ;;  %v9712_v12 = vld [vmem:[%s17255_s11 + $0x50] sm:$0xf] }
 0x516   : > { %v15697_v30 = vpop.eup %11081  ;;  %v5434_v39 = vmul.f32 %v15641_v48, %v5433_v42  ;;  %v5157_v62 = vand.u32 2147483647, %v15613_v34  ;;  %v5159_v7 = vand.u32 2147483648, %v15613_v34  ;;  %v5488_v21 = vadd.f32 %v5486_v8, %v5192_v35  ;;  %vm15743_vm15 = vmor %vm5436_vm5, %vm5437_vm12  ;;  %6200 = vmatpush.bf16.msrb.mxu2 %v9717_v49 }
 0x517   : > { %v5149_v15 = vmul.f32 %v15697_v30, %v15613_v34  ;;  %v5141_v43 = vsel %vm15717_vm11, %v15602_v60, %v5137_v31  ;;  %v9612_v52 = vor.u32 %v10702_v16, %v9611_v18  ;;  %v11084_v11 = vpop.eup %11083  ;;  %vm5154_vm14 = vweird.f32 %v15697_v30  ;;  %5901 = vmatpush.bf16.msra.mxu0 %v9572_v59  ;;  %v10723_v31 = vld [vmem:[%s17255_s11 + $0x38] sm:$0xf0]  ;;  %v9587_v34 = vld [vmem:[%s17251_s7 + $0x20] sm:$0xf] }
 0x518   : > { %v5435_v32 = vadd.f32 %v15641_v48, %v5434_v39  ;;  %v5443_v33 = vor.u32 1.1754944e-38, %v5442_v22  ;;  %v9705_v51 = vor.u32 %v10726_v26, %v9704_v19  ;;  %11085 = vtanh.f32 %v5166_v25  ;;  %vm15778_vm1 = vmor %vm5153_vm13, %vm5154_vm14  ;;  %v11203_v22 = vld [vmem:[%s11336_s25 + $0x10] sm:$0xff]  ;;  %v10720_v25 = vld [vmem:[%s17255_s11 + $0x20] sm:$0xf0] }
 0x519   : > { %v5150_v28 = vsub.f32 1.0, %v5149_v15  ;;  %v5404_v9 = vadd.f32 %v5403_v41, %v5232_v24  ;;  %v5146_v57 = vsel %vm15661_vm4, %v15630_v44, %v5141_v43  ;;  %vm15768_vm0 = vcmp.eq.f32.partialorder %v5157_v62, 8.507059e+37  ;;  %5912 = vmatpush.bf16.msra.mxu1 %v9612_v52  ;;  %v10696_v15 = vld [vmem:[%s17251_s7 + $0x28] sm:$0xf0]  ;;  %v9724_v24 = vld [vmem:[%s17255_s11 + $0x68] sm:$0xf] }
 0x51a   : > { %v5439_v36 = vsel %vm15743_vm15, %v15641_v48, %v5435_v32  ;;  %v5169_v45 = vsub.f32 1.0, %v5146_v57  ;;  %v5160_v44 = vor.u32 1.1754944e-38, %v5159_v7  ;;  %11087 = vtanh.f32 %v5488_v21  ;;  %6201 = vmatpush.bf16.msrb.mxu2 %v9705_v51  ;;  %v10739_v51 = vld [vmem:[%s17255_s11 + $0xb8] sm:$0xf0] }
 0x51b   : > { %v5151_v2 = vmul.f32 %v15697_v30, %v5150_v28  ;;  %v5444_v48 = vsel %vm15702_vm10, %v5443_v33, %v5439_v36  ;;  %v9600_v8 = vor.u32 %v10699_v4, %v9599_v40  ;;  %v9693_v58 = vor.u32 %v10723_v31, %v9692_v38  ;;  %v9760_v33 = vld [vmem:[%s17255_s11 + $0xb0] sm:$0xf]  ;;  %v10736_v36 = vld [vmem:[%s17255_s11 + $0xa0] sm:$0xf0]  ;;  %v9736_v31 = vld [vmem:[%s17255_s11 + $0x80] sm:$0xf] }
 0x51c   : > { %v5487_v17 = vmul.f32 %v5444_v48, %v5404_v9  ;;  %v5171_v56 = vmul.f32 %v11084_v11, %v5169_v45  ;;  %v5173_v49 = vmul.f32 %v11203_v22, %v5146_v57  ;;  %v5468_v18 = vor.u32 1.1754944e-38, %v5467_v1  ;;  %v10733_v57 = vld [vmem:[%s17255_s11 + $0x88] sm:$0xf0]  ;;  %v10730_v48 = vld [vmem:[%s17255_s11 + $0x70] sm:$0xf0] }
 0x51d   : > { %v5152_v13 = vadd.f32 %v15697_v30, %v5151_v2  ;;  %vm5466_vm3 = vcmp.eq.f32.partialorder %v5465_v0, 8.507059e+37  ;;  %v5479_v39 = vsel %vm15799_vm2, %v15393_v20, %v15553_v14  ;;  %v5483_v43 = vor.u32 1.1754944e-38, %v5482_v27  ;;  %5913 = vmatpush.bf16.msra.mxu1 %v9600_v8  ;;  %v9575_v14 = vld [vmem:[%s17251_s7 + $0x8] sm:$0xf]  ;;  %v9700_v8 = vld [vmem:[%s17255_s11 + $0x38] sm:$0xf] }
 0x51e   : > { %v5489_v16 = vadd.f32 %v5487_v17, %v5195_v47  ;;  %v15817_v19 = vadd.f32 %v5173_v49, %v5171_v56  ;;  %v11086_v26 = vpop.eup %11085  ;;  %v5469_v54 = vsel %vm5466_vm3, %v5468_v18, %v5464_v3  ;;  %v9588_v0 = vor.u32 %v10696_v15, %v9587_v34  ;;  %6202 = vmatpush.bf16.msrb.mxu2 %v9693_v58  ;;  %v9688_v58 = vld [vmem:[%s17255_s11 + $0x20] sm:$0xf]  ;;  %v10721_v34 = vld [vmem:[%s17255_s11 + $0x28] sm:$0xf0]  ;;  %v9676_v56 = vld [vmem:[%s17255_s11 + $0x8] sm:$0xf] }
 0x51f   : > { %v5156_v42 = vsel %vm15778_vm1, %v15697_v30, %v5152_v13  ;;  %vm5481_vm4 = vcmp.eq.f32.partialorder %v5480_v37, 8.507059e+37  ;;  %v9681_v20 = vor.u32 %v10720_v25, %v9680_v50  ;;  %v10717_v37 = vld [vmem:[%s17255_s11 + $0x8] sm:$0xf0]  ;;  %v5492_v62 = vsub.f32 1.0, %v5469_v54  ;;  %v9948_v22 = vld [vmem:[%s17259_s15 + $0xa8] sm:$0xf] }
 0x520   : > { %v5161_v1 = vsel %vm15768_vm0, %v5160_v44, %v5156_v42  ;;  %11089 = vtanh.f32 %v5489_v16  ;;  %9364 = vst [vmem:[%s11336_s25 + $0x20] sm:$0xff] %v15817_v19  ;;  %v11088_v3 = vpop.eup %11087  ;;  %v5484_v28 = vsel %vm5481_vm4, %v5483_v43, %v5479_v39  ;;  %v9576_v41 = vor.u32 %v10693_v5, %v9575_v14  ;;  %v10727_v44 = vld [vmem:[%s17255_s11 + $0x58] sm:$0xf0]  ;;  %v10724_v42 = vld [vmem:[%s17255_s11 + $0x40] sm:$0xf0] }
 0x521   : > { %v5170_v59 = vsub.f32 1.0, %v5161_v1  ;;  %v5174_v61 = vmul.f32 %v11204_v10, %v5161_v1  ;;  %5914 = vmatpush.bf16.msra.mxu1 %v9588_v0  ;;  %v5494_v7 = vmul.f32 %v11088_v3, %v5492_v62  ;;  %v5493_v21 = vsub.f32 1.0, %v5484_v28  ;;  %v10786_v49 = vld [vmem:[%s17259_s15 + $0xb0] sm:$0xf0]  ;;  %v9936_v16 = vld [vmem:[%s17259_s15 + $0x90] sm:$0xf] }
 0x522   : > { %6203 = vmatpush.bf16.msrb.mxu2 %v9681_v20  ;;  %v9669_v32 = vor.u32 %v10717_v37, %v9668_v53  ;;  %v5496_v11 = vmul.f32 %v5469_v54, %v14323_v63  ;;  %v5497_v60 = vmul.f32 %v5484_v28, %v14325_v55  ;;  %v9761_v9 = vor.u32 %v10739_v51, %v9760_v33  ;;  %v9748_v55 = vld [vmem:[%s17255_s11 + $0x98] sm:$0xf]  ;;  %v10783_v50 = vld [vmem:[%s17259_s15 + $0x98] sm:$0xf0]  ;;  %v10780_v39 = vld [vmem:[%s17259_s15 + $0x80] sm:$0xf0] }
 0x523   : > { %v5172_v27 = vmul.f32 %v11086_v26, %v5170_v59  ;;  %v9749_v38 = vor.u32 %v10736_v36, %v9748_v55  ;;  %v9737_v13 = vor.u32 %v10733_v57, %v9736_v31  ;;  %v9725_v45 = vor.u32 %v10730_v48, %v9724_v24  ;;  %v9924_v1 = vld [vmem:[%s17259_s15 + $0x78] sm:$0xf]  ;;  %v9912_v26 = vld [vmem:[%s17259_s15 + $0x60] sm:$0xf]  ;;  %v10777_v43 = vld [vmem:[%s17259_s15 + $0x68] sm:$0xf0] }
 0x524   : > { %v15855_v40 = vadd.f32 %v5496_v11, %v5494_v7  ;;  %v9713_v17 = vor.u32 %v10727_v44, %v9712_v12  ;;  %v9701_v47 = vor.u32 %v10724_v42, %v9700_v8  ;;  %v9689_v15 = vor.u32 %v10721_v34, %v9688_v58  ;;  %v9900_v0 = vld [vmem:[%s17259_s15 + $0x48] sm:$0xf]  ;;  %v9888_v14 = vld [vmem:[%s17259_s15 + $0x30] sm:$0xf]  ;;  %v10771_v5 = vld [vmem:[%s17259_s15 + $0x38] sm:$0xf0] }
 0x525   : > { %v15843_v35 = vadd.f32 %v5174_v61, %v5172_v27  ;;  %5915 = vmatpush.bf16.msra.mxu1 %v9576_v41  ;;  %v9949_v30 = vor.u32 %v10786_v49, %v9948_v22  ;;  %v9937_v25 = vor.u32 %v10783_v50, %v9936_v16  ;;  %v9925_v59 = vor.u32 %v10780_v39, %v9924_v1  ;;  %v9876_v10 = vld [vmem:[%s17259_s15 + $0x18] sm:$0xf]  ;;  %v10768_v61 = vld [vmem:[%s17259_s15 + $0x20] sm:$0xf0]  ;;  %v9864_v28 = vld [vmem:[%s17259_s15] sm:$0xf] }
 0x526   : > { %v11090_v52 = vpop.eup %11089  ;;  %6204 = vmatpush.bf16.msrb.mxu2 %v9669_v32  ;;  %v9913_v54 = vor.u32 %v10777_v43, %v9912_v26  ;;  %v9889_v27 = vor.u32 %v10771_v5, %v9888_v14  ;;  %v9877_v3 = vor.u32 %v10768_v61, %v9876_v10  ;;  %v10765_v53 = vld [vmem:[%s17259_s15 + $0x8] sm:$0xf0]  ;;  %v10053_v62 = vld [vmem:[%s17281_s29 + $0xb4] sm:$0xf0]  ;;  %v10041_v32 = vld [vmem:[%s17281_s29 + $0x9c] sm:$0xf0] }
 0x527   : > { %9365 = vst [vmem:[%s11336_s25 + $0x28] sm:$0xff] %v15843_v35  ;;  %v5495_v2 = vmul.f32 %v11090_v52, %v5493_v21  ;;  %v10810_v37 = vld [vmem:[%s17281_s29 + $0xac] sm:$0xf]  ;;  %v9865_v41 = vor.u32 %v10765_v53, %v9864_v28  ;;  %v10807_v21 = vld [vmem:[%s17281_s29 + $0x94] sm:$0xf]  ;;  %v15974_v52 = vpack.c.bf16 %v15843_v35, %v15817_v19  ;;  %v6027_v5 = vld [vmem:[%s16022_s24 + $0x20] sm:$0xff] }
 0x528   : > { %v10056_v7 = vor.u32 %v10810_v37, %v10053_v62  ;;  %v10044_v11 = vor.u32 %v10807_v21, %v10041_v32  ;;  %v10801_v51 = vld [vmem:[%s17281_s29 + $0x64] sm:$0xf]  ;;  %v10017_v19 = vld [vmem:[%s17281_s29 + $0x6c] sm:$0xf0]  ;;  %v10005_v55 = vld [vmem:[%s17281_s29 + $0x54] sm:$0xf0] }
 0x529   : > { %v15857_v4 = vadd.f32 %v5497_v60, %v5495_v2  ;;  %v10804_v2 = vld [vmem:[%s17281_s29 + $0x7c] sm:$0xf]  ;;  %v10029_v60 = vld [vmem:[%s17281_s29 + $0x84] sm:$0xf0]  ;;  %v10020_v35 = vor.u32 %v10801_v51, %v10017_v19  ;;  %v9993_v31 = vld [vmem:[%s17281_s29 + $0x3c] sm:$0xf0] }
 0x52a   : > { %v10032_v33 = vor.u32 %v10804_v2, %v10029_v60  ;;  %v9981_v24 = vld [vmem:[%s17281_s29 + $0x24] sm:$0xf0]  ;;  %v9969_v12 = vld [vmem:[%s17281_s29 + $0xc] sm:$0xf0]  ;;  %v16019_v42 = vld [vmem:[%s17257_s13] sm:$0x7] }
 0x52b   : > { %v15861_v63 = vpack.c.bf16 %v15857_v4, %v15855_v40  ;;  %v16033_v49 = vld [vmem:[%s17252_s8] sm:$0x7]  ;;  %v9852_v16 = vld [vmem:[%s17258_s14 + $0xa8] sm:$0xf]  ;;  %v10762_v50 = vld [vmem:[%s17258_s14 + $0xb0] sm:$0xf0] }
 0x52c   : > { %v9853_v1 = vor.u32 %v10762_v50, %v9852_v16  ;;  %v9828_v28 = vld [vmem:[%s17258_s14 + $0x78] sm:$0xf]  ;;  %v10756_v53 = vld [vmem:[%s17258_s14 + $0x80] sm:$0xf0]  ;;  %v5536_v60 = vperm.slane %v16033_v49, 1 }
 0x52d   : > { %5677 = vmatmul.bf16.vlgmr.msrb.gmra.mxu0 %v15861_v63  ;;  %5691 = vmatmul.bf16.vlgmr.msrb.gmra.mxu1 %v15861_v63  ;;  %v9829_v62 = vor.u32 %v10756_v53, %v9828_v28 }
 0x52e   : > { %5705 = vmatmul.bf16.vlgmr.msra.gmra.mxu2 %v15861_v63  ;;  %6225 = vmatpush.bf16.msrb.mxu0 %v9761_v9  ;;  %v10798_v9 = vld [vmem:[%s17281_s29 + $0x4c] sm:$0xf] }
 0x52f   : > { %v10008_v36 = vor.u32 %v10798_v9, %v10005_v55  ;;  %6502 = vmatpush.bf16.msrb.mxu1 %v9853_v1  ;;  %v10753_v9 = vld [vmem:[%s17258_s14 + $0x68] sm:$0xf0]  ;;  %v9842_v1 = vld [vmem:[%s17258_s14 + $0x9c] sm:$0xf0] }
 0x532   : > { %6226 = vmatpush.bf16.msrb.mxu0 %v9749_v38  ;;  %v10795_v38 = vld [vmem:[%s17281_s29 + $0x34] sm:$0xf] }
 0x533   : > { %v9996_v57 = vor.u32 %v10795_v38, %v9993_v31  ;;  %v10761_v31 = vld [vmem:[%s17258_s14 + $0xac] sm:$0xf] }
 0x536   : > { %6227 = vmatpush.bf16.msrb.mxu0 %v9737_v13  ;;  %v10792_v13 = vld [vmem:[%s17281_s29 + $0x1c] sm:$0xf] }
 0x537   : > { %v9984_v48 = vor.u32 %v10792_v13, %v9981_v24 }
 0x53a   : > { %6228 = vmatpush.bf16.msrb.mxu0 %v9725_v45  ;;  %v10789_v45 = vld [vmem:[%s17281_s29 + $0x4] sm:$0xf] }
 0x53b   : > { %v9972_v44 = vor.u32 %v10789_v45, %v9969_v12  ;;  %v9860_v12 = vld [vmem:[%s17258_s14 + $0xb0] sm:$0xf] }
 0x53d   : > { %5902 = vmatmul.bf16.vlgmr.msra.gmra.mxu0 %v15205_v29  ;;  %5916 = vmatmul.bf16.vlgmr.msra.gmra.mxu1 %v15205_v29  ;;  %v10718_v29 = vld [vmem:[%s17255_s11 + $0x10] sm:$0xf0] }
 0x53e   : > { %6205 = vmatmul.bf16.vlgmr.msrb.gmra.mxu2 %v15092_v6  ;;  %6229 = vmatpush.bf16.msrb.mxu0 %v9713_v17  ;;  %v9677_v18 = vor.u32 %v10718_v29, %v9676_v56  ;;  %v5889_v17 = vpop.f32.mrf.mxu3  ;;  %v16028_v29 = vld [vmem:[%s17253_s9] sm:$0x7] }
 0x53f   : > { %v5747_v51 = vperm.slane %v16028_v29, 1 }
 0x542   : > { %6230 = vmatpush.bf16.msrb.mxu0 %v9701_v47  ;;  %v6064_v47 = vperm.slane %v16019_v42, 1 }
 0x546   : > { %6231 = vmatpush.bf16.msrb.mxu0 %v9689_v15  ;;  %v5891_v8 = vpop.f32.mrf.mxu3  ;;  %v6024_v15 = vld [vmem:[%s16022_s24 + $0x8] sm:$0xff] }
 0x54a   : > { %6232 = vmatpush.bf16.msrb.mxu0 %v9677_v18  ;;  %v5746_v18 = vperm.slane %v16028_v29, 0 }
 0x54d   : > { %6233 = vmatmul.bf16.vlgmr.msrb.gmra.mxu0 %v15092_v6  ;;  %v10774_v6 = vld [vmem:[%s17259_s15 + $0x50] sm:$0xf0] }
 0x54e   : > { %6713 = vmatpush.bf16.msra.mxu0 %v9949_v30  ;;  %v9901_v20 = vor.u32 %v10774_v6, %v9900_v0  ;;  %v6220_v58 = vpop.f32.mrf.mxu3  ;;  %v5535_v30 = vperm.slane %v16033_v49, 0  ;;  %v10759_v0 = vld [vmem:[%s17258_s14 + $0x98] sm:$0xf0] }
 0x54f   : > { %v6221_v34 = vadd.f32 %v6220_v58, %v6064_v47 }
 0x551   : > { %v6279_v56 = vadd.f32 %v6221_v34, %v6024_v15 }
 0x552   : > { %6714 = vmatpush.bf16.msra.mxu0 %v9937_v25 }
 0x553   : > { %v9764_v22 = vmul.f32 -1.442695, %v6279_v56 }
 0x555   : > { %11091 = vpow2.f32 %v9764_v22 }
 0x556   : > { %6715 = vmatpush.bf16.msra.mxu0 %v9925_v59  ;;  %v6222_v25 = vpop.f32.mrf.mxu3  ;;  %v5890_v59 = vadd.f32 %v5889_v17, %v5746_v18 }
 0x557   : > { %v6223_v43 = vadd.f32 %v6222_v25, %v6064_v47  ;;  %v10750_v47 = vld [vmem:[%s17258_s14 + $0x50] sm:$0xf0] }
 0x558   : > { %v10758_v25 = vld [vmem:[%s17258_s14 + $0x94] sm:$0xf] }
 0x559   : > { %v6280_v10 = vadd.f32 %v6223_v43, %v6027_v5  ;;  %v9845_v43 = vor.u32 %v10758_v25, %v9842_v1 }
 0x55a   : > { %6716 = vmatpush.bf16.msra.mxu0 %v9913_v54  ;;  %v9840_v54 = vld [vmem:[%s17258_s14 + $0x90] sm:$0xf] }
 0x55b   : > { %v11092_v14 = vpop.eup %11091  ;;  %v9765_v32 = vmul.f32 -1.442695, %v6280_v10  ;;  %v10747_v10 = vld [vmem:[%s17258_s14 + $0x38] sm:$0xf0] }
 0x55c   : > { %v16050_v61 = vadd.f32 1.0, %v11092_v14 }
 0x55e   : > { %6717 = vmatpush.bf16.msra.mxu0 %v9901_v20  ;;  %v9841_v20 = vor.u32 %v10759_v0, %v9840_v54  ;;  %v9848_v54 = vld [vmem:[%s17258_s14 + $0x98] sm:$0xf]  ;;  %v10760_v0 = vld [vmem:[%s17258_s14 + $0xa0] sm:$0xf0]  ;;  %vm6294_vm3 = vweird.f32 %v16050_v61 }
 0x55f   : > { %v9849_v5 = vor.u32 %v10760_v0, %v9848_v54 }
 0x560   : > { %6503 = vmatpush.bf16.msrb.mxu1 %v9841_v20 }
 0x562   : > { %6718 = vmatpush.bf16.msra.mxu0 %v9889_v27 }
 0x564   : > { %6504 = vmatpush.bf16.msrb.mxu1 %v9829_v62 }
 0x566   : > { %6719 = vmatpush.bf16.msra.mxu0 %v9877_v3 }
 0x56a   : > { %6720 = vmatpush.bf16.msra.mxu0 %v9865_v41  ;;  %v5892_v41 = vadd.f32 %v5891_v8, %v5746_v18  ;;  %v9804_v8 = vld [vmem:[%s17258_s14 + $0x48] sm:$0xf]  ;;  %v6063_v18 = vperm.slane %v16019_v42, 0 }
 0x56b   : > { %v9805_v15 = vor.u32 %v10750_v47, %v9804_v8 }
 0x56d   : > { %6721 = vmatmul.bf16.vlgmr.msra.gmra.mxu0 %v15974_v52 }
 0x56e   : > { %7049 = vmatpush.bf16.msrb.mxu0 %v10056_v7 }
 0x572   : > { %7050 = vmatpush.bf16.msrb.mxu0 %v10044_v11 }
 0x576   : > { %7051 = vmatpush.bf16.msrb.mxu0 %v10032_v33 }
 0x57a   : > { %7052 = vmatpush.bf16.msrb.mxu0 %v10020_v35  ;;  %v9816_v35 = vld [vmem:[%s17258_s14 + $0x60] sm:$0xf] }
 0x57e   : > { %7053 = vmatpush.bf16.msrb.mxu0 %v10008_v36  ;;  %v9817_v36 = vor.u32 %v10753_v9, %v9816_v35 }
 0x580   : > { %6505 = vmatpush.bf16.msrb.mxu1 %v9817_v36 }
 0x582   : > { %7054 = vmatpush.bf16.msrb.mxu0 %v9996_v57  ;;  %v9854_v57 = vld [vmem:[%s17258_s14 + $0xb4] sm:$0xf0] }
 0x583   : > { %v9857_v45 = vor.u32 %v10761_v31, %v9854_v57 }
 0x584   : > { %6506 = vmatpush.bf16.msrb.mxu1 %v9805_v15 }
 0x585   : > { %6516 = vmatpush.bf16.msra.mxu2 %v9857_v45  ;;  %v10744_v45 = vld [vmem:[%s17258_s14 + $0x20] sm:$0xf0] }
 0x586   : > { %7055 = vmatpush.bf16.msrb.mxu0 %v9984_v48 }
 0x589   : > { %6517 = vmatpush.bf16.msra.mxu2 %v9845_v43  ;;  %v9824_v43 = vld [vmem:[%s17258_s14 + $0x68] sm:$0xf] }
 0x58a   : > { %7056 = vmatpush.bf16.msrb.mxu0 %v9972_v44  ;;  %v10763_v44 = vld [vmem:[%s17258_s14 + $0xb8] sm:$0xf0] }
 0x58b   : > { %v9861_v17 = vor.u32 %v10763_v44, %v9860_v12  ;;  %v5748_v12 = vperm.slane %v16028_v29, 2 }
 0x58d   : > { %7057 = vmatmul.bf16.vlgmr.msrb.gmra.mxu0 %v15861_v63  ;;  %6530 = vmatpush.bf16.msra.mxu3 %v9861_v17 }
 0x591   : > { %6531 = vmatpush.bf16.msra.mxu3 %v9849_v5  ;;  %v10754_v5 = vld [vmem:[%s17258_s14 + $0x70] sm:$0xf0] }
 0x5aa   : > { %v5678_v39 = vpop.f32.mrf.mxu0  ;;  %v5692_v7 = vpop.f32.mrf.mxu1 }
 0x5ab   : > { %v5679_v26 = vadd.f32 %v5678_v39, %v5535_v30  ;;  %v5693_v24 = vadd.f32 %v5692_v7, %v5536_v60  ;;  %v5537_v7 = vperm.slane %v16033_v49, 2  ;;  %v10743_v49 = vld [vmem:[%s17258_s14 + $0x1c] sm:$0xf] }
 0x5ad   : > { %v5922_v6 = vadd.f32 %v5890_v59, %v5679_v26  ;;  %v6300_v59 = vand.u32 2147483648, %v16050_v61 }
 0x5af   : > { %v9661_v27 = vmul.f32 -1.442695, %v5922_v6 }
 0x5b1   : > { %11093 = vpow2.f32 %v9661_v27  ;;  %v16052_v3 = vpop.f32.mrf.mxu2  ;;  %v9792_v27 = vld [vmem:[%s17258_s14 + $0x30] sm:$0xf] }
 0x5b2   : > { %v5680_v37 = vpop.f32.mrf.mxu0  ;;  %11095 = vrcp.f32 %v16050_v61  ;;  %v5694_v58 = vpop.f32.mrf.mxu1  ;;  %v9793_v36 = vor.u32 %v10747_v10, %v9792_v27  ;;  %v9768_v27 = vld [vmem:[%s17258_s14] sm:$0xf]  ;;  %v10741_v10 = vld [vmem:[%s17258_s14 + $0x8] sm:$0xf0] }
 0x5b3   : > { %v5681_v21 = vadd.f32 %v5680_v37, %v5535_v30  ;;  %11097 = vpow2.f32 %v9765_v32  ;;  %v6298_v30 = vand.u32 2147483647, %v16050_v61  ;;  %v6023_v37 = vld [vmem:[%s16022_s24] sm:$0xff] }
 0x5b4   : > { %6507 = vmatpush.bf16.msrb.mxu1 %v9793_v36  ;;  %v9812_v36 = vld [vmem:[%s17258_s14 + $0x50] sm:$0xf] }
 0x5b5   : > { %v5923_v11 = vadd.f32 %v5892_v41, %v5681_v21  ;;  %v5695_v21 = vadd.f32 %v5694_v58, %v5536_v60  ;;  %v9836_v60 = vld [vmem:[%s17258_s14 + $0x80] sm:$0xf] }
 0x5b7   : > { %v11094_v2 = vpop.eup %11093  ;;  %v9662_v33 = vmul.f32 -1.442695, %v5923_v11 }
 0x5b8   : > { %v16063_v19 = vadd.f32 1.0, %v11094_v2  ;;  %v16080_v13 = vpop.eup %11095  ;;  %v10755_v2 = vld [vmem:[%s17258_s14 + $0x7c] sm:$0xf] }
 0x5b9   : > { %11099 = vpow2.f32 %v9662_v33  ;;  %v16071_v55 = vpop.f32.mrf.mxu2  ;;  %v11098_v56 = vpop.eup %11097  ;;  %v16096_v22 = vmul.f32 %v16080_v13, %v16050_v61  ;;  %v9830_v33 = vld [vmem:[%s17258_s14 + $0x84] sm:$0xf0]  ;;  %vm6295_vm0 = vweird.f32 %v16080_v13 }
 0x5ba   : > { %11101 = vrcp.f32 %v16063_v19  ;;  %v5903_v38 = vpop.f32.mrf.mxu0  ;;  %v16117_v6 = vadd.f32 1.0, %v11098_v56  ;;  %v5941_v53 = vand.u32 2147483647, %v16063_v19  ;;  %v5943_v35 = vand.u32 2147483648, %v16063_v19  ;;  %v5917_v58 = vpop.f32.mrf.mxu1  ;;  %v10752_v56 = vld [vmem:[%s17258_s14 + $0x64] sm:$0xf] }
 0x5bb   : > { %v5904_v48 = vadd.f32 %v5903_v38, %v5747_v51  ;;  %v6291_v28 = vsub.f32 1.0, %v16096_v22  ;;  %v9833_v38 = vor.u32 %v10755_v2, %v9830_v33  ;;  %vm5937_vm7 = vweird.f32 %v16063_v19  ;;  %v9818_v22 = vld [vmem:[%s17258_s14 + $0x6c] sm:$0xf0]  ;;  %v6026_v33 = vld [vmem:[%s16022_s24 + $0x18] sm:$0xff] }
 0x5bc   : > { %vm16156_vm5 = vcmp.eq.f32.partialorder %v5941_v53, 8.507059e+37  ;;  %v9821_v1 = vor.u32 %v10752_v56, %v9818_v22 }
 0x5bd   : > { %v5962_v34 = vadd.f32 %v5904_v48, %v5693_v24  ;;  %v9780_v48 = vld [vmem:[%s17258_s14 + $0x18] sm:$0xf]  ;;  %6518 = vmatpush.bf16.msra.mxu2 %v9833_v38  ;;  %v16183_v54 = vmul.f32 %v16080_v13, %v6291_v28 }
 0x5be   : > { %v9781_v8 = vor.u32 %v10744_v45, %v9780_v48 }
 0x5bf   : > { %v11100_v16 = vpop.eup %11099  ;;  %v9663_v50 = vmul.f32 -1.442695, %v5962_v34 }
 0x5c0   : > { %v16106_v39 = vpop.eup %11101  ;;  %v16109_v26 = vadd.f32 1.0, %v11100_v16  ;;  %6508 = vmatpush.bf16.msrb.mxu1 %v9781_v8 }
 0x5c1   : > { %11103 = vpow2.f32 %v9663_v50  ;;  %v5933_v20 = vmul.f32 %v16106_v39, %v16063_v19  ;;  %v6206_v14 = vpop.f32.mrf.mxu2  ;;  %vm5938_vm6 = vweird.f32 %v16106_v39  ;;  %v5944_v19 = vor.u32 1.1754944e-38, %v5943_v35  ;;  %6519 = vmatpush.bf16.msra.mxu2 %v9821_v1  ;;  %v9770_v1 = vld [vmem:[%s17258_s14 + $0xc] sm:$0xf0] }
 0x5c2   : > { %11105 = vrcp.f32 %v16109_v26  ;;  %v6207_v62 = vadd.f32 %v6206_v14, %v6063_v18  ;;  %v5905_v41 = vpop.f32.mrf.mxu0  ;;  %vm16175_vm8 = vmor %vm5937_vm7, %vm5938_vm6  ;;  %v5956_v53 = vand.u32 2147483647, %v16109_v26  ;;  %v5958_v2 = vand.u32 2147483648, %v16109_v26 }
 0x5c3   : > { %v5934_v32 = vsub.f32 1.0, %v5933_v20  ;;  %v5906_v11 = vadd.f32 %v5905_v41, %v5747_v51  ;;  %v10757_v51 = vld [vmem:[%s17258_s14 + $0x88] sm:$0xf0]  ;;  %11107 = vrcp.f32 %v16117_v6  ;;  %v9825_v35 = vor.u32 %v10754_v5, %v9824_v43  ;;  %v5919_v5 = vpop.f32.mrf.mxu1  ;;  %v9776_v43 = vld [vmem:[%s17258_s14 + $0x8] sm:$0xf] }
 0x5c4   : > { %v6239_v9 = vadd.f32 %v6207_v62, %v6023_v37  ;;  %v9837_v24 = vor.u32 %v10757_v51, %v9836_v60  ;;  %v10785_v37 = vld [vmem:[%s17259_s15 + $0xac] sm:$0xf]  ;;  %v5918_v62 = vadd.f32 %v5917_v58, %v5748_v12  ;;  %v9938_v58 = vld [vmem:[%s17259_s15 + $0x9c] sm:$0xf0]  ;;  %vm5952_vm10 = vweird.f32 %v16109_v26 }
 0x5c5   : > { %v5935_v31 = vmul.f32 %v16106_v39, %v5934_v32  ;;  %v5963_v57 = vadd.f32 %v5906_v11, %v5695_v21  ;;  %v6065_v21 = vperm.slane %v16019_v42, 2  ;;  %v9950_v32 = vld [vmem:[%s17259_s15 + $0xb4] sm:$0xf0]  ;;  %v10749_v11 = vld [vmem:[%s17258_s14 + $0x4c] sm:$0xf]  ;;  %vm16257_vm12 = vcmp.eq.f32.partialorder %v5956_v53, 8.507059e+37 }
 0x5c6   : > { %v9762_v17 = vmul.f32 -1.442695, %v6239_v9  ;;  %6532 = vmatpush.bf16.msra.mxu3 %v9837_v24  ;;  %v9769_v9 = vor.u32 %v10741_v10, %v9768_v27  ;;  %v10751_v24 = vld [vmem:[%s17258_s14 + $0x58] sm:$0xf0]  ;;  %v9953_v44 = vor.u32 %v10785_v37, %v9950_v32  ;;  %v16276_v37 = vadd.f32 %v16080_v13, %v16183_v54  ;;  %v9800_v54 = vld [vmem:[%s17258_s14 + $0x38] sm:$0xf] }
 0x5c7   : > { %v11104_v47 = vpop.eup %11103  ;;  %v5936_v34 = vadd.f32 %v16106_v39, %v5935_v31  ;;  %v9664_v15 = vmul.f32 -1.442695, %v5963_v57  ;;  %v9813_v8 = vor.u32 %v10751_v24, %v9812_v36  ;;  %v10748_v32 = vld [vmem:[%s17258_s14 + $0x40] sm:$0xf0] }
 0x5c8   : > { %v16169_v16 = vpop.eup %11105  ;;  %v16171_v50 = vadd.f32 1.0, %v11104_v47  ;;  %11109 = vpow2.f32 %v9762_v17  ;;  %6509 = vmatpush.bf16.msrb.mxu1 %v9769_v9  ;;  %v10782_v47 = vld [vmem:[%s17259_s15 + $0x94] sm:$0xf]  ;;  %v9926_v9 = vld [vmem:[%s17259_s15 + $0x84] sm:$0xf0] }
 0x5c9   : > { %v5940_v0 = vsel %vm16175_vm8, %v16106_v39, %v5936_v34  ;;  %11111 = vpow2.f32 %v9664_v15  ;;  %v5948_v20 = vmul.f32 %v16169_v16, %v16109_v26  ;;  %v6208_v14 = vpop.f32.mrf.mxu2  ;;  %v5707_v39 = vadd.f32 %v16052_v3, %v5537_v7  ;;  %v16229_v38 = vpop.eup %11107 }
 0x5ca   : > { %11113 = vrcp.f32 %v16171_v50  ;;  %v5945_v28 = vsel %vm16156_vm5, %v5944_v19, %v5940_v0  ;;  %v6209_v3 = vadd.f32 %v6208_v14, %v6063_v18  ;;  %vm5953_vm9 = vweird.f32 %v16169_v16  ;;  %v9806_v18 = vld [vmem:[%s17258_s14 + $0x54] sm:$0xf0]  ;;  %6533 = vmatpush.bf16.msra.mxu3 %v9825_v35  ;;  %v6234_v53 = vpop.f32.mrf.mxu0  ;;  %v10779_v35 = vld [vmem:[%s17259_s15 + $0x7c] sm:$0xf] }
 0x5cb   : > { %v5949_v41 = vsub.f32 1.0, %v5948_v20  ;;  %v5983_v60 = vand.u32 2147483648, %v16171_v50  ;;  %v6002_v51 = vmul.f32 %v5945_v28, %v5918_v62  ;;  %v5981_v45 = vand.u32 2147483647, %v16171_v50  ;;  %vm16253_vm11 = vmor %vm5952_vm10, %vm5953_vm9  ;;  %v9902_v28 = vld [vmem:[%s17259_s15 + $0x54] sm:$0xf0] }
 0x5cc   : > { %v6240_v57 = vadd.f32 %v6209_v3, %v6026_v33  ;;  %v9809_v17 = vor.u32 %v10749_v11, %v9806_v18  ;;  %v5959_v0 = vor.u32 1.1754944e-38, %v5958_v2  ;;  %6727 = vmatpush.bf16.msra.mxu1 %v9953_v44  ;;  %v9941_v20 = vor.u32 %v10782_v47, %v9938_v58  ;;  %v10745_v18 = vld [vmem:[%s17258_s14 + $0x28] sm:$0xf0] }
 0x5cd   : > { %v5950_v31 = vmul.f32 %v16169_v16, %v5949_v41  ;;  %v6004_v14 = vadd.f32 %v6002_v51, %v5707_v39  ;;  %v16267_v10 = vor.u32 1.1754944e-38, %v5983_v60  ;;  %vm16269_vm13 = vcmp.eq.f32.partialorder %v5981_v45, 8.507059e+37  ;;  %v10746_v39 = vld [vmem:[%s17258_s14 + $0x34] sm:$0xf] }
 0x5ce   : > { %v11110_v48 = vpop.eup %11109  ;;  %v9763_v22 = vmul.f32 -1.442695, %v6240_v57  ;;  %6520 = vmatpush.bf16.msra.mxu2 %v9809_v17  ;;  %6534 = vmatpush.bf16.msra.mxu3 %v9813_v8  ;;  %v16295_v11 = vmul.f32 %v16229_v38, %v16117_v6  ;;  %v5709_v2 = vadd.f32 %v16071_v55, %v5537_v7  ;;  %v5920_v33 = vadd.f32 %v5919_v5, %v5748_v12  ;;  %v9782_v7 = vld [vmem:[%s17258_s14 + $0x24] sm:$0xf0]  ;;  %v9788_v12 = vld [vmem:[%s17258_s14 + $0x20] sm:$0xf] }
 0x5cf   : > { %v11112_v34 = vpop.eup %11111  ;;  %v16243_v15 = vadd.f32 1.0, %v11110_v48  ;;  %v5951_v56 = vadd.f32 %v16169_v16, %v5950_v31  ;;  %vm5977_vm15 = vweird.f32 %v16171_v50  ;;  %v16316_v29 = vadd.f32 %v6234_v53, %v6065_v21  ;;  %v10776_v31 = vld [vmem:[%s17259_s15 + $0x64] sm:$0xf]  ;;  %v9914_v8 = vld [vmem:[%s17259_s15 + $0x6c] sm:$0xf0] }
 0x5d0   : > { %v16247_v25 = vpop.eup %11113  ;;  %v16249_v19 = vadd.f32 1.0, %v11112_v34  ;;  %6728 = vmatpush.bf16.msra.mxu1 %v9941_v20  ;;  %v9801_v51 = vor.u32 %v10748_v32, %v9800_v54  ;;  %v9929_v17 = vor.u32 %v10779_v35, %v9926_v9  ;;  %v9785_v34 = vor.u32 %v10743_v49, %v9782_v7  ;;  %v10742_v5 = vld [vmem:[%s17258_s14 + $0x10] sm:$0xf0]  ;;  %v10787_v53 = vld [vmem:[%s17259_s15 + $0xb8] sm:$0xf0] }
 0x5d1   : > { %v5973_v26 = vmul.f32 %v16247_v25, %v16171_v50  ;;  %11115 = vrcp.f32 %v16243_v15  ;;  %v5955_v27 = vsel %vm16253_vm11, %v16169_v16, %v5951_v56  ;;  %v9794_v16 = vld [vmem:[%s17258_s14 + $0x3c] sm:$0xf0]  ;;  %vm5978_vm14 = vweird.f32 %v16247_v25  ;;  %v10811_v54 = vld [vmem:[%s17281_s29 + $0xb0] sm:$0xf0]  ;;  %vm16462_vm11 = vmor %vm6294_vm3, %vm6295_vm0 }
 0x5d2   : > { %11117 = vrcp.f32 %v16249_v19  ;;  %v5998_v41 = vand.u32 2147483648, %v16249_v19  ;;  %v5960_v3 = vsel %vm16257_vm12, %v5959_v0, %v5955_v27  ;;  %v5996_v36 = vand.u32 2147483647, %v16249_v19  ;;  %vm16336_vm1 = vmor %vm5977_vm15, %vm5978_vm14  ;;  %6535 = vmatpush.bf16.msra.mxu3 %v9801_v51  ;;  %v9956_v27 = vld [vmem:[%s17259_s15 + $0xb0] sm:$0xf] }
 0x5d3   : > { %v5974_v62 = vsub.f32 1.0, %v5973_v26  ;;  %11119 = vpow2.f32 %v9763_v22  ;;  %v6003_v50 = vmul.f32 %v5960_v3, %v5920_v33  ;;  %v9797_v60 = vor.u32 %v10746_v39, %v9794_v16  ;;  %v10740_v22 = vld [vmem:[%s17258_s14 + $0x4] sm:$0xf]  ;;  %v10051_v3 = vld [vmem:[%s17281_s29 + $0xa8] sm:$0xf]  ;;  %v11205_v7 = vld [vmem:[%s11341_s28 + $0x10] sm:$0xff] }
 0x5d4   : > { %11121 = vtanh.f32 %v6004_v14  ;;  %v6258_v45 = vand.u32 2147483647, %v16243_v15  ;;  %v6260_v44 = vand.u32 2147483648, %v16243_v15  ;;  %vm5992_vm2 = vweird.f32 %v16249_v19  ;;  %6729 = vmatpush.bf16.msra.mxu1 %v9929_v17  ;;  %v10784_v51 = vld [vmem:[%s17259_s15 + $0xa0] sm:$0xf0] }
 0x5d5   : > { %v5975_v55 = vmul.f32 %v16247_v25, %v5974_v62  ;;  %6521 = vmatpush.bf16.msra.mxu2 %v9797_v60  ;;  %v9789_v56 = vor.u32 %v10745_v18, %v9788_v12  ;;  %vm6254_vm4 = vweird.f32 %v16243_v15  ;;  %v9917_v14 = vor.u32 %v10776_v31, %v9914_v8  ;;  %v9944_v60 = vld [vmem:[%s17259_s15 + $0x98] sm:$0xf]  ;;  %v10039_v17 = vld [vmem:[%s17281_s29 + $0x90] sm:$0xf]  ;;  %v10808_v8 = vld [vmem:[%s17281_s29 + $0x98] sm:$0xf0] }
 0x5d6   : > { %v6005_v39 = vadd.f32 %v6003_v50, %v5709_v2  ;;  %v9773_v9 = vor.u32 %v10740_v22, %v9770_v1  ;;  %v9777_v49 = vor.u32 %v10742_v5, %v9776_v43  ;;  %v9957_v50 = vor.u32 %v10787_v53, %v9956_v27  ;;  %v10770_v1 = vld [vmem:[%s17259_s15 + $0x34] sm:$0xf]  ;;  %v9890_v43 = vld [vmem:[%s17259_s15 + $0x3c] sm:$0xf0] }
 0x5d7   : > { %v16331_v57 = vpop.eup %11115  ;;  %v5976_v48 = vadd.f32 %v16247_v25, %v5975_v55  ;;  %6536 = vmatpush.bf16.msra.mxu3 %v9789_v56  ;;  %v10052_v24 = vor.u32 %v10811_v54, %v10051_v3  ;;  %v6261_v22 = vor.u32 1.1754944e-38, %v6260_v44  ;;  %vm16437_vm9 = vcmp.eq.f32.partialorder %v5996_v36, 8.507059e+37  ;;  %v10003_v44 = vld [vmem:[%s17281_s29 + $0x48] sm:$0xf] }
 0x5d8   : > { %v16346_v47 = vpop.eup %11117  ;;  %v6250_v58 = vmul.f32 %v16331_v57, %v16243_v15  ;;  %vm6255_vm5 = vweird.f32 %v16331_v57  ;;  %6730 = vmatpush.bf16.msra.mxu1 %v9917_v14  ;;  %vm6259_vm10 = vcmp.eq.f32.partialorder %v6258_v45, 8.507059e+37  ;;  %v6025_v14 = vld [vmem:[%s16022_s24 + $0x10] sm:$0xff]  ;;  %v10040_v36 = vor.u32 %v10808_v8, %v10039_v17  ;;  %v10781_v15 = vld [vmem:[%s17259_s15 + $0x88] sm:$0xf0]  ;;  %v6236_v17 = vpop.f32.mrf.mxu0 }
 0x5d9   : > { %v11120_v0 = vpop.eup %11119  ;;  %v5980_v20 = vsel %vm16336_vm1, %v16247_v25, %v5976_v48  ;;  %v5988_v26 = vmul.f32 %v16346_v47, %v16249_v19  ;;  %vm5993_vm6 = vweird.f32 %v16346_v47  ;;  %6522 = vmatpush.bf16.msra.mxu2 %v9785_v34  ;;  %v5999_v34 = vor.u32 1.1754944e-38, %v5998_v41  ;;  %vm6256_vm7 = vmor %vm6254_vm4, %vm6255_vm5 }
 0x5da   : > { %v5985_v25 = vsel %vm16269_vm13, %v16267_v10, %v5980_v20  ;;  %v16379_v16 = vadd.f32 1.0, %v11120_v0  ;;  %v6251_v62 = vsub.f32 1.0, %v6250_v58  ;;  %v11122_v32 = vpop.eup %11121  ;;  %v10773_v10 = vld [vmem:[%s17259_s15 + $0x4c] sm:$0xf]  ;;  %vm16431_vm8 = vmor %vm5992_vm2, %vm5993_vm6  ;;  %v9945_v20 = vor.u32 %v10784_v51, %v9944_v60 }
 0x5db   : > { %v6008_v33 = vsub.f32 1.0, %v5985_v25  ;;  %v5989_v35 = vsub.f32 1.0, %v5988_v26  ;;  %v6012_v12 = vmul.f32 %v11205_v7, %v5985_v25  ;;  %v9905_v48 = vor.u32 %v10773_v10, %v9902_v28  ;;  %6537 = vmatpush.bf16.msra.mxu3 %v9777_v49 }
 0x5dc   : > { %11123 = vrcp.f32 %v16379_v16  ;;  %v6252_v2 = vmul.f32 %v16331_v57, %v6251_v62  ;;  %v6306_v5 = vsub.f32 1.0, %v16295_v11  ;;  %v9893_v25 = vor.u32 %v10770_v1, %v9890_v43  ;;  %v10805_v62 = vld [vmem:[%s17281_s29 + $0x80] sm:$0xf0]  ;;  %v10775_v1 = vld [vmem:[%s17259_s15 + $0x58] sm:$0xf0] }
 0x5dd   : > { %v6010_v55 = vmul.f32 %v11122_v32, %v6008_v33  ;;  %v5990_v18 = vmul.f32 %v16346_v47, %v5989_v35  ;;  %11125 = vtanh.f32 %v6005_v39  ;;  %6523 = vmatpush.bf16.msra.mxu2 %v9773_v9  ;;  %6731 = vmatpush.bf16.msra.mxu1 %v9905_v48  ;;  %v10027_v39 = vld [vmem:[%s17281_s29 + $0x78] sm:$0xf]  ;;  %v6301_v3 = vor.u32 1.1754944e-38, %v6300_v59  ;;  %v10767_v32 = vld [vmem:[%s17259_s15 + $0x1c] sm:$0xf] }
 0x5de   : > { %v6253_v31 = vadd.f32 %v16331_v57, %v6252_v2  ;;  %v9878_v33 = vld [vmem:[%s17259_s15 + $0x24] sm:$0xf0]  ;;  %vm6299_vm12 = vcmp.eq.f32.partialorder %v6298_v30, 8.507059e+37  ;;  %v6275_v10 = vand.u32 2147483648, %v16379_v16  ;;  %v10028_v49 = vor.u32 %v10805_v62, %v10027_v39  ;;  %v10778_v30 = vld [vmem:[%s17259_s15 + $0x70] sm:$0xf0] }
 0x5df   : > { %v16412_v58 = vadd.f32 %v6012_v12, %v6010_v55  ;;  %v5991_v56 = vadd.f32 %v16346_v47, %v5990_v18  ;;  %7035 = vmatpush.bf16.msrb.mxu3 %v10052_v24  ;;  %v9920_v55 = vld [vmem:[%s17259_s15 + $0x68] sm:$0xf]  ;;  %v6307_v7 = vmul.f32 %v16229_v38, %v6306_v5  ;;  %v9881_v61 = vor.u32 %v10767_v32, %v9878_v33  ;;  %v10015_v18 = vld [vmem:[%s17281_s29 + $0x60] sm:$0xf]  ;;  %v10764_v24 = vld [vmem:[%s17259_s15 + $0x4] sm:$0xf] }
 0x5e0   : > { %v6257_v0 = vsel %vm6256_vm7, %v16331_v57, %v6253_v31  ;;  %v9932_v57 = vld [vmem:[%s17259_s15 + $0x80] sm:$0xf]  ;;  %v6273_v31 = vand.u32 2147483647, %v16379_v16  ;;  %v9866_v48 = vld [vmem:[%s17259_s15 + $0xc] sm:$0xf0]  ;;  %vm6309_vm14 = vweird.f32 %v16117_v6  ;;  %vm6269_vm15 = vweird.f32 %v16379_v16 }
 0x5e1   : > { %6852 = vst [vmem:[%s11341_s28] sm:$0xff] %v16412_v58  ;;  %v5995_v26 = vsel %vm16431_vm8, %v16346_v47, %v5991_v56  ;;  %v6262_v19 = vsel %vm6259_vm10, %v6261_v22, %v6257_v0  ;;  %6741 = vmatpush.bf16.msrb.mxu2 %v9957_v50  ;;  %v9933_v28 = vor.u32 %v10781_v15, %v9932_v57  ;;  %v10802_v50 = vld [vmem:[%s17281_s29 + $0x68] sm:$0xf0]  ;;  %v9908_v22 = vld [vmem:[%s17259_s15 + $0x50] sm:$0xf]  ;;  %vm6310_vm0 = vweird.f32 %v16229_v38  ;;  %v10799_v0 = vld [vmem:[%s17281_s29 + $0x50] sm:$0xf0] }
 0x5e2   : > { %v16456_v45 = vpop.eup %11123  ;;  %v6000_v27 = vsel %vm16437_vm9, %v5999_v34, %v5995_v26  ;;  %v6319_v53 = vmul.f32 %v6262_v19, %v16316_v29  ;;  %v6297_v29 = vsel %vm16462_vm11, %v16080_v13, %v16276_v37  ;;  %v11206_v37 = vld [vmem:[%s11341_s28 + $0x18] sm:$0xff]  ;;  %6732 = vmatpush.bf16.msra.mxu1 %v9893_v25  ;;  %v9921_v34 = vor.u32 %v10778_v30, %v9920_v55  ;;  %vm16548_vm3 = vmor %vm6309_vm14, %vm6310_vm0  ;;  %v10772_v25 = vld [vmem:[%s17259_s15 + $0x40] sm:$0xf0] }
 0x5e3   : > { %v6009_v11 = vsub.f32 1.0, %v6000_v27  ;;  %v6265_v54 = vmul.f32 %v16456_v45, %v16379_v16  ;;  %v11126_v35 = vpop.eup %11125  ;;  %v6013_v2 = vmul.f32 %v11206_v37, %v6000_v27  ;;  %7036 = vmatpush.bf16.msrb.mxu3 %v10040_v36  ;;  %v6302_v12 = vsel %vm6299_vm12, %v6301_v3, %v6297_v29  ;;  %v9991_v39 = vld [vmem:[%s17281_s29 + $0x30] sm:$0xf]  ;;  %v9884_v33 = vld [vmem:[%s17259_s15 + $0x20] sm:$0xf] }
 0x5e4   : > { %v6321_v59 = vadd.f32 %v6319_v53, %v6025_v14  ;;  %vm6270_vm13 = vweird.f32 %v16456_v45  ;;  %v10016_v56 = vor.u32 %v10802_v50, %v10015_v18  ;;  %v6325_v43 = vsub.f32 1.0, %v6302_v12  ;;  %v10790_v55 = vld [vmem:[%s17281_s29 + $0x8] sm:$0xf0]  ;;  %v10059_v30 = vld [vmem:[%s17281_s29 + $0xb0] sm:$0xf] }
 0x5e5   : > { %v6011_v13 = vmul.f32 %v11126_v35, %v6009_v11  ;;  %v6266_v9 = vsub.f32 1.0, %v6265_v54  ;;  %6742 = vmatpush.bf16.msrb.mxu2 %v9945_v20  ;;  %vm6271_vm1 = vmor %vm6269_vm15, %vm6270_vm13  ;;  %v6276_v16 = vor.u32 1.1754944e-38, %v6275_v10  ;;  %v9869_v41 = vor.u32 %v10764_v24, %v9866_v48  ;;  %v10793_v10 = vld [vmem:[%s17281_s29 + $0x20] sm:$0xf0]  ;;  %v10812_v18 = vld [vmem:[%s17281_s29 + $0xb8] sm:$0xf0] }
 0x5e6   : > { %11127 = vtanh.f32 %v6321_v59  ;;  %6733 = vmatpush.bf16.msra.mxu1 %v9881_v61  ;;  %v6237_v20 = vadd.f32 %v6236_v17, %v6065_v21  ;;  %vm6274_vm2 = vcmp.eq.f32.partialorder %v6273_v31, 8.507059e+37  ;;  %v6308_v14 = vadd.f32 %v16229_v38, %v6307_v7  ;;  %v6028_v21 = vld [vmem:[%s16022_s24 + $0x28] sm:$0xff]  ;;  %v10809_v17 = vld [vmem:[%s17281_s29 + $0xa0] sm:$0xf0]  ;;  %v10859_v5 = vld [vmem:[%s17251_s7 + $0xb0] sm:$0xf0] }
 0x5e7   : > { %v16507_v60 = vadd.f32 %v6013_v2, %v6011_v13  ;;  %v6267_v51 = vmul.f32 %v16456_v45, %v6266_v9  ;;  %7037 = vmatpush.bf16.msrb.mxu3 %v10028_v49  ;;  %v6315_v36 = vand.u32 2147483648, %v16117_v6  ;;  %v6329_v15 = vmul.f32 %v6302_v12, %v15086_v23  ;;  %v9896_v23 = vld [vmem:[%s17259_s15 + $0x38] sm:$0xf]  ;;  %v10769_v59 = vld [vmem:[%s17259_s15 + $0x28] sm:$0xf0] }
 0x5e8   : > { %v9909_v47 = vor.u32 %v10775_v1, %v9908_v22  ;;  %v10004_v53 = vor.u32 %v10799_v0, %v10003_v44  ;;  %v6312_v62 = vsel %vm16548_vm3, %v16229_v38, %v6308_v14  ;;  %v9897_v54 = vor.u32 %v10772_v25, %v9896_v23  ;;  %v9979_v38 = vld [vmem:[%s17281_s29 + $0x18] sm:$0xf]  ;;  %v9872_v2 = vld [vmem:[%s17259_s15 + $0x8] sm:$0xf]  ;;  %v10766_v9 = vld [vmem:[%s17259_s15 + $0x10] sm:$0xf0] }
 0x5e9   : > { %6853 = vst [vmem:[%s11341_s28 + $0x8] sm:$0xff] %v16507_v60  ;;  %v6268_v8 = vadd.f32 %v16456_v45, %v6267_v51  ;;  %6743 = vmatpush.bf16.msrb.mxu2 %v9933_v28  ;;  %v6316_v29 = vor.u32 1.1754944e-38, %v6315_v36  ;;  %v9885_v13 = vor.u32 %v10769_v59, %v9884_v33  ;;  %v9980_v37 = vor.u32 %v10793_v10, %v9979_v38  ;;  %v9967_v49 = vld [vmem:[%s17281_s29] sm:$0xf]  ;;  %v10023_v1 = vld [vmem:[%s17281_s29 + $0x68] sm:$0xf] }
 0x5ea   : > { %6734 = vmatpush.bf16.msra.mxu1 %v9869_v41  ;;  %v9873_v50 = vor.u32 %v10766_v9, %v9872_v2  ;;  %v9968_v51 = vor.u32 %v10790_v55, %v9967_v49  ;;  %v10060_v24 = vor.u32 %v10812_v18, %v10059_v30  ;;  %v10011_v41 = vld [vmem:[%s17281_s29 + $0x50] sm:$0xf]  ;;  %v10800_v44 = vld [vmem:[%s17281_s29 + $0x58] sm:$0xf0]  ;;  %v10794_v36 = vld [vmem:[%s17281_s29 + $0x28] sm:$0xf0]  ;;  %v6722_v2 = vpop.f32.mrf.mxu0 }
 0x5eb   : > { %v6272_v26 = vsel %vm6271_vm1, %v16456_v45, %v6268_v8  ;;  %v6313_v45 = vand.u32 2147483647, %v16117_v6  ;;  %7038 = vmatpush.bf16.msrb.mxu3 %v10016_v56  ;;  %v10796_v6 = vld [vmem:[%s17281_s29 + $0x38] sm:$0xf0]  ;;  %v10806_v56 = vld [vmem:[%s17281_s29 + $0x88] sm:$0xf0]  ;;  %v10012_v0 = vor.u32 %v10800_v44, %v10011_v41 }
 0x5ec   : > { %v11128_v19 = vpop.eup %11127  ;;  %v6277_v57 = vsel %vm6274_vm2, %v6276_v16, %v6272_v26  ;;  %v9992_v32 = vor.u32 %v10796_v6, %v9991_v39  ;;  %v10797_v26 = vld [vmem:[%s17281_s29 + $0x40] sm:$0xf0]  ;;  %v10223_v23 = vld [vmem:[%s17251_s7 + $0x78] sm:$0xf]  ;;  %v10211_v6 = vld [vmem:[%s17251_s7 + $0x60] sm:$0xf] }
 0x5ed   : > { %v6327_v42 = vmul.f32 %v11128_v19, %v6325_v43  ;;  %v6320_v27 = vmul.f32 %v6277_v57, %v6237_v20  ;;  %6744 = vmatpush.bf16.msrb.mxu2 %v9921_v34  ;;  %vm6314_vm4 = vcmp.eq.f32.partialorder %v6313_v45, 8.507059e+37  ;;  %v10035_v34 = vld [vmem:[%s17281_s29 + $0x80] sm:$0xf]  ;;  %v10803_v43 = vld [vmem:[%s17281_s29 + $0x70] sm:$0xf0] }
 0x5ee   : > { %v6317_v35 = vsel %vm6314_vm4, %v6316_v29, %v6312_v62  ;;  %v10036_v22 = vor.u32 %v10806_v56, %v10035_v34  ;;  %v10024_v16 = vor.u32 %v10803_v43, %v10023_v1  ;;  %v9999_v20 = vld [vmem:[%s17281_s29 + $0x38] sm:$0xf]  ;;  %v9987_v19 = vld [vmem:[%s17281_s29 + $0x20] sm:$0xf]  ;;  %v10235_v45 = vld [vmem:[%s17251_s7 + $0x90] sm:$0xf] }
 0x5ef   : > { %v6322_v3 = vadd.f32 %v6320_v27, %v6028_v21  ;;  %v6331_v11 = vadd.f32 %v6329_v15, %v6327_v42  ;;  %7039 = vmatpush.bf16.msrb.mxu3 %v10004_v53  ;;  %v6326_v28 = vsub.f32 1.0, %v6317_v35  ;;  %v6330_v61 = vmul.f32 %v6317_v35, %v15088_v46  ;;  %v10047_v46 = vld [vmem:[%s17281_s29 + $0x98] sm:$0xf]  ;;  %v9975_v15 = vld [vmem:[%s17281_s29 + $0x8] sm:$0xf] }
 0x5f0   : > { %v10048_v8 = vor.u32 %v10809_v17, %v10047_v46  ;;  %v10000_v14 = vor.u32 %v10797_v26, %v9999_v20  ;;  %v9988_v57 = vor.u32 %v10794_v36, %v9987_v19  ;;  %v10856_v27 = vld [vmem:[%s17251_s7 + $0x98] sm:$0xf0]  ;;  %v10853_v25 = vld [vmem:[%s17251_s7 + $0x80] sm:$0xf0]  ;;  %v10850_v62 = vld [vmem:[%s17251_s7 + $0x68] sm:$0xf0] }
 0x5f1   : > { %11129 = vtanh.f32 %v6322_v3  ;;  %7687 = vst [vmem:[#allocation4 + $0x30] sm:$0xff] %v6331_v11  ;;  %6745 = vmatpush.bf16.msrb.mxu2 %v9909_v47  ;;  %v10247_v47 = vld [vmem:[%s17251_s7 + $0xa8] sm:$0xf]  ;;  %v10236_v53 = vor.u32 %v10856_v27, %v10235_v45  ;;  %v10224_v39 = vor.u32 %v10853_v25, %v10223_v23  ;;  %v10212_v3 = vor.u32 %v10850_v62, %v10211_v6  ;;  %v10175_v35 = vld [vmem:[%s17251_s7 + $0x18] sm:$0xf] }
 0x5f2   : > { %v10248_v21 = vor.u32 %v10859_v5, %v10247_v47  ;;  %v10841_v59 = vld [vmem:[%s17251_s7 + $0x20] sm:$0xf0]  ;;  %v10163_v10 = vld [vmem:[%s17251_s7] sm:$0xf]  ;;  %v6724_v9 = vpop.f32.mrf.mxu0  ;;  %v10835_v47 = vld [vmem:[%s17250_s6 + $0xb0] sm:$0xf0] }
 0x5f3   : > { %7040 = vmatpush.bf16.msrb.mxu3 %v9992_v32  ;;  %v10844_v32 = vld [vmem:[%s17251_s7 + $0x38] sm:$0xf0]  ;;  %v10176_v38 = vor.u32 %v10841_v59, %v10175_v35  ;;  %v16704_v49 = vld [vmem:[%s17249_s5] sm:$0x7]  ;;  %v10834_v45 = vld [vmem:[%s17250_s6 + $0xac] sm:$0xf] }
 0x5f4   : > { %v6902_v55 = vperm.slane %v16704_v49, 1  ;;  %v16713_v18 = vld [vmem:[%s17261_s17] sm:$0x7]  ;;  %v10153_v27 = vld [vmem:[%s17250_s6 + $0xb4] sm:$0xf0] }
 0x5f5   : > { %6746 = vmatpush.bf16.msrb.mxu2 %v9897_v54  ;;  %v10187_v54 = vld [vmem:[%s17251_s7 + $0x30] sm:$0xf]  ;;  %v6580_v36 = vperm.slane %v16713_v18, 1  ;;  %v10141_v35 = vld [vmem:[%s17250_s6 + $0x9c] sm:$0xf0] }
 0x5f6   : > { %v10188_v33 = vor.u32 %v10844_v32, %v10187_v54 }
 0x5f7   : > { %v11130_v7 = vpop.eup %11129  ;;  %7041 = vmatpush.bf16.msrb.mxu3 %v9980_v37  ;;  %v16696_v37 = vpack.c.bf16 %v16507_v60, %v16412_v58  ;;  %v6862_v58 = vld [vmem:[%s16707_s3 + $0x8] sm:$0xff] }
 0x5f8   : > { %v6328_v12 = vmul.f32 %v11130_v7, %v6326_v28  ;;  %v10838_v28 = vld [vmem:[%s17251_s7 + $0x8] sm:$0xf0] }
 0x5f9   : > { %6747 = vmatpush.bf16.msrb.mxu2 %v9885_v13  ;;  %v10164_v13 = vor.u32 %v10838_v28, %v10163_v10  ;;  %v6901_v28 = vperm.slane %v16704_v49, 0 }
 0x5fa   : > { %v6332_v31 = vadd.f32 %v6330_v61, %v6328_v12 }
 0x5fb   : > { %7042 = vmatpush.bf16.msrb.mxu3 %v9968_v51 }
 0x5fc   : > { %v6333_v48 = vpack.c.bf16 %v6332_v31, %v6331_v11  ;;  %7688 = vst [vmem:[#allocation4] sm:$0xff] %v6332_v31  ;;  %v10199_v11 = vld [vmem:[%s17251_s7 + $0x48] sm:$0xf]  ;;  %v6579_v31 = vperm.slane %v16713_v18, 0 }
 0x5fd   : > { %6748 = vmatpush.bf16.msrb.mxu2 %v9873_v50  ;;  %v16718_v50 = vld [vmem:[%s17260_s16] sm:$0x7] }
 0x5fe   : > { %6510 = vmatmul.bf16.vlgmr.msrb.gmra.mxu1 %v6333_v48  ;;  %6524 = vmatmul.bf16.vlgmr.msra.gmra.mxu2 %v6333_v48  ;;  %v6725_v20 = vadd.f32 %v6724_v9, %v6579_v31  ;;  %v6369_v19 = vperm.slane %v16718_v50, 1  ;;  %v10127_v9 = vld [vmem:[%s17250_s6 + $0x78] sm:$0xf] }
 0x5ff   : > { %6538 = vmatmul.bf16.vlgmr.msra.gmra.mxu3 %v6333_v48  ;;  %7063 = vmatpush.bf16.msrb.mxu1 %v10060_v24  ;;  %v6368_v24 = vperm.slane %v16718_v50, 0  ;;  %v6865_v48 = vld [vmem:[%s16707_s3 + $0x20] sm:$0xff] }
 0x603   : > { %7064 = vmatpush.bf16.msrb.mxu1 %v10048_v8  ;;  %v6723_v8 = vadd.f32 %v6722_v2, %v6579_v31 }
 0x607   : > { %7065 = vmatpush.bf16.msrb.mxu1 %v10036_v22 }
 0x60a   : > { %v7058_v7 = vpop.f32.mrf.mxu0 }
 0x60b   : > { %7066 = vmatpush.bf16.msrb.mxu1 %v10024_v16  ;;  %v7059_v12 = vadd.f32 %v7058_v7, %v6902_v55 }
 0x60d   : > { %v7117_v60 = vadd.f32 %v7059_v12, %v6862_v58 }
 0x60e   : > { %6735 = vmatmul.bf16.vlgmr.msra.gmra.mxu1 %v15974_v52  ;;  %6749 = vmatmul.bf16.vlgmr.msrb.gmra.mxu2 %v15974_v52  ;;  %v10791_v52 = vld [vmem:[%s17281_s29 + $0x10] sm:$0xf0] }
 0x60f   : > { %7043 = vmatmul.bf16.vlgmr.msrb.gmra.mxu3 %v15861_v63  ;;  %7067 = vmatpush.bf16.msrb.mxu1 %v10012_v0  ;;  %v9976_v42 = vor.u32 %v10791_v52, %v9975_v15  ;;  %v10063_v61 = vmul.f32 -1.442695, %v7117_v60  ;;  %v10151_v52 = vld [vmem:[%s17250_s6 + $0xa8] sm:$0xf] }
 0x611   : > { %11131 = vpow2.f32 %v10063_v61  ;;  %v10828_v61 = vld [vmem:[%s17250_s6 + $0x7c] sm:$0xf] }
 0x612   : > { %v7060_v30 = vpop.f32.mrf.mxu0 }
 0x613   : > { %7068 = vmatpush.bf16.msrb.mxu1 %v10000_v14  ;;  %v7061_v51 = vadd.f32 %v7060_v30, %v6902_v55  ;;  %v10829_v55 = vld [vmem:[%s17250_s6 + $0x80] sm:$0xf0]  ;;  %v10129_v30 = vld [vmem:[%s17250_s6 + $0x84] sm:$0xf0] }
 0x614   : > { %v10128_v60 = vor.u32 %v10829_v55, %v10127_v9  ;;  %v10822_v55 = vld [vmem:[%s17250_s6 + $0x4c] sm:$0xf] }
 0x615   : > { %v7118_v46 = vadd.f32 %v7061_v51, %v6865_v48 }
 0x617   : > { %7069 = vmatpush.bf16.msrb.mxu1 %v9988_v57  ;;  %v11132_v56 = vpop.eup %11131  ;;  %v10064_v1 = vmul.f32 -1.442695, %v7118_v46  ;;  %v6370_v46 = vperm.slane %v16718_v50, 2  ;;  %v10814_v50 = vld [vmem:[%s17250_s6 + $0x8] sm:$0xf0] }
 0x618   : > { %v16723_v43 = vadd.f32 1.0, %v11132_v56 }
 0x61a   : > { %v7138_v10 = vand.u32 2147483648, %v16723_v43  ;;  %vm7132_vm1 = vweird.f32 %v16723_v43 }
 0x61b   : > { %7070 = vmatpush.bf16.msrb.mxu1 %v9976_v42 }
 0x61c   : > { %v16787_v48 = vor.u32 1.1754944e-38, %v7138_v10 }
 0x61e   : > { %7071 = vmatmul.bf16.vlgmr.msrb.gmra.mxu1 %v15861_v63  ;;  %v10847_v63 = vld [vmem:[%s17251_s7 + $0x50] sm:$0xf0] }
 0x61f   : > { %7551 = vmatpush.bf16.msra.mxu1 %v10248_v21  ;;  %v10200_v29 = vor.u32 %v10847_v63, %v10199_v11  ;;  %v10152_v21 = vor.u32 %v10835_v47, %v10151_v52  ;;  %v10139_v11 = vld [vmem:[%s17250_s6 + $0x90] sm:$0xf]  ;;  %v10832_v63 = vld [vmem:[%s17250_s6 + $0x98] sm:$0xf0] }
 0x620   : > { %v10140_v32 = vor.u32 %v10832_v63, %v10139_v11 }
 0x621   : > { %7340 = vmatpush.bf16.msra.mxu2 %v10152_v21  ;;  %v10159_v21 = vld [vmem:[%s17250_s6 + $0xb0] sm:$0xf] }
 0x623   : > { %7552 = vmatpush.bf16.msra.mxu1 %v10236_v53 }
 0x625   : > { %7341 = vmatpush.bf16.msra.mxu2 %v10140_v32  ;;  %v10103_v32 = vld [vmem:[%s17250_s6 + $0x48] sm:$0xf] }
 0x627   : > { %7553 = vmatpush.bf16.msra.mxu1 %v10224_v39  ;;  %v10156_v39 = vor.u32 %v10834_v45, %v10153_v27  ;;  %v10836_v45 = vld [vmem:[%s17250_s6 + $0xb8] sm:$0xf0] }
 0x629   : > { %7354 = vmatpush.bf16.msra.mxu3 %v10156_v39  ;;  %7342 = vmatpush.bf16.msra.mxu2 %v10128_v60  ;;  %v6903_v60 = vperm.slane %v16704_v49, 2  ;;  %v10177_v49 = vld [vmem:[%s17251_s7 + $0x24] sm:$0xf0] }
 0x62b   : > { %7554 = vmatpush.bf16.msra.mxu1 %v10212_v3 }
 0x62f   : > { %7555 = vmatpush.bf16.msra.mxu1 %v10200_v29 }
 0x633   : > { %7556 = vmatpush.bf16.msra.mxu1 %v10188_v33  ;;  %v10831_v33 = vld [vmem:[%s17250_s6 + $0x94] sm:$0xf] }
 0x637   : > { %7557 = vmatpush.bf16.msra.mxu1 %v10176_v38  ;;  %v10144_v38 = vor.u32 %v10831_v33, %v10141_v35  ;;  %v10823_v33 = vld [vmem:[%s17250_s6 + $0x50] sm:$0xf0] }
 0x639   : > { %7355 = vmatpush.bf16.msra.mxu3 %v10144_v38  ;;  %v10104_v38 = vor.u32 %v10823_v33, %v10103_v32  ;;  %v10817_v32 = vld [vmem:[%s17250_s6 + $0x20] sm:$0xf0] }
 0x63b   : > { %7558 = vmatpush.bf16.msra.mxu1 %v10164_v13 }
 0x63e   : > { %7559 = vmatmul.bf16.vlgmr.msra.gmra.mxu1 %v16696_v37 }
 0x67b   : > { %v6511_v17 = vpop.f32.mrf.mxu1 }
 0x67c   : > { %v6512_v34 = vadd.f32 %v6511_v17, %v6368_v24 }
 0x67e   : > { %v6755_v22 = vadd.f32 %v6723_v8, %v6512_v34 }
 0x680   : > { %v9958_v16 = vmul.f32 -1.442695, %v6755_v22 }
 0x681   : > { %v6525_v41 = vpop.f32.mrf.mxu2 }
 0x682   : > { %11133 = vpow2.f32 %v9958_v16  ;;  %v16725_v44 = vpop.f32.mrf.mxu3  ;;  %v6526_v62 = vadd.f32 %v6525_v41, %v6369_v19  ;;  %v10132_v41 = vor.u32 %v10828_v61, %v10129_v30  ;;  %v10147_v61 = vld [vmem:[%s17250_s6 + $0x98] sm:$0xf]  ;;  %v10833_v30 = vld [vmem:[%s17250_s6 + $0xa0] sm:$0xf0] }
 0x683   : > { %11135 = vpow2.f32 %v10064_v1  ;;  %v6513_v0 = vpop.f32.mrf.mxu1  ;;  %v6861_v1 = vld [vmem:[%s16707_s3] sm:$0xff]  ;;  %v16825_v11 = vadd.f32 %v16725_v44, %v6370_v46 }
 0x684   : > { %11137 = vrcp.f32 %v16723_v43  ;;  %v6514_v26 = vadd.f32 %v6513_v0, %v6368_v24  ;;  %v7136_v24 = vand.u32 2147483647, %v16723_v43  ;;  %v10115_v0 = vld [vmem:[%s17250_s6 + $0x60] sm:$0xf]  ;;  %7356 = vmatpush.bf16.msra.mxu3 %v10132_v41  ;;  %v10820_v41 = vld [vmem:[%s17250_s6 + $0x38] sm:$0xf0] }
 0x686   : > { %v6756_v14 = vadd.f32 %v6725_v20, %v6514_v26  ;;  %v10826_v20 = vld [vmem:[%s17250_s6 + $0x68] sm:$0xf0] }
 0x688   : > { %v11134_v57 = vpop.eup %11133  ;;  %v9959_v15 = vmul.f32 -1.442695, %v6756_v14 }
 0x689   : > { %v11136_v5 = vpop.eup %11135  ;;  %v16736_v42 = vadd.f32 1.0, %v11134_v57  ;;  %v6527_v23 = vpop.f32.mrf.mxu2 }
 0x68a   : > { %v16744_v53 = vpop.eup %11137  ;;  %11139 = vpow2.f32 %v9959_v15  ;;  %v16746_v25 = vpop.f32.mrf.mxu3  ;;  %v16757_v54 = vadd.f32 1.0, %v11136_v5  ;;  %v6528_v34 = vadd.f32 %v6527_v23, %v6369_v19  ;;  %v10116_v19 = vor.u32 %v10826_v20, %v10115_v0  ;;  %v10117_v15 = vld [vmem:[%s17250_s6 + $0x6c] sm:$0xf0]  ;;  %v10819_v0 = vld [vmem:[%s17250_s6 + $0x34] sm:$0xf] }
 0x68b   : > { %11141 = vrcp.f32 %v16736_v42  ;;  %v6736_v6 = vpop.f32.mrf.mxu1  ;;  %v7128_v29 = vmul.f32 %v16744_v53, %v16723_v43  ;;  %v6776_v14 = vand.u32 2147483648, %v16736_v42  ;;  %v6581_v23 = vperm.slane %v16713_v18, 2 }
 0x68c   : > { %v6737_v3 = vadd.f32 %v6736_v6, %v6580_v36  ;;  %11143 = vrcp.f32 %v16757_v54  ;;  %v6774_v39 = vand.u32 2147483647, %v16736_v42  ;;  %7343 = vmatpush.bf16.msra.mxu2 %v10116_v19  ;;  %vm6770_vm5 = vweird.f32 %v16736_v42 }
 0x68d   : > { %v7129_v12 = vsub.f32 1.0, %v7128_v29  ;;  %v10148_v19 = vor.u32 %v10833_v30, %v10147_v61  ;;  %v6542_v30 = vadd.f32 %v16746_v25, %v6370_v46  ;;  %vm7133_vm0 = vweird.f32 %v16744_v53 }
 0x68e   : > { %v6795_v59 = vadd.f32 %v6737_v3, %v6526_v62  ;;  %v10160_v62 = vor.u32 %v10836_v45, %v10159_v21  ;;  %vm6775_vm8 = vcmp.eq.f32.partialorder %v6774_v39, 8.507059e+37  ;;  %v10830_v45 = vld [vmem:[%s17250_s6 + $0x88] sm:$0xf0] }
 0x68f   : > { %v16801_v26 = vmul.f32 %v16744_v53, %v7129_v12  ;;  %v10105_v12 = vld [vmem:[%s17250_s6 + $0x54] sm:$0xf0] }
 0x690   : > { %v11140_v13 = vpop.eup %11139  ;;  %v9960_v2 = vmul.f32 -1.442695, %v6795_v59  ;;  %7368 = vmatpush.bf16.msra.mxu0 %v10160_v62  ;;  %7344 = vmatpush.bf16.msra.mxu2 %v10104_v38 }
 0x691   : > { %v16773_v7 = vpop.eup %11141  ;;  %v16776_v58 = vadd.f32 1.0, %v11140_v13  ;;  %v6750_v56 = vpop.f32.mrf.mxu2  ;;  %v6777_v13 = vor.u32 1.1754944e-38, %v6776_v14 }
 0x692   : > { %11145 = vpow2.f32 %v9960_v2  ;;  %v6766_v51 = vmul.f32 %v16773_v7, %v16736_v42  ;;  %v7044_v31 = vpop.f32.mrf.mxu3  ;;  %vm6771_vm6 = vweird.f32 %v16773_v7  ;;  %v16818_v27 = vpop.eup %11143 }
 0x693   : > { %11147 = vrcp.f32 %v16776_v58  ;;  %v7045_v17 = vadd.f32 %v7044_v31, %v6901_v28  ;;  %v6738_v8 = vpop.f32.mrf.mxu1  ;;  %vm16841_vm7 = vmor %vm6770_vm5, %vm6771_vm6  ;;  %v6789_v42 = vand.u32 2147483647, %v16776_v58  ;;  %vm6785_vm9 = vweird.f32 %v16776_v58 }
 0x694   : > { %v6767_v22 = vsub.f32 1.0, %v6766_v51  ;;  %v6739_v16 = vadd.f32 %v6738_v8, %v6580_v36  ;;  %v10825_v36 = vld [vmem:[%s17250_s6 + $0x64] sm:$0xf]  ;;  %v6864_v8 = vld [vmem:[%s16707_s3 + $0x18] sm:$0xff]  ;;  %7369 = vmatpush.bf16.msra.mxu0 %v10148_v19  ;;  %v16943_v61 = vmul.f32 %v16818_v27, %v16757_v54 }
 0x695   : > { %v7077_v57 = vadd.f32 %v7045_v17, %v6861_v1  ;;  %v10120_v5 = vor.u32 %v10825_v36, %v10117_v15  ;;  %v6791_v17 = vand.u32 2147483648, %v16776_v58  ;;  %vm16874_vm10 = vcmp.eq.f32.partialorder %v6789_v42, 8.507059e+37  ;;  %v10135_v36 = vld [vmem:[%s17250_s6 + $0x80] sm:$0xf] }
 0x696   : > { %v6768_v52 = vmul.f32 %v16773_v7, %v6767_v22  ;;  %v6796_v47 = vadd.f32 %v6739_v16, %v6528_v34  ;;  %v10091_v34 = vld [vmem:[%s17250_s6 + $0x30] sm:$0xf]  ;;  %v10108_v16 = vor.u32 %v10822_v55, %v10105_v12  ;;  %v10816_v55 = vld [vmem:[%s17250_s6 + $0x1c] sm:$0xf] }
 0x697   : > { %v10061_v6 = vmul.f32 -1.442695, %v7077_v57  ;;  %7357 = vmatpush.bf16.msra.mxu3 %v10120_v5  ;;  %v10092_v5 = vor.u32 %v10820_v41, %v10091_v34  ;;  %v10067_v34 = vld [vmem:[%s17250_s6] sm:$0xf]  ;;  %v10111_v41 = vld [vmem:[%s17250_s6 + $0x50] sm:$0xf] }
 0x698   : > { %v11146_v3 = vpop.eup %11145  ;;  %v6769_v63 = vadd.f32 %v16773_v7, %v6768_v52  ;;  %v9961_v29 = vmul.f32 -1.442695, %v6796_v47  ;;  %v10068_v19 = vor.u32 %v10814_v50, %v10067_v34 }
 0x699   : > { %v16835_v35 = vpop.eup %11147  ;;  %v16837_v59 = vadd.f32 1.0, %v11146_v3  ;;  %11149 = vpow2.f32 %v10061_v6  ;;  %v6752_v14 = vpop.f32.mrf.mxu2  ;;  %v6792_v3 = vor.u32 1.1754944e-38, %v6791_v17  ;;  %7345 = vmatpush.bf16.msra.mxu2 %v10092_v5  ;;  %v16950_v17 = vadd.f32 %v16744_v53, %v16801_v26  ;;  %v10813_v26 = vld [vmem:[%s17250_s6 + $0x4] sm:$0xf] }
 0x69a   : > { %v6773_v10 = vsel %vm16841_vm7, %v16773_v7, %v6769_v63  ;;  %11151 = vpow2.f32 %v9961_v29  ;;  %v6781_v2 = vmul.f32 %v16835_v35, %v16776_v58  ;;  %v7046_v9 = vpop.f32.mrf.mxu3  ;;  %v6751_v7 = vadd.f32 %v6750_v56, %v6581_v23  ;;  %v10079_v29 = vld [vmem:[%s17250_s6 + $0x18] sm:$0xf] }
 0x69b   : > { %11153 = vrcp.f32 %v16837_v59  ;;  %v6778_v51 = vsel %vm6775_vm8, %v6777_v13, %v6773_v10  ;;  %v6816_v56 = vand.u32 2147483648, %v16837_v59  ;;  %v7047_v1 = vadd.f32 %v7046_v9, %v6901_v28  ;;  %v10093_v28 = vld [vmem:[%s17250_s6 + $0x3c] sm:$0xf0]  ;;  %7358 = vmatpush.bf16.msra.mxu3 %v10108_v16 }
 0x69c   : > { %v6782_v31 = vsub.f32 1.0, %v6781_v2  ;;  %v6814_v20 = vand.u32 2147483647, %v16837_v59  ;;  %vm6786_vm11 = vweird.f32 %v16835_v35  ;;  %v6835_v52 = vmul.f32 %v6778_v51, %v6751_v7  ;;  %v10857_v7 = vld [vmem:[%s17251_s7 + $0xa0] sm:$0xf0] }
 0x69d   : > { %v7078_v47 = vadd.f32 %v7047_v1, %v6864_v8  ;;  %v10096_v21 = vor.u32 %v10819_v0, %v10093_v28  ;;  %v10136_v63 = vor.u32 %v10830_v45, %v10135_v36  ;;  %v6753_v42 = vadd.f32 %v6752_v14, %v6581_v23  ;;  %vm6787_vm12 = vmor %vm6785_vm9, %vm6786_vm11  ;;  %v10827_v8 = vld [vmem:[%s17250_s6 + $0x70] sm:$0xf0]  ;;  %v10824_v28 = vld [vmem:[%s17250_s6 + $0x58] sm:$0xf0] }
 0x69e   : > { %v6783_v57 = vmul.f32 %v16835_v35, %v6782_v31  ;;  %v10080_v10 = vor.u32 %v10817_v32, %v10079_v29  ;;  %v16919_v2 = vor.u32 1.1754944e-38, %v6816_v56  ;;  %v6837_v18 = vadd.f32 %v6835_v52, %v16825_v11  ;;  %v10081_v11 = vld [vmem:[%s17250_s6 + $0x24] sm:$0xf0]  ;;  %v7072_v31 = vpop.f32.mrf.mxu1  ;;  %v10069_v56 = vld [vmem:[%s17250_s6 + $0xc] sm:$0xf0]  ;;  %vm17099_vm11 = vmor %vm7132_vm1, %vm7133_vm0 }
 0x69f   : > { %v11150_v15 = vpop.eup %11149  ;;  %v10062_v38 = vmul.f32 -1.442695, %v7078_v47  ;;  %7359 = vmatpush.bf16.msra.mxu3 %v10096_v21  ;;  %vm16931_vm13 = vcmp.eq.f32.partialorder %v6814_v20, 8.507059e+37  ;;  %7370 = vmatpush.bf16.msra.mxu0 %v10136_v63  ;;  %vm6810_vm14 = vweird.f32 %v16837_v59  ;;  %v10084_v16 = vor.u32 %v10816_v55, %v10081_v11  ;;  %v10858_v36 = vld [vmem:[%s17251_s7 + $0xac] sm:$0xf] }
 0x6a0   : > { %v11152_v39 = vpop.eup %11151  ;;  %v16898_v6 = vadd.f32 1.0, %v11150_v15  ;;  %v6784_v62 = vadd.f32 %v16835_v35, %v6783_v57  ;;  %7346 = vmatpush.bf16.msra.mxu2 %v10080_v10  ;;  %v16983_v14 = vadd.f32 %v7072_v31, %v6903_v60  ;;  %v10249_v15 = vld [vmem:[%s17251_s7 + $0xb4] sm:$0xf0]  ;;  %v10072_v45 = vor.u32 %v10813_v26, %v10069_v56  ;;  %v10821_v10 = vld [vmem:[%s17250_s6 + $0x40] sm:$0xf0] }
 0x6a1   : > { %v16907_v33 = vpop.eup %11153  ;;  %v16909_v44 = vadd.f32 1.0, %v11152_v39  ;;  %v10112_v39 = vor.u32 %v10824_v28, %v10111_v41  ;;  %v10087_v26 = vld [vmem:[%s17250_s6 + $0x20] sm:$0xf]  ;;  %v10818_v56 = vld [vmem:[%s17250_s6 + $0x28] sm:$0xf0]  ;;  %vm7148_vm1 = vweird.f32 %v16818_v27 }
 0x6a2   : > { %v6806_v13 = vmul.f32 %v16907_v33, %v16837_v59  ;;  %11155 = vrcp.f32 %v16898_v6  ;;  %v6788_v9 = vsel %vm6787_vm12, %v16835_v35, %v6784_v62  ;;  %v10123_v35 = vld [vmem:[%s17250_s6 + $0x68] sm:$0xf]  ;;  %vm6811_vm15 = vweird.f32 %v16907_v33  ;;  %v10255_v62 = vld [vmem:[%s17251_s7 + $0xb0] sm:$0xf] }
 0x6a3   : > { %11157 = vrcp.f32 %v16909_v44  ;;  %v6831_v23 = vand.u32 2147483648, %v16909_v44  ;;  %v6793_v58 = vsel %vm16874_vm10, %v6792_v3, %v6788_v9  ;;  %v6829_v46 = vand.u32 2147483647, %v16909_v44  ;;  %vm17001_vm2 = vmor %vm6810_vm14, %vm6811_vm15  ;;  %7360 = vmatpush.bf16.msra.mxu3 %v10084_v16  ;;  %v10860_v3 = vld [vmem:[%s17251_s7 + $0xb8] sm:$0xf0] }
 0x6a4   : > { %v6807_v12 = vsub.f32 1.0, %v6806_v13  ;;  %11159 = vpow2.f32 %v10062_v38  ;;  %v6836_v51 = vmul.f32 %v6793_v58, %v6753_v42  ;;  %v7096_v1 = vand.u32 2147483647, %v16898_v6  ;;  %7347 = vmatpush.bf16.msra.mxu2 %v10068_v19  ;;  %v10099_v38 = vld [vmem:[%s17250_s6 + $0x38] sm:$0xf] }
 0x6a5   : > { %11161 = vtanh.f32 %v6837_v18  ;;  %v16972_v22 = vor.u32 1.1754944e-38, %v6831_v23  ;;  %v10124_v57 = vor.u32 %v10827_v8, %v10123_v35  ;;  %v7098_v32 = vand.u32 2147483648, %v16898_v6  ;;  %v10855_v23 = vld [vmem:[%s17251_s7 + $0x94] sm:$0xf]  ;;  %v10237_v58 = vld [vmem:[%s17251_s7 + $0x9c] sm:$0xf0] }
 0x6a6   : > { %v6808_v25 = vmul.f32 %v16907_v33, %v6807_v12  ;;  %v6838_v5 = vadd.f32 %v6836_v51, %v6542_v30  ;;  %v10252_v42 = vor.u32 %v10858_v36, %v10249_v15  ;;  %v10256_v18 = vor.u32 %v10860_v3, %v10255_v62  ;;  %v11207_v35 = vld [vmem:[%s11336_s25 + $0x20] sm:$0xff]  ;;  %v10852_v8 = vld [vmem:[%s17251_s7 + $0x7c] sm:$0xf]  ;;  %v10225_v16 = vld [vmem:[%s17251_s7 + $0x84] sm:$0xf0] }
 0x6a7   : > { %7371 = vmatpush.bf16.msra.mxu0 %v10124_v57  ;;  %vm6825_vm3 = vweird.f32 %v16909_v44  ;;  %7361 = vmatpush.bf16.msra.mxu3 %v10072_v45  ;;  %v10100_v31 = vor.u32 %v10821_v10, %v10099_v38  ;;  %vm7092_vm5 = vweird.f32 %v16898_v6  ;;  %v10231_v57 = vld [vmem:[%s17251_s7 + $0x80] sm:$0xf]  ;;  %v10854_v19 = vld [vmem:[%s17251_s7 + $0x88] sm:$0xf0]  ;;  %v7099_v15 = vor.u32 1.1754944e-38, %v7098_v32 }
 0x6a8   : > { %v16978_v0 = vpop.eup %11155  ;;  %v6809_v20 = vadd.f32 %v16907_v33, %v6808_v25  ;;  %7565 = vmatpush.bf16.msrb.mxu2 %v10252_v42  ;;  %v10240_v25 = vor.u32 %v10855_v23, %v10237_v58  ;;  %v10228_v47 = vor.u32 %v10852_v8, %v10225_v16  ;;  %vm17082_vm9 = vcmp.eq.f32.partialorder %v6829_v46, 8.507059e+37  ;;  %v10849_v62 = vld [vmem:[%s17251_s7 + $0x64] sm:$0xf]  ;;  %v10213_v3 = vld [vmem:[%s17251_s7 + $0x6c] sm:$0xf0] }
 0x6a9   : > { %v16994_v52 = vpop.eup %11157  ;;  %v7088_v21 = vmul.f32 %v16978_v0, %v16898_v6  ;;  %vm7093_vm4 = vweird.f32 %v16978_v0  ;;  %vm7097_vm10 = vcmp.eq.f32.partialorder %v7096_v1, 8.507059e+37  ;;  %v10232_v1 = vor.u32 %v10854_v19, %v10231_v57  ;;  %v10219_v38 = vld [vmem:[%s17251_s7 + $0x68] sm:$0xf]  ;;  %v10846_v23 = vld [vmem:[%s17251_s7 + $0x4c] sm:$0xf] }
 0x6aa   : > { %v11160_v59 = vpop.eup %11159  ;;  %v6813_v63 = vsel %vm17001_vm2, %v16907_v33, %v6809_v20  ;;  %v6821_v29 = vmul.f32 %v16994_v52, %v16909_v44  ;;  %vm6826_vm6 = vweird.f32 %v16994_v52  ;;  %vm7094_vm7 = vmor %vm7092_vm5, %vm7093_vm4  ;;  %vm17124_vm12 = vcmp.eq.f32.partialorder %v7136_v24, 8.507059e+37  ;;  %v10195_v57 = vld [vmem:[%s17251_s7 + $0x38] sm:$0xf]  ;;  %v10845_v19 = vld [vmem:[%s17251_s7 + $0x40] sm:$0xf0] }
 0x6ab   : > { %v6818_v33 = vsel %vm16931_vm13, %v16919_v2, %v6813_v63  ;;  %v17028_v13 = vadd.f32 1.0, %v11160_v59  ;;  %v7089_v9 = vsub.f32 1.0, %v7088_v21  ;;  %v10243_v2 = vld [vmem:[%s17251_s7 + $0x98] sm:$0xf]  ;;  %v11162_v11 = vpop.eup %11161  ;;  %7372 = vmatpush.bf16.msra.mxu0 %v10112_v39  ;;  %7579 = vmatpush.bf16.msrb.mxu3 %v10256_v18  ;;  %vm17076_vm8 = vmor %vm6825_vm3, %vm6826_vm6  ;;  %v10088_v39 = vor.u32 %v10818_v56, %v10087_v26  ;;  %v10815_v59 = vld [vmem:[%s17250_s6 + $0x10] sm:$0xf0] }
 0x6ac   : > { %v6841_v55 = vsub.f32 1.0, %v6818_v33  ;;  %v6822_v12 = vsub.f32 1.0, %v6821_v29  ;;  %v6845_v30 = vmul.f32 %v11207_v35, %v6818_v33  ;;  %v10244_v20 = vor.u32 %v10857_v7, %v10243_v2  ;;  %7566 = vmatpush.bf16.msrb.mxu2 %v10240_v25  ;;  %v10843_v25 = vld [vmem:[%s17251_s7 + $0x34] sm:$0xf]  ;;  %v10189_v26 = vld [vmem:[%s17251_s7 + $0x3c] sm:$0xf0] }
 0x6ad   : > { %11163 = vrcp.f32 %v17028_v13  ;;  %v7090_v51 = vmul.f32 %v16978_v0, %v7089_v9  ;;  %v7135_v29 = vsel %vm17099_vm11, %v16744_v53, %v16950_v17  ;;  %v7144_v10 = vsub.f32 1.0, %v16943_v61  ;;  %v6863_v17 = vld [vmem:[%s16707_s3 + $0x10] sm:$0xff]  ;;  %v10201_v61 = vld [vmem:[%s17251_s7 + $0x54] sm:$0xf0] }
 0x6ae   : > { %v6843_v34 = vmul.f32 %v11162_v11, %v6841_v55  ;;  %v6823_v50 = vmul.f32 %v16994_v52, %v6822_v12  ;;  %11165 = vtanh.f32 %v6838_v5  ;;  %v10216_v24 = vor.u32 %v10849_v62, %v10213_v3  ;;  %v11208_v55 = vld [vmem:[%s11336_s25 + $0x28] sm:$0xff] }
 0x6af   : > { %v7091_v41 = vadd.f32 %v16978_v0, %v7090_v51  ;;  %7373 = vmatpush.bf16.msra.mxu0 %v10100_v31  ;;  %7580 = vmatpush.bf16.msrb.mxu3 %v10244_v20  ;;  %v7111_v9 = vand.u32 2147483647, %v17028_v13  ;;  %v7140_v11 = vsel %vm17124_vm12, %v16787_v48, %v7135_v29  ;;  %v7113_v35 = vand.u32 2147483648, %v17028_v13  ;;  %v10848_v51 = vld [vmem:[%s17251_s7 + $0x58] sm:$0xf0] }
 0x6b0   : > { %v6847_v28 = vadd.f32 %v6845_v30, %v6843_v34  ;;  %v6824_v36 = vadd.f32 %v16994_v52, %v6823_v50  ;;  %7567 = vmatpush.bf16.msrb.mxu2 %v10228_v47  ;;  %v10207_v30 = vld [vmem:[%s17251_s7 + $0x50] sm:$0xf]  ;;  %v10204_v34 = vor.u32 %v10846_v23, %v10201_v61  ;;  %v7145_v48 = vmul.f32 %v16818_v27, %v7144_v10  ;;  %v7074_v50 = vpop.f32.mrf.mxu1 }
 0x6b1   : > { %v7095_v45 = vsel %vm7094_vm7, %v16978_v0, %v7091_v41  ;;  %v10075_v0 = vld [vmem:[%s17250_s6 + $0x8] sm:$0xf]  ;;  %v7163_v56 = vsub.f32 1.0, %v7140_v11  ;;  %vm7107_vm14 = vweird.f32 %v17028_v13  ;;  %v10208_v41 = vor.u32 %v10848_v51, %v10207_v30  ;;  %v10165_v29 = vld [vmem:[%s17251_s7 + $0xc] sm:$0xf0] }
 0x6b2   : > { %9962 = vst [vmem:[%s11336_s25 + $0x30] sm:$0xff] %v6847_v28  ;;  %v6828_v6 = vsel %vm17076_vm8, %v16994_v52, %v6824_v36  ;;  %v7100_v46 = vsel %vm7097_vm10, %v7099_v15, %v7095_v45  ;;  %v10076_v18 = vor.u32 %v10815_v59, %v10075_v0  ;;  %v7114_v20 = vor.u32 1.1754944e-38, %v7113_v35  ;;  %v10840_v45 = vld [vmem:[%s17251_s7 + $0x1c] sm:$0xf] }
 0x6b3   : > { %v17113_v63 = vpop.eup %11163  ;;  %7689 = vst [vmem:[#allocation4 + $0x18] sm:$0xff] %v6847_v28  ;;  %v6833_v52 = vsel %vm17082_vm9, %v16972_v22, %v6828_v6  ;;  %v7157_v42 = vmul.f32 %v7100_v46, %v16983_v14  ;;  %v10851_v22 = vld [vmem:[%s17251_s7 + $0x70] sm:$0xf0]  ;;  %7374 = vmatpush.bf16.msra.mxu0 %v10088_v39  ;;  %7581 = vmatpush.bf16.msrb.mxu3 %v10232_v1  ;;  %vm7112_vm0 = vcmp.eq.f32.partialorder %v7111_v9, 8.507059e+37  ;;  %v7153_v47 = vand.u32 2147483648, %v16757_v54  ;;  %v6866_v39 = vld [vmem:[%s16707_s3 + $0x28] sm:$0xff] }
 0x6b4   : > { %v6842_v53 = vsub.f32 1.0, %v6833_v52  ;;  %v7103_v43 = vmul.f32 %v17113_v63, %v17028_v13  ;;  %v11166_v33 = vpop.eup %11165  ;;  %v6846_v12 = vmul.f32 %v11208_v55, %v6833_v52  ;;  %v10220_v7 = vor.u32 %v10851_v22, %v10219_v38  ;;  %7568 = vmatpush.bf16.msrb.mxu2 %v10216_v24  ;;  %v10183_v46 = vld [vmem:[%s17251_s7 + $0x20] sm:$0xf]  ;;  %v10842_v1 = vld [vmem:[%s17251_s7 + $0x28] sm:$0xf0] }
 0x6b5   : > { %v7159_v14 = vadd.f32 %v7157_v42, %v6863_v17  ;;  %vm7108_vm13 = vweird.f32 %v17113_v63  ;;  %v7075_v13 = vadd.f32 %v7074_v50, %v6903_v60  ;;  %v10192_v36 = vor.u32 %v10843_v25, %v10189_v26  ;;  %v10837_v52 = vld [vmem:[%s17251_s7 + $0x4] sm:$0xf]  ;;  %v10171_v38 = vld [vmem:[%s17251_s7 + $0x8] sm:$0xf] }
 0x6b6   : > { %v6844_v58 = vmul.f32 %v11166_v33, %v6842_v53  ;;  %v7104_v2 = vsub.f32 1.0, %v7103_v43  ;;  %vm7109_vm15 = vmor %vm7107_vm14, %vm7108_vm13  ;;  %v7146_v21 = vadd.f32 %v16818_v27, %v7145_v48  ;;  %v7167_v3 = vmul.f32 %v7140_v11, %v15855_v40 }
 0x6b7   : > { %11167 = vtanh.f32 %v7159_v14  ;;  %7375 = vmatpush.bf16.msra.mxu0 %v10076_v18  ;;  %7582 = vmatpush.bf16.msrb.mxu3 %v10220_v7  ;;  %v10196_v44 = vor.u32 %v10845_v19, %v10195_v57  ;;  %vm7147_vm2 = vweird.f32 %v16757_v54  ;;  %v7151_v6 = vand.u32 2147483647, %v16757_v54  ;;  %v17226_v18 = vld [vmem:[%s17253_s9] sm:$0x7] }
 0x6b8   : > { %v6848_v31 = vadd.f32 %v6846_v12, %v6844_v58  ;;  %v7105_v8 = vmul.f32 %v17113_v63, %v7104_v2  ;;  %7569 = vmatpush.bf16.msrb.mxu2 %v10204_v34  ;;  %vm17201_vm3 = vmor %vm7147_vm2, %vm7148_vm1  ;;  %v7154_v32 = vor.u32 1.1754944e-38, %v7153_v47  ;;  %v10184_v42 = vor.u32 %v10842_v1, %v10183_v46 }
 0x6b9   : > { %v7150_v54 = vsel %vm17201_vm3, %v16818_v27, %v7146_v21  ;;  %vm7152_vm4 = vcmp.eq.f32.partialorder %v7151_v6, 8.507059e+37  ;;  %v10839_v27 = vld [vmem:[%s17251_s7 + $0x10] sm:$0xf0]  ;;  %v10168_v10 = vor.u32 %v10837_v52, %v10165_v29  ;;  %v7417_v61 = vperm.slane %v17226_v18, 0 }
 0x6ba   : > { %9963 = vst [vmem:[%s11336_s25 + $0x38] sm:$0xff] %v6848_v31  ;;  %v7106_v16 = vadd.f32 %v17113_v63, %v7105_v8  ;;  %v7155_v22 = vsel %vm7152_vm4, %v7154_v32, %v7150_v54  ;;  %v10172_v53 = vor.u32 %v10839_v27, %v10171_v38  ;;  %v7418_v25 = vperm.slane %v17226_v18, 1 }
 0x6bb   : > { %7690 = vst [vmem:[#allocation4 + $0x10] sm:$0xff] %v6848_v31  ;;  %7583 = vmatpush.bf16.msrb.mxu3 %v10208_v41  ;;  %v7164_v17 = vsub.f32 1.0, %v7155_v22  ;;  %v7168_v33 = vmul.f32 %v7155_v22, %v15857_v4  ;;  %v7560_v23 = vpop.f32.mrf.mxu1  ;;  %v17231_v4 = vld [vmem:[%s17252_s8] sm:$0x7] }
 0x6bc   : > { %v7110_v28 = vsel %vm7109_vm15, %v17113_v63, %v7106_v16  ;;  %7570 = vmatpush.bf16.msrb.mxu2 %v10192_v36  ;;  %v10180_v63 = vor.u32 %v10840_v45, %v10177_v49  ;;  %v7206_v58 = vperm.slane %v17231_v4, 0  ;;  %v7561_v12 = vadd.f32 %v7560_v23, %v7417_v61 }
 0x6bd   : > { %v11168_v15 = vpop.eup %11167  ;;  %v7115_v5 = vsel %vm7112_vm0, %v7114_v20, %v7110_v28  ;;  %v7207_v48 = vperm.slane %v17231_v4, 1 }
 0x6be   : > { %v7165_v60 = vmul.f32 %v11168_v15, %v7163_v56  ;;  %v7158_v62 = vmul.f32 %v7115_v5, %v7075_v13 }
 0x6bf   : > { %7584 = vmatpush.bf16.msrb.mxu3 %v10196_v44 }
 0x6c0   : > { %v7160_v40 = vadd.f32 %v7158_v62, %v6866_v39  ;;  %v7169_v59 = vadd.f32 %v7167_v3, %v7165_v60  ;;  %7571 = vmatpush.bf16.msrb.mxu2 %v10180_v63 }
 0x6c2   : > { %11169 = vtanh.f32 %v7160_v40  ;;  %7691 = vst [vmem:[#allocation4 + $0x8] sm:$0xff] %v7169_v59  ;;  %v7419_v40 = vperm.slane %v17226_v18, 2 }
 0x6c3   : > { %7585 = vmatpush.bf16.msrb.mxu3 %v10184_v42  ;;  %v7562_v11 = vpop.f32.mrf.mxu1  ;;  %v7208_v42 = vperm.slane %v17231_v4, 2 }
 0x6c4   : > { %7572 = vmatpush.bf16.msrb.mxu2 %v10168_v10  ;;  %v7563_v30 = vadd.f32 %v7562_v11, %v7417_v61 }
 0x6c7   : > { %7586 = vmatpush.bf16.msrb.mxu3 %v10172_v53 }
 0x6c8   : > { %v11170_v43 = vpop.eup %11169 }
 0x6c9   : > { %v7166_v24 = vmul.f32 %v11170_v43, %v7164_v17 }
 0x6cb   : > { %v7170_v14 = vadd.f32 %v7168_v33, %v7166_v24 }
 0x6cd   : > { %v7171_v9 = vpack.c.bf16 %v7170_v14, %v7169_v59  ;;  %7692 = vst [vmem:[#allocation4 + $0x20] sm:$0xff] %v7170_v14 }
 0x6cf   : > { %7348 = vmatmul.bf16.vlgmr.msra.gmra.mxu2 %v7171_v9  ;;  %7362 = vmatmul.bf16.vlgmr.msra.gmra.mxu3 %v7171_v9 }
 0x6d0   : > { %7376 = vmatmul.bf16.vlgmr.msra.gmra.mxu0 %v7171_v9 }
 0x6df   : > { %7573 = vmatmul.bf16.vlgmr.msrb.gmra.mxu2 %v16696_v37  ;;  %7587 = vmatmul.bf16.vlgmr.msrb.gmra.mxu3 %v16696_v37 }
 0x74d   : > { %v7377_v52 = vpop.f32.mrf.mxu0 }
 0x74e   : > { %v7378_v33 = vadd.f32 %v7377_v52, %v7208_v42 }
 0x752   : > { %v7349_v55 = vpop.f32.mrf.mxu2  ;;  %v7363_v51 = vpop.f32.mrf.mxu3 }
 0x753   : > { %v7350_v2 = vadd.f32 %v7349_v55, %v7206_v58  ;;  %v7364_v16 = vadd.f32 %v7363_v51, %v7207_v48 }
 0x755   : > { %v7593_v7 = vadd.f32 %v7561_v12, %v7350_v2 }
 0x757   : > { %v10257_v37 = vmul.f32 -1.442695, %v7593_v7  ;;  %v7379_v7 = vpop.f32.mrf.mxu0 }
 0x759   : > { %11171 = vpow2.f32 %v10257_v37 }
 0x75a   : > { %v7351_v35 = vpop.f32.mrf.mxu2  ;;  %v7365_v20 = vpop.f32.mrf.mxu3 }
 0x75b   : > { %v7352_v31 = vadd.f32 %v7351_v35, %v7206_v58  ;;  %v7366_v5 = vadd.f32 %v7365_v20, %v7207_v48 }
 0x75d   : > { %v7594_v8 = vadd.f32 %v7563_v30, %v7352_v31  ;;  %v7380_v31 = vadd.f32 %v7379_v7, %v7208_v42 }
 0x75f   : > { %v11172_v34 = vpop.eup %11171  ;;  %v10258_v50 = vmul.f32 -1.442695, %v7594_v8 }
 0x760   : > { %v7601_v26 = vadd.f32 1.0, %v11172_v34 }
 0x761   : > { %11173 = vpow2.f32 %v10258_v50 }
 0x762   : > { %11175 = vrcp.f32 %v7601_v26  ;;  %v7574_v56 = vpop.f32.mrf.mxu2  ;;  %v7614_v60 = vand.u32 2147483648, %v7601_v26  ;;  %v7612_v62 = vand.u32 2147483647, %v7601_v26  ;;  %v7588_v44 = vpop.f32.mrf.mxu3  ;;  %vm7608_vm5 = vweird.f32 %v7601_v26 }
 0x763   : > { %v7575_v41 = vadd.f32 %v7574_v56, %v7418_v25  ;;  %v7589_v38 = vadd.f32 %v7588_v44, %v7419_v40 }
 0x764   : > { %v7615_v63 = vor.u32 1.1754944e-38, %v7614_v60  ;;  %vm7613_vm8 = vcmp.eq.f32.partialorder %v7612_v62, 8.507059e+37 }
 0x765   : > { %v7633_v57 = vadd.f32 %v7575_v41, %v7364_v16 }
 0x767   : > { %v11174_v19 = vpop.eup %11173  ;;  %v10259_v13 = vmul.f32 -1.442695, %v7633_v57 }
 0x768   : > { %v11176_v28 = vpop.eup %11175  ;;  %v7602_v36 = vadd.f32 1.0, %v11174_v19  ;;  %v11209_v19 = vld [vmem:[%s11341_s28] sm:$0xff] }
 0x769   : > { %11177 = vpow2.f32 %v10259_v13  ;;  %v7604_v15 = vmul.f32 %v11176_v28, %v7601_v26  ;;  %vm7609_vm6 = vweird.f32 %v11176_v28 }
 0x76a   : > { %11179 = vrcp.f32 %v7602_v36  ;;  %v7576_v47 = vpop.f32.mrf.mxu2  ;;  %vm7610_vm7 = vmor %vm7608_vm5, %vm7609_vm6  ;;  %v7629_v22 = vand.u32 2147483648, %v7602_v36  ;;  %v7627_v53 = vand.u32 2147483647, %v7602_v36  ;;  %vm7623_vm10 = vweird.f32 %v7602_v36  ;;  %v7590_v18 = vpop.f32.mrf.mxu3 }
 0x76b   : > { %v7605_v21 = vsub.f32 1.0, %v7604_v15  ;;  %v7577_v45 = vadd.f32 %v7576_v47, %v7418_v25  ;;  %v7591_v2 = vadd.f32 %v7590_v18, %v7419_v40 }
 0x76c   : > { %v7630_v61 = vor.u32 1.1754944e-38, %v7629_v22  ;;  %vm7628_vm12 = vcmp.eq.f32.partialorder %v7627_v53, 8.507059e+37 }
 0x76d   : > { %v7606_v49 = vmul.f32 %v11176_v28, %v7605_v21  ;;  %v7634_v39 = vadd.f32 %v7577_v45, %v7366_v5 }
 0x76f   : > { %v11178_v3 = vpop.eup %11177  ;;  %v7607_v6 = vadd.f32 %v11176_v28, %v7606_v49  ;;  %v10260_v46 = vmul.f32 -1.442695, %v7634_v39  ;;  %v11210_v39 = vld [vmem:[%s11341_s28 + $0x8] sm:$0xff] }
 0x770   : > { %v11180_v1 = vpop.eup %11179  ;;  %v7641_v0 = vadd.f32 1.0, %v11178_v3 }
 0x771   : > { %v7611_v59 = vsel %vm7610_vm7, %v11176_v28, %v7607_v6  ;;  %11181 = vpow2.f32 %v10260_v46  ;;  %v7619_v54 = vmul.f32 %v11180_v1, %v7602_v36  ;;  %vm7624_vm9 = vweird.f32 %v11180_v1 }
 0x772   : > { %11183 = vrcp.f32 %v7641_v0  ;;  %v7616_v29 = vsel %vm7613_vm8, %v7615_v63, %v7611_v59  ;;  %vm7625_vm11 = vmor %vm7623_vm10, %vm7624_vm9  ;;  %v7654_v12 = vand.u32 2147483648, %v7641_v0  ;;  %v7652_v11 = vand.u32 2147483647, %v7641_v0 }
 0x773   : > { %v7620_v32 = vsub.f32 1.0, %v7619_v54  ;;  %v7673_v10 = vmul.f32 %v7616_v29, %v7589_v38  ;;  %vm7648_vm14 = vweird.f32 %v7641_v0 }
 0x774   : > { %v7655_v8 = vor.u32 1.1754944e-38, %v7654_v12  ;;  %vm7653_vm0 = vcmp.eq.f32.partialorder %v7652_v11, 8.507059e+37 }
 0x775   : > { %v7621_v27 = vmul.f32 %v11180_v1, %v7620_v32  ;;  %v7675_v58 = vadd.f32 %v7673_v10, %v7378_v33 }
 0x777   : > { %v11182_v17 = vpop.eup %11181  ;;  %v7622_v43 = vadd.f32 %v11180_v1, %v7621_v27 }
 0x778   : > { %v11184_v24 = vpop.eup %11183  ;;  %v7642_v14 = vadd.f32 1.0, %v11182_v17 }
 0x779   : > { %v7644_v9 = vmul.f32 %v11184_v24, %v7641_v0  ;;  %v7626_v23 = vsel %vm7625_vm11, %v11180_v1, %v7622_v43  ;;  %vm7649_vm13 = vweird.f32 %v11184_v24 }
 0x77a   : > { %11185 = vrcp.f32 %v7642_v14  ;;  %v7631_v55 = vsel %vm7628_vm12, %v7630_v61, %v7626_v23  ;;  %vm7650_vm15 = vmor %vm7648_vm14, %vm7649_vm13  ;;  %v7669_v41 = vand.u32 2147483648, %v7642_v14  ;;  %v7667_v20 = vand.u32 2147483647, %v7642_v14 }
 0x77b   : > { %v7645_v4 = vsub.f32 1.0, %v7644_v9  ;;  %11187 = vtanh.f32 %v7675_v58  ;;  %v7674_v35 = vmul.f32 %v7631_v55, %v7591_v2  ;;  %vm7663_vm2 = vweird.f32 %v7642_v14 }
 0x77c   : > { %v7670_v47 = vor.u32 1.1754944e-38, %v7669_v41  ;;  %vm7668_vm4 = vcmp.eq.f32.partialorder %v7667_v20, 8.507059e+37 }
 0x77d   : > { %v7646_v37 = vmul.f32 %v11184_v24, %v7645_v4  ;;  %v7676_v25 = vadd.f32 %v7674_v35, %v7380_v31 }
 0x77f   : > { %v7647_v30 = vadd.f32 %v11184_v24, %v7646_v37  ;;  %11189 = vtanh.f32 %v7676_v25 }
 0x780   : > { %v11186_v51 = vpop.eup %11185 }
 0x781   : > { %v7651_v34 = vsel %vm7650_vm15, %v11184_v24, %v7647_v30  ;;  %v7659_v48 = vmul.f32 %v11186_v51, %v7642_v14  ;;  %v11188_v16 = vpop.eup %11187  ;;  %vm7664_vm1 = vweird.f32 %v11186_v51 }
 0x782   : > { %v7656_v50 = vsel %vm7653_vm0, %v7655_v8, %v7651_v34  ;;  %vm7665_vm3 = vmor %vm7663_vm2, %vm7664_vm1 }
 0x783   : > { %v7679_v26 = vsub.f32 1.0, %v7656_v50  ;;  %v7660_v56 = vsub.f32 1.0, %v7659_v48  ;;  %v7683_v13 = vmul.f32 %v11209_v19, %v7656_v50 }
 0x785   : > { %v7681_v57 = vmul.f32 %v11188_v16, %v7679_v26  ;;  %v7661_v28 = vmul.f32 %v11186_v51, %v7660_v56  ;;  %v11190_v49 = vpop.eup %11189 }
 0x787   : > { %v7685_v36 = vadd.f32 %v7683_v13, %v7681_v57  ;;  %v7662_v15 = vadd.f32 %v11186_v51, %v7661_v28 }
 0x789   : > { %7693 = vst [vmem:[#allocation4 + $0x28] sm:$0xff] %v7685_v36  ;;  %v7666_v5 = vsel %vm7665_vm3, %v11186_v51, %v7662_v15 }
 0x78a   : > { %v7671_v21 = vsel %vm7668_vm4, %v7670_v47, %v7666_v5 }
 0x78b   : > { %v7680_v45 = vsub.f32 1.0, %v7671_v21  ;;  %v7684_v62 = vmul.f32 %v11210_v39, %v7671_v21 }
 0x78d   : > { %v7682_v60 = vmul.f32 %v11190_v49, %v7680_v45 }
 0x78f   : > { %v7686_v3 = vadd.f32 %v7684_v62, %v7682_v60 }
 0x791   : > { %7694 = vst [vmem:[#allocation4 + $0x38] sm:$0xff] %v7686_v3 }
 0x792 PF: > { %s17417_s22 = sld [smem:[#allocation5_spill]] }
 0x798   : > { %s30_s0 = sadd.s32 1, %s17417_s22  }
 0x799   : > { %p27_p2 = scmp.ge.s32.totalorder %s30_s0, 4  }
 0x79b   :  { %29 = sbr.rel (!%p27_p2) target bundleno = 8 (0x8), region = 154 }

</bundles_post_ra>
